<compile_context>
chip_gen: v7x
topology: tpu7x:2x2x1
jax: 0.10.0
libtpu: 0.0.40
codegen_flags: <defaults>
</compile_context>

<pallas_src>
import functools

import jax
import jax.numpy as jnp
from jax.experimental import pallas as pl
from jax.experimental.pallas import tpu as pltpu


def _policy_base_kernel(state_ref, ego_ref, dt_ref, pe_ref,
                        wih_x_ref, bih_x_ref, whh_x_ref, bhh_x_ref,
                        wih_e_ref, bih_e_ref, whh_e_ref, bhh_e_ref,
                        out_ref, *, h_dim):
    """One batch tile of GAMMAPolicyBase.forward.

    state_ref : (TB, nt,   in_dim)  batch-major state sequence
    ego_ref   : (TB, nt_e, 32)      batch-major egosensing sequence
    dt_ref    : (TB, 2)             [dist | time]
    pe_ref    : (2, 64)             row0 = duplicated freqs [1,1,2,2,...],
                                    row1 = phase [0, pi/2, 0, pi/2, ...]
    w*_ref    : GRU weights, stored (in, 3H) with gate columns [r | z | n]
    out_ref   : (TB, 2*h_dim + 128)
    """
    H = h_dim
    TB, nt, _ = state_ref.shape
    _, nt_e, _ = ego_ref.shape

    # ---- hoisted input projections: one well-shaped MXU pass per GRU -------
    def input_gates(x_ref, wih_ref, bih_ref):
        n_t = x_ref.shape[1]
        d = x_ref.shape[2]
        x2 = x_ref[...].astype(jnp.float32).reshape(TB * n_t, d)
        gi = jnp.dot(x2, wih_ref[...], preferred_element_type=jnp.float32)
        gi = gi + bih_ref[...]                       # fold input bias in once
        return gi.reshape(TB, n_t, 3 * H)

    gi_x = input_gates(state_ref, wih_x_ref, bih_x_ref)   # (TB, nt,   3H)
    gi_e = input_gates(ego_ref, wih_e_ref, bih_e_ref)     # (TB, nt_e, 3H)

    whh_x = whh_x_ref[...]
    bhh_x = bhh_x_ref[...]
    whh_e = whh_e_ref[...]
    bhh_e = bhh_e_ref[...]

    def sigmoid(v):
        # exact sigmoid via tanh: EUP slot, no divide on the recurrence path
        return 0.5 * (jnp.tanh(0.5 * v) + 1.0)

    def gru_step(h, gi_t, whh, bhh):
        gh = jnp.dot(h, whh, preferred_element_type=jnp.float32) + bhh
        r = sigmoid(gi_t[:, 0:H] + gh[:, 0:H])
        z = sigmoid(gi_t[:, H:2 * H] + gh[:, H:2 * H])
        n = jnp.tanh(gi_t[:, 2 * H:3 * H] + r * gh[:, 2 * H:3 * H])
        return (1.0 - z) * n + z * h

    hx = jnp.zeros((TB, H), jnp.float32)
    he = jnp.zeros((TB, H), jnp.float32)

    # Static unroll: nt is the (small) block shape; per-iteration work is tiny
    # now that the input projection is precomputed.
    if nt == nt_e:
        # interleave the two independent recurrences -> ILP on the latency-
        # bound serial chain (one GRU's MXU/EUP latency hides behind the other)
        for t in range(nt):
            hx = gru_step(hx, gi_x[:, t, :], whh_x, bhh_x)
            he = gru_step(he, gi_e[:, t, :], whh_e, bhh_e)
    else:
        for t in range(nt):
            hx = gru_step(hx, gi_x[:, t, :], whh_x, bhh_x)
        for t in range(nt_e):
            he = gru_step(he, gi_e[:, t, :], whh_e, bhh_e)

    # ---- positional encoding: single sin, cos(x) == sin(x + pi/2) ----------
    freqs = pe_ref[0:1, :]                               # (1, 64)
    phase = pe_ref[1:2, :]                               # (1, 64)
    dt = dt_ref[...].astype(jnp.float32)                 # (TB, 2)
    d_pe = jnp.sin(dt[:, 0:1] * freqs + phase)           # (TB, 64)
    t_pe = jnp.sin(dt[:, 1:2] * freqs + phase)           # (TB, 64)

    out = jnp.concatenate([hx, he, d_pe, t_pe], axis=-1)  # (TB, 2H + 128)
    out_ref[...] = out.astype(out_ref.dtype)


def _default_tb(nb):
    """Batch-tile heuristic: >=2 grid steps (megacore sharding) once the batch
    is big enough, tiles kept small enough for v7x's 64 MiB VMEM."""
    if nb <= 128:
        return nb
    for cand in (256, 128, 64, 32, 16, 8):
        if nb % cand == 0 and nb // cand >= 2:
            return cand
    return nb


def gamma_policy_base_forward(obs, params, *, h_dim, tb=None,
                              vmem_limit_bytes=48 * 1024 * 1024):
    """Pallas wrapper.

    obs: dict with
      'state'      : (nb, nt, in_dim) float32   (batch-major; NOT transposed)
      'egosensing' : (nb, nt_e, 32)   float32
      'dist','time': (nb,) or (nb, 1) float32
    returns (nb, 2*h_dim + 128) float32
    """
    state = obs["state"].astype(jnp.float32)
    ego = obs["egosensing"].astype(jnp.float32)

    nb, nt, in_dim = state.shape
    _, nt_e, ego_dim = ego.shape
    L = 32
    out_dim = 2 * h_dim + 4 * L                 # = 2*h_dim + 128

    dist = obs["dist"].reshape(nb).astype(jnp.float32)
    time_v = obs["time"].reshape(nb).astype(jnp.float32)
    dt = jnp.stack([dist, time_v], axis=-1)     # (nb, 2): one block, no 1-lane DMAs

    # row0: duplicated freqs [1,1,2,2,...,2^31,2^31]; row1: phase [0, pi/2, ...]
    freqs = jnp.repeat(2.0 ** jnp.arange(L, dtype=jnp.float32), 2)
    phase = jnp.tile(jnp.array([0.0, jnp.pi / 2.0], jnp.float32), L)
    pe_tab = jnp.stack([freqs, phase], axis=0)  # (2, 2L)

    if tb is None:
        tb = _default_tb(nb)
    assert nb % tb == 0, "tb must divide nb"
    assert tb == nb or tb % 8 == 0, "partial batch tiles must be sublane-aligned"

    (wih_x, bih_x, whh_x, bhh_x, wih_e, bih_e, whh_e, bhh_e) = params

    kernel = functools.partial(_policy_base_kernel, h_dim=h_dim)

    def bcast(shape):
        return pl.BlockSpec(shape, lambda *_: (0,) * len(shape))

    return pl.pallas_call(
        kernel,
        out_shape=jax.ShapeDtypeStruct((nb, out_dim), jnp.float32),
        grid_spec=pltpu.PrefetchScalarGridSpec(
            num_scalar_prefetch=0,
            grid=(nb // tb,),
            in_specs=[
                pl.BlockSpec((tb, nt, in_dim), lambda i: (i, 0, 0)),     # state
                pl.BlockSpec((tb, nt_e, ego_dim), lambda i: (i, 0, 0)),  # egosensing
                pl.BlockSpec((tb, 2), lambda i: (i, 0)),                 # [dist|time]
                bcast((2, 2 * L)),                                       # PE freq/phase
                bcast((in_dim, 3 * h_dim)),                              # x_enc W_ih
                bcast((1, 3 * h_dim)),                                   # x_enc b_ih
                bcast((h_dim, 3 * h_dim)),                               # x_enc W_hh
                bcast((1, 3 * h_dim)),                                   # x_enc b_hh
                bcast((ego_dim, 3 * h_dim)),                             # ego_enc W_ih
                bcast((1, 3 * h_dim)),                                   # ego_enc b_ih
                bcast((h_dim, 3 * h_dim)),                               # ego_enc W_hh
                bcast((1, 3 * h_dim)),                                   # ego_enc b_hh
            ],
            out_specs=pl.BlockSpec((tb, out_dim), lambda i: (i, 0)),
        ),
        compiler_params=pltpu.CompilerParams(
            dimension_semantics=("parallel",),
            vmem_limit_bytes=vmem_limit_bytes,
        ),
    )(state, ego, dt, pe_tab,
      wih_x, bih_x, whh_x, bhh_x, wih_e, bih_e, whh_e, bhh_e)


def init_params(key, in_dim, ego_dim, h_dim):
    """Synthetic GRU params, PyTorch-like uniform(-1/sqrt(h_dim), +1/sqrt(h_dim)).

    Weights stored transposed as (in, 3H) with gate columns ordered [r | z | n]
    (i.e. torch's weight_ih_l0/(3H,in) transposed; torch gate order is already r,z,n).
    """
    ks = jax.random.split(key, 8)
    s = 1.0 / (h_dim ** 0.5)

    def u(k, shape):
        return jax.random.uniform(k, shape, jnp.float32, -s, s)

    wih_x = u(ks[0], (in_dim, 3 * h_dim))
    bih_x = u(ks[1], (1, 3 * h_dim))
    whh_x = u(ks[2], (h_dim, 3 * h_dim))
    bhh_x = u(ks[3], (1, 3 * h_dim))
    wih_e = u(ks[4], (ego_dim, 3 * h_dim))
    bih_e = u(ks[5], (1, 3 * h_dim))
    whh_e = u(ks[6], (h_dim, 3 * h_dim))
    bhh_e = u(ks[7], (1, 3 * h_dim))
    return (wih_x, bih_x, whh_x, bhh_x, wih_e, bih_e, whh_e, bhh_e)


def reference_forward(obs, params, *, h_dim):
    """Pure-JAX reference of GAMMAPolicyBase.forward for correctness checking."""
    H = h_dim
    (wih_x, bih_x, whh_x, bhh_x, wih_e, bih_e, whh_e, bhh_e) = params
    state = obs["state"].astype(jnp.float32)
    ego = obs["egosensing"].astype(jnp.float32)
    nb = state.shape[0]

    def gru(x_tm, wih, bih, whh, bhh):
        h = jnp.zeros((x_tm.shape[1], H), jnp.float32)
        for t in range(x_tm.shape[0]):
            gi = x_tm[t] @ wih + bih
            gh = h @ whh + bhh
            r = jax.nn.sigmoid(gi[:, 0:H] + gh[:, 0:H])
            z = jax.nn.sigmoid(gi[:, H:2 * H] + gh[:, H:2 * H])
            n = jnp.tanh(gi[:, 2 * H:3 * H] + r * gh[:, 2 * H:3 * H])
            h = (1.0 - z) * n + z * h
        return h

    hx = gru(jnp.transpose(state, (1, 0, 2)), wih_x, bih_x, whh_x, bhh_x)
    hego = gru(jnp.transpose(ego, (1, 0, 2)), wih_e, bih_e, whh_e, bhh_e)

    def pe(v, L=32):
        freqs = 2.0 ** jnp.arange(L, dtype=jnp.float32)
        ang = v.reshape(nb, 1).astype(jnp.float32) * freqs[None, :]
        return jnp.stack([jnp.sin(ang), jnp.cos(ang)], axis=-1).reshape(nb, 2 * L)

    return jnp.concatenate([hx, hego, pe(obs["dist"]), pe(obs["time"])], axis=-1)


if __name__ == "__main__":
    # Config consistent with GAMMAPolicyBase.__init__:
    #   h_dim=32, body_repr='ssm2_67_marker_orient' -> in_dim = 67*3 = 201,
    #   ego_enc input dim = 32, positional encoding L = 32.
    h_dim = 32
    in_dim = 67 * 3
    ego_dim = 32
    nb, nt, nt_e = 8, 8, 8

    key = jax.random.PRNGKey(0)
    k_s, k_e, k_d, k_t, k_p = jax.random.split(key, 5)
    obs = {
        "state": jax.random.normal(k_s, (nb, nt, in_dim), jnp.float32),
        "egosensing": jax.random.normal(k_e, (nb, nt_e, ego_dim), jnp.float32),
        # keep dist/time tiny so the 2^31-frequency positional-encoding angles
        # stay in a range where float32 sin/cos are well conditioned for the
        # kernel-vs-reference comparison below.
        "dist": jax.random.uniform(k_d, (nb, 1), jnp.float32, 0.0, 1e-7),
        "time": jax.random.uniform(k_t, (nb, 1), jnp.float32, 0.0, 1e-7),
    }
    params = init_params(k_p, in_dim, ego_dim, h_dim)

    out = gamma_policy_base_forward(obs, params, h_dim=h_dim)
    out = jax.block_until_ready(out)

    ref = reference_forward(obs, params, h_dim=h_dim)
    assert out.shape == (nb, 2 * h_dim + 128)
    assert jnp.allclose(out, ref, atol=2e-3, rtol=2e-3), "mismatch vs reference"

    print("KERNEL_OK")
</pallas_src>

<mosaic_0001>
module attributes {stable_mosaic.version = 11 : i64} {
  func.func @_policy_base_kernel(%arg0: i32, %arg1: memref<8x8x201xf32, #tpu.memory_space<vmem>>, %arg2: memref<8x8x32xf32, #tpu.memory_space<vmem>>, %arg3: memref<8x2xf32, #tpu.memory_space<vmem>>, %arg4: memref<2x64xf32, #tpu.memory_space<vmem>>, %arg5: memref<201x96xf32, #tpu.memory_space<vmem>>, %arg6: memref<1x96xf32, #tpu.memory_space<vmem>>, %arg7: memref<32x96xf32, #tpu.memory_space<vmem>>, %arg8: memref<1x96xf32, #tpu.memory_space<vmem>>, %arg9: memref<32x96xf32, #tpu.memory_space<vmem>>, %arg10: memref<1x96xf32, #tpu.memory_space<vmem>>, %arg11: memref<32x96xf32, #tpu.memory_space<vmem>>, %arg12: memref<1x96xf32, #tpu.memory_space<vmem>>, %arg13: memref<8x192xf32, #tpu.memory_space<vmem>>) attributes {dimension_semantics = [#tpu.dimension_semantics<parallel>], iteration_bounds = array<i64: 1>, scalar_prefetch = 0 : i64, scratch_operands = 0 : i64, tpu.core_type = #tpu.core_type<tc>, window_params = [{transform_indices = @transform_0, window_bounds = array<i64: 8, 8, 201>}, {transform_indices = @transform_1, window_bounds = array<i64: 8, 8, 32>}, {transform_indices = @transform_2, window_bounds = array<i64: 8, 2>}, {pipeline_mode = #tpu.pipeline_mode<synchronous>, transform_indices = @transform_3, window_bounds = array<i64: 2, 64>}, {pipeline_mode = #tpu.pipeline_mode<synchronous>, transform_indices = @transform_4, window_bounds = array<i64: 201, 96>}, {pipeline_mode = #tpu.pipeline_mode<synchronous>, transform_indices = @transform_5, window_bounds = array<i64: 1, 96>}, {pipeline_mode = #tpu.pipeline_mode<synchronous>, transform_indices = @transform_6, window_bounds = array<i64: 32, 96>}, {pipeline_mode = #tpu.pipeline_mode<synchronous>, transform_indices = @transform_7, window_bounds = array<i64: 1, 96>}, {pipeline_mode = #tpu.pipeline_mode<synchronous>, transform_indices = @transform_8, window_bounds = array<i64: 32, 96>}, {pipeline_mode = #tpu.pipeline_mode<synchronous>, transform_indices = @transform_9, window_bounds = array<i64: 1, 96>}, {pipeline_mode = #tpu.pipeline_mode<synchronous>, transform_indices = @transform_10, window_bounds = array<i64: 32, 96>}, {pipeline_mode = #tpu.pipeline_mode<synchronous>, transform_indices = @transform_11, window_bounds = array<i64: 1, 96>}, {transform_indices = @transform_12, window_bounds = array<i64: 8, 192>}]} {
    %c0 = arith.constant 0 : index
    %c0_0 = arith.constant 0 : index
    %c0_1 = arith.constant 0 : index
    %0 = vector.load %arg1[%c0, %c0_0, %c0_1] : memref<8x8x201xf32, #tpu.memory_space<vmem>>, vector<8x8x201xf32>
    %1 = vector.shape_cast %0 : vector<8x8x201xf32> to vector<64x201xf32>
    %c0_2 = arith.constant 0 : index
    %c0_3 = arith.constant 0 : index
    %2 = vector.load %arg5[%c0_2, %c0_3] : memref<201x96xf32, #tpu.memory_space<vmem>>, vector<201x96xf32>
    %cst = arith.constant dense<0.000000e+00> : vector<64x96xf32>
    %3 = tpu.matmul %1, %2, %cst {dimension_numbers = #tpu.dot_dimension_numbers<[1], [0], [0], [1], [0, 0, 1, 1], [], []>} : vector<64x201xf32>, vector<201x96xf32>, vector<64x96xf32> -> vector<64x96xf32>
    %c0_4 = arith.constant 0 : index
    %c0_5 = arith.constant 0 : index
    %4 = vector.load %arg6[%c0_4, %c0_5] : memref<1x96xf32, #tpu.memory_space<vmem>>, vector<1x96xf32>
    %5 = vector.broadcast %4 : vector<1x96xf32> to vector<64x96xf32>
    %6 = arith.addf %3, %5 : vector<64x96xf32>
    %7 = vector.shape_cast %6 : vector<64x96xf32> to vector<8x8x96xf32>
    %c0_6 = arith.constant 0 : index
    %c0_7 = arith.constant 0 : index
    %c0_8 = arith.constant 0 : index
    %8 = vector.load %arg2[%c0_6, %c0_7, %c0_8] : memref<8x8x32xf32, #tpu.memory_space<vmem>>, vector<8x8x32xf32>
    %9 = vector.shape_cast %8 : vector<8x8x32xf32> to vector<64x32xf32>
    %c0_9 = arith.constant 0 : index
    %c0_10 = arith.constant 0 : index
    %10 = vector.load %arg9[%c0_9, %c0_10] : memref<32x96xf32, #tpu.memory_space<vmem>>, vector<32x96xf32>
    %cst_11 = arith.constant dense<0.000000e+00> : vector<64x96xf32>
    %11 = tpu.matmul %9, %10, %cst_11 {dimension_numbers = #tpu.dot_dimension_numbers<[1], [0], [0], [1], [0, 0, 1, 1], [], []>} : vector<64x32xf32>, vector<32x96xf32>, vector<64x96xf32> -> vector<64x96xf32>
    %c0_12 = arith.constant 0 : index
    %c0_13 = arith.constant 0 : index
    %12 = vector.load %arg10[%c0_12, %c0_13] : memref<1x96xf32, #tpu.memory_space<vmem>>, vector<1x96xf32>
    %13 = vector.broadcast %12 : vector<1x96xf32> to vector<64x96xf32>
    %14 = arith.addf %11, %13 : vector<64x96xf32>
    %15 = vector.shape_cast %14 : vector<64x96xf32> to vector<8x8x96xf32>
    %c0_14 = arith.constant 0 : index
    %c0_15 = arith.constant 0 : index
    %16 = vector.load %arg7[%c0_14, %c0_15] : memref<32x96xf32, #tpu.memory_space<vmem>>, vector<32x96xf32>
    %c0_16 = arith.constant 0 : index
    %c0_17 = arith.constant 0 : index
    %17 = vector.load %arg8[%c0_16, %c0_17] : memref<1x96xf32, #tpu.memory_space<vmem>>, vector<1x96xf32>
    %c0_18 = arith.constant 0 : index
    %c0_19 = arith.constant 0 : index
    %18 = vector.load %arg11[%c0_18, %c0_19] : memref<32x96xf32, #tpu.memory_space<vmem>>, vector<32x96xf32>
    %c0_20 = arith.constant 0 : index
    %c0_21 = arith.constant 0 : index
    %19 = vector.load %arg12[%c0_20, %c0_21] : memref<1x96xf32, #tpu.memory_space<vmem>>, vector<1x96xf32>
    %cst_22 = arith.constant 0.000000e+00 : f32
    %20 = vector.broadcast %cst_22 : f32 to vector<8x32xf32>
    %cst_23 = arith.constant 0.000000e+00 : f32
    %21 = vector.broadcast %cst_23 : f32 to vector<8x32xf32>
    %22 = vector.extract_strided_slice %7 {offsets = [0, 0, 0], sizes = [8, 1, 96], strides = [1, 1, 1]} : vector<8x8x96xf32> to vector<8x1x96xf32>
    %23 = vector.shape_cast %22 : vector<8x1x96xf32> to vector<8x96xf32>
    %cst_24 = arith.constant dense<0.000000e+00> : vector<8x96xf32>
    %24 = tpu.matmul %20, %16, %cst_24 {dimension_numbers = #tpu.dot_dimension_numbers<[1], [0], [0], [1], [0, 0, 1, 1], [], []>} : vector<8x32xf32>, vector<32x96xf32>, vector<8x96xf32> -> vector<8x96xf32>
    %25 = vector.broadcast %17 : vector<1x96xf32> to vector<8x96xf32>
    %26 = arith.addf %24, %25 : vector<8x96xf32>
    %27 = vector.extract_strided_slice %23 {offsets = [0, 0], sizes = [8, 32], strides = [1, 1]} : vector<8x96xf32> to vector<8x32xf32>
    %28 = vector.extract_strided_slice %26 {offsets = [0, 0], sizes = [8, 32], strides = [1, 1]} : vector<8x96xf32> to vector<8x32xf32>
    %29 = arith.addf %27, %28 : vector<8x32xf32>
    %cst_25 = arith.constant 5.000000e-01 : f32
    %30 = vector.broadcast %cst_25 : f32 to vector<8x32xf32>
    %31 = arith.mulf %30, %29 : vector<8x32xf32>
    %32 = math.tanh %31 : vector<8x32xf32>
    %cst_26 = arith.constant 1.000000e+00 : f32
    %33 = vector.broadcast %cst_26 : f32 to vector<8x32xf32>
    %34 = arith.addf %32, %33 : vector<8x32xf32>
    %cst_27 = arith.constant 5.000000e-01 : f32
    %35 = vector.broadcast %cst_27 : f32 to vector<8x32xf32>
    %36 = arith.mulf %35, %34 : vector<8x32xf32>
    %37 = vector.extract_strided_slice %23 {offsets = [0, 32], sizes = [8, 32], strides = [1, 1]} : vector<8x96xf32> to vector<8x32xf32>
    %38 = vector.extract_strided_slice %26 {offsets = [0, 32], sizes = [8, 32], strides = [1, 1]} : vector<8x96xf32> to vector<8x32xf32>
    %39 = arith.addf %37, %38 : vector<8x32xf32>
    %cst_28 = arith.constant 5.000000e-01 : f32
    %40 = vector.broadcast %cst_28 : f32 to vector<8x32xf32>
    %41 = arith.mulf %40, %39 : vector<8x32xf32>
    %42 = math.tanh %41 : vector<8x32xf32>
    %cst_29 = arith.constant 1.000000e+00 : f32
    %43 = vector.broadcast %cst_29 : f32 to vector<8x32xf32>
    %44 = arith.addf %42, %43 : vector<8x32xf32>
    %cst_30 = arith.constant 5.000000e-01 : f32
    %45 = vector.broadcast %cst_30 : f32 to vector<8x32xf32>
    %46 = arith.mulf %45, %44 : vector<8x32xf32>
    %47 = vector.extract_strided_slice %23 {offsets = [0, 64], sizes = [8, 32], strides = [1, 1]} : vector<8x96xf32> to vector<8x32xf32>
    %48 = vector.extract_strided_slice %26 {offsets = [0, 64], sizes = [8, 32], strides = [1, 1]} : vector<8x96xf32> to vector<8x32xf32>
    %49 = arith.mulf %36, %48 : vector<8x32xf32>
    %50 = arith.addf %47, %49 : vector<8x32xf32>
    %51 = math.tanh %50 : vector<8x32xf32>
    %cst_31 = arith.constant 1.000000e+00 : f32
    %52 = vector.broadcast %cst_31 : f32 to vector<8x32xf32>
    %53 = arith.subf %52, %46 : vector<8x32xf32>
    %54 = arith.mulf %53, %51 : vector<8x32xf32>
    %55 = arith.mulf %46, %20 : vector<8x32xf32>
    %56 = arith.addf %54, %55 : vector<8x32xf32>
    %57 = vector.extract_strided_slice %15 {offsets = [0, 0, 0], sizes = [8, 1, 96], strides = [1, 1, 1]} : vector<8x8x96xf32> to vector<8x1x96xf32>
    %58 = vector.shape_cast %57 : vector<8x1x96xf32> to vector<8x96xf32>
    %cst_32 = arith.constant dense<0.000000e+00> : vector<8x96xf32>
    %59 = tpu.matmul %21, %18, %cst_32 {dimension_numbers = #tpu.dot_dimension_numbers<[1], [0], [0], [1], [0, 0, 1, 1], [], []>} : vector<8x32xf32>, vector<32x96xf32>, vector<8x96xf32> -> vector<8x96xf32>
    %60 = vector.broadcast %19 : vector<1x96xf32> to vector<8x96xf32>
    %61 = arith.addf %59, %60 : vector<8x96xf32>
    %62 = vector.extract_strided_slice %58 {offsets = [0, 0], sizes = [8, 32], strides = [1, 1]} : vector<8x96xf32> to vector<8x32xf32>
    %63 = vector.extract_strided_slice %61 {offsets = [0, 0], sizes = [8, 32], strides = [1, 1]} : vector<8x96xf32> to vector<8x32xf32>
    %64 = arith.addf %62, %63 : vector<8x32xf32>
    %cst_33 = arith.constant 5.000000e-01 : f32
    %65 = vector.broadcast %cst_33 : f32 to vector<8x32xf32>
    %66 = arith.mulf %65, %64 : vector<8x32xf32>
    %67 = math.tanh %66 : vector<8x32xf32>
    %cst_34 = arith.constant 1.000000e+00 : f32
    %68 = vector.broadcast %cst_34 : f32 to vector<8x32xf32>
    %69 = arith.addf %67, %68 : vector<8x32xf32>
    %cst_35 = arith.constant 5.000000e-01 : f32
    %70 = vector.broadcast %cst_35 : f32 to vector<8x32xf32>
    %71 = arith.mulf %70, %69 : vector<8x32xf32>
    %72 = vector.extract_strided_slice %58 {offsets = [0, 32], sizes = [8, 32], strides = [1, 1]} : vector<8x96xf32> to vector<8x32xf32>
    %73 = vector.extract_strided_slice %61 {offsets = [0, 32], sizes = [8, 32], strides = [1, 1]} : vector<8x96xf32> to vector<8x32xf32>
    %74 = arith.addf %72, %73 : vector<8x32xf32>
    %cst_36 = arith.constant 5.000000e-01 : f32
    %75 = vector.broadcast %cst_36 : f32 to vector<8x32xf32>
    %76 = arith.mulf %75, %74 : vector<8x32xf32>
    %77 = math.tanh %76 : vector<8x32xf32>
    %cst_37 = arith.constant 1.000000e+00 : f32
    %78 = vector.broadcast %cst_37 : f32 to vector<8x32xf32>
    %79 = arith.addf %77, %78 : vector<8x32xf32>
    %cst_38 = arith.constant 5.000000e-01 : f32
    %80 = vector.broadcast %cst_38 : f32 to vector<8x32xf32>
    %81 = arith.mulf %80, %79 : vector<8x32xf32>
    %82 = vector.extract_strided_slice %58 {offsets = [0, 64], sizes = [8, 32], strides = [1, 1]} : vector<8x96xf32> to vector<8x32xf32>
    %83 = vector.extract_strided_slice %61 {offsets = [0, 64], sizes = [8, 32], strides = [1, 1]} : vector<8x96xf32> to vector<8x32xf32>
    %84 = arith.mulf %71, %83 : vector<8x32xf32>
    %85 = arith.addf %82, %84 : vector<8x32xf32>
    %86 = math.tanh %85 : vector<8x32xf32>
    %cst_39 = arith.constant 1.000000e+00 : f32
    %87 = vector.broadcast %cst_39 : f32 to vector<8x32xf32>
    %88 = arith.subf %87, %81 : vector<8x32xf32>
    %89 = arith.mulf %88, %86 : vector<8x32xf32>
    %90 = arith.mulf %81, %21 : vector<8x32xf32>
    %91 = arith.addf %89, %90 : vector<8x32xf32>
    %92 = vector.extract_strided_slice %7 {offsets = [0, 1, 0], sizes = [8, 1, 96], strides = [1, 1, 1]} : vector<8x8x96xf32> to vector<8x1x96xf32>
    %93 = vector.shape_cast %92 : vector<8x1x96xf32> to vector<8x96xf32>
    %cst_40 = arith.constant dense<0.000000e+00> : vector<8x96xf32>
    %94 = tpu.matmul %56, %16, %cst_40 {dimension_numbers = #tpu.dot_dimension_numbers<[1], [0], [0], [1], [0, 0, 1, 1], [], []>} : vector<8x32xf32>, vector<32x96xf32>, vector<8x96xf32> -> vector<8x96xf32>
    %95 = vector.broadcast %17 : vector<1x96xf32> to vector<8x96xf32>
    %96 = arith.addf %94, %95 : vector<8x96xf32>
    %97 = vector.extract_strided_slice %93 {offsets = [0, 0], sizes = [8, 32], strides = [1, 1]} : vector<8x96xf32> to vector<8x32xf32>
    %98 = vector.extract_strided_slice %96 {offsets = [0, 0], sizes = [8, 32], strides = [1, 1]} : vector<8x96xf32> to vector<8x32xf32>
    %99 = arith.addf %97, %98 : vector<8x32xf32>
    %cst_41 = arith.constant 5.000000e-01 : f32
    %100 = vector.broadcast %cst_41 : f32 to vector<8x32xf32>
    %101 = arith.mulf %100, %99 : vector<8x32xf32>
    %102 = math.tanh %101 : vector<8x32xf32>
    %cst_42 = arith.constant 1.000000e+00 : f32
    %103 = vector.broadcast %cst_42 : f32 to vector<8x32xf32>
    %104 = arith.addf %102, %103 : vector<8x32xf32>
    %cst_43 = arith.constant 5.000000e-01 : f32
    %105 = vector.broadcast %cst_43 : f32 to vector<8x32xf32>
    %106 = arith.mulf %105, %104 : vector<8x32xf32>
    %107 = vector.extract_strided_slice %93 {offsets = [0, 32], sizes = [8, 32], strides = [1, 1]} : vector<8x96xf32> to vector<8x32xf32>
    %108 = vector.extract_strided_slice %96 {offsets = [0, 32], sizes = [8, 32], strides = [1, 1]} : vector<8x96xf32> to vector<8x32xf32>
    %109 = arith.addf %107, %108 : vector<8x32xf32>
    %cst_44 = arith.constant 5.000000e-01 : f32
    %110 = vector.broadcast %cst_44 : f32 to vector<8x32xf32>
    %111 = arith.mulf %110, %109 : vector<8x32xf32>
    %112 = math.tanh %111 : vector<8x32xf32>
    %cst_45 = arith.constant 1.000000e+00 : f32
    %113 = vector.broadcast %cst_45 : f32 to vector<8x32xf32>
    %114 = arith.addf %112, %113 : vector<8x32xf32>
    %cst_46 = arith.constant 5.000000e-01 : f32
    %115 = vector.broadcast %cst_46 : f32 to vector<8x32xf32>
    %116 = arith.mulf %115, %114 : vector<8x32xf32>
    %117 = vector.extract_strided_slice %93 {offsets = [0, 64], sizes = [8, 32], strides = [1, 1]} : vector<8x96xf32> to vector<8x32xf32>
    %118 = vector.extract_strided_slice %96 {offsets = [0, 64], sizes = [8, 32], strides = [1, 1]} : vector<8x96xf32> to vector<8x32xf32>
    %119 = arith.mulf %106, %118 : vector<8x32xf32>
    %120 = arith.addf %117, %119 : vector<8x32xf32>
    %121 = math.tanh %120 : vector<8x32xf32>
    %cst_47 = arith.constant 1.000000e+00 : f32
    %122 = vector.broadcast %cst_47 : f32 to vector<8x32xf32>
    %123 = arith.subf %122, %116 : vector<8x32xf32>
    %124 = arith.mulf %123, %121 : vector<8x32xf32>
    %125 = arith.mulf %116, %56 : vector<8x32xf32>
    %126 = arith.addf %124, %125 : vector<8x32xf32>
    %127 = vector.extract_strided_slice %15 {offsets = [0, 1, 0], sizes = [8, 1, 96], strides = [1, 1, 1]} : vector<8x8x96xf32> to vector<8x1x96xf32>
    %128 = vector.shape_cast %127 : vector<8x1x96xf32> to vector<8x96xf32>
    %cst_48 = arith.constant dense<0.000000e+00> : vector<8x96xf32>
    %129 = tpu.matmul %91, %18, %cst_48 {dimension_numbers = #tpu.dot_dimension_numbers<[1], [0], [0], [1], [0, 0, 1, 1], [], []>} : vector<8x32xf32>, vector<32x96xf32>, vector<8x96xf32> -> vector<8x96xf32>
    %130 = vector.broadcast %19 : vector<1x96xf32> to vector<8x96xf32>
    %131 = arith.addf %129, %130 : vector<8x96xf32>
    %132 = vector.extract_strided_slice %128 {offsets = [0, 0], sizes = [8, 32], strides = [1, 1]} : vector<8x96xf32> to vector<8x32xf32>
    %133 = vector.extract_strided_slice %131 {offsets = [0, 0], sizes = [8, 32], strides = [1, 1]} : vector<8x96xf32> to vector<8x32xf32>
    %134 = arith.addf %132, %133 : vector<8x32xf32>
    %cst_49 = arith.constant 5.000000e-01 : f32
    %135 = vector.broadcast %cst_49 : f32 to vector<8x32xf32>
    %136 = arith.mulf %135, %134 : vector<8x32xf32>
    %137 = math.tanh %136 : vector<8x32xf32>
    %cst_50 = arith.constant 1.000000e+00 : f32
    %138 = vector.broadcast %cst_50 : f32 to vector<8x32xf32>
    %139 = arith.addf %137, %138 : vector<8x32xf32>
    %cst_51 = arith.constant 5.000000e-01 : f32
    %140 = vector.broadcast %cst_51 : f32 to vector<8x32xf32>
    %141 = arith.mulf %140, %139 : vector<8x32xf32>
    %142 = vector.extract_strided_slice %128 {offsets = [0, 32], sizes = [8, 32], strides = [1, 1]} : vector<8x96xf32> to vector<8x32xf32>
    %143 = vector.extract_strided_slice %131 {offsets = [0, 32], sizes = [8, 32], strides = [1, 1]} : vector<8x96xf32> to vector<8x32xf32>
    %144 = arith.addf %142, %143 : vector<8x32xf32>
    %cst_52 = arith.constant 5.000000e-01 : f32
    %145 = vector.broadcast %cst_52 : f32 to vector<8x32xf32>
    %146 = arith.mulf %145, %144 : vector<8x32xf32>
    %147 = math.tanh %146 : vector<8x32xf32>
    %cst_53 = arith.constant 1.000000e+00 : f32
    %148 = vector.broadcast %cst_53 : f32 to vector<8x32xf32>
    %149 = arith.addf %147, %148 : vector<8x32xf32>
    %cst_54 = arith.constant 5.000000e-01 : f32
    %150 = vector.broadcast %cst_54 : f32 to vector<8x32xf32>
    %151 = arith.mulf %150, %149 : vector<8x32xf32>
    %152 = vector.extract_strided_slice %128 {offsets = [0, 64], sizes = [8, 32], strides = [1, 1]} : vector<8x96xf32> to vector<8x32xf32>
    %153 = vector.extract_strided_slice %131 {offsets = [0, 64], sizes = [8, 32], strides = [1, 1]} : vector<8x96xf32> to vector<8x32xf32>
    %154 = arith.mulf %141, %153 : vector<8x32xf32>
    %155 = arith.addf %152, %154 : vector<8x32xf32>
    %156 = math.tanh %155 : vector<8x32xf32>
    %cst_55 = arith.constant 1.000000e+00 : f32
    %157 = vector.broadcast %cst_55 : f32 to vector<8x32xf32>
    %158 = arith.subf %157, %151 : vector<8x32xf32>
    %159 = arith.mulf %158, %156 : vector<8x32xf32>
    %160 = arith.mulf %151, %91 : vector<8x32xf32>
    %161 = arith.addf %159, %160 : vector<8x32xf32>
    %162 = vector.extract_strided_slice %7 {offsets = [0, 2, 0], sizes = [8, 1, 96], strides = [1, 1, 1]} : vector<8x8x96xf32> to vector<8x1x96xf32>
    %163 = vector.shape_cast %162 : vector<8x1x96xf32> to vector<8x96xf32>
    %cst_56 = arith.constant dense<0.000000e+00> : vector<8x96xf32>
    %164 = tpu.matmul %126, %16, %cst_56 {dimension_numbers = #tpu.dot_dimension_numbers<[1], [0], [0], [1], [0, 0, 1, 1], [], []>} : vector<8x32xf32>, vector<32x96xf32>, vector<8x96xf32> -> vector<8x96xf32>
    %165 = vector.broadcast %17 : vector<1x96xf32> to vector<8x96xf32>
    %166 = arith.addf %164, %165 : vector<8x96xf32>
    %167 = vector.extract_strided_slice %163 {offsets = [0, 0], sizes = [8, 32], strides = [1, 1]} : vector<8x96xf32> to vector<8x32xf32>
    %168 = vector.extract_strided_slice %166 {offsets = [0, 0], sizes = [8, 32], strides = [1, 1]} : vector<8x96xf32> to vector<8x32xf32>
    %169 = arith.addf %167, %168 : vector<8x32xf32>
    %cst_57 = arith.constant 5.000000e-01 : f32
    %170 = vector.broadcast %cst_57 : f32 to vector<8x32xf32>
    %171 = arith.mulf %170, %169 : vector<8x32xf32>
    %172 = math.tanh %171 : vector<8x32xf32>
    %cst_58 = arith.constant 1.000000e+00 : f32
    %173 = vector.broadcast %cst_58 : f32 to vector<8x32xf32>
    %174 = arith.addf %172, %173 : vector<8x32xf32>
    %cst_59 = arith.constant 5.000000e-01 : f32
    %175 = vector.broadcast %cst_59 : f32 to vector<8x32xf32>
    %176 = arith.mulf %175, %174 : vector<8x32xf32>
    %177 = vector.extract_strided_slice %163 {offsets = [0, 32], sizes = [8, 32], strides = [1, 1]} : vector<8x96xf32> to vector<8x32xf32>
    %178 = vector.extract_strided_slice %166 {offsets = [0, 32], sizes = [8, 32], strides = [1, 1]} : vector<8x96xf32> to vector<8x32xf32>
    %179 = arith.addf %177, %178 : vector<8x32xf32>
    %cst_60 = arith.constant 5.000000e-01 : f32
    %180 = vector.broadcast %cst_60 : f32 to vector<8x32xf32>
    %181 = arith.mulf %180, %179 : vector<8x32xf32>
    %182 = math.tanh %181 : vector<8x32xf32>
    %cst_61 = arith.constant 1.000000e+00 : f32
    %183 = vector.broadcast %cst_61 : f32 to vector<8x32xf32>
    %184 = arith.addf %182, %183 : vector<8x32xf32>
    %cst_62 = arith.constant 5.000000e-01 : f32
    %185 = vector.broadcast %cst_62 : f32 to vector<8x32xf32>
    %186 = arith.mulf %185, %184 : vector<8x32xf32>
    %187 = vector.extract_strided_slice %163 {offsets = [0, 64], sizes = [8, 32], strides = [1, 1]} : vector<8x96xf32> to vector<8x32xf32>
    %188 = vector.extract_strided_slice %166 {offsets = [0, 64], sizes = [8, 32], strides = [1, 1]} : vector<8x96xf32> to vector<8x32xf32>
    %189 = arith.mulf %176, %188 : vector<8x32xf32>
    %190 = arith.addf %187, %189 : vector<8x32xf32>
    %191 = math.tanh %190 : vector<8x32xf32>
    %cst_63 = arith.constant 1.000000e+00 : f32
    %192 = vector.broadcast %cst_63 : f32 to vector<8x32xf32>
    %193 = arith.subf %192, %186 : vector<8x32xf32>
    %194 = arith.mulf %193, %191 : vector<8x32xf32>
    %195 = arith.mulf %186, %126 : vector<8x32xf32>
    %196 = arith.addf %194, %195 : vector<8x32xf32>
    %197 = vector.extract_strided_slice %15 {offsets = [0, 2, 0], sizes = [8, 1, 96], strides = [1, 1, 1]} : vector<8x8x96xf32> to vector<8x1x96xf32>
    %198 = vector.shape_cast %197 : vector<8x1x96xf32> to vector<8x96xf32>
    %cst_64 = arith.constant dense<0.000000e+00> : vector<8x96xf32>
    %199 = tpu.matmul %161, %18, %cst_64 {dimension_numbers = #tpu.dot_dimension_numbers<[1], [0], [0], [1], [0, 0, 1, 1], [], []>} : vector<8x32xf32>, vector<32x96xf32>, vector<8x96xf32> -> vector<8x96xf32>
    %200 = vector.broadcast %19 : vector<1x96xf32> to vector<8x96xf32>
    %201 = arith.addf %199, %200 : vector<8x96xf32>
    %202 = vector.extract_strided_slice %198 {offsets = [0, 0], sizes = [8, 32], strides = [1, 1]} : vector<8x96xf32> to vector<8x32xf32>
    %203 = vector.extract_strided_slice %201 {offsets = [0, 0], sizes = [8, 32], strides = [1, 1]} : vector<8x96xf32> to vector<8x32xf32>
    %204 = arith.addf %202, %203 : vector<8x32xf32>
    %cst_65 = arith.constant 5.000000e-01 : f32
    %205 = vector.broadcast %cst_65 : f32 to vector<8x32xf32>
    %206 = arith.mulf %205, %204 : vector<8x32xf32>
    %207 = math.tanh %206 : vector<8x32xf32>
    %cst_66 = arith.constant 1.000000e+00 : f32
    %208 = vector.broadcast %cst_66 : f32 to vector<8x32xf32>
    %209 = arith.addf %207, %208 : vector<8x32xf32>
    %cst_67 = arith.constant 5.000000e-01 : f32
    %210 = vector.broadcast %cst_67 : f32 to vector<8x32xf32>
    %211 = arith.mulf %210, %209 : vector<8x32xf32>
    %212 = vector.extract_strided_slice %198 {offsets = [0, 32], sizes = [8, 32], strides = [1, 1]} : vector<8x96xf32> to vector<8x32xf32>
    %213 = vector.extract_strided_slice %201 {offsets = [0, 32], sizes = [8, 32], strides = [1, 1]} : vector<8x96xf32> to vector<8x32xf32>
    %214 = arith.addf %212, %213 : vector<8x32xf32>
    %cst_68 = arith.constant 5.000000e-01 : f32
    %215 = vector.broadcast %cst_68 : f32 to vector<8x32xf32>
    %216 = arith.mulf %215, %214 : vector<8x32xf32>
    %217 = math.tanh %216 : vector<8x32xf32>
    %cst_69 = arith.constant 1.000000e+00 : f32
    %218 = vector.broadcast %cst_69 : f32 to vector<8x32xf32>
    %219 = arith.addf %217, %218 : vector<8x32xf32>
    %cst_70 = arith.constant 5.000000e-01 : f32
    %220 = vector.broadcast %cst_70 : f32 to vector<8x32xf32>
    %221 = arith.mulf %220, %219 : vector<8x32xf32>
    %222 = vector.extract_strided_slice %198 {offsets = [0, 64], sizes = [8, 32], strides = [1, 1]} : vector<8x96xf32> to vector<8x32xf32>
    %223 = vector.extract_strided_slice %201 {offsets = [0, 64], sizes = [8, 32], strides = [1, 1]} : vector<8x96xf32> to vector<8x32xf32>
    %224 = arith.mulf %211, %223 : vector<8x32xf32>
    %225 = arith.addf %222, %224 : vector<8x32xf32>
    %226 = math.tanh %225 : vector<8x32xf32>
    %cst_71 = arith.constant 1.000000e+00 : f32
    %227 = vector.broadcast %cst_71 : f32 to vector<8x32xf32>
    %228 = arith.subf %227, %221 : vector<8x32xf32>
    %229 = arith.mulf %228, %226 : vector<8x32xf32>
    %230 = arith.mulf %221, %161 : vector<8x32xf32>
    %231 = arith.addf %229, %230 : vector<8x32xf32>
    %232 = vector.extract_strided_slice %7 {offsets = [0, 3, 0], sizes = [8, 1, 96], strides = [1, 1, 1]} : vector<8x8x96xf32> to vector<8x1x96xf32>
    %233 = vector.shape_cast %232 : vector<8x1x96xf32> to vector<8x96xf32>
    %cst_72 = arith.constant dense<0.000000e+00> : vector<8x96xf32>
    %234 = tpu.matmul %196, %16, %cst_72 {dimension_numbers = #tpu.dot_dimension_numbers<[1], [0], [0], [1], [0, 0, 1, 1], [], []>} : vector<8x32xf32>, vector<32x96xf32>, vector<8x96xf32> -> vector<8x96xf32>
    %235 = vector.broadcast %17 : vector<1x96xf32> to vector<8x96xf32>
    %236 = arith.addf %234, %235 : vector<8x96xf32>
    %237 = vector.extract_strided_slice %233 {offsets = [0, 0], sizes = [8, 32], strides = [1, 1]} : vector<8x96xf32> to vector<8x32xf32>
    %238 = vector.extract_strided_slice %236 {offsets = [0, 0], sizes = [8, 32], strides = [1, 1]} : vector<8x96xf32> to vector<8x32xf32>
    %239 = arith.addf %237, %238 : vector<8x32xf32>
    %cst_73 = arith.constant 5.000000e-01 : f32
    %240 = vector.broadcast %cst_73 : f32 to vector<8x32xf32>
    %241 = arith.mulf %240, %239 : vector<8x32xf32>
    %242 = math.tanh %241 : vector<8x32xf32>
    %cst_74 = arith.constant 1.000000e+00 : f32
    %243 = vector.broadcast %cst_74 : f32 to vector<8x32xf32>
    %244 = arith.addf %242, %243 : vector<8x32xf32>
    %cst_75 = arith.constant 5.000000e-01 : f32
    %245 = vector.broadcast %cst_75 : f32 to vector<8x32xf32>
    %246 = arith.mulf %245, %244 : vector<8x32xf32>
    %247 = vector.extract_strided_slice %233 {offsets = [0, 32], sizes = [8, 32], strides = [1, 1]} : vector<8x96xf32> to vector<8x32xf32>
    %248 = vector.extract_strided_slice %236 {offsets = [0, 32], sizes = [8, 32], strides = [1, 1]} : vector<8x96xf32> to vector<8x32xf32>
    %249 = arith.addf %247, %248 : vector<8x32xf32>
    %cst_76 = arith.constant 5.000000e-01 : f32
    %250 = vector.broadcast %cst_76 : f32 to vector<8x32xf32>
    %251 = arith.mulf %250, %249 : vector<8x32xf32>
    %252 = math.tanh %251 : vector<8x32xf32>
    %cst_77 = arith.constant 1.000000e+00 : f32
    %253 = vector.broadcast %cst_77 : f32 to vector<8x32xf32>
    %254 = arith.addf %252, %253 : vector<8x32xf32>
    %cst_78 = arith.constant 5.000000e-01 : f32
    %255 = vector.broadcast %cst_78 : f32 to vector<8x32xf32>
    %256 = arith.mulf %255, %254 : vector<8x32xf32>
    %257 = vector.extract_strided_slice %233 {offsets = [0, 64], sizes = [8, 32], strides = [1, 1]} : vector<8x96xf32> to vector<8x32xf32>
    %258 = vector.extract_strided_slice %236 {offsets = [0, 64], sizes = [8, 32], strides = [1, 1]} : vector<8x96xf32> to vector<8x32xf32>
    %259 = arith.mulf %246, %258 : vector<8x32xf32>
    %260 = arith.addf %257, %259 : vector<8x32xf32>
    %261 = math.tanh %260 : vector<8x32xf32>
    %cst_79 = arith.constant 1.000000e+00 : f32
    %262 = vector.broadcast %cst_79 : f32 to vector<8x32xf32>
    %263 = arith.subf %262, %256 : vector<8x32xf32>
    %264 = arith.mulf %263, %261 : vector<8x32xf32>
    %265 = arith.mulf %256, %196 : vector<8x32xf32>
    %266 = arith.addf %264, %265 : vector<8x32xf32>
    %267 = vector.extract_strided_slice %15 {offsets = [0, 3, 0], sizes = [8, 1, 96], strides = [1, 1, 1]} : vector<8x8x96xf32> to vector<8x1x96xf32>
    %268 = vector.shape_cast %267 : vector<8x1x96xf32> to vector<8x96xf32>
    %cst_80 = arith.constant dense<0.000000e+00> : vector<8x96xf32>
    %269 = tpu.matmul %231, %18, %cst_80 {dimension_numbers = #tpu.dot_dimension_numbers<[1], [0], [0], [1], [0, 0, 1, 1], [], []>} : vector<8x32xf32>, vector<32x96xf32>, vector<8x96xf32> -> vector<8x96xf32>
    %270 = vector.broadcast %19 : vector<1x96xf32> to vector<8x96xf32>
    %271 = arith.addf %269, %270 : vector<8x96xf32>
    %272 = vector.extract_strided_slice %268 {offsets = [0, 0], sizes = [8, 32], strides = [1, 1]} : vector<8x96xf32> to vector<8x32xf32>
    %273 = vector.extract_strided_slice %271 {offsets = [0, 0], sizes = [8, 32], strides = [1, 1]} : vector<8x96xf32> to vector<8x32xf32>
    %274 = arith.addf %272, %273 : vector<8x32xf32>
    %cst_81 = arith.constant 5.000000e-01 : f32
    %275 = vector.broadcast %cst_81 : f32 to vector<8x32xf32>
    %276 = arith.mulf %275, %274 : vector<8x32xf32>
    %277 = math.tanh %276 : vector<8x32xf32>
    %cst_82 = arith.constant 1.000000e+00 : f32
    %278 = vector.broadcast %cst_82 : f32 to vector<8x32xf32>
    %279 = arith.addf %277, %278 : vector<8x32xf32>
    %cst_83 = arith.constant 5.000000e-01 : f32
    %280 = vector.broadcast %cst_83 : f32 to vector<8x32xf32>
    %281 = arith.mulf %280, %279 : vector<8x32xf32>
    %282 = vector.extract_strided_slice %268 {offsets = [0, 32], sizes = [8, 32], strides = [1, 1]} : vector<8x96xf32> to vector<8x32xf32>
    %283 = vector.extract_strided_slice %271 {offsets = [0, 32], sizes = [8, 32], strides = [1, 1]} : vector<8x96xf32> to vector<8x32xf32>
    %284 = arith.addf %282, %283 : vector<8x32xf32>
    %cst_84 = arith.constant 5.000000e-01 : f32
    %285 = vector.broadcast %cst_84 : f32 to vector<8x32xf32>
    %286 = arith.mulf %285, %284 : vector<8x32xf32>
    %287 = math.tanh %286 : vector<8x32xf32>
    %cst_85 = arith.constant 1.000000e+00 : f32
    %288 = vector.broadcast %cst_85 : f32 to vector<8x32xf32>
    %289 = arith.addf %287, %288 : vector<8x32xf32>
    %cst_86 = arith.constant 5.000000e-01 : f32
    %290 = vector.broadcast %cst_86 : f32 to vector<8x32xf32>
    %291 = arith.mulf %290, %289 : vector<8x32xf32>
    %292 = vector.extract_strided_slice %268 {offsets = [0, 64], sizes = [8, 32], strides = [1, 1]} : vector<8x96xf32> to vector<8x32xf32>
    %293 = vector.extract_strided_slice %271 {offsets = [0, 64], sizes = [8, 32], strides = [1, 1]} : vector<8x96xf32> to vector<8x32xf32>
    %294 = arith.mulf %281, %293 : vector<8x32xf32>
    %295 = arith.addf %292, %294 : vector<8x32xf32>
    %296 = math.tanh %295 : vector<8x32xf32>
    %cst_87 = arith.constant 1.000000e+00 : f32
    %297 = vector.broadcast %cst_87 : f32 to vector<8x32xf32>
    %298 = arith.subf %297, %291 : vector<8x32xf32>
    %299 = arith.mulf %298, %296 : vector<8x32xf32>
    %300 = arith.mulf %291, %231 : vector<8x32xf32>
    %301 = arith.addf %299, %300 : vector<8x32xf32>
    %302 = vector.extract_strided_slice %7 {offsets = [0, 4, 0], sizes = [8, 1, 96], strides = [1, 1, 1]} : vector<8x8x96xf32> to vector<8x1x96xf32>
    %303 = vector.shape_cast %302 : vector<8x1x96xf32> to vector<8x96xf32>
    %cst_88 = arith.constant dense<0.000000e+00> : vector<8x96xf32>
    %304 = tpu.matmul %266, %16, %cst_88 {dimension_numbers = #tpu.dot_dimension_numbers<[1], [0], [0], [1], [0, 0, 1, 1], [], []>} : vector<8x32xf32>, vector<32x96xf32>, vector<8x96xf32> -> vector<8x96xf32>
    %305 = vector.broadcast %17 : vector<1x96xf32> to vector<8x96xf32>
    %306 = arith.addf %304, %305 : vector<8x96xf32>
    %307 = vector.extract_strided_slice %303 {offsets = [0, 0], sizes = [8, 32], strides = [1, 1]} : vector<8x96xf32> to vector<8x32xf32>
    %308 = vector.extract_strided_slice %306 {offsets = [0, 0], sizes = [8, 32], strides = [1, 1]} : vector<8x96xf32> to vector<8x32xf32>
    %309 = arith.addf %307, %308 : vector<8x32xf32>
    %cst_89 = arith.constant 5.000000e-01 : f32
    %310 = vector.broadcast %cst_89 : f32 to vector<8x32xf32>
    %311 = arith.mulf %310, %309 : vector<8x32xf32>
    %312 = math.tanh %311 : vector<8x32xf32>
    %cst_90 = arith.constant 1.000000e+00 : f32
    %313 = vector.broadcast %cst_90 : f32 to vector<8x32xf32>
    %314 = arith.addf %312, %313 : vector<8x32xf32>
    %cst_91 = arith.constant 5.000000e-01 : f32
    %315 = vector.broadcast %cst_91 : f32 to vector<8x32xf32>
    %316 = arith.mulf %315, %314 : vector<8x32xf32>
    %317 = vector.extract_strided_slice %303 {offsets = [0, 32], sizes = [8, 32], strides = [1, 1]} : vector<8x96xf32> to vector<8x32xf32>
    %318 = vector.extract_strided_slice %306 {offsets = [0, 32], sizes = [8, 32], strides = [1, 1]} : vector<8x96xf32> to vector<8x32xf32>
    %319 = arith.addf %317, %318 : vector<8x32xf32>
    %cst_92 = arith.constant 5.000000e-01 : f32
    %320 = vector.broadcast %cst_92 : f32 to vector<8x32xf32>
    %321 = arith.mulf %320, %319 : vector<8x32xf32>
    %322 = math.tanh %321 : vector<8x32xf32>
    %cst_93 = arith.constant 1.000000e+00 : f32
    %323 = vector.broadcast %cst_93 : f32 to vector<8x32xf32>
    %324 = arith.addf %322, %323 : vector<8x32xf32>
    %cst_94 = arith.constant 5.000000e-01 : f32
    %325 = vector.broadcast %cst_94 : f32 to vector<8x32xf32>
    %326 = arith.mulf %325, %324 : vector<8x32xf32>
    %327 = vector.extract_strided_slice %303 {offsets = [0, 64], sizes = [8, 32], strides = [1, 1]} : vector<8x96xf32> to vector<8x32xf32>
    %328 = vector.extract_strided_slice %306 {offsets = [0, 64], sizes = [8, 32], strides = [1, 1]} : vector<8x96xf32> to vector<8x32xf32>
    %329 = arith.mulf %316, %328 : vector<8x32xf32>
    %330 = arith.addf %327, %329 : vector<8x32xf32>
    %331 = math.tanh %330 : vector<8x32xf32>
    %cst_95 = arith.constant 1.000000e+00 : f32
    %332 = vector.broadcast %cst_95 : f32 to vector<8x32xf32>
    %333 = arith.subf %332, %326 : vector<8x32xf32>
    %334 = arith.mulf %333, %331 : vector<8x32xf32>
    %335 = arith.mulf %326, %266 : vector<8x32xf32>
    %336 = arith.addf %334, %335 : vector<8x32xf32>
    %337 = vector.extract_strided_slice %15 {offsets = [0, 4, 0], sizes = [8, 1, 96], strides = [1, 1, 1]} : vector<8x8x96xf32> to vector<8x1x96xf32>
    %338 = vector.shape_cast %337 : vector<8x1x96xf32> to vector<8x96xf32>
    %cst_96 = arith.constant dense<0.000000e+00> : vector<8x96xf32>
    %339 = tpu.matmul %301, %18, %cst_96 {dimension_numbers = #tpu.dot_dimension_numbers<[1], [0], [0], [1], [0, 0, 1, 1], [], []>} : vector<8x32xf32>, vector<32x96xf32>, vector<8x96xf32> -> vector<8x96xf32>
    %340 = vector.broadcast %19 : vector<1x96xf32> to vector<8x96xf32>
    %341 = arith.addf %339, %340 : vector<8x96xf32>
    %342 = vector.extract_strided_slice %338 {offsets = [0, 0], sizes = [8, 32], strides = [1, 1]} : vector<8x96xf32> to vector<8x32xf32>
    %343 = vector.extract_strided_slice %341 {offsets = [0, 0], sizes = [8, 32], strides = [1, 1]} : vector<8x96xf32> to vector<8x32xf32>
    %344 = arith.addf %342, %343 : vector<8x32xf32>
    %cst_97 = arith.constant 5.000000e-01 : f32
    %345 = vector.broadcast %cst_97 : f32 to vector<8x32xf32>
    %346 = arith.mulf %345, %344 : vector<8x32xf32>
    %347 = math.tanh %346 : vector<8x32xf32>
    %cst_98 = arith.constant 1.000000e+00 : f32
    %348 = vector.broadcast %cst_98 : f32 to vector<8x32xf32>
    %349 = arith.addf %347, %348 : vector<8x32xf32>
    %cst_99 = arith.constant 5.000000e-01 : f32
    %350 = vector.broadcast %cst_99 : f32 to vector<8x32xf32>
    %351 = arith.mulf %350, %349 : vector<8x32xf32>
    %352 = vector.extract_strided_slice %338 {offsets = [0, 32], sizes = [8, 32], strides = [1, 1]} : vector<8x96xf32> to vector<8x32xf32>
    %353 = vector.extract_strided_slice %341 {offsets = [0, 32], sizes = [8, 32], strides = [1, 1]} : vector<8x96xf32> to vector<8x32xf32>
    %354 = arith.addf %352, %353 : vector<8x32xf32>
    %cst_100 = arith.constant 5.000000e-01 : f32
    %355 = vector.broadcast %cst_100 : f32 to vector<8x32xf32>
    %356 = arith.mulf %355, %354 : vector<8x32xf32>
    %357 = math.tanh %356 : vector<8x32xf32>
    %cst_101 = arith.constant 1.000000e+00 : f32
    %358 = vector.broadcast %cst_101 : f32 to vector<8x32xf32>
    %359 = arith.addf %357, %358 : vector<8x32xf32>
    %cst_102 = arith.constant 5.000000e-01 : f32
    %360 = vector.broadcast %cst_102 : f32 to vector<8x32xf32>
    %361 = arith.mulf %360, %359 : vector<8x32xf32>
    %362 = vector.extract_strided_slice %338 {offsets = [0, 64], sizes = [8, 32], strides = [1, 1]} : vector<8x96xf32> to vector<8x32xf32>
    %363 = vector.extract_strided_slice %341 {offsets = [0, 64], sizes = [8, 32], strides = [1, 1]} : vector<8x96xf32> to vector<8x32xf32>
    %364 = arith.mulf %351, %363 : vector<8x32xf32>
    %365 = arith.addf %362, %364 : vector<8x32xf32>
    %366 = math.tanh %365 : vector<8x32xf32>
    %cst_103 = arith.constant 1.000000e+00 : f32
    %367 = vector.broadcast %cst_103 : f32 to vector<8x32xf32>
    %368 = arith.subf %367, %361 : vector<8x32xf32>
    %369 = arith.mulf %368, %366 : vector<8x32xf32>
    %370 = arith.mulf %361, %301 : vector<8x32xf32>
    %371 = arith.addf %369, %370 : vector<8x32xf32>
    %372 = vector.extract_strided_slice %7 {offsets = [0, 5, 0], sizes = [8, 1, 96], strides = [1, 1, 1]} : vector<8x8x96xf32> to vector<8x1x96xf32>
    %373 = vector.shape_cast %372 : vector<8x1x96xf32> to vector<8x96xf32>
    %cst_104 = arith.constant dense<0.000000e+00> : vector<8x96xf32>
    %374 = tpu.matmul %336, %16, %cst_104 {dimension_numbers = #tpu.dot_dimension_numbers<[1], [0], [0], [1], [0, 0, 1, 1], [], []>} : vector<8x32xf32>, vector<32x96xf32>, vector<8x96xf32> -> vector<8x96xf32>
    %375 = vector.broadcast %17 : vector<1x96xf32> to vector<8x96xf32>
    %376 = arith.addf %374, %375 : vector<8x96xf32>
    %377 = vector.extract_strided_slice %373 {offsets = [0, 0], sizes = [8, 32], strides = [1, 1]} : vector<8x96xf32> to vector<8x32xf32>
    %378 = vector.extract_strided_slice %376 {offsets = [0, 0], sizes = [8, 32], strides = [1, 1]} : vector<8x96xf32> to vector<8x32xf32>
    %379 = arith.addf %377, %378 : vector<8x32xf32>
    %cst_105 = arith.constant 5.000000e-01 : f32
    %380 = vector.broadcast %cst_105 : f32 to vector<8x32xf32>
    %381 = arith.mulf %380, %379 : vector<8x32xf32>
    %382 = math.tanh %381 : vector<8x32xf32>
    %cst_106 = arith.constant 1.000000e+00 : f32
    %383 = vector.broadcast %cst_106 : f32 to vector<8x32xf32>
    %384 = arith.addf %382, %383 : vector<8x32xf32>
    %cst_107 = arith.constant 5.000000e-01 : f32
    %385 = vector.broadcast %cst_107 : f32 to vector<8x32xf32>
    %386 = arith.mulf %385, %384 : vector<8x32xf32>
    %387 = vector.extract_strided_slice %373 {offsets = [0, 32], sizes = [8, 32], strides = [1, 1]} : vector<8x96xf32> to vector<8x32xf32>
    %388 = vector.extract_strided_slice %376 {offsets = [0, 32], sizes = [8, 32], strides = [1, 1]} : vector<8x96xf32> to vector<8x32xf32>
    %389 = arith.addf %387, %388 : vector<8x32xf32>
    %cst_108 = arith.constant 5.000000e-01 : f32
    %390 = vector.broadcast %cst_108 : f32 to vector<8x32xf32>
    %391 = arith.mulf %390, %389 : vector<8x32xf32>
    %392 = math.tanh %391 : vector<8x32xf32>
    %cst_109 = arith.constant 1.000000e+00 : f32
    %393 = vector.broadcast %cst_109 : f32 to vector<8x32xf32>
    %394 = arith.addf %392, %393 : vector<8x32xf32>
    %cst_110 = arith.constant 5.000000e-01 : f32
    %395 = vector.broadcast %cst_110 : f32 to vector<8x32xf32>
    %396 = arith.mulf %395, %394 : vector<8x32xf32>
    %397 = vector.extract_strided_slice %373 {offsets = [0, 64], sizes = [8, 32], strides = [1, 1]} : vector<8x96xf32> to vector<8x32xf32>
    %398 = vector.extract_strided_slice %376 {offsets = [0, 64], sizes = [8, 32], strides = [1, 1]} : vector<8x96xf32> to vector<8x32xf32>
    %399 = arith.mulf %386, %398 : vector<8x32xf32>
    %400 = arith.addf %397, %399 : vector<8x32xf32>
    %401 = math.tanh %400 : vector<8x32xf32>
    %cst_111 = arith.constant 1.000000e+00 : f32
    %402 = vector.broadcast %cst_111 : f32 to vector<8x32xf32>
    %403 = arith.subf %402, %396 : vector<8x32xf32>
    %404 = arith.mulf %403, %401 : vector<8x32xf32>
    %405 = arith.mulf %396, %336 : vector<8x32xf32>
    %406 = arith.addf %404, %405 : vector<8x32xf32>
    %407 = vector.extract_strided_slice %15 {offsets = [0, 5, 0], sizes = [8, 1, 96], strides = [1, 1, 1]} : vector<8x8x96xf32> to vector<8x1x96xf32>
    %408 = vector.shape_cast %407 : vector<8x1x96xf32> to vector<8x96xf32>
    %cst_112 = arith.constant dense<0.000000e+00> : vector<8x96xf32>
    %409 = tpu.matmul %371, %18, %cst_112 {dimension_numbers = #tpu.dot_dimension_numbers<[1], [0], [0], [1], [0, 0, 1, 1], [], []>} : vector<8x32xf32>, vector<32x96xf32>, vector<8x96xf32> -> vector<8x96xf32>
    %410 = vector.broadcast %19 : vector<1x96xf32> to vector<8x96xf32>
    %411 = arith.addf %409, %410 : vector<8x96xf32>
    %412 = vector.extract_strided_slice %408 {offsets = [0, 0], sizes = [8, 32], strides = [1, 1]} : vector<8x96xf32> to vector<8x32xf32>
    %413 = vector.extract_strided_slice %411 {offsets = [0, 0], sizes = [8, 32], strides = [1, 1]} : vector<8x96xf32> to vector<8x32xf32>
    %414 = arith.addf %412, %413 : vector<8x32xf32>
    %cst_113 = arith.constant 5.000000e-01 : f32
    %415 = vector.broadcast %cst_113 : f32 to vector<8x32xf32>
    %416 = arith.mulf %415, %414 : vector<8x32xf32>
    %417 = math.tanh %416 : vector<8x32xf32>
    %cst_114 = arith.constant 1.000000e+00 : f32
    %418 = vector.broadcast %cst_114 : f32 to vector<8x32xf32>
    %419 = arith.addf %417, %418 : vector<8x32xf32>
    %cst_115 = arith.constant 5.000000e-01 : f32
    %420 = vector.broadcast %cst_115 : f32 to vector<8x32xf32>
    %421 = arith.mulf %420, %419 : vector<8x32xf32>
    %422 = vector.extract_strided_slice %408 {offsets = [0, 32], sizes = [8, 32], strides = [1, 1]} : vector<8x96xf32> to vector<8x32xf32>
    %423 = vector.extract_strided_slice %411 {offsets = [0, 32], sizes = [8, 32], strides = [1, 1]} : vector<8x96xf32> to vector<8x32xf32>
    %424 = arith.addf %422, %423 : vector<8x32xf32>
    %cst_116 = arith.constant 5.000000e-01 : f32
    %425 = vector.broadcast %cst_116 : f32 to vector<8x32xf32>
    %426 = arith.mulf %425, %424 : vector<8x32xf32>
    %427 = math.tanh %426 : vector<8x32xf32>
    %cst_117 = arith.constant 1.000000e+00 : f32
    %428 = vector.broadcast %cst_117 : f32 to vector<8x32xf32>
    %429 = arith.addf %427, %428 : vector<8x32xf32>
    %cst_118 = arith.constant 5.000000e-01 : f32
    %430 = vector.broadcast %cst_118 : f32 to vector<8x32xf32>
    %431 = arith.mulf %430, %429 : vector<8x32xf32>
    %432 = vector.extract_strided_slice %408 {offsets = [0, 64], sizes = [8, 32], strides = [1, 1]} : vector<8x96xf32> to vector<8x32xf32>
    %433 = vector.extract_strided_slice %411 {offsets = [0, 64], sizes = [8, 32], strides = [1, 1]} : vector<8x96xf32> to vector<8x32xf32>
    %434 = arith.mulf %421, %433 : vector<8x32xf32>
    %435 = arith.addf %432, %434 : vector<8x32xf32>
    %436 = math.tanh %435 : vector<8x32xf32>
    %cst_119 = arith.constant 1.000000e+00 : f32
    %437 = vector.broadcast %cst_119 : f32 to vector<8x32xf32>
    %438 = arith.subf %437, %431 : vector<8x32xf32>
    %439 = arith.mulf %438, %436 : vector<8x32xf32>
    %440 = arith.mulf %431, %371 : vector<8x32xf32>
    %441 = arith.addf %439, %440 : vector<8x32xf32>
    %442 = vector.extract_strided_slice %7 {offsets = [0, 6, 0], sizes = [8, 1, 96], strides = [1, 1, 1]} : vector<8x8x96xf32> to vector<8x1x96xf32>
    %443 = vector.shape_cast %442 : vector<8x1x96xf32> to vector<8x96xf32>
    %cst_120 = arith.constant dense<0.000000e+00> : vector<8x96xf32>
    %444 = tpu.matmul %406, %16, %cst_120 {dimension_numbers = #tpu.dot_dimension_numbers<[1], [0], [0], [1], [0, 0, 1, 1], [], []>} : vector<8x32xf32>, vector<32x96xf32>, vector<8x96xf32> -> vector<8x96xf32>
    %445 = vector.broadcast %17 : vector<1x96xf32> to vector<8x96xf32>
    %446 = arith.addf %444, %445 : vector<8x96xf32>
    %447 = vector.extract_strided_slice %443 {offsets = [0, 0], sizes = [8, 32], strides = [1, 1]} : vector<8x96xf32> to vector<8x32xf32>
    %448 = vector.extract_strided_slice %446 {offsets = [0, 0], sizes = [8, 32], strides = [1, 1]} : vector<8x96xf32> to vector<8x32xf32>
    %449 = arith.addf %447, %448 : vector<8x32xf32>
    %cst_121 = arith.constant 5.000000e-01 : f32
    %450 = vector.broadcast %cst_121 : f32 to vector<8x32xf32>
    %451 = arith.mulf %450, %449 : vector<8x32xf32>
    %452 = math.tanh %451 : vector<8x32xf32>
    %cst_122 = arith.constant 1.000000e+00 : f32
    %453 = vector.broadcast %cst_122 : f32 to vector<8x32xf32>
    %454 = arith.addf %452, %453 : vector<8x32xf32>
    %cst_123 = arith.constant 5.000000e-01 : f32
    %455 = vector.broadcast %cst_123 : f32 to vector<8x32xf32>
    %456 = arith.mulf %455, %454 : vector<8x32xf32>
    %457 = vector.extract_strided_slice %443 {offsets = [0, 32], sizes = [8, 32], strides = [1, 1]} : vector<8x96xf32> to vector<8x32xf32>
    %458 = vector.extract_strided_slice %446 {offsets = [0, 32], sizes = [8, 32], strides = [1, 1]} : vector<8x96xf32> to vector<8x32xf32>
    %459 = arith.addf %457, %458 : vector<8x32xf32>
    %cst_124 = arith.constant 5.000000e-01 : f32
    %460 = vector.broadcast %cst_124 : f32 to vector<8x32xf32>
    %461 = arith.mulf %460, %459 : vector<8x32xf32>
    %462 = math.tanh %461 : vector<8x32xf32>
    %cst_125 = arith.constant 1.000000e+00 : f32
    %463 = vector.broadcast %cst_125 : f32 to vector<8x32xf32>
    %464 = arith.addf %462, %463 : vector<8x32xf32>
    %cst_126 = arith.constant 5.000000e-01 : f32
    %465 = vector.broadcast %cst_126 : f32 to vector<8x32xf32>
    %466 = arith.mulf %465, %464 : vector<8x32xf32>
    %467 = vector.extract_strided_slice %443 {offsets = [0, 64], sizes = [8, 32], strides = [1, 1]} : vector<8x96xf32> to vector<8x32xf32>
    %468 = vector.extract_strided_slice %446 {offsets = [0, 64], sizes = [8, 32], strides = [1, 1]} : vector<8x96xf32> to vector<8x32xf32>
    %469 = arith.mulf %456, %468 : vector<8x32xf32>
    %470 = arith.addf %467, %469 : vector<8x32xf32>
    %471 = math.tanh %470 : vector<8x32xf32>
    %cst_127 = arith.constant 1.000000e+00 : f32
    %472 = vector.broadcast %cst_127 : f32 to vector<8x32xf32>
    %473 = arith.subf %472, %466 : vector<8x32xf32>
    %474 = arith.mulf %473, %471 : vector<8x32xf32>
    %475 = arith.mulf %466, %406 : vector<8x32xf32>
    %476 = arith.addf %474, %475 : vector<8x32xf32>
    %477 = vector.extract_strided_slice %15 {offsets = [0, 6, 0], sizes = [8, 1, 96], strides = [1, 1, 1]} : vector<8x8x96xf32> to vector<8x1x96xf32>
    %478 = vector.shape_cast %477 : vector<8x1x96xf32> to vector<8x96xf32>
    %cst_128 = arith.constant dense<0.000000e+00> : vector<8x96xf32>
    %479 = tpu.matmul %441, %18, %cst_128 {dimension_numbers = #tpu.dot_dimension_numbers<[1], [0], [0], [1], [0, 0, 1, 1], [], []>} : vector<8x32xf32>, vector<32x96xf32>, vector<8x96xf32> -> vector<8x96xf32>
    %480 = vector.broadcast %19 : vector<1x96xf32> to vector<8x96xf32>
    %481 = arith.addf %479, %480 : vector<8x96xf32>
    %482 = vector.extract_strided_slice %478 {offsets = [0, 0], sizes = [8, 32], strides = [1, 1]} : vector<8x96xf32> to vector<8x32xf32>
    %483 = vector.extract_strided_slice %481 {offsets = [0, 0], sizes = [8, 32], strides = [1, 1]} : vector<8x96xf32> to vector<8x32xf32>
    %484 = arith.addf %482, %483 : vector<8x32xf32>
    %cst_129 = arith.constant 5.000000e-01 : f32
    %485 = vector.broadcast %cst_129 : f32 to vector<8x32xf32>
    %486 = arith.mulf %485, %484 : vector<8x32xf32>
    %487 = math.tanh %486 : vector<8x32xf32>
    %cst_130 = arith.constant 1.000000e+00 : f32
    %488 = vector.broadcast %cst_130 : f32 to vector<8x32xf32>
    %489 = arith.addf %487, %488 : vector<8x32xf32>
    %cst_131 = arith.constant 5.000000e-01 : f32
    %490 = vector.broadcast %cst_131 : f32 to vector<8x32xf32>
    %491 = arith.mulf %490, %489 : vector<8x32xf32>
    %492 = vector.extract_strided_slice %478 {offsets = [0, 32], sizes = [8, 32], strides = [1, 1]} : vector<8x96xf32> to vector<8x32xf32>
    %493 = vector.extract_strided_slice %481 {offsets = [0, 32], sizes = [8, 32], strides = [1, 1]} : vector<8x96xf32> to vector<8x32xf32>
    %494 = arith.addf %492, %493 : vector<8x32xf32>
    %cst_132 = arith.constant 5.000000e-01 : f32
    %495 = vector.broadcast %cst_132 : f32 to vector<8x32xf32>
    %496 = arith.mulf %495, %494 : vector<8x32xf32>
    %497 = math.tanh %496 : vector<8x32xf32>
    %cst_133 = arith.constant 1.000000e+00 : f32
    %498 = vector.broadcast %cst_133 : f32 to vector<8x32xf32>
    %499 = arith.addf %497, %498 : vector<8x32xf32>
    %cst_134 = arith.constant 5.000000e-01 : f32
    %500 = vector.broadcast %cst_134 : f32 to vector<8x32xf32>
    %501 = arith.mulf %500, %499 : vector<8x32xf32>
    %502 = vector.extract_strided_slice %478 {offsets = [0, 64], sizes = [8, 32], strides = [1, 1]} : vector<8x96xf32> to vector<8x32xf32>
    %503 = vector.extract_strided_slice %481 {offsets = [0, 64], sizes = [8, 32], strides = [1, 1]} : vector<8x96xf32> to vector<8x32xf32>
    %504 = arith.mulf %491, %503 : vector<8x32xf32>
    %505 = arith.addf %502, %504 : vector<8x32xf32>
    %506 = math.tanh %505 : vector<8x32xf32>
    %cst_135 = arith.constant 1.000000e+00 : f32
    %507 = vector.broadcast %cst_135 : f32 to vector<8x32xf32>
    %508 = arith.subf %507, %501 : vector<8x32xf32>
    %509 = arith.mulf %508, %506 : vector<8x32xf32>
    %510 = arith.mulf %501, %441 : vector<8x32xf32>
    %511 = arith.addf %509, %510 : vector<8x32xf32>
    %512 = vector.extract_strided_slice %7 {offsets = [0, 7, 0], sizes = [8, 1, 96], strides = [1, 1, 1]} : vector<8x8x96xf32> to vector<8x1x96xf32>
    %513 = vector.shape_cast %512 : vector<8x1x96xf32> to vector<8x96xf32>
    %cst_136 = arith.constant dense<0.000000e+00> : vector<8x96xf32>
    %514 = tpu.matmul %476, %16, %cst_136 {dimension_numbers = #tpu.dot_dimension_numbers<[1], [0], [0], [1], [0, 0, 1, 1], [], []>} : vector<8x32xf32>, vector<32x96xf32>, vector<8x96xf32> -> vector<8x96xf32>
    %515 = vector.broadcast %17 : vector<1x96xf32> to vector<8x96xf32>
    %516 = arith.addf %514, %515 : vector<8x96xf32>
    %517 = vector.extract_strided_slice %513 {offsets = [0, 0], sizes = [8, 32], strides = [1, 1]} : vector<8x96xf32> to vector<8x32xf32>
    %518 = vector.extract_strided_slice %516 {offsets = [0, 0], sizes = [8, 32], strides = [1, 1]} : vector<8x96xf32> to vector<8x32xf32>
    %519 = arith.addf %517, %518 : vector<8x32xf32>
    %cst_137 = arith.constant 5.000000e-01 : f32
    %520 = vector.broadcast %cst_137 : f32 to vector<8x32xf32>
    %521 = arith.mulf %520, %519 : vector<8x32xf32>
    %522 = math.tanh %521 : vector<8x32xf32>
    %cst_138 = arith.constant 1.000000e+00 : f32
    %523 = vector.broadcast %cst_138 : f32 to vector<8x32xf32>
    %524 = arith.addf %522, %523 : vector<8x32xf32>
    %cst_139 = arith.constant 5.000000e-01 : f32
    %525 = vector.broadcast %cst_139 : f32 to vector<8x32xf32>
    %526 = arith.mulf %525, %524 : vector<8x32xf32>
    %527 = vector.extract_strided_slice %513 {offsets = [0, 32], sizes = [8, 32], strides = [1, 1]} : vector<8x96xf32> to vector<8x32xf32>
    %528 = vector.extract_strided_slice %516 {offsets = [0, 32], sizes = [8, 32], strides = [1, 1]} : vector<8x96xf32> to vector<8x32xf32>
    %529 = arith.addf %527, %528 : vector<8x32xf32>
    %cst_140 = arith.constant 5.000000e-01 : f32
    %530 = vector.broadcast %cst_140 : f32 to vector<8x32xf32>
    %531 = arith.mulf %530, %529 : vector<8x32xf32>
    %532 = math.tanh %531 : vector<8x32xf32>
    %cst_141 = arith.constant 1.000000e+00 : f32
    %533 = vector.broadcast %cst_141 : f32 to vector<8x32xf32>
    %534 = arith.addf %532, %533 : vector<8x32xf32>
    %cst_142 = arith.constant 5.000000e-01 : f32
    %535 = vector.broadcast %cst_142 : f32 to vector<8x32xf32>
    %536 = arith.mulf %535, %534 : vector<8x32xf32>
    %537 = vector.extract_strided_slice %513 {offsets = [0, 64], sizes = [8, 32], strides = [1, 1]} : vector<8x96xf32> to vector<8x32xf32>
    %538 = vector.extract_strided_slice %516 {offsets = [0, 64], sizes = [8, 32], strides = [1, 1]} : vector<8x96xf32> to vector<8x32xf32>
    %539 = arith.mulf %526, %538 : vector<8x32xf32>
    %540 = arith.addf %537, %539 : vector<8x32xf32>
    %541 = math.tanh %540 : vector<8x32xf32>
    %cst_143 = arith.constant 1.000000e+00 : f32
    %542 = vector.broadcast %cst_143 : f32 to vector<8x32xf32>
    %543 = arith.subf %542, %536 : vector<8x32xf32>
    %544 = arith.mulf %543, %541 : vector<8x32xf32>
    %545 = arith.mulf %536, %476 : vector<8x32xf32>
    %546 = arith.addf %544, %545 : vector<8x32xf32>
    %547 = vector.extract_strided_slice %15 {offsets = [0, 7, 0], sizes = [8, 1, 96], strides = [1, 1, 1]} : vector<8x8x96xf32> to vector<8x1x96xf32>
    %548 = vector.shape_cast %547 : vector<8x1x96xf32> to vector<8x96xf32>
    %cst_144 = arith.constant dense<0.000000e+00> : vector<8x96xf32>
    %549 = tpu.matmul %511, %18, %cst_144 {dimension_numbers = #tpu.dot_dimension_numbers<[1], [0], [0], [1], [0, 0, 1, 1], [], []>} : vector<8x32xf32>, vector<32x96xf32>, vector<8x96xf32> -> vector<8x96xf32>
    %550 = vector.broadcast %19 : vector<1x96xf32> to vector<8x96xf32>
    %551 = arith.addf %549, %550 : vector<8x96xf32>
    %552 = vector.extract_strided_slice %548 {offsets = [0, 0], sizes = [8, 32], strides = [1, 1]} : vector<8x96xf32> to vector<8x32xf32>
    %553 = vector.extract_strided_slice %551 {offsets = [0, 0], sizes = [8, 32], strides = [1, 1]} : vector<8x96xf32> to vector<8x32xf32>
    %554 = arith.addf %552, %553 : vector<8x32xf32>
    %cst_145 = arith.constant 5.000000e-01 : f32
    %555 = vector.broadcast %cst_145 : f32 to vector<8x32xf32>
    %556 = arith.mulf %555, %554 : vector<8x32xf32>
    %557 = math.tanh %556 : vector<8x32xf32>
    %cst_146 = arith.constant 1.000000e+00 : f32
    %558 = vector.broadcast %cst_146 : f32 to vector<8x32xf32>
    %559 = arith.addf %557, %558 : vector<8x32xf32>
    %cst_147 = arith.constant 5.000000e-01 : f32
    %560 = vector.broadcast %cst_147 : f32 to vector<8x32xf32>
    %561 = arith.mulf %560, %559 : vector<8x32xf32>
    %562 = vector.extract_strided_slice %548 {offsets = [0, 32], sizes = [8, 32], strides = [1, 1]} : vector<8x96xf32> to vector<8x32xf32>
    %563 = vector.extract_strided_slice %551 {offsets = [0, 32], sizes = [8, 32], strides = [1, 1]} : vector<8x96xf32> to vector<8x32xf32>
    %564 = arith.addf %562, %563 : vector<8x32xf32>
    %cst_148 = arith.constant 5.000000e-01 : f32
    %565 = vector.broadcast %cst_148 : f32 to vector<8x32xf32>
    %566 = arith.mulf %565, %564 : vector<8x32xf32>
    %567 = math.tanh %566 : vector<8x32xf32>
    %cst_149 = arith.constant 1.000000e+00 : f32
    %568 = vector.broadcast %cst_149 : f32 to vector<8x32xf32>
    %569 = arith.addf %567, %568 : vector<8x32xf32>
    %cst_150 = arith.constant 5.000000e-01 : f32
    %570 = vector.broadcast %cst_150 : f32 to vector<8x32xf32>
    %571 = arith.mulf %570, %569 : vector<8x32xf32>
    %572 = vector.extract_strided_slice %548 {offsets = [0, 64], sizes = [8, 32], strides = [1, 1]} : vector<8x96xf32> to vector<8x32xf32>
    %573 = vector.extract_strided_slice %551 {offsets = [0, 64], sizes = [8, 32], strides = [1, 1]} : vector<8x96xf32> to vector<8x32xf32>
    %574 = arith.mulf %561, %573 : vector<8x32xf32>
    %575 = arith.addf %572, %574 : vector<8x32xf32>
    %576 = math.tanh %575 : vector<8x32xf32>
    %cst_151 = arith.constant 1.000000e+00 : f32
    %577 = vector.broadcast %cst_151 : f32 to vector<8x32xf32>
    %578 = arith.subf %577, %571 : vector<8x32xf32>
    %579 = arith.mulf %578, %576 : vector<8x32xf32>
    %580 = arith.mulf %571, %511 : vector<8x32xf32>
    %581 = arith.addf %579, %580 : vector<8x32xf32>
    %c0_152 = arith.constant 0 : index
    %c0_153 = arith.constant 0 : index
    %582 = vector.load %arg4[%c0_152, %c0_153] : memref<2x64xf32, #tpu.memory_space<vmem>>, vector<1x64xf32>
    %c1 = arith.constant 1 : index
    %c0_154 = arith.constant 0 : index
    %583 = vector.load %arg4[%c1, %c0_154] : memref<2x64xf32, #tpu.memory_space<vmem>>, vector<1x64xf32>
    %c0_155 = arith.constant 0 : index
    %c0_156 = arith.constant 0 : index
    %584 = vector.load %arg3[%c0_155, %c0_156] : memref<8x2xf32, #tpu.memory_space<vmem>>, vector<8x2xf32>
    %585 = vector.extract_strided_slice %584 {offsets = [0, 0], sizes = [8, 1], strides = [1, 1]} : vector<8x2xf32> to vector<8x1xf32>
    %586 = vector.broadcast %585 : vector<8x1xf32> to vector<8x64xf32>
    %587 = vector.broadcast %582 : vector<1x64xf32> to vector<8x64xf32>
    %588 = arith.mulf %586, %587 : vector<8x64xf32>
    %589 = vector.broadcast %583 : vector<1x64xf32> to vector<8x64xf32>
    %590 = arith.addf %588, %589 : vector<8x64xf32>
    %591 = math.sin %590 : vector<8x64xf32>
    %592 = vector.extract_strided_slice %584 {offsets = [0, 1], sizes = [8, 1], strides = [1, 1]} : vector<8x2xf32> to vector<8x1xf32>
    %593 = vector.broadcast %592 : vector<8x1xf32> to vector<8x64xf32>
    %594 = vector.broadcast %582 : vector<1x64xf32> to vector<8x64xf32>
    %595 = arith.mulf %593, %594 : vector<8x64xf32>
    %596 = vector.broadcast %583 : vector<1x64xf32> to vector<8x64xf32>
    %597 = arith.addf %595, %596 : vector<8x64xf32>
    %598 = math.sin %597 : vector<8x64xf32>
    %599 = tpu.concatenate %546, %581, %591, %598 in 1 : vector<8x32xf32>, vector<8x32xf32>, vector<8x64xf32>, vector<8x64xf32> -> vector<8x192xf32>
    %c0_157 = arith.constant 0 : index
    %c0_158 = arith.constant 0 : index
    %600 = vector.load %arg13[%c0_157, %c0_158] : memref<8x192xf32, #tpu.memory_space<vmem>>, vector<8x192xf32>
    tpu.vector_store %arg13[%c0_157, %c0_158], %599 {strides = array<i32>} : memref<8x192xf32, #tpu.memory_space<vmem>>, vector<8x192xf32>,
    return
  }
  func.func @transform_0(%arg0: i32) -> (i32, i32, i32) {
    %c0_i32 = arith.constant 0 : i32
    %c0_i32_0 = arith.constant 0 : i32
    %c0_i32_1 = arith.constant 0 : i32
    return %arg0, %c0_i32, %c0_i32_0 : i32, i32, i32
  }
  func.func @transform_1(%arg0: i32) -> (i32, i32, i32) {
    %c0_i32 = arith.constant 0 : i32
    %c0_i32_0 = arith.constant 0 : i32
    %c0_i32_1 = arith.constant 0 : i32
    return %arg0, %c0_i32, %c0_i32_0 : i32, i32, i32
  }
  func.func @transform_2(%arg0: i32) -> (i32, i32) {
    %c0_i32 = arith.constant 0 : i32
    %c0_i32_0 = arith.constant 0 : i32
    return %arg0, %c0_i32 : i32, i32
  }
  func.func @transform_3(%arg0: i32) -> (i32, i32) {
    %c0_i32 = arith.constant 0 : i32
    %c0_i32_0 = arith.constant 0 : i32
    %c0_i32_1 = arith.constant 0 : i32
    return %c0_i32, %c0_i32_0 : i32, i32
  }
  func.func @transform_4(%arg0: i32) -> (i32, i32) {
    %c0_i32 = arith.constant 0 : i32
    %c0_i32_0 = arith.constant 0 : i32
    %c0_i32_1 = arith.constant 0 : i32
    return %c0_i32, %c0_i32_0 : i32, i32
  }
  func.func @transform_5(%arg0: i32) -> (i32, i32) {
    %c0_i32 = arith.constant 0 : i32
    %c0_i32_0 = arith.constant 0 : i32
    %c0_i32_1 = arith.constant 0 : i32
    return %c0_i32, %c0_i32_0 : i32, i32
  }
  func.func @transform_6(%arg0: i32) -> (i32, i32) {
    %c0_i32 = arith.constant 0 : i32
    %c0_i32_0 = arith.constant 0 : i32
    %c0_i32_1 = arith.constant 0 : i32
    return %c0_i32, %c0_i32_0 : i32, i32
  }
  func.func @transform_7(%arg0: i32) -> (i32, i32) {
    %c0_i32 = arith.constant 0 : i32
    %c0_i32_0 = arith.constant 0 : i32
    %c0_i32_1 = arith.constant 0 : i32
    return %c0_i32, %c0_i32_0 : i32, i32
  }
  func.func @transform_8(%arg0: i32) -> (i32, i32) {
    %c0_i32 = arith.constant 0 : i32
    %c0_i32_0 = arith.constant 0 : i32
    %c0_i32_1 = arith.constant 0 : i32
    return %c0_i32, %c0_i32_0 : i32, i32
  }
  func.func @transform_9(%arg0: i32) -> (i32, i32) {
    %c0_i32 = arith.constant 0 : i32
    %c0_i32_0 = arith.constant 0 : i32
    %c0_i32_1 = arith.constant 0 : i32
    return %c0_i32, %c0_i32_0 : i32, i32
  }
  func.func @transform_10(%arg0: i32) -> (i32, i32) {
    %c0_i32 = arith.constant 0 : i32
    %c0_i32_0 = arith.constant 0 : i32
    %c0_i32_1 = arith.constant 0 : i32
    return %c0_i32, %c0_i32_0 : i32, i32
  }
  func.func @transform_11(%arg0: i32) -> (i32, i32) {
    %c0_i32 = arith.constant 0 : i32
    %c0_i32_0 = arith.constant 0 : i32
    %c0_i32_1 = arith.constant 0 : i32
    return %c0_i32, %c0_i32_0 : i32, i32
  }
  func.func @transform_12(%arg0: i32) -> (i32, i32) {
    %c0_i32 = arith.constant 0 : i32
    %c0_i32_0 = arith.constant 0 : i32
    return %arg0, %c0_i32 : i32, i32
  }
}

</mosaic_0001>

<bundles_post_ra>
// kernel: tpu_custom_call.1
= control target key start
LH: loop header
LB: loop body
LE: loop exit
PB: predicated region body
PF: predicated region fallthrough
CT: control target
= control target key end

     0   :  { %vm244_vm0 = vcmask 261120   ;;  %v9559_v3 = vmov 0.0|0.0   ;;  %vm91_vm1 = vcmask 596992   ;;  %s9546_s0 = inlined_call_operand.vmem [shape: f32[8,8,201], index: 0, kind: input, shape index: {}]   ;;  %s9547_s1 = inlined_call_operand.vmem [shape: f32[8,8,32], index: 1, kind: input, shape index: {}]   ;;  %s9548_s2 = inlined_call_operand.vmem [shape: f32[8,2], index: 2, kind: input, shape index: {}]   ;;  %s9549_s3 = inlined_call_operand.vmem [shape: f32[2,64], index: 3, kind: input, shape index: {}]   ;;  %s9550_s4 = inlined_call_operand.vmem [shape: f32[201,96], index: 4, kind: input, shape index: {}]   ;;  %s9551_s5 = inlined_call_operand.vmem [shape: f32[1,96], index: 5, kind: input, shape index: {}]   ;;  %s9552_s6 = inlined_call_operand.vmem [shape: f32[32,96], index: 6, kind: input, shape index: {}]   ;;  %s9553_s7 = inlined_call_operand.vmem [shape: f32[1,96], index: 7, kind: input, shape index: {}]   ;;  %s9554_s8 = inlined_call_operand.vmem [shape: f32[32,96], index: 8, kind: input, shape index: {}]   ;;  %s9555_s9 = inlined_call_operand.vmem [shape: f32[1,96], index: 9, kind: input, shape index: {}]   ;;  %s9556_s10 = inlined_call_operand.vmem [shape: f32[32,96], index: 10, kind: input, shape index: {}]   ;;  %s9557_s11 = inlined_call_operand.vmem [shape: f32[1,96], index: 11, kind: input, shape index: {}]   ;;  %s9558_s12 = inlined_call_operand.hbm [shape: f32[8,192], index: 12, kind: output, shape index: {}]  }
   0x1   :  { %v58_v0 = vld [vmem:[%s9550_s4] sm:$0xff]  ;;  %v59_v1 = vld [vmem:[%s9550_s4 + $0x8] sm:$0xff]  ;;  %5953 = vmatprep.subr.bf16.mxu0 %v9559_v3  ;;  %v60_v6 = vld [vmem:[%s9550_s4 + $0x10] sm:$0xff] }
   0x2   :  { %v233_v2 = vld [vmem:[%s9554_s8] sm:$0xff]  ;;  %v5954_v4 = vpack.c.bf16 %v59_v1, %v58_v0  ;;  %v234_v5 = vld [vmem:[%s9554_s8 + $0x8] sm:$0xff]  ;;  %v61_v7 = vld [vmem:[%s9550_s4 + $0x18] sm:$0xff] }
   0x3   :  { %v5993_v8 = vpack.c.bf16 %v234_v5, %v233_v2  ;;  %v235_v9 = vld [vmem:[%s9554_s8 + $0x10] sm:$0xff]  ;;  %v236_v10 = vld [vmem:[%s9554_s8 + $0x18] sm:$0xff]  ;;  %v225_v11 = vld [vmem:[%s9547_s1] sm:$0xff]  ;;  %v5957_v12 = vpack.c.bf16 %v61_v7, %v60_v6 }
   0x4   :  { %5955 = vmatpush1.bf16.msra.mxu0 %v5954_v4  ;;  %v5997_v13 = vpack.c.bf16 %v236_v10, %v235_v9  ;;  %5765 = vmatprep.mubr.msk.f32.mxu1 %vm244_vm0, %v225_v11  ;;  %v62_v14 = vld [vmem:[%s9550_s4 + $0x20] sm:$0xff]  ;;  %v63_v15 = vld [vmem:[%s9550_s4 + $0x28] sm:$0xff]  ;;  %v64_v19 = vld [vmem:[%s9550_s4 + $0x30] sm:$0xff] }
   0x5   :  { %5994 = vmatprep.subr.bf16.mxu1 %v5993_v8  ;;  %5956 = vmatprep.subr.bf16.mxu0 %v9559_v3  ;;  %v374_v16 = vld [vmem:[%s9552_s6] sm:$0xff]  ;;  %v375_v17 = vld [vmem:[%s9552_s6 + $0x8] sm:$0xff]  ;;  %v5960_v18 = vpack.c.bf16 %v63_v15, %v62_v14  ;;  %v65_v20 = vld [vmem:[%s9550_s4 + $0x38] sm:$0xff] }
   0x6   :  { %5996 = vmatpush3.bf16.msra.mxu1 %v5993_v8  ;;  %v226_v21 = vld [vmem:[%s9547_s1 + $0x8] sm:$0xff]  ;;  %v6804_v22 = vpack.c.bf16 %v375_v17, %v374_v16  ;;  %v227_v23 = vld [vmem:[%s9547_s1 + $0x10] sm:$0xff]  ;;  %v377_v25 = vld [vmem:[%s9552_s6 + $0x18] sm:$0xff]  ;;  %v5963_v26 = vpack.c.bf16 %v65_v20, %v64_v19 }
   0x7   :  { %5998 = vmatprep.subr.bf16.mxu1 %v5997_v13  ;;  %v376_v24 = vld [vmem:[%s9552_s6 + $0x10] sm:$0xff]  ;;  %v66_v27 = vld [vmem:[%s9550_s4 + $0x40] sm:$0xff]  ;;  %v67_v28 = vld [vmem:[%s9550_s4 + $0x48] sm:$0xff] }
   0x8   :  { %5958 = vmatpush1.bf16.msra.mxu0 %v5957_v12  ;;  %9648 = vst [vmem:[#allocation5_spill] sm:$0xff] %v6804_v22  ;;  %v228_v29 = vld [vmem:[%s9547_s1 + $0x18] sm:$0xff]  ;;  %v6829_v30 = vpack.c.bf16 %v377_v25, %v376_v24  ;;  %v229_v31 = vld [vmem:[%s9547_s1 + $0x20] sm:$0xff]  ;;  %v5966_v32 = vpack.c.bf16 %v67_v28, %v66_v27  ;;  %v43_v33 = vld [vmem:[%s9546_s0 + $0x8] sm:$0xff] }
   0x9   :  { %5959 = vmatprep.subr.bf16.mxu0 %v9559_v3  ;;  %v68_v34 = vld [vmem:[%s9550_s4 + $0x50] sm:$0xff]  ;;  %v69_v35 = vld [vmem:[%s9550_s4 + $0x58] sm:$0xff]  ;;  %v230_v36 = vld [vmem:[%s9547_s1 + $0x28] sm:$0xff]  ;;  %5621 = vmatprep.mubr.msk.f32.mxu0 %vm91_vm1, %v43_v33 }
   0xa   :  { %6000 = vmatpush3.bf16.msra.mxu1 %v5997_v13  ;;  %9649 = vst [vmem:[#allocation6_spill] sm:$0xff] %v6829_v30  ;;  %v231_v37 = vld [vmem:[%s9547_s1 + $0x30] sm:$0xff]  ;;  %v5969_v38 = vpack.c.bf16 %v69_v35, %v68_v34  ;;  %v70_v39 = vld [vmem:[%s9550_s4 + $0x60] sm:$0xff]  ;;  %v71_v40 = vld [vmem:[%s9550_s4 + $0x68] sm:$0xff] }
   0xb   :  { %6001 = vmatprep.subr.bf16.mxu1 %v9559_v3  ;;  %v232_v41 = vld [vmem:[%s9547_s1 + $0x38] sm:$0xff] }
   0xc   :  { %5961 = vmatpush1.bf16.msra.mxu0 %v5960_v18 }
   0xd   :  { %5766 = vmatmul.mubr.msk.f32.vlgmr.msra.gmra.mrb[0].mxu1 %vm244_vm0, %v226_v21  ;;  %5962 = vmatprep.subr.bf16.mxu0 %v9559_v3 }
   0xe   :  { %6003 = vmatpush3.bf16.msra.mxu1 %v6804_v22  ;;  %5768 = vmatprep.mubr.msk.f32.mxu1 %vm244_vm0, %v227_v23 }
   0xf   :  { %6004 = vmatprep.subr.bf16.mxu1 %v9559_v3 }
  0x10   :  { %5964 = vmatpush1.bf16.msra.mxu0 %v5963_v26 }
  0x11   :  { %5769 = vmatmul.mubr.msk.f32.gmra.mrb[2].mxu1 %vm244_vm0, %v228_v29  ;;  %5965 = vmatprep.subr.bf16.mxu0 %v9559_v3 }
  0x12   :  { %5771 = vmatprep.mubr.msk.f32.mxu1 %vm244_vm0, %v229_v31  ;;  %6006 = vmatpush3.bf16.msra.mxu1 %v6829_v30 }
  0x13   :  { %6007 = vmatprep.subr.bf16.mxu1 %v9559_v3 }
  0x14   :  { %5967 = vmatpush1.bf16.msra.mxu0 %v5966_v32 }
  0x15   :  { %5772 = vmatmul.mubr.msk.f32.gmra.mrb[4].mxu1 %vm244_vm0, %v230_v36  ;;  %5968 = vmatprep.subr.bf16.mxu0 %v9559_v3 }
  0x16   :  { %5774 = vmatprep.mubr.msk.f32.mxu1 %vm244_vm0, %v231_v37 }
  0x17   :  { %17 = vsyncpa [#allocation3], 0  ;;  %v379_v42 = vld [vmem:[%s9556_s10] sm:$0xff]  ;;  %v380_v43 = vld [vmem:[%s9556_s10 + $0x8] sm:$0xff]  ;;  %v5972_v44 = vpack.c.bf16 %v71_v40, %v70_v39  ;;  %vm6673_vm2 = vmmov 0   ;;  %v9561_v47 = vmov 0.0  }
  0x18   :  { %5970 = vmatpush1.bf16.msra.mxu0 %v5969_v38  ;;  %v72_v45 = vld [vmem:[%s9550_s4 + $0x70] sm:$0xff]  ;;  %v73_v46 = vld [vmem:[%s9550_s4 + $0x78] sm:$0xff]  ;;  %v6884_v48 = vpack.c.bf16 %v380_v43, %v379_v42  ;;  %v74_v52 = vld [vmem:[%s9550_s4 + $0x80] sm:$0xff]  ;;  %vm116_vm3 = vcmask 1040384   ;;  %vm6675_vm4 = vmmov 1   ;;  %s6676_s23 = smov 64  }
  0x19   :  { %5775 = vmatmul.mubr.msk.f32.gmra.mrb[6].mxu1 %vm244_vm0, %v232_v41  ;;  %5971 = vmatprep.subr.bf16.mxu0 %v9559_v3  ;;  %v381_v49 = vld [vmem:[%s9556_s10 + $0x10] sm:$0xff]  ;;  %v382_v50 = vld [vmem:[%s9556_s10 + $0x18] sm:$0xff]  ;;  %v5975_v51 = vpack.c.bf16 %v73_v46, %v72_v45  ;;  %v75_v53 = vld [vmem:[%s9550_s4 + $0x88] sm:$0xff]  ;;  %vm948_vm6 = vcmask 1041409   ;;  %vm951_vm7 = vcmask 1042434   ;;  %vm954_vm8 = vcmask 1043459  }
  0x1a   :  { %5785 = vmatprep.mubr.msk.f32.mxu1 %vm6673_vm2, %v9561_v47  ;;  %9650 = vst [vmem:[#allocation7_spill] sm:$0xff] %v6884_v48  ;;  %v6901_v54 = vpack.c.bf16 %v382_v50, %v381_v49  ;;  %v5978_v55 = vpack.c.bf16 %v75_v53, %v74_v52  ;;  %v76_v56 = vld [vmem:[%s9550_s4 + $0x90] sm:$0xff]  ;;  %v77_v57 = vld [vmem:[%s9550_s4 + $0x98] sm:$0xff]  ;;  %v78_v59 = vld [vmem:[%s9550_s4 + $0xa0] sm:$0xff]  ;;  %vm957_vm9 = vcmask 1044484   ;;  %vm960_vm10 = vcmask 1045509  }
  0x1b   :  { %v5981_v58 = vpack.c.bf16 %v77_v57, %v76_v56  ;;  %v79_v60 = vld [vmem:[%s9550_s4 + $0xa8] sm:$0xff]  ;;  %v80_v62 = vld [vmem:[%s9550_s4 + $0xb0] sm:$0xff]  ;;  %v81_v63 = vld [vmem:[%s9550_s4 + $0xb8] sm:$0xff]  ;;  %vm963_vm11 = vcmask 1046534   ;;  %vm966_vm12 = vcmask 1047559  }
  0x1c   :  { %5973 = vmatpush1.bf16.msra.mxu0 %v5972_v44  ;;  %9651 = vst [vmem:[#allocation8_spill] sm:$0xff] %v6901_v54  ;;  %v5984_v61 = vpack.c.bf16 %v79_v60, %v78_v59  ;;  %v5987_v0 = vpack.c.bf16 %v81_v63, %v80_v62  ;;  %v82_v1 = vld [vmem:[%s9550_s4 + $0xc0] sm:$0xff]  ;;  %v83_v2 = vld [vmem:[%s9550_s4 + $0xc8] sm:$0x1]  ;;  %vm5991_vm5 = vmpackc.low %vm116_vm3, %vm6675_vm4 }
  0x1d   :  { %5786 = vmatmul.mubr.f32.vlgmr.msra.gmra.mrb[8].mxu1 %v9561_v47  ;;  %5974 = vmatprep.subr.bf16.mxu0 %v9559_v3  ;;  %v5990_v4 = vpack.c.bf16 %v83_v2, %v82_v1  ;;  %v42_v5 = vld [vmem:[%s9546_s0] sm:$0xff]  ;;  %v45_v6 = vld [vmem:[%s9546_s0 + $0x18] sm:$0xff]  ;;  %v44_v7 = vld [vmem:[%s9546_s0 + $0x10] sm:$0xff] }
  0x1e   :  { %6009 = vmatpush3.bf16.msra.mxu1 %v6884_v48  ;;  %5796 = vmatprep.mubr.msk.f32.mxu1 %vm6673_vm2, %v9561_v47  ;;  %v47_v8 = vld [vmem:[%s9546_s0 + $0x28] sm:$0xff]  ;;  %v46_v9 = vld [vmem:[%s9546_s0 + $0x20] sm:$0xff]  ;;  %v49_v10 = vld [vmem:[%s9546_s0 + $0x38] sm:$0xff] }
  0x1f   :  { %6010 = vmatprep.subr.bf16.mxu1 %v9559_v3  ;;  %v48_v11 = vld [vmem:[%s9546_s0 + $0x30] sm:$0xff]  ;;  %v51_v12 = vld [vmem:[%s9546_s0 + $0x48] sm:$0xff]  ;;  %v50_v13 = vld [vmem:[%s9546_s0 + $0x40] sm:$0xff] }
  0x20   :  { %5976 = vmatpush1.bf16.msra.mxu0 %v5975_v51  ;;  %v53_v14 = vld [vmem:[%s9546_s0 + $0x58] sm:$0xff]  ;;  %v52_v15 = vld [vmem:[%s9546_s0 + $0x50] sm:$0xff]  ;;  %v55_v16 = vld [vmem:[%s9546_s0 + $0x68] sm:$0xff] }
  0x21   :  { %5977 = vmatprep.subr.bf16.mxu0 %v9559_v3  ;;  %v54_v17 = vld [vmem:[%s9546_s0 + $0x60] sm:$0xff]  ;;  %v57_v18 = vld [vmem:[%s9546_s0 + $0x78] sm:$0xff]  ;;  %v56_v19 = vld [vmem:[%s9546_s0 + $0x70] sm:$0xff] }
  0x22   :  { %6012 = vmatpush3.bf16.msra.mxu1 %v6901_v54  ;;  %v7019_v27 = vld [vmem:[%s9555_s9] ss:$0 sm:$0xff] }
  0x23   :  { %6013 = vmatprep.subr.bf16.mxu1 %v9559_v3  ;;  %v7029_v32 = vld [vmem:[%s9553_s7] ss:$0 sm:$0xff] }
  0x24   :  { %5979 = vmatpush1.bf16.msra.mxu0 %v5978_v55  ;;  %v7048_v43 = vld [vmem:[%s9557_s11] ss:$0 sm:$0xff] }
  0x25   :  { %5797 = vmatmul.mubr.f32.vlgmr.msra.gmra.mrb[10].mxu1 %v9561_v47  ;;  %5980 = vmatprep.subr.bf16.mxu0 %v9559_v3 }
  0x26   :  { %6015 = vmatpush3.bf16.msra.mxu1 %v6804_v22  ;;  %5807 = vmatprep.mubr.msk.f32.mxu1 %vm6673_vm2, %v9561_v47 }
  0x27   :  { %6016 = vmatprep.subr.bf16.mxu1 %v9559_v3 }
  0x28   :  { %5982 = vmatpush1.bf16.msra.mxu0 %v5981_v58 }
  0x29   :  { %5983 = vmatprep.subr.bf16.mxu0 %v9559_v3 }
  0x2a   :  { %6018 = vmatpush3.bf16.msra.mxu1 %v6829_v30 }
  0x2b   :  { %6019 = vmatprep.subr.bf16.mxu1 %v9559_v3 }
  0x2c   :  { %5985 = vmatpush1.bf16.msra.mxu0 %v5984_v61 }
  0x2d   :  { %5986 = vmatprep.subr.bf16.mxu0 %v9559_v3 }
  0x30   :  { %5988 = vmatpush1.bf16.msra.mxu0 %v5987_v0 }
  0x31   :  { %5989 = vmatprep.subr.bf16.mxu0 %v9559_v3 }
  0x34   :  { %5992 = vmatpush1.bf16.msk.msra.mxu0 %vm5991_vm5, %v5990_v4 }
  0x35   :  { %6049 = vmatprep.subr.bf16.mxu0 %v9559_v3 }
  0x37   :  { %185 = vmatmul.mubr.f32.vlgmr.msra.gmra.mrb[0].mxu0 %v42_v5 }
  0x38   :  { %5622 = vmatprep.mubr.msk.f32.mxu0 %vm91_vm1, %v45_v6  ;;  %6051 = vmatpush3.bf16.msra.mxu0 %v6804_v22 }
  0x39   :  { %6052 = vmatprep.subr.bf16.mxu0 %v9559_v3 }
  0x3b   :  { %190 = vmatmul.mubr.f32.gmra.mrb[2].mxu0 %v44_v7 }
  0x3c   :  { %5623 = vmatprep.mubr.msk.f32.mxu0 %vm91_vm1, %v47_v8  ;;  %6054 = vmatpush3.bf16.msra.mxu0 %v6829_v30 }
  0x3d   :  { %6061 = vmatprep.subr.bf16.mxu0 %v9559_v3 }
  0x3f   :  { %195 = vmatmul.mubr.f32.gmra.mrb[4].mxu0 %v46_v9  ;;  %v5619_v9 = vld [vmem:[%s9551_s5] ss:$0 sm:$0xff]  ;;  %s6677_s5 = smov 96  }
  0x40   :  { %5624 = vmatprep.mubr.msk.f32.mxu0 %vm91_vm1, %v49_v10 }
  0x43   :  { %200 = vmatmul.mubr.f32.gmra.mrb[6].mxu0 %v48_v11 }
  0x44   :  { %5625 = vmatprep.mubr.msk.f32.mxu0 %vm91_vm1, %v51_v12 }
  0x47   :  { %205 = vmatmul.mubr.f32.gmra.mrb[8].mxu0 %v50_v13 }
  0x48   :  { %5626 = vmatprep.mubr.msk.f32.mxu0 %vm91_vm1, %v53_v14 }
  0x4b   :  { %210 = vmatmul.mubr.f32.gmra.mrb[10].mxu0 %v52_v15 }
  0x4c   :  { %5627 = vmatprep.mubr.msk.f32.mxu0 %vm91_vm1, %v55_v16 }
  0x4f   :  { %215 = vmatmul.mubr.f32.gmra.mrb[12].mxu0 %v54_v17 }
  0x50   :  { %5628 = vmatprep.mubr.msk.f32.mxu0 %vm91_vm1, %v57_v18 }
  0x53   :  { %220 = vmatmul.mubr.f32.gmra.mrb[14].mxu0 %v56_v19 }
  0x54   :  { %5873 = vmatprep.mubr.msk.f32.mxu0 %vm6673_vm2, %v9561_v47 }
  0xe0   :  { %v7004_v20 = vpop.f32.mrb[0].mxu1 }
  0xe1   :  { %v7006_v21 = vpop.f32.mrb[1].mxu1 }
  0xe4   :  { %v7008_v23 = vpop.f32.mrb[2].mxu1 }
  0xe5   :  { %v7010_v24 = vpop.f32.mrb[3].mxu1 }
  0xe8   :  { %v7012_v25 = vpop.f32.mrb[4].mxu1 }
  0xe9   :  { %v7014_v26 = vpop.f32.mrb[5].mxu1 }
  0xec   :  { %v5776_v28 = vpop.f32.mrb[6].mxu1 }
  0xed   :  { %v7022_v29 = vadd.f32 %v5776_v28, %v7019_v27  ;;  %v7024_v31 = vpop.f32.mrb[7].mxu1 }
  0xef   :  { %9652 = vst [vmem:[#allocation9_spill] sm:$0xff] %v7022_v29 }
  0xf0   :  { %v459_v33 = vpop.f32.mrb[8].mxu1 }
  0xf1   :  { %v7032_v34 = vadd.f32 %v7029_v32, %v459_v33  ;;  %v5787_v35 = vpop.f32.mrb[9].mxu1 }
  0xf3   :  { %519 = vrot.lane.b32.xlu1 %v7032_v34, %s6676_s23  ;;  %v464_v36 = vrot.slane %v7032_v34, 1  ;;  %v466_v37 = vrot.slane %v7032_v34, 3  ;;  %v465_v38 = vrot.slane %v7032_v34, 2  ;;  %v468_v40 = vrot.slane %v7032_v34, 5 }
  0xf4   :  { %v467_v42 = vrot.slane %v7032_v34, 4  ;;  %v470_v44 = vrot.slane %v7032_v34, 7  ;;  %v469_v46 = vrot.slane %v7032_v34, 6 }
  0xf5   :  { %521 = vrot.lane.b32.xlu0 %v464_v36, %s6676_s23 }
  0xf7   :  { %525 = vrot.lane.b32.xlu1 %v466_v37, %s6676_s23 }
  0xf8   :  { %v735_v39 = vpop.f32.mrb[10].mxu1 }
  0xf9   :  { %523 = vrot.lane.b32.xlu0 %v465_v38, %s6676_s23  ;;  %v5798_v41 = vpop.f32.mrb[11].mxu1  ;;  %v7053_v45 = vadd.f32 %v7048_v43, %v735_v39 }
  0xfb   :  { %529 = vrot.lane.b32.xlu1 %v468_v40, %s6676_s23  ;;  %v740_v49 = vrot.slane %v7053_v45, 1  ;;  %v741_v50 = vrot.slane %v7053_v45, 2  ;;  %v742_v51 = vrot.slane %v7053_v45, 3  ;;  %v744_v52 = vrot.slane %v7053_v45, 5 }
  0xfc   :  { %v743_v55 = vrot.slane %v7053_v45, 4  ;;  %v745_v57 = vrot.slane %v7053_v45, 6 }
  0xfd   :  { %527 = vrot.lane.b32.xlu0 %v467_v42, %s6676_s23 }
  0xff   :  { %533 = vrot.lane.b32.xlu1 %v470_v44, %s6676_s23 }
 0x101   :  { %531 = vrot.lane.b32.xlu0 %v469_v46, %s6676_s23 }
 0x103   :  { %795 = vrot.lane.b32.xlu1 %v7053_v45, %s6676_s23 }
 0x105   :  { %797 = vrot.lane.b32.xlu0 %v740_v49, %s6676_s23 }
 0x107   :  { %799 = vrot.lane.b32.xlu1 %v741_v50, %s6676_s23 }
 0x109   :  { %801 = vrot.lane.b32.xlu0 %v742_v51, %s6676_s23 }
 0x10a   :  { %v186_v53 = vpop.f32.mrb[0].mxu0 }
 0x10b   :  { %805 = vrot.lane.b32.xlu1 %v744_v52, %s6676_s23  ;;  %v188_v56 = vpop.f32.mrb[1].mxu0  ;;  %v7085_v10 = vadd.f32 %v5619_v9, %v186_v53 }
 0x10d   :  { %803 = vrot.lane.b32.xlu0 %v743_v55, %s6676_s23  ;;  %v479_v12 = vadd.f32 %v7032_v34, %v7085_v10 }
 0x10e   :  { %v191_v58 = vpop.f32.mrb[2].mxu0 }
 0x10f   :  { %807 = vrot.lane.b32.xlu1 %v745_v57, %s6676_s23  ;;  %v193_v59 = vpop.f32.mrb[3].mxu0  ;;  %v7087_v11 = vadd.f32 %v5619_v9, %v191_v58  ;;  %v487_v16 = vmul.f32 0.5, %v479_v12 }
 0x110   :  { %v7111_v59 = vadd.f32 %v7019_v27, %v7010_v24 }
 0x111   :  { %v480_v15 = vadd.f32 %v464_v36, %v7087_v11  ;;  %6122 = vtanh.f32 %v487_v16  ;;  %v7146_v16 = vadd.f32 %v7019_v27, %v7014_v26 }
 0x112   :  { %v196_v60 = vpop.f32.mrb[4].mxu0 }
 0x113   :  { %v198_v61 = vpop.f32.mrb[5].mxu0  ;;  %v7091_v13 = vadd.f32 %v5619_v9, %v196_v60  ;;  %v488_v19 = vmul.f32 0.5, %v480_v15  ;;  %9658 = vst [vmem:[#allocation15_spill] sm:$0xff] %v7146_v16 }
 0x115   :  { %v481_v17 = vadd.f32 %v465_v38, %v7091_v13  ;;  %6124 = vtanh.f32 %v488_v19 }
 0x116   :  { %v201_v62 = vpop.f32.mrb[6].mxu0 }
 0x117   :  { %v203_v63 = vpop.f32.mrb[7].mxu0  ;;  %v7093_v14 = vadd.f32 %v5619_v9, %v201_v62  ;;  %v489_v35 = vmul.f32 0.5, %v481_v17  ;;  %v757_v62 = vadd.f32 %v741_v50, %v7111_v59 }
 0x119   :  { %v482_v28 = vadd.f32 %v466_v37, %v7093_v14  ;;  %6126 = vtanh.f32 %v489_v35  ;;  %v759_v35 = vadd.f32 %v743_v55, %v7146_v16 }
 0x11a   :  { %v206_v0 = vpop.f32.mrb[8].mxu0 }
 0x11b   :  { %v208_v1 = vpop.f32.mrb[9].mxu0  ;;  %v7097_v18 = vadd.f32 %v5619_v9, %v206_v0  ;;  %v490_v34 = vmul.f32 0.5, %v482_v28  ;;  %v6123_v58 = vpop.eup %6122 }
 0x11c   :  { %v503_v63 = vadd.f32 1.0, %v6123_v58 }
 0x11d   :  { %9653 = vst [vmem:[#allocation10_spill] sm:$0xff] %v7097_v18  ;;  %v483_v41 = vadd.f32 %v467_v42, %v7097_v18  ;;  %6128 = vtanh.f32 %v490_v34 }
 0x11e   :  { %v211_v2 = vpop.f32.mrb[10].mxu0 }
 0x11f   :  { %v213_v4 = vpop.f32.mrb[11].mxu0  ;;  %v7100_v33 = vadd.f32 %v5619_v9, %v211_v2  ;;  %v491_v38 = vmul.f32 0.5, %v483_v41  ;;  %v6125_v42 = vpop.eup %6124 }
 0x120   :  { %v765_v4 = vmul.f32 0.5, %v757_v62 }
 0x121   :  { %v484_v36 = vadd.f32 %v468_v40, %v7100_v33  ;;  %6130 = vtanh.f32 %v491_v38  ;;  %v7116_v40 = vadd.f32 %v7019_v27, %v7006_v21  ;;  %v7127_v21 = vadd.f32 %v7004_v20, %v7019_v27 }
 0x122   :  { %v216_v5 = vpop.f32.mrb[12].mxu0 }
 0x123   :  { %v218_v6 = vpop.f32.mrb[13].mxu0  ;;  %v7106_v53 = vadd.f32 %v5619_v9, %v216_v5  ;;  %v492_v37 = vmul.f32 0.5, %v484_v36  ;;  %9654 = vst [vmem:[#allocation11_spill] sm:$0xff] %v7116_v40  ;;  %v755_v0 = vadd.f32 %v7053_v45, %v7116_v40  ;;  %v6127_v1 = vpop.eup %6126  ;;  %9656 = vst [vmem:[#allocation13_spill] sm:$0xff] %v7127_v21  ;;  %v7132_v5 = vmul.f32 0.5, %v503_v63 }
 0x124   :  { %v756_v6 = vadd.f32 %v740_v49, %v7127_v21  ;;  %v505_v15 = vadd.f32 1.0, %v6127_v1 }
 0x125   :  { %v485_v61 = vadd.f32 %v469_v46, %v7106_v53  ;;  %6132 = vtanh.f32 %v492_v37  ;;  %v504_v46 = vadd.f32 1.0, %v6125_v42 }
 0x126   :  { %v221_v7 = vpop.f32.mrb[14].mxu0  ;;  %v764_v28 = vmul.f32 0.5, %v756_v6  ;;  %v7159_v36 = vmul.f32 0.5, %v505_v15 }
 0x127   :  { %v223_v8 = vpop.f32.mrb[15].mxu0  ;;  %v7102_v39 = vadd.f32 %v5619_v9, %v221_v7  ;;  %v493_v24 = vmul.f32 0.5, %v485_v61  ;;  %v6129_v2 = vpop.eup %6128  ;;  %v7142_v9 = vmul.f32 0.5, %v504_v46  ;;  %v767_v61 = vmul.f32 0.5, %v759_v35 }
 0x128   :  { %v763_v8 = vmul.f32 0.5, %v755_v0  ;;  %v506_v12 = vadd.f32 1.0, %v6129_v2  ;;  %v746_v46 = vrot.slane %v7053_v45, 7 }
 0x129   :  { %v486_v56 = vadd.f32 %v470_v44, %v7102_v39  ;;  %v7121_v44 = vadd.f32 %v7008_v23, %v7019_v27  ;;  %v7136_v23 = vadd.f32 %v7012_v25, %v7019_v27 }
 0x12a   :  { %v7156_v41 = vmul.f32 0.5, %v506_v12 }
 0x12b   :  { %v494_v60 = vmul.f32 0.5, %v486_v56  ;;  %9655 = vst [vmem:[#allocation12_spill] sm:$0xff] %v7121_v44  ;;  %v758_v50 = vadd.f32 %v742_v51, %v7121_v44  ;;  %9657 = vst [vmem:[#allocation14_spill] sm:$0xff] %v7136_v23  ;;  %v6131_v51 = vpop.eup %6130  ;;  %v760_v49 = vadd.f32 %v744_v52, %v7136_v23  ;;  %v7163_v56 = vadd.f32 %v7019_v27, %v7024_v31 }
 0x12c   :  { %v507_v52 = vadd.f32 1.0, %v6131_v51 }
 0x12d   :  { %6134 = vtanh.f32 %v494_v60  ;;  %v766_v25 = vmul.f32 0.5, %v758_v50  ;;  %9659 = vst [vmem:[#allocation16_spill] sm:$0xff] %v7163_v56  ;;  %v768_v37 = vmul.f32 0.5, %v760_v49  ;;  %v761_v42 = vadd.f32 %v745_v57, %v7163_v56 }
 0x12e   :  { %6136 = vtanh.f32 %v493_v24  ;;  %v7172_v27 = vmul.f32 0.5, %v507_v52 }
 0x12f   :  { %6138 = vtanh.f32 %v765_v4  ;;  %v6133_v26 = vpop.eup %6132  ;;  %v769_v4 = vmul.f32 0.5, %v761_v42 }
 0x130   :  { %6140 = vtanh.f32 %v763_v8  ;;  %v508_v63 = vadd.f32 1.0, %v6133_v26 }
 0x131   :  { %6142 = vtanh.f32 %v766_v25 }
 0x132   :  { %6144 = vtanh.f32 %v764_v28  ;;  %v7176_v50 = vmul.f32 0.5, %v508_v63 }
 0x133   :  { %6146 = vtanh.f32 %v768_v37 }
 0x134   :  { %6148 = vtanh.f32 %v767_v61 }
 0x135   :  { %6150 = vtanh.f32 %v769_v4 }
 0x137   :  { %v6135_v38 = vpop.eup %6134 }
 0x138   :  { %v510_v31 = vadd.f32 1.0, %v6135_v38  ;;  %v6137_v24 = vpop.eup %6136 }
 0x139   :  { %v6139_v2 = vpop.eup %6138 }
 0x13a   :  { %v7178_v6 = vmul.f32 0.5, %v510_v31  ;;  %v6141_v8 = vpop.eup %6140  ;;  %v781_v45 = vadd.f32 1.0, %v6139_v2 }
 0x13b   :  { %v6143_v51 = vpop.eup %6142 }
 0x13c   :  { %v782_v26 = vadd.f32 1.0, %v6143_v51 }
 0x165   :  { %v520_v7 = vpop.permute.xlu1 %519 }
 0x166   :  { %v543_v20 = vmul.f32 %v520_v7, %v7132_v5  ;;  %v509_v7 = vadd.f32 1.0, %v6137_v24 }
 0x167   :  { %v522_v17 = vpop.permute.xlu0 %521 }
 0x168   :  { %v544_v19 = vmul.f32 %v522_v17, %v7142_v9  ;;  %559 = vrot.lane.b32.xlu1 %v543_v20, %s6676_s23  ;;  %v7184_v49 = vmul.f32 0.5, %v509_v7  ;;  %v779_v17 = vadd.f32 1.0, %v6141_v8 }
 0x169   :  { %v526_v34 = vpop.permute.xlu1 %525 }
 0x16a   :  { %561 = vrot.lane.b32.xlu0 %v544_v19, %s6676_s23  ;;  %v546_v55 = vmul.f32 %v526_v34, %v7156_v41  ;;  %v6145_v19 = vpop.eup %6144  ;;  %v7189_v34 = vmul.f32 0.5, %v781_v45  ;;  %v7191_v37 = vmul.f32 0.5, %v779_v17  ;;  %v762_v17 = vadd.f32 %v746_v46, %v7022_v29 }
 0x16b   :  { %v524_v58 = vpop.permute.xlu0 %523  ;;  %v6147_v52 = vpop.eup %6146 }
 0x16c   :  { %v545_v60 = vmul.f32 %v524_v58, %v7159_v36  ;;  %v780_v58 = vadd.f32 1.0, %v6145_v19  ;;  %v784_v63 = vadd.f32 1.0, %v6147_v52  ;;  %v770_v19 = vmul.f32 0.5, %v762_v17 }
 0x16d   :  { %v530_v62 = vpop.permute.xlu1 %529 }
 0x16e   :  { %565 = vrot.lane.b32.xlu0 %v546_v55, %s6676_s23  ;;  %563 = vrot.lane.b32.xlu1 %v545_v60, %s6676_s23  ;;  %v548_v12 = vmul.f32 %v530_v62, %v7176_v50  ;;  %v6149_v60 = vpop.eup %6148  ;;  %v7196_v62 = vmul.f32 0.5, %v782_v26  ;;  %v7199_v31 = vmul.f32 0.5, %v780_v58  ;;  %6152 = vtanh.f32 %v770_v19 }
 0x16f   :  { %v528_v0 = vpop.permute.xlu0 %527 }
 0x170   :  { %v547_v1 = vmul.f32 %v528_v0, %v7172_v27  ;;  %v783_v0 = vadd.f32 1.0, %v6149_v60 }
 0x171   :  { %v534_v57 = vpop.permute.xlu1 %533 }
 0x172   :  { %567 = vrot.lane.b32.xlu0 %v547_v1, %s6676_s23  ;;  %809 = vrot.lane.b32.xlu1 %v746_v46, %s6676_s23  ;;  %v550_v15 = vmul.f32 %v534_v57, %v7178_v6  ;;  %v6151_v1 = vpop.eup %6150  ;;  %v7204_v57 = vmul.f32 0.5, %v784_v63 }
 0x173   :  { %v532_v20 = vpop.permute.xlu0 %531 }
 0x174   :  { %v549_v35 = vmul.f32 %v532_v20, %v7184_v49  ;;  %v7208_v20 = vmul.f32 0.5, %v783_v0 }
 0x175   :  { %v796_v25 = vpop.permute.xlu1 %795 }
 0x176   :  { %569 = vrot.lane.b32.xlu0 %v548_v12, %s6676_s23  ;;  %573 = vrot.lane.b32.xlu1 %v550_v15, %s6676_s23  ;;  %v819_v42 = vmul.f32 %v796_v25, %v7191_v37  ;;  %v785_v12 = vadd.f32 1.0, %v6151_v1 }
 0x177   :  { %v798_v28 = vpop.permute.xlu0 %797 }
 0x178   :  { %v820_v4 = vmul.f32 %v798_v28, %v7199_v31  ;;  %v7213_v51 = vmul.f32 0.5, %v785_v12  ;;  %v6153_v26 = vpop.eup %6152 }
 0x179   :  { %v800_v38 = vpop.permute.xlu1 %799  ;;  %v786_v58 = vadd.f32 1.0, %v6153_v26 }
 0x17a   :  { %v821_v55 = vmul.f32 %v800_v38, %v7189_v34  ;;  %571 = vrot.lane.b32.xlu0 %v549_v35, %s6676_s23 }
 0x17b   :  { %v802_v61 = vpop.permute.xlu0 %801 }
 0x17c   :  { %839 = vrot.lane.b32.xlu1 %v821_v55, %s6676_s23  ;;  %v822_v24 = vmul.f32 %v802_v61, %v7196_v62 }
 0x17d   :  { %v806_v2 = vpop.permute.xlu1 %805 }
 0x17e   :  { %835 = vrot.lane.b32.xlu0 %v819_v42, %s6676_s23  ;;  %v824_v8 = vmul.f32 %v806_v2, %v7204_v57  ;;  %v7222_v42 = vmul.f32 0.5, %v786_v58 }
 0x17f   :  { %v804_v7 = vpop.permute.xlu0 %803 }
 0x180   :  { %841 = vrot.lane.b32.xlu1 %v822_v24, %s6676_s23  ;;  %v823_v15 = vmul.f32 %v804_v7, %v7208_v20 }
 0x181   :  { %v808_v45 = vpop.permute.xlu1 %807 }
 0x182   :  { %837 = vrot.lane.b32.xlu0 %v820_v4, %s6676_s23  ;;  %v825_v25 = vmul.f32 %v808_v45, %v7213_v51 }
 0x184   :  { %845 = vrot.lane.b32.xlu1 %v824_v8, %s6676_s23 }
 0x186   :  { %843 = vrot.lane.b32.xlu0 %v823_v15, %s6676_s23 }
 0x18a   :  { %847 = vrot.lane.b32.xlu0 %v825_v25, %s6676_s23 }
 0x1da   :  { %v560_v28 = vpop.permute.xlu1 %559 }
 0x1db   :  { %v583_v35 = vadd.f32 %v560_v28, %v7085_v10 }
 0x1dc   :  { %v562_v52 = vpop.permute.xlu0 %561 }
 0x1dd   :  { %6154 = vtanh.f32 %v583_v35  ;;  %v584_v38 = vadd.f32 %v562_v52, %v7087_v11 }
 0x1df   :  { %6156 = vtanh.f32 %v584_v38 }
 0x1e0   :  { %v566_v55 = vpop.permute.xlu0 %565  ;;  %v564_v60 = vpop.permute.xlu1 %563 }
 0x1e1   :  { %v585_v61 = vadd.f32 %v564_v60, %v7091_v13  ;;  %v586_v46 = vadd.f32 %v566_v55, %v7093_v14 }
 0x1e3   :  { %6158 = vtanh.f32 %v585_v61 }
 0x1e4   :  { %v568_v63 = vpop.permute.xlu0 %567  ;;  %v810_v24 = vpop.permute.xlu1 %809 }
 0x1e5   :  { %v587_v0 = vadd.f32 %v568_v63, %v7097_v18  ;;  %v826_v1 = vmul.f32 %v810_v24, %v7222_v42 }
 0x1e7   :  { %v6155_v2 = vpop.eup %6154  ;;  %6160 = vtanh.f32 %v587_v0  ;;  %849 = vrot.lane.b32.xlu1 %v826_v1, %s6676_s23 }
 0x1e8   :  { %6162 = vtanh.f32 %v586_v46  ;;  %v570_v4 = vpop.permute.xlu0 %569  ;;  %615 = vrot.lane.b32.xlu0 %v6155_v2, %s6677_s5  ;;  %v574_v8 = vpop.permute.xlu1 %573 }
 0x1e9   :  { %v588_v7 = vadd.f32 %v570_v4, %v7100_v33  ;;  %v6157_v12 = vpop.eup %6156  ;;  %v590_v15 = vadd.f32 %v574_v8, %v7102_v39 }
 0x1eb   :  { %6164 = vtanh.f32 %v588_v7 }
 0x1ec   :  { %v572_v45 = vpop.permute.xlu0 %571  ;;  %617 = vrot.lane.b32.xlu0 %v6157_v12, %s6677_s5 }
 0x1ed   :  { %v589_v25 = vadd.f32 %v572_v45, %v7106_v53  ;;  %v6159_v17 = vpop.eup %6158 }
 0x1ee   :  { %v840_v19 = vpop.permute.xlu1 %839  ;;  %619 = vrot.lane.b32.xlu1 %v6159_v17, %s6677_s5 }
 0x1ef   :  { %6166 = vtanh.f32 %v589_v25  ;;  %v861_v28 = vadd.f32 %v840_v19, %v7111_v59 }
 0x1f0   :  { %6168 = vtanh.f32 %v590_v15  ;;  %v836_v35 = vpop.permute.xlu0 %835 }
 0x1f1   :  { %v6161_v26 = vpop.eup %6160  ;;  %v859_v52 = vadd.f32 %v836_v35, %v7116_v40 }
 0x1f2   :  { %v6163_v38 = vpop.eup %6162  ;;  %623 = vrot.lane.b32.xlu0 %v6161_v26, %s6677_s5  ;;  %v842_v58 = vpop.permute.xlu1 %841 }
 0x1f3   :  { %6170 = vtanh.f32 %v859_v52  ;;  %621 = vrot.lane.b32.xlu1 %v6163_v38, %s6677_s5  ;;  %v862_v55 = vadd.f32 %v842_v58, %v7121_v44  ;;  %v600_v38 = vsub.f32 1.0, %v7142_v9 }
 0x1f4   :  { %6172 = vtanh.f32 %v861_v28  ;;  %v838_v60 = vpop.permute.xlu0 %837 }
 0x1f5   :  { %v6165_v61 = vpop.eup %6164  ;;  %v860_v46 = vadd.f32 %v838_v60, %v7127_v21 }
 0x1f6   :  { %v846_v63 = vpop.permute.xlu1 %845 }
 0x1f7   :  { %6174 = vtanh.f32 %v860_v46  ;;  %625 = vrot.lane.b32.xlu1 %v6165_v61, %s6677_s5  ;;  %v864_v24 = vadd.f32 %v846_v63, %v7136_v23  ;;  %v599_v61 = vsub.f32 1.0, %v7132_v5  ;;  %v601_v46 = vsub.f32 1.0, %v7159_v36 }
 0x1f8   :  { %6176 = vtanh.f32 %v862_v55  ;;  %v844_v0 = vpop.permute.xlu0 %843  ;;  %v648_v55 = vmul.f32 0.0, %v7142_v9 }
 0x1f9   :  { %v6167_v1 = vpop.eup %6166  ;;  %v863_v2 = vadd.f32 %v844_v0, %v7146_v16 }
 0x1fa   :  { %v6169_v4 = vpop.eup %6168  ;;  %627 = vrot.lane.b32.xlu0 %v6167_v1, %s6677_s5  ;;  %v649_v1 = vmul.f32 0.0, %v7159_v36  ;;  %v650_v36 = vmul.f32 0.0, %v7156_v41 }
 0x1fb   :  { %6178 = vtanh.f32 %v863_v2  ;;  %629 = vrot.lane.b32.xlu1 %v6169_v4, %s6677_s5  ;;  %v603_v4 = vsub.f32 1.0, %v7172_v27 }
 0x1fc   :  { %6180 = vtanh.f32 %v864_v24  ;;  %v848_v7 = vpop.permute.xlu0 %847 }
 0x1fd   :  { %v6171_v8 = vpop.eup %6170  ;;  %v865_v12 = vadd.f32 %v848_v7, %v7163_v56  ;;  %v647_v7 = vmul.f32 0.0, %v7132_v5 }
 0x1fe   :  { %v6173_v15 = vpop.eup %6172  ;;  %891 = vrot.lane.b32.xlu0 %v6171_v8, %s6677_s5 }
 0x1ff   :  { %6182 = vtanh.f32 %v865_v12  ;;  %895 = vrot.lane.b32.xlu1 %v6173_v15, %s6677_s5  ;;  %v602_v15 = vsub.f32 1.0, %v7156_v41 }
 0x201   :  { %v6175_v45 = vpop.eup %6174 }
 0x202   :  { %v6177_v25 = vpop.eup %6176  ;;  %893 = vrot.lane.b32.xlu0 %v6175_v45, %s6677_s5  ;;  %v651_v45 = vmul.f32 0.0, %v7172_v27 }
 0x203   :  { %897 = vrot.lane.b32.xlu1 %v6177_v25, %s6677_s5 }
 0x205   :  { %v6179_v17 = vpop.eup %6178 }
 0x206   :  { %v6181_v19 = vpop.eup %6180  ;;  %899 = vrot.lane.b32.xlu0 %v6179_v17, %s6677_s5 }
 0x207   :  { %901 = vrot.lane.b32.xlu1 %v6181_v19, %s6677_s5 }
 0x209   :  { %v6183_v28 = vpop.eup %6182 }
 0x20a   :  { %903 = vrot.lane.b32.xlu0 %v6183_v28, %s6677_s5 }
 0x259   :  { %v850_v35 = vpop.permute.xlu1 %849 }
 0x25a   :  { %v866_v26 = vadd.f32 %v850_v35, %v7022_v29  ;;  %v616_v52 = vpop.permute.xlu0 %615 }
 0x25b   :  { %v639_v0 = vmul.f32 %v616_v52, %v599_v61 }
 0x25c   :  { %6184 = vtanh.f32 %v866_v26 }
 0x25d   :  { %v7268_v28 = vadd.f32 %v647_v7, %v639_v0  ;;  %v653_v7 = vmul.f32 0.0, %v7184_v49 }
 0x25e   :  { %v618_v58 = vpop.permute.xlu0 %617 }
 0x25f   :  { %v640_v60 = vmul.f32 %v618_v58, %v600_v38  ;;  %v604_v38 = vsub.f32 1.0, %v7176_v50 }
 0x260   :  { %v620_v24 = vpop.permute.xlu1 %619 }
 0x261   :  { %v7258_v63 = vadd.f32 %v648_v55, %v640_v60  ;;  %v641_v2 = vmul.f32 %v620_v24, %v601_v46  ;;  %v652_v60 = vmul.f32 0.0, %v7176_v50  ;;  %v605_v24 = vsub.f32 1.0, %v7184_v49 }
 0x263   :  { %v9564_v8 = vrot.slane %v7258_v63, 7  ;;  %v7264_v12 = vadd.f32 %v649_v1, %v641_v2 }
 0x264   :  { %v624_v9 = vpop.permute.xlu0 %623 }
 0x265   :  { %v643_v25 = vmul.f32 %v624_v9, %v603_v4  ;;  %v622_v17 = vpop.permute.xlu1 %621  ;;  %v950_v5 = vrot.slane %v7264_v12, 6  ;;  %v949_v52 = vsel %vm948_vm6, %v9564_v8, %v7268_v28  ;;  %v606_v4 = vsub.f32 1.0, %v7178_v6 }
 0x266   :  { %v6185_v19 = vpop.eup %6184  ;;  %v642_v35 = vmul.f32 %v622_v17, %v602_v15 }
 0x267   :  { %v7272_v26 = vadd.f32 %v651_v45, %v643_v25  ;;  %905 = vrot.lane.b32.xlu1 %v6185_v19, %s6677_s5  ;;  %v952_v46 = vsel %vm951_vm7, %v950_v5, %v949_v52  ;;  %v654_v25 = vmul.f32 0.0, %v7178_v6 }
 0x268   :  { %v7279_v27 = vadd.f32 %v650_v36, %v642_v35 }
 0x269   :  { %v956_v58 = vrot.slane %v7272_v26, 4  ;;  %v626_v41 = vpop.permute.xlu1 %625 }
 0x26a   :  { %v953_v55 = vrot.slane %v7279_v27, 5  ;;  %v644_v61 = vmul.f32 %v626_v41, %v604_v38 }
 0x26c   :  { %v955_v0 = vsel %vm954_vm8, %v953_v55, %v952_v46  ;;  %v7288_v1 = vadd.f32 %v652_v60, %v644_v61  ;;  %v628_v2 = vpop.permute.xlu0 %627  ;;  %v876_v55 = vsub.f32 1.0, %v7199_v31  ;;  %v924_v61 = vmul.f32 0.0, %v7199_v31 }
 0x26d   :  { %v645_v9 = vmul.f32 %v628_v2, %v605_v24  ;;  %v630_v15 = vpop.permute.xlu1 %629  ;;  %v958_v45 = vsel %vm957_vm9, %v956_v58, %v955_v0  ;;  %v877_v46 = vsub.f32 1.0, %v7189_v34  ;;  %v875_v0 = vsub.f32 1.0, %v7191_v37 }
 0x26e   :  { %v959_v50 = vrot.slane %v7288_v1, 3  ;;  %v646_v17 = vmul.f32 %v630_v15, %v606_v4  ;;  %v878_v15 = vsub.f32 1.0, %v7196_v62 }
 0x26f   :  { %v7295_v19 = vadd.f32 %v653_v7, %v645_v9 }
 0x270   :  { %v7297_v36 = vadd.f32 %v654_v25, %v646_v17  ;;  %v961_v35 = vsel %vm960_vm10, %v959_v50, %v958_v45  ;;  %v892_v6 = vpop.permute.xlu0 %891  ;;  %v925_v45 = vmul.f32 0.0, %v7189_v34  ;;  %v879_v50 = vsub.f32 1.0, %v7208_v20 }
 0x271   :  { %v962_v5 = vrot.slane %v7295_v19, 2  ;;  %v896_v58 = vpop.permute.xlu1 %895  ;;  %v915_v9 = vmul.f32 %v892_v6, %v875_v0  ;;  %v923_v25 = vmul.f32 0.0, %v7191_v37  ;;  %v880_v6 = vsub.f32 1.0, %v7204_v57 }
 0x272   :  { %v965_v49 = vrot.slane %v7297_v36, 1  ;;  %v917_v7 = vmul.f32 %v896_v58, %v877_v46  ;;  %v927_v34 = vmul.f32 0.0, %v7208_v20  ;;  %v929_v20 = vmul.f32 0.0, %v7213_v51 }
 0x273   :  { %v964_v52 = vsel %vm963_vm11, %v962_v5, %v961_v35 }
 0x274   :  { %v967_v38 = vsel %vm966_vm12, %v965_v49, %v964_v52  ;;  %v894_v41 = vpop.permute.xlu0 %893  ;;  %v7316_v35 = vadd.f32 %v925_v45, %v917_v7  ;;  %v7318_v52 = vadd.f32 %v923_v25, %v915_v9 }
 0x275   :  { %968 = vrot.lane.b32.xlu0 %v967_v38, %s6677_s5  ;;  %v916_v60 = vmul.f32 %v894_v41, %v876_v55  ;;  %v898_v24 = vpop.permute.xlu1 %897  ;;  %v926_v38 = vmul.f32 0.0, %v7196_v62  ;;  %v881_v41 = vsub.f32 1.0, %v7213_v51 }
 0x276   :  { %v918_v17 = vmul.f32 %v898_v24, %v878_v15  ;;  %v928_v24 = vmul.f32 0.0, %v7204_v57  ;;  %v930_v57 = vmul.f32 0.0, %v7222_v42 }
 0x277   :  { %v7309_v2 = vadd.f32 %v924_v61, %v916_v60  ;;  %v1267_v61 = vrot.slane %v7316_v35, 6 }
 0x278   :  { %v900_v4 = vpop.permute.xlu0 %899  ;;  %v7328_v55 = vadd.f32 %v926_v38, %v918_v17 }
 0x279   :  { %v9563_v31 = vrot.slane %v7309_v2, 7  ;;  %v919_v5 = vmul.f32 %v900_v4, %v879_v50  ;;  %v902_v49 = vpop.permute.xlu1 %901  ;;  %v882_v50 = vsub.f32 1.0, %v7222_v42 }
 0x27a   :  { %v920_v60 = vmul.f32 %v902_v49, %v880_v6  ;;  %v1269_v4 = vrot.slane %v7328_v55, 5 }
 0x27b   :  { %v1266_v37 = vsel %vm948_vm6, %v9563_v31, %v7318_v52  ;;  %v7331_v46 = vadd.f32 %v927_v34, %v919_v5 }
 0x27c   :  { %v904_v58 = vpop.permute.xlu0 %903  ;;  %v1268_v0 = vsel %vm951_vm7, %v1267_v61, %v1266_v37  ;;  %v7337_v7 = vadd.f32 %v928_v24, %v920_v60 }
 0x27d   :  { %v921_v62 = vmul.f32 %v904_v58, %v881_v41  ;;  %v1271_v9 = vrot.slane %v7331_v46, 4  ;;  %v1270_v45 = vsel %vm954_vm8, %v1269_v4, %v1268_v0 }
 0x27e   :  { %v1273_v17 = vrot.slane %v7337_v7, 3 }
 0x27f   :  { %v7340_v15 = vadd.f32 %v929_v20, %v921_v62  ;;  %v1272_v49 = vsel %vm957_vm9, %v1271_v9, %v1270_v45 }
 0x280   :  { %v1274_v58 = vsel %vm960_vm10, %v1273_v17, %v1272_v49 }
 0x281   :  { %v1275_v51 = vrot.slane %v7340_v15, 2 }
 0x283   :  { %v1276_v34 = vsel %vm963_vm11, %v1275_v51, %v1274_v58 }
 0x2d9   :  { %v906_v25 = vpop.permute.xlu1 %905 }
 0x2da   :  { %v922_v5 = vmul.f32 %v906_v25, %v882_v50 }
 0x2dc   :  { %v7348_v38 = vadd.f32 %v930_v57, %v922_v5 }
 0x2de   :  { %v1277_v6 = vrot.slane %v7348_v38, 1 }
 0x2e0   :  { %v1278_v41 = vsel %vm966_vm12, %v1277_v6, %v1276_v34 }
 0x2e1   :  { %1279 = vrot.lane.b32.xlu1 %v1278_v41, %s6677_s5 }
 0x2e7   :  { %v969_v37 = vpop.permute.xlu0 %968 }
 0x2e8   :  { %5808 = vmatmul.mubr.msk.f32.vlgmr.msra.gmra.mrb[12].mxu1 %vm244_vm0, %v969_v37 }
 0x2e9   :  { %6021 = vmatpush3.bf16.msra.mxu1 %v6884_v48  ;;  %5818 = vmatprep.mubr.msk.f32.mxu1 %vm6673_vm2, %v9561_v47 }
 0x2ea   :  { %6022 = vmatprep.subr.bf16.mxu1 %v9559_v3 }
 0x2ed   :  { %6024 = vmatpush3.bf16.msra.mxu1 %v6901_v54 }
 0x2ee   :  { %6025 = vmatprep.subr.bf16.mxu1 %v9559_v3 }
 0x353   :  { %v1280_v42 = vpop.permute.xlu1 %1279 }
 0x354   :  { %5819 = vmatmul.mubr.msk.f32.vlgmr.msra.gmra.mrb[14].mxu1 %vm244_vm0, %v1280_v42 }
 0x355   :  { %6027 = vmatpush3.bf16.msra.mxu1 %v6804_v22  ;;  %5829 = vmatprep.mubr.msk.f32.mxu1 %vm6673_vm2, %v9561_v47 }
 0x356   :  { %6028 = vmatprep.subr.bf16.mxu1 %v9559_v3 }
 0x359   :  { %6030 = vmatpush3.bf16.msra.mxu1 %v6829_v30 }
 0x35a   :  { %6031 = vmatprep.subr.bf16.mxu1 %v9559_v3 }
 0x3bb   :  { %v1038_v60 = vpop.f32.mrb[12].mxu1 }
 0x3bc   :  { %v1039_v61 = vadd.f32 %v7029_v32, %v1038_v60  ;;  %v5809_v62 = vpop.f32.mrb[13].mxu1 }
 0x3be   :  { %1100 = vrot.lane.b32.xlu0 %v1039_v61, %s6676_s23  ;;  %v1044_v24 = vrot.slane %v1039_v61, 1  ;;  %v1043_v0 = vrot.slane %v1039_v61, 7  ;;  %v1045_v20 = vrot.slane %v1039_v61, 2  ;;  %v1046_v4 = vrot.slane %v1039_v61, 3 }
 0x3bf   :  { %v1047_v9 = vrot.slane %v1039_v61, 4  ;;  %v1048_v45 = vrot.slane %v1039_v61, 5  ;;  %v1049_v32 = vrot.slane %v1039_v61, 6  ;;  %v1059_v25 = vadd.f32 %v1039_v61, %v7087_v11 }
 0x3c0   :  { %1102 = vrot.lane.b32.xlu1 %v1044_v24, %s6676_s23  ;;  %v1058_v50 = vadd.f32 %v1043_v0, %v7085_v10  ;;  %v1061_v57 = vadd.f32 %v1045_v20, %v7093_v14  ;;  %v1060_v5 = vadd.f32 %v1044_v24, %v7091_v13  ;;  %v1062_v6 = vadd.f32 %v1046_v4, %v7097_v18 }
 0x3c1   :  { %v1067_v51 = vmul.f32 0.5, %v1059_v25  ;;  %v1063_v41 = vadd.f32 %v1047_v9, %v7100_v33  ;;  %v1065_v61 = vadd.f32 %v1049_v32, %v7102_v39 }
 0x3c2   :  { %1098 = vrot.lane.b32.xlu0 %v1043_v0, %s6676_s23  ;;  %v1066_v17 = vmul.f32 0.5, %v1058_v50  ;;  %v1069_v49 = vmul.f32 0.5, %v1061_v57  ;;  %v1068_v58 = vmul.f32 0.5, %v1060_v5  ;;  %v1070_v34 = vmul.f32 0.5, %v1062_v6 }
 0x3c3   :  { %v1071_v24 = vmul.f32 0.5, %v1063_v41  ;;  %v1064_v0 = vadd.f32 %v1048_v45, %v7106_v53 }
 0x3c4   :  { %1104 = vrot.lane.b32.xlu1 %v1045_v20, %s6676_s23  ;;  %6186 = vtanh.f32 %v1066_v17 }
 0x3c5   :  { %6188 = vtanh.f32 %v1067_v51  ;;  %v1072_v50 = vmul.f32 0.5, %v1064_v0 }
 0x3c6   :  { %1106 = vrot.lane.b32.xlu0 %v1046_v4, %s6676_s23  ;;  %6190 = vtanh.f32 %v1069_v49  ;;  %v1073_v4 = vmul.f32 0.5, %v1065_v61 }
 0x3c7   :  { %6192 = vtanh.f32 %v1068_v58 }
 0x3c8   :  { %1108 = vrot.lane.b32.xlu1 %v1047_v9, %s6676_s23  ;;  %6194 = vtanh.f32 %v1070_v34 }
 0x3c9   :  { %6196 = vtanh.f32 %v1071_v24 }
 0x3ca   :  { %1110 = vrot.lane.b32.xlu0 %v1048_v45, %s6676_s23  ;;  %6198 = vtanh.f32 %v1073_v4 }
 0x3cb   :  { %6200 = vtanh.f32 %v1072_v50 }
 0x3cc   :  { %1112 = vrot.lane.b32.xlu1 %v1049_v32, %s6676_s23 }
 0x3ce   :  { %v6187_v20 = vpop.eup %6186 }
 0x3cf   :  { %v6189_v32 = vpop.eup %6188  ;;  %v1082_v25 = vadd.f32 1.0, %v6187_v20 }
 0x3d0   :  { %v6191_v57 = vpop.eup %6190  ;;  %v1083_v5 = vadd.f32 1.0, %v6189_v32 }
 0x3d1   :  { %v6193_v6 = vpop.eup %6192  ;;  %v7408_v58 = vmul.f32 0.5, %v1082_v25 }
 0x3d2   :  { %v7413_v24 = vmul.f32 0.5, %v1083_v5  ;;  %v1084_v0 = vadd.f32 1.0, %v6193_v6 }
 0x3d4   :  { %v7420_v3 = vmul.f32 0.5, %v1084_v0 }
 0x427   :  { %v1349_v37 = vpop.f32.mrb[14].mxu1 }
 0x428   :  { %v7385_v42 = vadd.f32 %v7048_v43, %v1349_v37  ;;  %v5820_v60 = vpop.f32.mrb[15].mxu1  ;;  %v1085_v37 = vadd.f32 1.0, %v6191_v57 }
 0x429   :  { %v6195_v60 = vpop.eup %6194 }
 0x42a   :  { %1411 = vrot.lane.b32.xlu1 %v7385_v42, %s6676_s23  ;;  %v1354_v62 = vrot.slane %v7385_v42, 7  ;;  %v1355_v43 = vrot.slane %v7385_v42, 1  ;;  %v1356_v9 = vrot.slane %v7385_v42, 2  ;;  %v1358_v45 = vrot.slane %v7385_v42, 4  ;;  %v6197_v25 = vpop.eup %6196 }
 0x42b   :  { %v1357_v49 = vrot.slane %v7385_v42, 3  ;;  %v1359_v41 = vrot.slane %v7385_v42, 5  ;;  %v7417_v32 = vmul.f32 0.5, %v1085_v37  ;;  %v1086_v50 = vadd.f32 1.0, %v6195_v60  ;;  %v6199_v5 = vpop.eup %6198 }
 0x42c   :  { %1409 = vrot.lane.b32.xlu0 %v1354_v62, %s6676_s23  ;;  %v6201_v37 = vpop.eup %6200 }
 0x42d   :  { %v7425_v31 = vmul.f32 0.5, %v1086_v50 }
 0x42e   :  { %1413 = vrot.lane.b32.xlu1 %v1355_v43, %s6676_s23 }
 0x430   :  { %v1101_v17 = vpop.permute.xlu0 %1100  ;;  %1415 = vrot.lane.b32.xlu0 %v1356_v9, %s6676_s23 }
 0x431   :  { %v1123_v4 = vmul.f32 %v1101_v17, %v7413_v24  ;;  %v1087_v17 = vadd.f32 1.0, %v6197_v25 }
 0x432   :  { %1419 = vrot.lane.b32.xlu1 %v1358_v45, %s6676_s23  ;;  %v1103_v51 = vpop.permute.xlu1 %1102 }
 0x433   :  { %v1124_v47 = vmul.f32 %v1103_v51, %v7420_v3  ;;  %v7430_v0 = vmul.f32 0.5, %v1087_v17  ;;  %v1371_v17 = vadd.f32 %v1355_v43, %v7111_v59  ;;  %v1375_v43 = vadd.f32 %v1359_v41, %v7163_v56 }
 0x434   :  { %v1099_v34 = vpop.permute.xlu0 %1098  ;;  %1417 = vrot.lane.b32.xlu0 %v1357_v49, %s6676_s23 }
 0x435   :  { %v1122_v61 = vmul.f32 %v1099_v34, %v7408_v58 }
 0x436   :  { %1421 = vrot.lane.b32.xlu1 %v1359_v41, %s6676_s23  ;;  %v1105_v20 = vpop.permute.xlu1 %1104 }
 0x437   :  { %v1125_v57 = vmul.f32 %v1105_v20, %v7417_v32  ;;  %v1088_v20 = vadd.f32 1.0, %v6201_v37 }
 0x438   :  { %1138 = vrot.lane.b32.xlu0 %v1122_v61, %s6676_s23  ;;  %v1107_v34 = vpop.permute.xlu0 %1106  ;;  %v1089_v61 = vadd.f32 1.0, %v6199_v5 }
 0x439   :  { %v1126_v60 = vmul.f32 %v1107_v34, %v7425_v31  ;;  %v1370_v34 = vadd.f32 %v7385_v42, %v7127_v21 }
 0x43a   :  { %1140 = vrot.lane.b32.xlu1 %v1123_v4, %s6676_s23  ;;  %v1109_v6 = vpop.permute.xlu1 %1108  ;;  %v1360_v4 = vrot.slane %v7385_v42, 6  ;;  %v7435_v50 = vmul.f32 0.5, %v1089_v61  ;;  %v1372_v61 = vadd.f32 %v1356_v9, %v7121_v44 }
 0x43b   :  { %v1127_v51 = vmul.f32 %v1109_v6, %v7430_v0  ;;  %v1369_v6 = vadd.f32 %v1354_v62, %v7116_v40  ;;  %v1374_v62 = vadd.f32 %v1358_v45, %v7136_v23 }
 0x43c   :  { %1144 = vrot.lane.b32.xlu0 %v1125_v57, %s6676_s23  ;;  %v1111_v25 = vpop.permute.xlu0 %1110  ;;  %v7438_v57 = vmul.f32 0.5, %v1088_v20  ;;  %v1373_v20 = vadd.f32 %v1357_v49, %v7146_v16  ;;  %v1376_v49 = vadd.f32 %v1360_v4, %v7022_v29 }
 0x43d   :  { %v1377_v37 = vmul.f32 0.5, %v1369_v6 }
 0x43e   :  { %1142 = vrot.lane.b32.xlu1 %v1124_v47, %s6676_s23  ;;  %v1113_v8 = vpop.permute.xlu1 %1112  ;;  %v1128_v5 = vmul.f32 %v1111_v25, %v7438_v57  ;;  %v1381_v25 = vmul.f32 0.5, %v1373_v20  ;;  %v1384_v20 = vmul.f32 0.5, %v1376_v49 }
 0x43f   :  { %v1129_v47 = vmul.f32 %v1113_v8, %v7435_v50  ;;  %v1378_v8 = vmul.f32 0.5, %v1370_v34  ;;  %v1383_v34 = vmul.f32 0.5, %v1375_v43 }
 0x440   :  { %1146 = vrot.lane.b32.xlu0 %v1126_v60, %s6676_s23  ;;  %v1379_v60 = vmul.f32 0.5, %v1371_v17 }
 0x441   :  { %6202 = vtanh.f32 %v1378_v8 }
 0x442   :  { %1423 = vrot.lane.b32.xlu1 %v1360_v4, %s6676_s23  ;;  %6204 = vtanh.f32 %v1377_v37 }
 0x443   :  { %6206 = vtanh.f32 %v1379_v60 }
 0x444   :  { %1148 = vrot.lane.b32.xlu0 %v1127_v51, %s6676_s23  ;;  %v1380_v51 = vmul.f32 0.5, %v1372_v61 }
 0x446   :  { %1152 = vrot.lane.b32.xlu1 %v1129_v47, %s6676_s23  ;;  %6208 = vtanh.f32 %v1380_v51  ;;  %v1382_v47 = vmul.f32 0.5, %v1374_v62 }
 0x447   :  { %6210 = vtanh.f32 %v1381_v25 }
 0x448   :  { %1150 = vrot.lane.b32.xlu0 %v1128_v5, %s6676_s23  ;;  %6212 = vtanh.f32 %v1382_v47 }
 0x449   :  { %6214 = vtanh.f32 %v1383_v34 }
 0x44a   :  { %6216 = vtanh.f32 %v1384_v20 }
 0x44b   :  { %v6203_v5 = vpop.eup %6202 }
 0x44c   :  { %v6205_v9 = vpop.eup %6204  ;;  %v1394_v6 = vadd.f32 1.0, %v6203_v5 }
 0x44d   :  { %v6207_v17 = vpop.eup %6206  ;;  %v1393_v37 = vadd.f32 1.0, %v6205_v9 }
 0x44e   :  { %v7462_v8 = vmul.f32 0.5, %v1394_v6  ;;  %v1395_v42 = vadd.f32 1.0, %v6207_v17 }
 0x44f   :  { %v7465_v62 = vmul.f32 0.5, %v1393_v37 }
 0x450   :  { %v6209_v45 = vpop.eup %6208  ;;  %v7468_v25 = vmul.f32 0.5, %v1395_v42 }
 0x451   :  { %v6211_v61 = vpop.eup %6210  ;;  %v1396_v43 = vadd.f32 1.0, %v6209_v45 }
 0x452   :  { %v6213_v47 = vpop.eup %6212  ;;  %v1397_v9 = vadd.f32 1.0, %v6211_v61 }
 0x453   :  { %v6215_v6 = vpop.eup %6214  ;;  %v1398_v49 = vadd.f32 1.0, %v6213_v47 }
 0x454   :  { %v7477_v45 = vmul.f32 0.5, %v1397_v9 }
 0x455   :  { %v7479_v30 = vmul.f32 0.5, %v1398_v49 }
 0x49c   :  { %v1412_v60 = vpop.permute.xlu1 %1411 }
 0x49d   :  { %v1434_v41 = vmul.f32 %v1412_v60, %v7462_v8  ;;  %v7472_v60 = vmul.f32 0.5, %v1396_v43 }
 0x49e   :  { %v1410_v51 = vpop.permute.xlu0 %1409 }
 0x49f   :  { %1451 = vrot.lane.b32.xlu0 %v1434_v41, %s6676_s23  ;;  %v1433_v5 = vmul.f32 %v1410_v51, %v7465_v62  ;;  %v1399_v41 = vadd.f32 1.0, %v6215_v6 }
 0x4a0   :  { %v1414_v4 = vpop.permute.xlu1 %1413 }
 0x4a1   :  { %v1435_v34 = vmul.f32 %v1414_v4, %v7468_v25  ;;  %v7484_v4 = vmul.f32 0.5, %v1399_v41 }
 0x4a2   :  { %v1416_v17 = vpop.permute.xlu0 %1415 }
 0x4a3   :  { %1449 = vrot.lane.b32.xlu0 %v1433_v5, %s6676_s23  ;;  %1453 = vrot.lane.b32.xlu1 %v1435_v34, %s6676_s23  ;;  %v1436_v42 = vmul.f32 %v1416_v17, %v7472_v60  ;;  %v6217_v34 = vpop.eup %6216 }
 0x4a4   :  { %v1420_v37 = vpop.permute.xlu1 %1419 }
 0x4a5   :  { %v1438_v43 = vmul.f32 %v1420_v37, %v7479_v30  ;;  %v1400_v37 = vadd.f32 1.0, %v6217_v34 }
 0x4a6   :  { %v1418_v51 = vpop.permute.xlu0 %1417 }
 0x4a7   :  { %v1437_v61 = vmul.f32 %v1418_v51, %v7477_v45  ;;  %1455 = vrot.lane.b32.xlu1 %v1436_v42, %s6676_s23 }
 0x4a8   :  { %v1422_v20 = vpop.permute.xlu1 %1421 }
 0x4a9   :  { %1457 = vrot.lane.b32.xlu0 %v1437_v61, %s6676_s23  ;;  %v1439_v5 = vmul.f32 %v1422_v20, %v7484_v4 }
 0x4aa   :  { %v1139_v47 = vpop.permute.xlu0 %1138 }
 0x4ab   :  { %1459 = vrot.lane.b32.xlu1 %v1438_v43, %s6676_s23  ;;  %v1162_v17 = vadd.f32 %v1139_v47, %v7085_v10  ;;  %v7495_v43 = vmul.f32 0.5, %v1400_v37 }
 0x4ac   :  { %v1141_v9 = vpop.permute.xlu1 %1140 }
 0x4ad   :  { %v1163_v6 = vadd.f32 %v1141_v9, %v7087_v11  ;;  %1461 = vrot.lane.b32.xlu0 %v1439_v5, %s6676_s23 }
 0x4ae   :  { %v1145_v49 = vpop.permute.xlu0 %1144 }
 0x4af   :  { %6218 = vtanh.f32 %v1163_v6  ;;  %v1165_v51 = vadd.f32 %v1145_v49, %v7093_v14 }
 0x4b0   :  { %v1143_v42 = vpop.permute.xlu1 %1142  ;;  %6220 = vtanh.f32 %v1162_v17 }
 0x4b1   :  { %v1164_v41 = vadd.f32 %v1143_v42, %v7091_v13 }
 0x4b2   :  { %v1147_v61 = vpop.permute.xlu0 %1146 }
 0x4b3   :  { %6222 = vtanh.f32 %v1164_v41  ;;  %v1166_v20 = vadd.f32 %v1147_v61, %v7097_v18 }
 0x4b4   :  { %v1424_v9 = vpop.permute.xlu1 %1423  ;;  %6224 = vtanh.f32 %v1165_v51 }
 0x4b5   :  { %v1440_v5 = vmul.f32 %v1424_v9, %v7495_v43  ;;  %6226 = vtanh.f32 %v1166_v20 }
 0x4b6   :  { %v1149_v47 = vpop.permute.xlu0 %1148 }
 0x4b7   :  { %v1167_v34 = vadd.f32 %v1149_v47, %v7100_v33  ;;  %1463 = vrot.lane.b32.xlu1 %v1440_v5, %s6676_s23 }
 0x4b8   :  { %v1153_v6 = vpop.permute.xlu1 %1152 }
 0x4b9   :  { %v6219_v17 = vpop.eup %6218  ;;  %6228 = vtanh.f32 %v1167_v34  ;;  %v1169_v49 = vadd.f32 %v1153_v6, %v7102_v39 }
 0x4ba   :  { %v1151_v42 = vpop.permute.xlu0 %1150  ;;  %1196 = vrot.lane.b32.xlu0 %v6219_v17, %s6677_s5  ;;  %v6221_v41 = vpop.eup %6220 }
 0x4bb   :  { %v1168_v37 = vadd.f32 %v1151_v42, %v7106_v53 }
 0x4bd   :  { %v6223_v61 = vpop.eup %6222  ;;  %6230 = vtanh.f32 %v1168_v37 }
 0x4be   :  { %1194 = vrot.lane.b32.xlu0 %v6221_v41, %s6677_s5  ;;  %1198 = vrot.lane.b32.xlu1 %v6223_v61, %s6677_s5  ;;  %6232 = vtanh.f32 %v1169_v49  ;;  %v6225_v51 = vpop.eup %6224 }
 0x4bf   :  { %v6227_v20 = vpop.eup %6226 }
 0x4c2   :  { %1202 = vrot.lane.b32.xlu0 %v6227_v20, %s6677_s5  ;;  %1200 = vrot.lane.b32.xlu1 %v6225_v51, %s6677_s5 }
 0x4c3   :  { %v6229_v9 = vpop.eup %6228 }
 0x4c6   :  { %1204 = vrot.lane.b32.xlu1 %v6229_v9, %s6677_s5 }
 0x4c7   :  { %v6231_v5 = vpop.eup %6230 }
 0x4c8   :  { %1206 = vrot.lane.b32.xlu0 %v6231_v5, %s6677_s5  ;;  %v6233_v47 = vpop.eup %6232 }
 0x4ca   :  { %1208 = vrot.lane.b32.xlu1 %v6233_v47, %s6677_s5 }
 0x511   :  { %v1452_v34 = vpop.permute.xlu0 %1451 }
 0x512   :  { %v1474_v6 = vadd.f32 %v1452_v34, %v7127_v21 }
 0x514   :  { %6234 = vtanh.f32 %v1474_v6 }
 0x515   :  { %v1450_v17 = vpop.permute.xlu0 %1449  ;;  %v1454_v42 = vpop.permute.xlu1 %1453 }
 0x516   :  { %v1473_v49 = vadd.f32 %v1450_v17, %v7116_v40  ;;  %v1475_v37 = vadd.f32 %v1454_v42, %v7111_v59 }
 0x518   :  { %6236 = vtanh.f32 %v1473_v49 }
 0x519   :  { %6238 = vtanh.f32 %v1475_v37  ;;  %v1456_v41 = vpop.permute.xlu1 %1455 }
 0x51a   :  { %v1476_v61 = vadd.f32 %v1456_v41, %v7121_v44 }
 0x51b   :  { %v1458_v51 = vpop.permute.xlu0 %1457 }
 0x51c   :  { %6240 = vtanh.f32 %v1476_v61  ;;  %v1477_v20 = vadd.f32 %v1458_v51, %v7146_v16  ;;  %v9660_v16 = vrot.slane %v7258_v63, 7 }
 0x51d   :  { %v1460_v9 = vpop.permute.xlu1 %1459 }
 0x51e   :  { %v6235_v5 = vpop.eup %6234  ;;  %6242 = vtanh.f32 %v1477_v20  ;;  %v1478_v47 = vadd.f32 %v1460_v9, %v7136_v23  ;;  %v1182_v23 = vsub.f32 1.0, %v7425_v31  ;;  %v1242_v44 = vmul.f32 %v7413_v24, %v9660_v16 }
 0x51f   :  { %v1462_v34 = vpop.permute.xlu0 %1461  ;;  %1507 = vrot.lane.b32.xlu0 %v6235_v5, %s6677_s5  ;;  %v1226_v5 = vrot.slane %v7268_v28, 7 }
 0x520   :  { %6244 = vtanh.f32 %v1478_v47  ;;  %v1479_v6 = vadd.f32 %v1462_v34, %v7163_v56  ;;  %v1227_v47 = vrot.slane %v7264_v12, 7  ;;  %v1178_v34 = vsub.f32 1.0, %v7408_v58 }
 0x521   :  { %v1228_v56 = vrot.slane %v7279_v27, 7  ;;  %v1230_v27 = vrot.slane %v7288_v1, 7  ;;  %v1184_v1 = vsub.f32 1.0, %v7438_v57 }
 0x522   :  { %v6237_v17 = vpop.eup %6236  ;;  %6246 = vtanh.f32 %v1479_v6  ;;  %v1180_v6 = vsub.f32 1.0, %v7420_v3 }
 0x523   :  { %v6239_v42 = vpop.eup %6238  ;;  %1505 = vrot.lane.b32.xlu0 %v6237_v17, %s6677_s5  ;;  %v1179_v17 = vsub.f32 1.0, %v7413_v24  ;;  %v1183_v24 = vsub.f32 1.0, %v7430_v0 }
 0x524   :  { %1509 = vrot.lane.b32.xlu1 %v6239_v42, %s6677_s5 }
 0x526   :  { %v6241_v49 = vpop.eup %6240 }
 0x528   :  { %v6243_v37 = vpop.eup %6242  ;;  %1511 = vrot.lane.b32.xlu1 %v6241_v49, %s6677_s5 }
 0x529   :  { %1513 = vrot.lane.b32.xlu0 %v6243_v37, %s6677_s5  ;;  %v1464_v41 = vpop.permute.xlu1 %1463  ;;  %v1241_v37 = vmul.f32 %v1226_v5, %v7408_v58  ;;  %v1181_v5 = vsub.f32 1.0, %v7417_v32 }
 0x52a   :  { %v6245_v61 = vpop.eup %6244  ;;  %v1480_v51 = vadd.f32 %v1464_v41, %v7022_v29 }
 0x52c   :  { %v6247_v20 = vpop.eup %6246  ;;  %6248 = vtanh.f32 %v1480_v51  ;;  %1515 = vrot.lane.b32.xlu1 %v6245_v61, %s6677_s5  ;;  %v1197_v9 = vpop.permute.xlu0 %1196  ;;  %v1243_v61 = vmul.f32 %v1227_v47, %v7420_v3 }
 0x52d   :  { %1517 = vrot.lane.b32.xlu0 %v6247_v20, %s6677_s5  ;;  %v1219_v29 = vmul.f32 %v1197_v9, %v1179_v17  ;;  %v1229_v20 = vrot.slane %v7272_v26, 7  ;;  %v1244_v17 = vmul.f32 %v1228_v56, %v7417_v32  ;;  %v1246_v56 = vmul.f32 %v1230_v27, %v7430_v0 }
 0x52e   :  { %v1232_v32 = vrot.slane %v7297_v36, 7  ;;  %v1185_v0 = vsub.f32 1.0, %v7435_v50 }
 0x52f   :  { %v1245_v26 = vmul.f32 %v1229_v20, %v7425_v31 }
 0x530   :  { %v1195_v42 = vpop.permute.xlu0 %1194  ;;  %v1199_v49 = vpop.permute.xlu1 %1198 }
 0x531   :  { %v1218_v41 = vmul.f32 %v1195_v42, %v1178_v34  ;;  %v1220_v51 = vmul.f32 %v1199_v49, %v1180_v6  ;;  %v7545_v6 = vadd.f32 %v1242_v44, %v1219_v29  ;;  %v1231_v49 = vrot.slane %v7295_v19, 7 }
 0x533   :  { %v7533_v28 = vadd.f32 %v1241_v37, %v1218_v41  ;;  %v7535_v12 = vadd.f32 %v1243_v61, %v1220_v51  ;;  %v1247_v61 = vmul.f32 %v1231_v49, %v7438_v57 }
 0x534   :  { %v1203_v58 = vpop.permute.xlu0 %1202  ;;  %v1201_v3 = vpop.permute.xlu1 %1200 }
 0x535   :  { %v1576_v9 = vrot.slane %v7533_v28, 1  ;;  %v1222_v47 = vmul.f32 %v1203_v58, %v1182_v23  ;;  %v1221_v42 = vmul.f32 %v1201_v3, %v1181_v5  ;;  %v9578_v63 = vrot.slane %v7535_v12, 7 }
 0x536   :  { %v6249_v34 = vpop.eup %6248 }
 0x537   :  { %v7550_v16 = vadd.f32 %v1245_v26, %v1222_v47  ;;  %1519 = vrot.lane.b32.xlu1 %v6249_v34, %s6677_s5  ;;  %v1577_v23 = vsel %vm948_vm6, %v7545_v6, %v1576_v9  ;;  %v7557_v29 = vadd.f32 %v1244_v17, %v1221_v42  ;;  %v1248_v26 = vmul.f32 %v1232_v32, %v7435_v50 }
 0x538   :  { %v1205_v44 = vpop.permute.xlu1 %1204  ;;  %v1579_v51 = vsel %vm951_vm7, %v9578_v63, %v1577_v23  ;;  %v1537_v50 = vrot.slane %v7318_v52, 7  ;;  %v1491_v32 = vsub.f32 1.0, %v7468_v25  ;;  %v1539_v52 = vrot.slane %v7328_v55, 7 }
 0x539   :  { %v1223_v31 = vmul.f32 %v1205_v44, %v1183_v24  ;;  %v1582_v37 = vrot.slane %v7550_v16, 5  ;;  %v1580_v41 = vrot.slane %v7557_v29, 6  ;;  %v1489_v44 = vsub.f32 1.0, %v7465_v62 }
 0x53a   :  { %v1207_v19 = vpop.permute.xlu0 %1206 }
 0x53b   :  { %v7568_v20 = vadd.f32 %v1246_v56, %v1223_v31  ;;  %v1224_v58 = vmul.f32 %v1207_v19, %v1184_v1  ;;  %v1581_v5 = vsel %vm954_vm8, %v1580_v41, %v1579_v51  ;;  %v1538_v56 = vrot.slane %v7316_v35, 7 }
 0x53c   :  { %v1209_v3 = vpop.permute.xlu1 %1208  ;;  %v1583_v47 = vsel %vm957_vm9, %v1582_v37, %v1581_v5  ;;  %v1490_v31 = vsub.f32 1.0, %v7462_v8  ;;  %v1552_v37 = vmul.f32 %v1537_v50, %v7465_v62  ;;  %v9661_v5 = vrot.slane %v7309_v2, 7 }
 0x53d   :  { %v1584_v36 = vrot.slane %v7568_v20, 4  ;;  %v7573_v9 = vadd.f32 %v1247_v61, %v1224_v58  ;;  %v1225_v57 = vmul.f32 %v1209_v3, %v1185_v0  ;;  %v1554_v51 = vmul.f32 %v1538_v56, %v7468_v25 }
 0x53e   :  { %v1553_v35 = vmul.f32 %v7462_v8, %v9661_v5  ;;  %v1540_v62 = vrot.slane %v7331_v46, 7  ;;  %v1493_v25 = vsub.f32 1.0, %v7477_v45  ;;  %v1542_v50 = vrot.slane %v7340_v15, 7 }
 0x53f   :  { %v1586_v34 = vrot.slane %v7573_v9, 3  ;;  %v7578_v17 = vadd.f32 %v1248_v26, %v1225_v57  ;;  %v1585_v42 = vsel %vm960_vm10, %v1584_v36, %v1583_v47  ;;  %v1492_v36 = vsub.f32 1.0, %v7472_v60 }
 0x540   :  { %v1556_v8 = vmul.f32 %v1540_v62, %v7477_v45  ;;  %v1495_v56 = vsub.f32 1.0, %v7484_v4 }
 0x541   :  { %v1588_v27 = vrot.slane %v7578_v17, 2  ;;  %v1587_v24 = vsel %vm963_vm11, %v1586_v34, %v1585_v42  ;;  %v1555_v34 = vmul.f32 %v1539_v52, %v7472_v60 }
 0x543   :  { %v1589_v49 = vsel %vm966_vm12, %v1588_v27, %v1587_v24  ;;  %v1541_v24 = vrot.slane %v7337_v7, 7 }
 0x544   :  { %1590 = vrot.lane.b32.xlu0 %v1589_v49, %s6677_s5 }
 0x545   :  { %v1557_v45 = vmul.f32 %v1541_v24, %v7479_v30 }
 0x591   :  { %v1508_v23 = vpop.permute.xlu0 %1507 }
 0x592   :  { %v1530_v19 = vmul.f32 %v1508_v23, %v1490_v31  ;;  %v1494_v23 = vsub.f32 1.0, %v7479_v30 }
 0x594   :  { %v7604_v47 = vadd.f32 %v1553_v35, %v1530_v19 }
 0x595   :  { %v1506_v1 = vpop.permute.xlu0 %1505 }
 0x596   :  { %v1529_v41 = vmul.f32 %v1506_v1, %v1489_v44  ;;  %v1510_v61 = vpop.permute.xlu1 %1509 }
 0x597   :  { %v1531_v58 = vmul.f32 %v1510_v61, %v1491_v32 }
 0x598   :  { %v7592_v0 = vadd.f32 %v1552_v37, %v1529_v41  ;;  %v1558_v41 = vmul.f32 %v1542_v50, %v7484_v4  ;;  %v1496_v4 = vsub.f32 1.0, %v7495_v43 }
 0x599   :  { %v7598_v3 = vadd.f32 %v1554_v51, %v1531_v58 }
 0x59a   :  { %v1887_v26 = vrot.slane %v7592_v0, 1  ;;  %v1512_v57 = vpop.permute.xlu1 %1511 }
 0x59b   :  { %v1532_v55 = vmul.f32 %v1512_v57, %v1492_v36  ;;  %v1514_v42 = vpop.permute.xlu0 %1513  ;;  %v9577_v2 = vrot.slane %v7598_v3, 7  ;;  %v1543_v36 = vrot.slane %v7348_v38, 7  ;;  %v9662_v38 = vmov 0.0  }
 0x59c   :  { %v1533_v27 = vmul.f32 %v1514_v42, %v1493_v25  ;;  %v1888_v46 = vsel %vm948_vm6, %v7604_v47, %v1887_v26 }
 0x59d   :  { %v7612_v49 = vadd.f32 %v1555_v34, %v1532_v55  ;;  %v1890_v32 = vsel %vm951_vm7, %v9577_v2, %v1888_v46  ;;  %v1559_v26 = vmul.f32 %v1543_v36, %v7495_v43  ;;  %v7661_v46 = vld [vmem:[%s9553_s7] ss:$0 sm:$0xff] }
 0x59e   :  { %v7616_v44 = vadd.f32 %v1556_v8, %v1533_v27  ;;  %v1516_v60 = vpop.permute.xlu1 %1515  ;;  %v9663_v8 = vmov 0.0|0.0   ;;  %v9664_v27 = vld [vmem:[#allocation6_spill] sm:$0xff]  ;;  %9665 = vst [vmem:[#allocation17_spill] sm:$0xff] %v7661_v46 }
 0x59f   :  { %v1891_v31 = vrot.slane %v7612_v49, 6  ;;  %v1534_v1 = vmul.f32 %v1516_v60, %v1494_v23  ;;  %v1518_v7 = vpop.permute.xlu0 %1517 }
 0x5a0   :  { %v1893_v37 = vrot.slane %v7616_v44, 5  ;;  %v1535_v15 = vmul.f32 %v1518_v7, %v1495_v56 }
 0x5a1   :  { %v1892_v61 = vsel %vm954_vm8, %v1891_v31, %v1890_v32  ;;  %v7627_v19 = vadd.f32 %v1557_v45, %v1534_v1 }
 0x5a2   :  { %v7629_v51 = vadd.f32 %v1558_v41, %v1535_v15  ;;  %v1894_v58 = vsel %vm957_vm9, %v1893_v37, %v1892_v61 }
 0x5a3   :  { %v1895_v30 = vrot.slane %v7627_v19, 4 }
 0x5a4   :  { %v1897_v52 = vrot.slane %v7629_v51, 3 }
 0x5a5   :  { %v1896_v5 = vsel %vm960_vm10, %v1895_v30, %v1894_v58 }
 0x5a6   :  { %v1898_v35 = vsel %vm963_vm11, %v1897_v52, %v1896_v5 }
 0x5a9   :  { %v1520_v62 = vpop.permute.xlu1 %1519 }
 0x5aa   :  { %v1536_v57 = vmul.f32 %v1520_v62, %v1496_v4  ;;  %v7681_v62 = vld [vmem:[%s9557_s11] ss:$0 sm:$0xff] }
 0x5ab   :  { %9666 = vst [vmem:[#allocation18_spill] sm:$0xff] %v7681_v62 }
 0x5ac   :  { %v7639_v25 = vadd.f32 %v1559_v26, %v1536_v57 }
 0x5ae   :  { %v1899_v34 = vrot.slane %v7639_v25, 2 }
 0x5b0   :  { %v1900_v55 = vsel %vm966_vm12, %v1899_v34, %v1898_v35 }
 0x5b1   :  { %1901 = vrot.lane.b32.xlu1 %v1900_v55, %s6677_s5 }
 0x5b6   :  { %v1591_v42 = vpop.permute.xlu0 %1590 }
 0x5b7   :  { %5830 = vmatmul.mubr.msk.f32.vlgmr.msra.gmra.mrb[16].mxu1 %vm244_vm0, %v1591_v42 }
 0x5b8   :  { %6033 = vmatpush3.bf16.msra.mxu1 %v6884_v48  ;;  %5840 = vmatprep.mubr.msk.f32.mxu1 %vm6673_vm2, %v9662_v38 }
 0x5b9   :  { %6034 = vmatprep.subr.bf16.mxu1 %v9663_v8 }
 0x5bc   :  { %6036 = vmatpush3.bf16.msra.mxu1 %v6901_v54 }
 0x5bd   :  { %6037 = vmatprep.subr.bf16.mxu1 %v9663_v8 }
 0x623   :  { %v1902_v43 = vpop.permute.xlu1 %1901 }
 0x624   :  { %5841 = vmatmul.mubr.msk.f32.vlgmr.msra.gmra.mrb[18].mxu1 %vm244_vm0, %v1902_v43 }
 0x625   :  { %6039 = vmatpush3.bf16.msra.mxu1 %v6804_v22  ;;  %5851 = vmatprep.mubr.msk.f32.mxu1 %vm6673_vm2, %v9662_v38  ;;  %v9671_v22 = vld [vmem:[#allocation9_spill] sm:$0xff] }
 0x626   :  { %6040 = vmatprep.subr.bf16.mxu1 %v9663_v8 }
 0x629   :  { %6042 = vmatpush3.bf16.msra.mxu1 %v9664_v27 }
 0x62a   :  { %6043 = vmatprep.subr.bf16.mxu1 %v9663_v8 }
 0x68a   :  { %v1660_v24 = vpop.f32.mrb[16].mxu1 }
 0x68b   :  { %v1661_v23 = vadd.f32 %v7661_v46, %v1660_v24  ;;  %v5831_v50 = vpop.f32.mrb[17].mxu1 }
 0x68d   :  { %1724 = vrot.lane.b32.xlu1 %v1661_v23, %s6676_s23  ;;  %v1665_v60 = vrot.slane %v1661_v23, 6  ;;  %v1666_v56 = vrot.slane %v1661_v23, 7  ;;  %v1667_v31 = vrot.slane %v1661_v23, 1  ;;  %v1669_v45 = vrot.slane %v1661_v23, 3 }
 0x68e   :  { %v1668_v1 = vrot.slane %v1661_v23, 2  ;;  %v1671_v7 = vrot.slane %v1661_v23, 5  ;;  %v1670_v32 = vrot.slane %v1661_v23, 4  ;;  %v1682_v37 = vadd.f32 %v1661_v23, %v7091_v13 }
 0x68f   :  { %1720 = vrot.lane.b32.xlu0 %v1665_v60, %s6676_s23  ;;  %v1680_v41 = vadd.f32 %v1665_v60, %v7085_v10  ;;  %v1681_v15 = vadd.f32 %v1666_v56, %v7087_v11  ;;  %v1683_v52 = vadd.f32 %v1667_v31, %v7093_v14  ;;  %v1685_v35 = vadd.f32 %v1669_v45, %v7100_v33 }
 0x690   :  { %v1690_v61 = vmul.f32 0.5, %v1682_v37  ;;  %v1684_v58 = vadd.f32 %v1668_v1, %v7097_v18  ;;  %v1687_v34 = vadd.f32 %v1671_v7, %v7102_v39  ;;  %v1686_v43 = vadd.f32 %v1670_v32, %v7106_v53 }
 0x691   :  { %1722 = vrot.lane.b32.xlu1 %v1666_v56, %s6676_s23  ;;  %v1688_v30 = vmul.f32 0.5, %v1680_v41  ;;  %v1689_v5 = vmul.f32 0.5, %v1681_v15  ;;  %v1691_v55 = vmul.f32 0.5, %v1683_v52  ;;  %v1693_v24 = vmul.f32 0.5, %v1685_v35 }
 0x692   :  { %6250 = vtanh.f32 %v1690_v61  ;;  %v1692_v4 = vmul.f32 0.5, %v1684_v58  ;;  %v1695_v50 = vmul.f32 0.5, %v1687_v34 }
 0x693   :  { %1726 = vrot.lane.b32.xlu0 %v1667_v31, %s6676_s23  ;;  %6252 = vtanh.f32 %v1688_v30 }
 0x694   :  { %6254 = vtanh.f32 %v1689_v5 }
 0x695   :  { %1730 = vrot.lane.b32.xlu1 %v1669_v45, %s6676_s23  ;;  %6256 = vtanh.f32 %v1692_v4  ;;  %v1694_v45 = vmul.f32 0.5, %v1686_v43 }
 0x696   :  { %6258 = vtanh.f32 %v1691_v55 }
 0x697   :  { %1728 = vrot.lane.b32.xlu0 %v1668_v1, %s6676_s23  ;;  %6260 = vtanh.f32 %v1693_v24 }
 0x698   :  { %6262 = vtanh.f32 %v1695_v50 }
 0x699   :  { %1734 = vrot.lane.b32.xlu1 %v1671_v7, %s6676_s23  ;;  %6264 = vtanh.f32 %v1694_v45 }
 0x69b   :  { %1732 = vrot.lane.b32.xlu0 %v1670_v32, %s6676_s23 }
 0x69c   :  { %v6251_v56 = vpop.eup %6250 }
 0x69d   :  { %v6253_v7 = vpop.eup %6252  ;;  %v1706_v37 = vadd.f32 1.0, %v6251_v56 }
 0x69e   :  { %v6255_v15 = vpop.eup %6254  ;;  %v1704_v61 = vadd.f32 1.0, %v6253_v7 }
 0x69f   :  { %v6257_v30 = vpop.eup %6256  ;;  %v7709_v35 = vmul.f32 0.5, %v1706_v37 }
 0x6a0   :  { %v7716_v55 = vmul.f32 0.5, %v1704_v61  ;;  %v1708_v43 = vadd.f32 1.0, %v6257_v30 }
 0x6f7   :  { %v1971_v36 = vpop.f32.mrb[18].mxu1 }
 0x6f8   :  { %v7684_v26 = vadd.f32 %v7681_v62, %v1971_v36  ;;  %v5842_v57 = vpop.f32.mrb[19].mxu1  ;;  %v1705_v36 = vadd.f32 1.0, %v6255_v15 }
 0x6f9   :  { %v6259_v57 = vpop.eup %6258 }
 0x6fa   :  { %2035 = vrot.lane.b32.xlu1 %v7684_v26, %s6676_s23  ;;  %v1976_v42 = vrot.slane %v7684_v26, 6  ;;  %v1977_v23 = vrot.slane %v7684_v26, 7  ;;  %v1978_v60 = vrot.slane %v7684_v26, 1  ;;  %v1981_v1 = vrot.slane %v7684_v26, 4  ;;  %v6261_v24 = vpop.eup %6260 }
 0x6fb   :  { %v1979_v41 = vrot.slane %v7684_v26, 2  ;;  %v9579_v58 = vrot.slane %v7684_v26, 5  ;;  %v1980_v4 = vrot.slane %v7684_v26, 3  ;;  %v7720_v56 = vmul.f32 0.5, %v1705_v36  ;;  %v6263_v7 = vpop.eup %6262 }
 0x6fc   :  { %2031 = vrot.lane.b32.xlu0 %v1976_v42, %s6676_s23  ;;  %v1707_v45 = vadd.f32 1.0, %v6259_v57  ;;  %v1709_v63 = vadd.f32 1.0, %v6261_v24  ;;  %v6265_v61 = vpop.eup %6264  ;;  %v1711_v36 = vadd.f32 1.0, %v6263_v7 }
 0x6fe   :  { %2033 = vrot.lane.b32.xlu1 %v1977_v23, %s6676_s23  ;;  %v7727_v30 = vmul.f32 0.5, %v1707_v45  ;;  %v7736_v24 = vmul.f32 0.5, %v1711_v36 }
 0x6ff   :  { %v1725_v31 = vpop.permute.xlu1 %1724 }
 0x700   :  { %2037 = vrot.lane.b32.xlu0 %v1978_v60, %s6676_s23  ;;  %v1746_v34 = vmul.f32 %v1725_v31, %v7709_v35  ;;  %v7724_v31 = vmul.f32 0.5, %v1708_v43 }
 0x701   :  { %v1721_v32 = vpop.permute.xlu0 %1720 }
 0x702   :  { %2043 = vrot.lane.b32.xlu1 %v1981_v1, %s6676_s23  ;;  %v1744_v50 = vmul.f32 %v1721_v32, %v7716_v55 }
 0x703   :  { %v1723_v52 = vpop.permute.xlu1 %1722 }
 0x704   :  { %2039 = vrot.lane.b32.xlu0 %v1979_v41, %s6676_s23  ;;  %v1745_v2 = vmul.f32 %v1723_v52, %v7720_v56 }
 0x705   :  { %v1727_v5 = vpop.permute.xlu0 %1726 }
 0x706   :  { %2045 = vrot.lane.b32.xlu1 %v9579_v58, %s6676_s23  ;;  %v1747_v57 = vmul.f32 %v1727_v5, %v7727_v30  ;;  %v1710_v58 = vadd.f32 1.0, %v6265_v61  ;;  %v1991_v5 = vadd.f32 %v1976_v42, %v7116_v40 }
 0x707   :  { %v1731_v37 = vpop.permute.xlu1 %1730 }
 0x708   :  { %2041 = vrot.lane.b32.xlu0 %v1980_v4, %s6676_s23  ;;  %v7740_v7 = vmul.f32 0.5, %v1710_v58  ;;  %v1992_v58 = vadd.f32 %v1977_v23, %v7127_v21 }
 0x709   :  { %v1729_v15 = vpop.permute.xlu0 %1728 }
 0x70a   :  { %1764 = vrot.lane.b32.xlu1 %v1746_v34, %s6676_s23  ;;  %v1748_v32 = vmul.f32 %v1729_v15, %v7724_v31  ;;  %v7732_v34 = vmul.f32 0.5, %v1709_v63  ;;  %v9667_v15 = vld [vmem:[#allocation12_spill] sm:$0xff]  ;;  %v2000_v36 = vmul.f32 0.5, %v1992_v58 }
 0x70b   :  { %v1735_v52 = vpop.permute.xlu1 %1734  ;;  %v1994_v61 = vadd.f32 %v1978_v60, %v9667_v15  ;;  %v9672_v60 = vrot.slane %v7684_v26, 5 }
 0x70c   :  { %1760 = vrot.lane.b32.xlu0 %v1744_v50, %s6676_s23  ;;  %v1749_v43 = vmul.f32 %v1731_v37, %v7732_v34  ;;  %v1751_v45 = vmul.f32 %v1735_v52, %v7736_v24 }
 0x70d   :  { %v1733_v50 = vpop.permute.xlu0 %1732 }
 0x70e   :  { %1762 = vrot.lane.b32.xlu1 %v1745_v2, %s6676_s23  ;;  %v1750_v63 = vmul.f32 %v1733_v50, %v7740_v7  ;;  %v1993_v2 = vadd.f32 %v7684_v26, %v7111_v59  ;;  %v9669_v50 = vld [vmem:[#allocation16_spill] sm:$0xff] }
 0x70f   :  { %v1997_v42 = vadd.f32 %v1981_v1, %v9669_v50 }
 0x710   :  { %1768 = vrot.lane.b32.xlu0 %v1748_v32, %s6676_s23  ;;  %v2001_v37 = vmul.f32 0.5, %v1993_v2  ;;  %v1999_v32 = vmul.f32 0.5, %v1991_v5  ;;  %v1998_v5 = vadd.f32 %v9672_v60, %v9671_v22 }
 0x711   :  { %v2005_v2 = vmul.f32 0.5, %v1997_v42 }
 0x712   :  { %1766 = vrot.lane.b32.xlu1 %v1747_v57, %s6676_s23  ;;  %6266 = vtanh.f32 %v2001_v37  ;;  %v9668_v57 = vld [vmem:[#allocation15_spill] sm:$0xff] }
 0x713   :  { %v1995_v52 = vadd.f32 %v1979_v41, %v9668_v57  ;;  %6268 = vtanh.f32 %v1999_v32  ;;  %v2006_v32 = vmul.f32 0.5, %v1998_v5 }
 0x714   :  { %1770 = vrot.lane.b32.xlu0 %v1749_v43, %s6676_s23  ;;  %v2002_v43 = vmul.f32 0.5, %v1994_v61  ;;  %6270 = vtanh.f32 %v2000_v36 }
 0x715   :  { %v2003_v23 = vmul.f32 0.5, %v1995_v52 }
 0x716   :  { %1774 = vrot.lane.b32.xlu1 %v1751_v45, %s6676_s23  ;;  %v9670_v45 = vld [vmem:[#allocation14_spill] sm:$0xff]  ;;  %6272 = vtanh.f32 %v2002_v43 }
 0x717   :  { %6274 = vtanh.f32 %v2003_v23 }
 0x718   :  { %1772 = vrot.lane.b32.xlu0 %v1750_v63, %s6676_s23  ;;  %v1996_v63 = vadd.f32 %v1980_v4, %v9670_v45  ;;  %6276 = vtanh.f32 %v2005_v2 }
 0x71a   :  { %v2004_v58 = vmul.f32 0.5, %v1996_v63 }
 0x71c   :  { %v6267_v27 = vpop.eup %6266  ;;  %6278 = vtanh.f32 %v2004_v58 }
 0x71d   :  { %v6269_v41 = vpop.eup %6268  ;;  %v2017_v37 = vadd.f32 1.0, %v6267_v27  ;;  %6280 = vtanh.f32 %v2006_v32 }
 0x71e   :  { %v6271_v61 = vpop.eup %6270  ;;  %v2015_v36 = vadd.f32 1.0, %v6269_v41 }
 0x71f   :  { %v7765_v62 = vmul.f32 0.5, %v2017_v37  ;;  %v2016_v4 = vadd.f32 1.0, %v6271_v61 }
 0x720   :  { %v6273_v1 = vpop.eup %6272  ;;  %v7768_v42 = vmul.f32 0.5, %v2015_v36 }
 0x721   :  { %v2018_v26 = vadd.f32 1.0, %v6273_v1  ;;  %v6275_v23 = vpop.eup %6274  ;;  %v7772_v2 = vmul.f32 0.5, %v2016_v4 }
 0x722   :  { %v6277_v5 = vpop.eup %6276  ;;  %v2019_v37 = vadd.f32 1.0, %v6275_v23 }
 0x723   :  { %v7776_v41 = vmul.f32 0.5, %v2018_v26 }
 0x724   :  { %v7781_v4 = vmul.f32 0.5, %v2019_v37 }
 0x726   :  { %v6279_v61 = vpop.eup %6278 }
 0x76c   :  { %v2036_v52 = vpop.permute.xlu1 %2035 }
 0x76d   :  { %v2057_v43 = vmul.f32 %v2036_v52, %v7765_v62  ;;  %v2021_v52 = vadd.f32 1.0, %v6277_v5 }
 0x76e   :  { %v2032_v63 = vpop.permute.xlu0 %2031 }
 0x76f   :  { %v2055_v27 = vmul.f32 %v2032_v63, %v7768_v42  ;;  %2075 = vrot.lane.b32.xlu1 %v2057_v43, %s6676_s23  ;;  %v2020_v43 = vadd.f32 1.0, %v6279_v61  ;;  %v6281_v63 = vpop.eup %6280  ;;  %v7784_v46 = vmul.f32 0.5, %v2021_v52 }
 0x770   :  { %v2034_v60 = vpop.permute.xlu1 %2033  ;;  %v2022_v23 = vadd.f32 1.0, %v6281_v63 }
 0x771   :  { %v2056_v58 = vmul.f32 %v2034_v60, %v7772_v2  ;;  %2071 = vrot.lane.b32.xlu0 %v2055_v27, %s6676_s23 }
 0x772   :  { %v2038_v32 = vpop.permute.xlu0 %2037  ;;  %v7791_v54 = vmul.f32 0.5, %v2022_v23 }
 0x773   :  { %v2058_v36 = vmul.f32 %v2038_v32, %v7776_v41  ;;  %2073 = vrot.lane.b32.xlu1 %v2056_v58, %s6676_s23  ;;  %v7787_v32 = vmul.f32 0.5, %v2020_v43 }
 0x774   :  { %v2044_v1 = vpop.permute.xlu1 %2043 }
 0x775   :  { %2077 = vrot.lane.b32.xlu0 %v2058_v36, %s6676_s23  ;;  %v2061_v5 = vmul.f32 %v2044_v1, %v7784_v46 }
 0x776   :  { %v2040_v60 = vpop.permute.xlu0 %2039 }
 0x777   :  { %v2059_v27 = vmul.f32 %v2040_v60, %v7781_v4 }
 0x778   :  { %v2046_v26 = vpop.permute.xlu1 %2045 }
 0x779   :  { %2079 = vrot.lane.b32.xlu0 %v2059_v27, %s6676_s23  ;;  %v2062_v63 = vmul.f32 %v2046_v26, %v7791_v54 }
 0x77a   :  { %v2042_v58 = vpop.permute.xlu0 %2041 }
 0x77b   :  { %v2060_v36 = vmul.f32 %v2042_v58, %v7787_v32 }
 0x77c   :  { %v1765_v37 = vpop.permute.xlu1 %1764 }
 0x77d   :  { %v1786_v61 = vadd.f32 %v1765_v37, %v7091_v13  ;;  %2081 = vrot.lane.b32.xlu1 %v2060_v36, %s6676_s23  ;;  %2083 = vrot.lane.b32.xlu0 %v2061_v5, %s6676_s23 }
 0x77e   :  { %v1761_v52 = vpop.permute.xlu0 %1760 }
 0x77f   :  { %6282 = vtanh.f32 %v1786_v61  ;;  %v1784_v43 = vadd.f32 %v1761_v52, %v7085_v10 }
 0x780   :  { %v1763_v60 = vpop.permute.xlu1 %1762 }
 0x781   :  { %6284 = vtanh.f32 %v1784_v43  ;;  %v1785_v1 = vadd.f32 %v1763_v60, %v7087_v11  ;;  %2085 = vrot.lane.b32.xlu1 %v2062_v63, %s6676_s23 }
 0x782   :  { %v1769_v27 = vpop.permute.xlu0 %1768 }
 0x783   :  { %6286 = vtanh.f32 %v1785_v1  ;;  %v1788_v5 = vadd.f32 %v1769_v27, %v7097_v18 }
 0x784   :  { %v1767_v23 = vpop.permute.xlu1 %1766 }
 0x785   :  { %v1787_v58 = vadd.f32 %v1767_v23, %v7093_v14 }
 0x786   :  { %v1771_v36 = vpop.permute.xlu0 %1770 }
 0x787   :  { %6288 = vtanh.f32 %v1787_v58  ;;  %v1789_v26 = vadd.f32 %v1771_v36, %v7100_v33 }
 0x788   :  { %v1775_v37 = vpop.permute.xlu1 %1774 }
 0x789   :  { %v6283_v61 = vpop.eup %6282  ;;  %6290 = vtanh.f32 %v1789_v26  ;;  %v1791_v52 = vadd.f32 %v1775_v37, %v7102_v39 }
 0x78a   :  { %v1773_v43 = vpop.permute.xlu0 %1772  ;;  %1820 = vrot.lane.b32.xlu1 %v6283_v61, %s6677_s5  ;;  %6292 = vtanh.f32 %v1788_v5 }
 0x78b   :  { %v6285_v63 = vpop.eup %6284  ;;  %v1790_v60 = vadd.f32 %v1773_v43, %v7106_v53  ;;  %6294 = vtanh.f32 %v1791_v52 }
 0x78c   :  { %1816 = vrot.lane.b32.xlu0 %v6285_v63, %s6677_s5 }
 0x78d   :  { %v6287_v1 = vpop.eup %6286  ;;  %6296 = vtanh.f32 %v1790_v60 }
 0x78e   :  { %1818 = vrot.lane.b32.xlu1 %v6287_v1, %s6677_s5 }
 0x791   :  { %v6289_v27 = vpop.eup %6288 }
 0x792   :  { %1822 = vrot.lane.b32.xlu0 %v6289_v27, %s6677_s5 }
 0x793   :  { %v6291_v23 = vpop.eup %6290 }
 0x794   :  { %1826 = vrot.lane.b32.xlu1 %v6291_v23, %s6677_s5  ;;  %v6293_v58 = vpop.eup %6292 }
 0x795   :  { %v6295_v36 = vpop.eup %6294 }
 0x796   :  { %1824 = vrot.lane.b32.xlu0 %v6293_v58, %s6677_s5 }
 0x797   :  { %v6297_v5 = vpop.eup %6296 }
 0x798   :  { %1830 = vrot.lane.b32.xlu1 %v6295_v36, %s6677_s5 }
 0x79a   :  { %1828 = vrot.lane.b32.xlu0 %v6297_v5, %s6677_s5 }
 0x7e1   :  { %v2076_v26 = vpop.permute.xlu1 %2075 }
 0x7e2   :  { %v2097_v37 = vadd.f32 %v2076_v26, %v7111_v59 }
 0x7e3   :  { %v2072_v61 = vpop.permute.xlu0 %2071 }
 0x7e4   :  { %6298 = vtanh.f32 %v2097_v37  ;;  %v2095_v52 = vadd.f32 %v2072_v61, %v7116_v40 }
 0x7e5   :  { %v2074_v43 = vpop.permute.xlu1 %2073 }
 0x7e6   :  { %6300 = vtanh.f32 %v2095_v52  ;;  %v2096_v63 = vadd.f32 %v2074_v43, %v7127_v21 }
 0x7e7   :  { %v2078_v60 = vpop.permute.xlu0 %2077 }
 0x7e8   :  { %6302 = vtanh.f32 %v2096_v63  ;;  %v2098_v1 = vadd.f32 %v2078_v60, %v9667_v15 }
 0x7ea   :  { %6304 = vtanh.f32 %v2098_v1 }
 0x7eb   :  { %v2080_v27 = vpop.permute.xlu0 %2079 }
 0x7ec   :  { %v2099_v23 = vadd.f32 %v2080_v27, %v9668_v57 }
 0x7ee   :  { %v6299_v58 = vpop.eup %6298  ;;  %6306 = vtanh.f32 %v2099_v23 }
 0x7ef   :  { %v2084_v36 = vpop.permute.xlu0 %2083  ;;  %2131 = vrot.lane.b32.xlu1 %v6299_v58, %s6677_s5  ;;  %v2082_v5 = vpop.permute.xlu1 %2081 }
 0x7f0   :  { %v6301_v26 = vpop.eup %6300  ;;  %v2101_v37 = vadd.f32 %v2084_v36, %v9669_v50  ;;  %v2100_v61 = vadd.f32 %v2082_v5, %v9670_v45  ;;  %v1848_v36 = vrot.slane %v7533_v28, 7  ;;  %v1800_v5 = vsub.f32 1.0, %v7716_v55 }
 0x7f1   :  { %2127 = vrot.lane.b32.xlu0 %v6301_v26, %s6677_s5 }
 0x7f2   :  { %v6303_v52 = vpop.eup %6302  ;;  %6308 = vtanh.f32 %v2101_v37  ;;  %v1849_v37 = vrot.slane %v7545_v6, 7  ;;  %v1803_v6 = vsub.f32 1.0, %v7727_v30 }
 0x7f3   :  { %6310 = vtanh.f32 %v2100_v61  ;;  %2129 = vrot.lane.b32.xlu1 %v6303_v52, %s6677_s5  ;;  %v2086_v43 = vpop.permute.xlu1 %2085  ;;  %v1863_v61 = vmul.f32 %v1848_v36, %v7716_v55  ;;  %v1802_v55 = vsub.f32 1.0, %v7709_v35 }
 0x7f4   :  { %v6305_v63 = vpop.eup %6304  ;;  %v2102_v60 = vadd.f32 %v2086_v43, %v9671_v22  ;;  %v1801_v43 = vsub.f32 1.0, %v7720_v56  ;;  %v1864_v28 = vmul.f32 %v1849_v37, %v7720_v56  ;;  %v1805_v56 = vsub.f32 1.0, %v7732_v34 }
 0x7f5   :  { %2133 = vrot.lane.b32.xlu0 %v6305_v63, %s6677_s5  ;;  %v1852_v37 = vrot.slane %v7568_v20, 7  ;;  %v1854_v20 = vrot.slane %v7578_v17, 7 }
 0x7f6   :  { %6312 = vtanh.f32 %v2102_v60 }
 0x7f8   :  { %v6307_v1 = vpop.eup %6306 }
 0x7f9   :  { %2135 = vrot.lane.b32.xlu0 %v6307_v1, %s6677_s5 }
 0x7fc   :  { %v6309_v27 = vpop.eup %6308  ;;  %v1821_v23 = vpop.permute.xlu1 %1820 }
 0x7fd   :  { %v6311_v58 = vpop.eup %6310  ;;  %2139 = vrot.lane.b32.xlu0 %v6309_v27, %s6677_s5  ;;  %v1850_v27 = vrot.slane %v7557_v29, 7  ;;  %v1851_v29 = vrot.slane %v7550_v16, 7 }
 0x7fe   :  { %2137 = vrot.lane.b32.xlu1 %v6311_v58, %s6677_s5  ;;  %v1817_v26 = vpop.permute.xlu0 %1816 }
 0x7ff   :  { %v1840_v52 = vmul.f32 %v1817_v26, %v1800_v5  ;;  %v1866_v36 = vmul.f32 %v1850_v27, %v7727_v30  ;;  %v1868_v27 = vmul.f32 %v1852_v37, %v7732_v34  ;;  %v1867_v16 = vmul.f32 %v1851_v29, %v7724_v31 }
 0x800   :  { %v6313_v63 = vpop.eup %6312  ;;  %v1819_v60 = vpop.permute.xlu1 %1818 }
 0x801   :  { %v7833_v1 = vadd.f32 %v1863_v61, %v1840_v52  ;;  %v1841_v50 = vmul.f32 %v1819_v60, %v1801_v43  ;;  %v1804_v43 = vsub.f32 1.0, %v7724_v31 }
 0x802   :  { %2141 = vrot.lane.b32.xlu1 %v6313_v63, %s6677_s5  ;;  %v1842_v63 = vmul.f32 %v1821_v23, %v1802_v55  ;;  %v1807_v55 = vsub.f32 1.0, %v7736_v24 }
 0x803   :  { %9673 = vst [vmem:[#allocation19_spill] sm:$0xff] %v7833_v1  ;;  %v7838_v58 = vadd.f32 %v1864_v28, %v1841_v50  ;;  %v2198_v26 = vrot.slane %v7833_v1, 2 }
 0x804   :  { %v1823_v5 = vpop.permute.xlu0 %1822 }
 0x805   :  { %9674 = vst [vmem:[#allocation20_spill] sm:$0xff] %v7838_v58  ;;  %v2199_v61 = vrot.slane %v7838_v58, 1  ;;  %v1843_v52 = vmul.f32 %v1823_v5, %v1803_v6  ;;  %v9675_v6 = vrot.slane %v7535_v12, 7  ;;  %v1806_v12 = vsub.f32 1.0, %v7740_v7 }
 0x806   :  { %v1827_v50 = vpop.permute.xlu1 %1826 }
 0x807   :  { %v2200_v60 = vsel %vm948_vm6, %v2199_v61, %v2198_v26  ;;  %v7850_v28 = vadd.f32 %v1866_v36, %v1843_v52  ;;  %v1845_v30 = vmul.f32 %v1827_v50, %v1805_v56  ;;  %v1865_v5 = vmul.f32 %v7709_v35, %v9675_v6 }
 0x808   :  { %v1825_v1 = vpop.permute.xlu0 %1824  ;;  %v1853_v26 = vrot.slane %v7573_v9, 7  ;;  %v1870_v35 = vmul.f32 %v1854_v20, %v7736_v24  ;;  %v2159_v6 = vrot.slane %v7592_v0, 7  ;;  %v2160_v20 = vrot.slane %v7604_v47, 7 }
 0x809   :  { %v1844_v58 = vmul.f32 %v1825_v1, %v1804_v43  ;;  %v9591_v22 = vrot.slane %v7850_v28, 7  ;;  %v7859_v23 = vadd.f32 %v1868_v27, %v1845_v30  ;;  %v7863_v34 = vadd.f32 %v1865_v5, %v1842_v63 }
 0x80a   :  { %v1831_v36 = vpop.permute.xlu1 %1830  ;;  %v1869_v56 = vmul.f32 %v1853_v26, %v7740_v7  ;;  %v2111_v5 = vsub.f32 1.0, %v7768_v42  ;;  %v2112_v26 = vsub.f32 1.0, %v7772_v2 }
 0x80b   :  { %v7865_v61 = vadd.f32 %v1867_v16, %v1844_v58  ;;  %v1847_v31 = vmul.f32 %v1831_v36, %v1807_v55  ;;  %v2201_v17 = vsel %vm951_vm7, %v7863_v34, %v2200_v60  ;;  %v2206_v58 = vrot.slane %v7859_v23, 5 }
 0x80c   :  { %v1829_v1 = vpop.permute.xlu0 %1828  ;;  %v2203_v9 = vsel %vm954_vm8, %v9591_v22, %v2201_v17  ;;  %v2174_v55 = vmul.f32 %v2159_v6, %v7768_v42  ;;  %v2175_v17 = vmul.f32 %v2160_v20, %v7772_v2  ;;  %v2163_v20 = vrot.slane %v7627_v19, 7  ;;  %v9683_v22 = vld [vmem:[#allocation20_spill] sm:$0xff] }
 0x80d   :  { %v2204_v52 = vrot.slane %v7865_v61, 6  ;;  %v1846_v29 = vmul.f32 %v1829_v1, %v1806_v12  ;;  %v7877_v37 = vadd.f32 %v1870_v35, %v1847_v31  ;;  %v2161_v12 = vrot.slane %v7612_v49, 7 }
 0x80e   :  { %v2113_v35 = vsub.f32 1.0, %v7765_v62  ;;  %v9676_v49 = vrot.slane %v7598_v3, 7 }
 0x80f   :  { %v7879_v50 = vadd.f32 %v1869_v56, %v1846_v29  ;;  %v2205_v24 = vsel %vm957_vm9, %v2204_v52, %v2203_v9  ;;  %v2210_v60 = vrot.slane %v7877_v37, 3  ;;  %v2114_v52 = vsub.f32 1.0, %v7776_v41 }
 0x810   :  { %v2207_v43 = vsel %vm960_vm10, %v2206_v58, %v2205_v24  ;;  %v2177_v42 = vmul.f32 %v2161_v12, %v7776_v41  ;;  %v2162_v58 = vrot.slane %v7616_v44, 7  ;;  %v2176_v24 = vmul.f32 %v7765_v62, %v9676_v49 }
 0x811   :  { %v2208_v63 = vrot.slane %v7879_v50, 4  ;;  %v2164_v62 = vrot.slane %v7629_v51, 7 }
 0x813   :  { %v2209_v7 = vsel %vm963_vm11, %v2208_v63, %v2207_v43 }
 0x814   :  { %v2211_v30 = vsel %vm966_vm12, %v2210_v60, %v2209_v7  ;;  %v2115_v60 = vsub.f32 1.0, %v7781_v4 }
 0x815   :  { %2212 = vrot.lane.b32.xlu0 %v2211_v30, %s6677_s5 }
 0x861   :  { %v2132_v27 = vpop.permute.xlu1 %2131 }
 0x862   :  { %v2153_v29 = vmul.f32 %v2132_v27, %v2113_v35  ;;  %v2178_v27 = vmul.f32 %v2162_v58, %v7781_v4  ;;  %v2180_v4 = vmul.f32 %v2164_v62, %v7784_v46 }
 0x863   :  { %v2128_v16 = vpop.permute.xlu0 %2127 }
 0x864   :  { %v2151_v36 = vmul.f32 %v2128_v16, %v2111_v5  ;;  %v7911_v30 = vadd.f32 %v2176_v24, %v2153_v29  ;;  %v2117_v16 = vsub.f32 1.0, %v7784_v46  ;;  %v2118_v29 = vsub.f32 1.0, %v7791_v54 }
 0x865   :  { %v2130_v31 = vpop.permute.xlu1 %2129 }
 0x866   :  { %v7895_v1 = vadd.f32 %v2174_v55, %v2151_v36  ;;  %v2152_v0 = vmul.f32 %v2130_v31, %v2112_v26  ;;  %v2116_v36 = vsub.f32 1.0, %v7787_v32  ;;  %v2179_v31 = vmul.f32 %v2163_v20, %v7787_v32 }
 0x867   :  { %v2134_v56 = vpop.permute.xlu0 %2133 }
 0x868   :  { %v7899_v47 = vadd.f32 %v2175_v17, %v2152_v0  ;;  %v2154_v9 = vmul.f32 %v2134_v56, %v2114_v52  ;;  %v2509_v43 = vrot.slane %v7895_v1, 2  ;;  %v2165_v52 = vrot.slane %v7639_v25, 7 }
 0x86a   :  { %v2510_v2 = vrot.slane %v7899_v47, 1  ;;  %v7908_v63 = vadd.f32 %v2177_v42, %v2154_v9  ;;  %v2181_v58 = vmul.f32 %v2165_v52, %v7791_v54  ;;  %v9677_v54 = vld [vmem:[#allocation8_spill] sm:$0xff] }
 0x86b   :  { %v2136_v7 = vpop.permute.xlu0 %2135 }
 0x86c   :  { %v2511_v41 = vsel %vm948_vm6, %v2510_v2, %v2509_v43  ;;  %v2155_v44 = vmul.f32 %v2136_v7, %v2115_v60  ;;  %v9590_v3 = vrot.slane %v7908_v63, 7 }
 0x86d   :  { %v2512_v6 = vsel %vm951_vm7, %v7911_v30, %v2511_v41 }
 0x86e   :  { %v7919_v5 = vadd.f32 %v2178_v27, %v2155_v44  ;;  %v2514_v51 = vsel %vm954_vm8, %v9590_v3, %v2512_v6  ;;  %v9678_v27 = vld [vmem:[#allocation17_spill] sm:$0xff] }
 0x86f   :  { %v2140_v55 = vpop.permute.xlu0 %2139 }
 0x870   :  { %v2515_v26 = vrot.slane %v7919_v5, 6  ;;  %v2157_v12 = vmul.f32 %v2140_v55, %v2117_v16  ;;  %v2138_v35 = vpop.permute.xlu1 %2137 }
 0x871   :  { %v2156_v17 = vmul.f32 %v2138_v35, %v2116_v36 }
 0x872   :  { %v7930_v0 = vadd.f32 %v2180_v4, %v2157_v12  ;;  %v2516_v19 = vsel %vm957_vm9, %v2515_v26, %v2514_v51 }
 0x873   :  { %v7934_v56 = vadd.f32 %v2179_v31, %v2156_v17 }
 0x874   :  { %v2519_v46 = vrot.slane %v7930_v0, 4  ;;  %v2142_v42 = vpop.permute.xlu1 %2141 }
 0x875   :  { %v2517_v9 = vrot.slane %v7934_v56, 5  ;;  %v2158_v49 = vmul.f32 %v2142_v42, %v2118_v29 }
 0x877   :  { %v7940_v32 = vadd.f32 %v2181_v58, %v2158_v49  ;;  %v2518_v24 = vsel %vm960_vm10, %v2517_v9, %v2516_v19  ;;  %v9679_v58 = vld [vmem:[#allocation18_spill] sm:$0xff] }
 0x878   :  { %v2520_v43 = vsel %vm963_vm11, %v2519_v46, %v2518_v24 }
 0x879   :  { %v2521_v25 = vrot.slane %v7940_v32, 3 }
 0x87b   :  { %v2522_v2 = vsel %vm966_vm12, %v2521_v25, %v2520_v43 }
 0x87c   :  { %2523 = vrot.lane.b32.xlu1 %v2522_v2, %s6677_s5 }
 0x887   :  { %v2213_v60 = vpop.permute.xlu0 %2212 }
 0x888   :  { %5852 = vmatmul.mubr.msk.f32.vlgmr.msra.gmra.mrb[20].mxu1 %vm244_vm0, %v2213_v60 }
 0x889   :  { %6045 = vmatpush3.bf16.msra.mxu1 %v6884_v48  ;;  %5862 = vmatprep.mubr.msk.f32.mxu1 %vm6673_vm2, %v9662_v38 }
 0x88a   :  { %6046 = vmatprep.subr.bf16.mxu1 %v9663_v8 }
 0x88d   :  { %6048 = vmatpush3.bf16.msra.mxu1 %v9677_v54 }
 0x88e   :  { %6055 = vmatprep.subr.bf16.mxu1 %v9663_v8 }
 0x8ee   :  { %v2524_v7 = vpop.permute.xlu1 %2523 }
 0x8ef   :  { %5863 = vmatmul.mubr.msk.f32.vlgmr.msra.gmra.mrb[22].mxu1 %vm244_vm0, %v2524_v7 }
 0x8f0   :  { %6057 = vmatpush3.bf16.msra.mxu1 %v6884_v48  ;;  %5884 = vmatprep.mubr.msk.f32.mxu1 %vm6673_vm2, %v9662_v38 }
 0x8f1   :  { %6058 = vmatprep.subr.bf16.mxu1 %v9663_v8 }
 0x8f4   :  { %6060 = vmatpush3.bf16.msra.mxu1 %v9677_v54 }
 0x8f5   :  { %6067 = vmatprep.subr.bf16.mxu1 %v9663_v8 }
 0x95b   :  { %v2282_v41 = vpop.f32.mrb[20].mxu1 }
 0x95c   :  { %v2283_v44 = vadd.f32 %v9678_v27, %v2282_v41  ;;  %v5853_v62 = vpop.f32.mrb[21].mxu1 }
 0x95e   :  { %2348 = vrot.lane.b32.xlu0 %v2283_v44, %s6676_s23  ;;  %v2288_v6 = vrot.slane %v2283_v44, 6  ;;  %v2287_v16 = vrot.slane %v2283_v44, 5  ;;  %v2290_v20 = vrot.slane %v2283_v44, 1  ;;  %v2289_v55 = vrot.slane %v2283_v44, 7 }
 0x95f   :  { %v2291_v36 = vrot.slane %v2283_v44, 2  ;;  %v2292_v26 = vrot.slane %v2283_v44, 3  ;;  %v2293_v4 = vrot.slane %v2283_v44, 4  ;;  %v2305_v12 = vadd.f32 %v2283_v44, %v7093_v14 }
 0x960   :  { %2344 = vrot.lane.b32.xlu1 %v2288_v6, %s6676_s23  ;;  %v2302_v35 = vadd.f32 %v2287_v16, %v7085_v10  ;;  %v2303_v31 = vadd.f32 %v2288_v6, %v7087_v11  ;;  %v2304_v17 = vadd.f32 %v2289_v55, %v7091_v13  ;;  %v2306_v46 = vadd.f32 %v2290_v20, %v7097_v18 }
 0x961   :  { %v2313_v51 = vmul.f32 0.5, %v2305_v12  ;;  %v2307_v52 = vadd.f32 %v2291_v36, %v7100_v33  ;;  %v2308_v25 = vadd.f32 %v2292_v26, %v7106_v53  ;;  %v2309_v60 = vadd.f32 %v2293_v4, %v7102_v39 }
 0x962   :  { %2342 = vrot.lane.b32.xlu0 %v2287_v16, %s6676_s23  ;;  %v2310_v19 = vmul.f32 0.5, %v2302_v35  ;;  %v2311_v29 = vmul.f32 0.5, %v2303_v31  ;;  %v2312_v9 = vmul.f32 0.5, %v2304_v17  ;;  %v2314_v7 = vmul.f32 0.5, %v2306_v46 }
 0x963   :  { %6314 = vtanh.f32 %v2313_v51  ;;  %v2315_v43 = vmul.f32 0.5, %v2307_v52  ;;  %v2316_v62 = vmul.f32 0.5, %v2308_v25  ;;  %v2317_v6 = vmul.f32 0.5, %v2309_v60 }
 0x964   :  { %2350 = vrot.lane.b32.xlu1 %v2290_v20, %s6676_s23  ;;  %6316 = vtanh.f32 %v2310_v19 }
 0x965   :  { %6318 = vtanh.f32 %v2311_v29 }
 0x966   :  { %2346 = vrot.lane.b32.xlu0 %v2289_v55, %s6676_s23  ;;  %6320 = vtanh.f32 %v2312_v9 }
 0x967   :  { %6322 = vtanh.f32 %v2315_v43 }
 0x968   :  { %2352 = vrot.lane.b32.xlu1 %v2291_v36, %s6676_s23  ;;  %6324 = vtanh.f32 %v2314_v7 }
 0x969   :  { %6326 = vtanh.f32 %v2316_v62 }
 0x96a   :  { %2354 = vrot.lane.b32.xlu0 %v2292_v26, %s6676_s23  ;;  %6328 = vtanh.f32 %v2317_v6 }
 0x96c   :  { %2356 = vrot.lane.b32.xlu1 %v2293_v4, %s6676_s23 }
 0x96d   :  { %v6315_v27 = vpop.eup %6314 }
 0x96e   :  { %v2329_v20 = vadd.f32 1.0, %v6315_v27  ;;  %v6317_v55 = vpop.eup %6316 }
 0x96f   :  { %v6319_v26 = vpop.eup %6318  ;;  %v2326_v12 = vadd.f32 1.0, %v6317_v55 }
 0x970   :  { %v8001_v4 = vmul.f32 0.5, %v2329_v20  ;;  %v6321_v35 = vpop.eup %6320  ;;  %v2327_v29 = vadd.f32 1.0, %v6319_v26 }
 0x971   :  { %v6323_v19 = vpop.eup %6322  ;;  %v8007_v46 = vmul.f32 0.5, %v2326_v12 }
 0x972   :  { %v6325_v9 = vpop.eup %6324  ;;  %v2331_v25 = vadd.f32 1.0, %v6323_v19  ;;  %v8011_v27 = vmul.f32 0.5, %v2327_v29 }
 0x973   :  { %v6327_v7 = vpop.eup %6326  ;;  %v2330_v62 = vadd.f32 1.0, %v6325_v9 }
 0x974   :  { %v6329_v20 = vpop.eup %6328  ;;  %v2332_v29 = vadd.f32 1.0, %v6327_v7 }
 0x9c2   :  { %v2593_v42 = vpop.f32.mrb[22].mxu1 }
 0x9c3   :  { %v7977_v49 = vadd.f32 %v9679_v58, %v2593_v42  ;;  %v5864_v24 = vpop.f32.mrb[23].mxu1  ;;  %v2328_v42 = vadd.f32 1.0, %v6321_v35  ;;  %v8019_v35 = vmul.f32 0.5, %v2331_v25 }
 0x9c5   :  { %2659 = vrot.lane.b32.xlu1 %v7977_v49, %s6676_s23  ;;  %v2598_v2 = vrot.slane %v7977_v49, 5  ;;  %v2599_v41 = vrot.slane %v7977_v49, 6  ;;  %v2600_v44 = vrot.slane %v7977_v49, 7  ;;  %v2604_v16 = vrot.slane %v7977_v49, 4 }
 0x9c6   :  { %v2601_v36 = vrot.slane %v7977_v49, 1  ;;  %v2602_v17 = vrot.slane %v7977_v49, 2  ;;  %v2603_v43 = vrot.slane %v7977_v49, 3  ;;  %v8015_v6 = vmul.f32 0.5, %v2328_v42 }
 0x9c7   :  { %2653 = vrot.lane.b32.xlu0 %v2598_v2, %s6676_s23  ;;  %v2333_v42 = vadd.f32 1.0, %v6329_v20  ;;  %v2613_v7 = vadd.f32 %v2598_v2, %v7116_v40  ;;  %v2614_v20 = vadd.f32 %v2599_v41, %v7127_v21 }
 0x9c9   :  { %2655 = vrot.lane.b32.xlu1 %v2599_v41, %s6676_s23  ;;  %v8030_v25 = vmul.f32 0.5, %v2333_v42 }
 0x9cb   :  { %2657 = vrot.lane.b32.xlu0 %v2600_v44, %s6676_s23 }
 0x9cd   :  { %2667 = vrot.lane.b32.xlu1 %v2604_v16, %s6676_s23 }
 0x9cf   :  { %2661 = vrot.lane.b32.xlu0 %v2601_v36, %s6676_s23 }
 0x9d0   :  { %v2349_v51 = vpop.permute.xlu0 %2348 }
 0x9d1   :  { %v2369_v31 = vmul.f32 %v2349_v51, %v8001_v4 }
 0x9d2   :  { %v2345_v52 = vpop.permute.xlu1 %2344 }
 0x9d3   :  { %2663 = vrot.lane.b32.xlu0 %v2602_v17, %s6676_s23  ;;  %2388 = vrot.lane.b32.xlu1 %v2369_v31, %s6676_s23  ;;  %v2367_v26 = vmul.f32 %v2345_v52, %v8011_v27  ;;  %v8021_v31 = vmul.f32 0.5, %v2330_v62  ;;  %v8027_v52 = vmul.f32 0.5, %v2332_v29  ;;  %v2617_v29 = vadd.f32 %v2601_v36, %v9668_v57 }
 0x9d4   :  { %v2343_v58 = vpop.permute.xlu0 %2342 }
 0x9d5   :  { %v2366_v24 = vmul.f32 %v2343_v58, %v8007_v46  ;;  %v2625_v2 = vmul.f32 0.5, %v2617_v29 }
 0x9d6   :  { %v2351_v60 = vpop.permute.xlu1 %2350 }
 0x9d7   :  { %2665 = vrot.lane.b32.xlu0 %v2603_v43, %s6676_s23  ;;  %2382 = vrot.lane.b32.xlu1 %v2366_v24, %s6676_s23  ;;  %v2370_v9 = vmul.f32 %v2351_v60, %v8021_v31  ;;  %v2616_v60 = vadd.f32 %v7977_v49, %v9667_v15 }
 0x9d8   :  { %v2347_v55 = vpop.permute.xlu0 %2346 }
 0x9d9   :  { %v2368_v12 = vmul.f32 %v2347_v55, %v8015_v6 }
 0x9da   :  { %v2353_v51 = vpop.permute.xlu1 %2352 }
 0x9db   :  { %2384 = vrot.lane.b32.xlu0 %v2367_v26, %s6676_s23  ;;  %v2371_v19 = vmul.f32 %v2353_v51, %v8019_v35  ;;  %2386 = vrot.lane.b32.xlu1 %v2368_v12, %s6676_s23  ;;  %v2624_v26 = vmul.f32 0.5, %v2616_v60  ;;  %v2621_v12 = vmul.f32 0.5, %v2613_v7  ;;  %v2615_v51 = vadd.f32 %v2600_v44, %v7111_v59 }
 0x9dc   :  { %v2355_v58 = vpop.permute.xlu0 %2354 }
 0x9dd   :  { %v2372_v62 = vmul.f32 %v2355_v58, %v8027_v52  ;;  %6330 = vtanh.f32 %v2624_v26  ;;  %v2623_v42 = vmul.f32 0.5, %v2615_v51  ;;  %v9680_v58 = vld [vmem:[#allocation9_spill] sm:$0xff] }
 0x9de   :  { %v2357_v24 = vpop.permute.xlu1 %2356  ;;  %6332 = vtanh.f32 %v2621_v12  ;;  %v2620_v41 = vadd.f32 %v2604_v16, %v9680_v58 }
 0x9df   :  { %2392 = vrot.lane.b32.xlu0 %v2371_v19, %s6676_s23  ;;  %2390 = vrot.lane.b32.xlu1 %v2370_v9, %s6676_s23  ;;  %v2373_v55 = vmul.f32 %v2357_v24, %v8030_v25  ;;  %v2622_v19 = vmul.f32 0.5, %v2614_v20  ;;  %v2618_v9 = vadd.f32 %v2602_v17, %v9670_v45 }
 0x9e0   :  { %v2628_v20 = vmul.f32 0.5, %v2620_v41 }
 0x9e1   :  { %6334 = vtanh.f32 %v2622_v19  ;;  %v2626_v44 = vmul.f32 0.5, %v2618_v9 }
 0x9e2   :  { %6336 = vtanh.f32 %v2623_v42 }
 0x9e3   :  { %2394 = vrot.lane.b32.xlu0 %v2372_v62, %s6676_s23  ;;  %2396 = vrot.lane.b32.xlu1 %v2373_v55, %s6676_s23  ;;  %v9681_v62 = vld [vmem:[#allocation16_spill] sm:$0xff]  ;;  %6338 = vtanh.f32 %v2625_v2 }
 0x9e4   :  { %v2619_v55 = vadd.f32 %v2603_v43, %v9681_v62  ;;  %6340 = vtanh.f32 %v2626_v44 }
 0x9e5   :  { %6342 = vtanh.f32 %v2628_v20 }
 0x9e6   :  { %v2627_v26 = vmul.f32 0.5, %v2619_v55 }
 0x9e7   :  { %v6331_v24 = vpop.eup %6330 }
 0x9e8   :  { %v6333_v60 = vpop.eup %6332  ;;  %v2640_v7 = vadd.f32 1.0, %v6331_v24  ;;  %6344 = vtanh.f32 %v2627_v26 }
 0x9e9   :  { %v2637_v17 = vadd.f32 1.0, %v6333_v60 }
 0x9ea   :  { %v8054_v12 = vmul.f32 0.5, %v2640_v7 }
 0x9eb   :  { %v6335_v36 = vpop.eup %6334  ;;  %v8057_v42 = vmul.f32 0.5, %v2637_v17 }
 0x9ec   :  { %v2638_v51 = vadd.f32 1.0, %v6335_v36  ;;  %v6337_v19 = vpop.eup %6336 }
 0x9ed   :  { %v6339_v16 = vpop.eup %6338  ;;  %v2639_v2 = vadd.f32 1.0, %v6337_v19 }
 0x9ee   :  { %v8060_v9 = vmul.f32 0.5, %v2638_v51  ;;  %v2641_v44 = vadd.f32 1.0, %v6339_v16  ;;  %v6341_v60 = vpop.eup %6340 }
 0x9ef   :  { %v8064_v20 = vmul.f32 0.5, %v2639_v2  ;;  %v6343_v36 = vpop.eup %6342  ;;  %v2642_v51 = vadd.f32 1.0, %v6341_v60 }
 0x9f0   :  { %v8069_v17 = vmul.f32 0.5, %v2641_v44  ;;  %v2644_v16 = vadd.f32 1.0, %v6343_v36 }
 0x9f1   :  { %v8074_v2 = vmul.f32 0.5, %v2642_v51 }
 0x9f2   :  { %v6345_v19 = vpop.eup %6344  ;;  %v8078_v60 = vmul.f32 0.5, %v2644_v16 }
 0xa37   :  { %v2660_v29 = vpop.permute.xlu1 %2659 }
 0xa38   :  { %v2680_v49 = vmul.f32 %v2660_v29, %v8054_v12 }
 0xa39   :  { %v2654_v43 = vpop.permute.xlu0 %2653 }
 0xa3a   :  { %2699 = vrot.lane.b32.xlu0 %v2680_v49, %s6676_s23  ;;  %v2677_v24 = vmul.f32 %v2654_v43, %v8057_v42 }
 0xa3b   :  { %v2656_v41 = vpop.permute.xlu1 %2655 }
 0xa3c   :  { %v2678_v55 = vmul.f32 %v2656_v41, %v8060_v9  ;;  %v2643_v41 = vadd.f32 1.0, %v6345_v19 }
 0xa3d   :  { %v2658_v7 = vpop.permute.xlu0 %2657 }
 0xa3e   :  { %2693 = vrot.lane.b32.xlu0 %v2677_v24, %s6676_s23  ;;  %2695 = vrot.lane.b32.xlu1 %v2678_v55, %s6676_s23  ;;  %v2679_v26 = vmul.f32 %v2658_v7, %v8064_v20 }
 0xa3f   :  { %v2668_v29 = vpop.permute.xlu1 %2667 }
 0xa41   :  { %v2662_v49 = vpop.permute.xlu0 %2661 }
 0xa42   :  { %v2681_v43 = vmul.f32 %v2662_v49, %v8069_v17  ;;  %2697 = vrot.lane.b32.xlu0 %v2679_v26, %s6676_s23  ;;  %v8081_v49 = vmul.f32 0.5, %v2643_v41 }
 0xa44   :  { %2701 = vrot.lane.b32.xlu1 %v2681_v43, %s6676_s23  ;;  %v2684_v43 = vmul.f32 %v2668_v29, %v8078_v60 }
 0xa45   :  { %v2664_v24 = vpop.permute.xlu0 %2663  ;;  %v2389_v55 = vpop.permute.xlu1 %2388 }
 0xa46   :  { %v2682_v7 = vmul.f32 %v2664_v24, %v8074_v2  ;;  %v2409_v44 = vadd.f32 %v2389_v55, %v7093_v14 }
 0xa48   :  { %6346 = vtanh.f32 %v2409_v44  ;;  %2703 = vrot.lane.b32.xlu1 %v2682_v7, %s6676_s23 }
 0xa49   :  { %v2666_v26 = vpop.permute.xlu0 %2665  ;;  %v2383_v36 = vpop.permute.xlu1 %2382 }
 0xa4a   :  { %v2683_v51 = vmul.f32 %v2666_v26, %v8081_v49  ;;  %v2406_v19 = vadd.f32 %v2383_v36, %v7085_v10 }
 0xa4c   :  { %6348 = vtanh.f32 %v2406_v19  ;;  %2705 = vrot.lane.b32.xlu0 %v2683_v51, %s6676_s23  ;;  %2707 = vrot.lane.b32.xlu1 %v2684_v43, %s6676_s23 }
 0xa4d   :  { %v2385_v16 = vpop.permute.xlu0 %2384  ;;  %v2387_v24 = vpop.permute.xlu1 %2386 }
 0xa4e   :  { %v2407_v55 = vadd.f32 %v2385_v16, %v7087_v11  ;;  %v2408_v41 = vadd.f32 %v2387_v24, %v7091_v13 }
 0xa50   :  { %6350 = vtanh.f32 %v2407_v55 }
 0xa51   :  { %6352 = vtanh.f32 %v2408_v41  ;;  %v2393_v7 = vpop.permute.xlu0 %2392  ;;  %v2391_v44 = vpop.permute.xlu1 %2390 }
 0xa52   :  { %v6347_v29 = vpop.eup %6346  ;;  %v2410_v26 = vadd.f32 %v2391_v44, %v7097_v18  ;;  %v2411_v36 = vadd.f32 %v2393_v7, %v7100_v33 }
 0xa53   :  { %2444 = vrot.lane.b32.xlu0 %v6347_v29, %s6677_s5 }
 0xa54   :  { %6354 = vtanh.f32 %v2410_v26 }
 0xa55   :  { %v2395_v51 = vpop.permute.xlu0 %2394  ;;  %v2397_v3 = vpop.permute.xlu1 %2396 }
 0xa56   :  { %v6349_v43 = vpop.eup %6348  ;;  %v2412_v19 = vadd.f32 %v2395_v51, %v7106_v53  ;;  %v2413_v16 = vadd.f32 %v2397_v3, %v7102_v39 }
 0xa57   :  { %2438 = vrot.lane.b32.xlu0 %v6349_v43, %s6677_s5 }
 0xa58   :  { %6356 = vtanh.f32 %v2412_v19 }
 0xa59   :  { %6358 = vtanh.f32 %v2411_v36 }
 0xa5a   :  { %v6351_v24 = vpop.eup %6350  ;;  %6360 = vtanh.f32 %v2413_v16 }
 0xa5b   :  { %v6353_v55 = vpop.eup %6352  ;;  %2440 = vrot.lane.b32.xlu1 %v6351_v24, %s6677_s5 }
 0xa5c   :  { %2442 = vrot.lane.b32.xlu0 %v6353_v55, %s6677_s5 }
 0xa5e   :  { %v6355_v41 = vpop.eup %6354 }
 0xa5f   :  { %2446 = vrot.lane.b32.xlu1 %v6355_v41, %s6677_s5 }
 0xa62   :  { %v6357_v7 = vpop.eup %6356 }
 0xa63   :  { %v6359_v44 = vpop.eup %6358  ;;  %2450 = vrot.lane.b32.xlu0 %v6357_v7, %s6677_s5 }
 0xa64   :  { %2448 = vrot.lane.b32.xlu1 %v6359_v44, %s6677_s5  ;;  %v6361_v29 = vpop.eup %6360 }
 0xa68   :  { %2452 = vrot.lane.b32.xlu1 %v6361_v29, %s6677_s5 }
 0xaac   :  { %v2700_v3 = vpop.permute.xlu0 %2699 }
 0xaad   :  { %v2720_v26 = vadd.f32 %v2700_v3, %v9667_v15 }
 0xaaf   :  { %6362 = vtanh.f32 %v2720_v26 }
 0xab0   :  { %v2694_v36 = vpop.permute.xlu0 %2693  ;;  %v2696_v51 = vpop.permute.xlu1 %2695 }
 0xab1   :  { %v2717_v43 = vadd.f32 %v2694_v36, %v7116_v40  ;;  %v2718_v19 = vadd.f32 %v2696_v51, %v7127_v21 }
 0xab3   :  { %6364 = vtanh.f32 %v2717_v43 }
 0xab4   :  { %6366 = vtanh.f32 %v2718_v19  ;;  %v2698_v16 = vpop.permute.xlu0 %2697 }
 0xab5   :  { %v2719_v24 = vadd.f32 %v2698_v16, %v7111_v59 }
 0xab6   :  { %v2702_v55 = vpop.permute.xlu1 %2701 }
 0xab7   :  { %6368 = vtanh.f32 %v2719_v24  ;;  %v2721_v41 = vadd.f32 %v2702_v55, %v9668_v57 }
 0xab9   :  { %v6363_v7 = vpop.eup %6362  ;;  %6370 = vtanh.f32 %v2721_v41 }
 0xaba   :  { %2755 = vrot.lane.b32.xlu0 %v6363_v7, %s6677_s5  ;;  %v2704_v44 = vpop.permute.xlu1 %2703  ;;  %v2422_v7 = vsub.f32 1.0, %v8007_v46 }
 0xabb   :  { %v2722_v29 = vadd.f32 %v2704_v44, %v9670_v45 }
 0xabd   :  { %v6365_v3 = vpop.eup %6364  ;;  %6372 = vtanh.f32 %v2722_v29  ;;  %v9682_v29 = vld [vmem:[#allocation19_spill] sm:$0xff] }
 0xabe   :  { %v6367_v26 = vpop.eup %6366  ;;  %v2706_v36 = vpop.permute.xlu0 %2705  ;;  %2749 = vrot.lane.b32.xlu0 %v6365_v3, %s6677_s5  ;;  %v2470_v3 = vrot.slane %v9682_v29, 7 }
 0xabf   :  { %v2708_v51 = vpop.permute.xlu1 %2707  ;;  %v2723_v43 = vadd.f32 %v2706_v36, %v9681_v62  ;;  %2751 = vrot.lane.b32.xlu1 %v6367_v26, %s6677_s5 }
 0xac0   :  { %v2724_v19 = vadd.f32 %v2708_v51, %v9680_v58  ;;  %v2424_v58 = vsub.f32 1.0, %v8015_v6 }
 0xac1   :  { %v6369_v16 = vpop.eup %6368  ;;  %6374 = vtanh.f32 %v2723_v43  ;;  %v2471_v43 = vrot.slane %v9683_v22, 7 }
 0xac2   :  { %6376 = vtanh.f32 %v2724_v19  ;;  %2753 = vrot.lane.b32.xlu0 %v6369_v16, %s6677_s5  ;;  %v2485_v19 = vmul.f32 %v2470_v3, %v8007_v46  ;;  %v2423_v16 = vsub.f32 1.0, %v8011_v27 }
 0xac3   :  { %v6371_v24 = vpop.eup %6370 }
 0xac4   :  { %2757 = vrot.lane.b32.xlu1 %v6371_v24, %s6677_s5  ;;  %v2472_v24 = vrot.slane %v7863_v34, 7  ;;  %v2426_v34 = vsub.f32 1.0, %v8021_v31 }
 0xac5   :  { %v2445_v55 = vpop.permute.xlu0 %2444 }
 0xac6   :  { %v2487_v22 = vmul.f32 %v2472_v24, %v8015_v6 }
 0xac7   :  { %v6373_v41 = vpop.eup %6372 }
 0xac8   :  { %2759 = vrot.lane.b32.xlu1 %v6373_v41, %s6677_s5 }
 0xac9   :  { %v2439_v44 = vpop.permute.xlu0 %2438 }
 0xaca   :  { %v2462_v26 = vmul.f32 %v2439_v44, %v2422_v7  ;;  %v2486_v7 = vmul.f32 %v2471_v43, %v8011_v27  ;;  %v2425_v27 = vsub.f32 1.0, %v8001_v4 }
 0xacb   :  { %v6375_v36 = vpop.eup %6374 }
 0xacc   :  { %v6377_v51 = vpop.eup %6376  ;;  %2761 = vrot.lane.b32.xlu0 %v6375_v36, %s6677_s5  ;;  %v8125_v62 = vadd.f32 %v2485_v19, %v2462_v26  ;;  %v2473_v36 = vrot.slane %v7865_v61, 7  ;;  %v2475_v61 = vrot.slane %v7879_v50, 7 }
 0xacd   :  { %2763 = vrot.lane.b32.xlu1 %v6377_v51, %s6677_s5  ;;  %v2441_v41 = vpop.permute.xlu1 %2440 }
 0xace   :  { %v2463_v44 = vmul.f32 %v2441_v41, %v2423_v16  ;;  %v2443_v29 = vpop.permute.xlu0 %2442  ;;  %v2820_v51 = vrot.slane %v8125_v62, 3  ;;  %v2489_v6 = vmul.f32 %v2473_v36, %v8021_v31  ;;  %v2474_v16 = vrot.slane %v7859_v23, 7 }
 0xacf   :  { %v2464_v46 = vmul.f32 %v2443_v29, %v2424_v58  ;;  %v2428_v41 = vsub.f32 1.0, %v8027_v52  ;;  %v9685_v23 = vrot.slane %v7850_v28, 7 }
 0xad0   :  { %v8129_v3 = vadd.f32 %v2486_v7, %v2463_v44  ;;  %v2465_v7 = vmul.f32 %v2445_v55, %v2425_v27 }
 0xad1   :  { %v8132_v45 = vadd.f32 %v2487_v22, %v2464_v46  ;;  %v2447_v19 = vpop.permute.xlu1 %2446  ;;  %v2427_v46 = vsub.f32 1.0, %v8019_v35  ;;  %v2488_v50 = vmul.f32 %v8001_v4, %v9685_v23 }
 0xad2   :  { %v2821_v26 = vrot.slane %v8129_v3, 2  ;;  %v2466_v58 = vmul.f32 %v2447_v19, %v2426_v34  ;;  %v2490_v34 = vmul.f32 %v2474_v16, %v8019_v35  ;;  %v2476_v19 = vrot.slane %v7877_v37, 7 }
 0xad3   :  { %9684 = vst [vmem:[#allocation17_spill] sm:$0xff] %v8132_v45  ;;  %v2823_v43 = vrot.slane %v8132_v45, 1  ;;  %v2491_v45 = vmul.f32 %v2475_v61, %v8027_v52  ;;  %v8157_v27 = vadd.f32 %v2488_v50, %v2465_v7  ;;  %v2429_v52 = vsub.f32 1.0, %v8030_v25 }
 0xad4   :  { %v2822_v24 = vsel %vm948_vm6, %v2821_v26, %v2820_v51  ;;  %v8145_v29 = vadd.f32 %v2489_v6, %v2466_v58  ;;  %v2492_v35 = vmul.f32 %v2476_v19, %v8030_v25 }
 0xad5   :  { %v2824_v44 = vsel %vm951_vm7, %v2823_v43, %v2822_v24  ;;  %v2451_v22 = vpop.permute.xlu0 %2450 }
 0xad6   :  { %v2468_v31 = vmul.f32 %v2451_v22, %v2428_v41  ;;  %v2449_v36 = vpop.permute.xlu1 %2448  ;;  %v9597_v55 = vrot.slane %v8145_v29, 7  ;;  %v2825_v28 = vsel %vm954_vm8, %v8157_v27, %v2824_v44  ;;  %v2781_v44 = vrot.slane %v7895_v1, 7 }
 0xad7   :  { %v2467_v51 = vmul.f32 %v2449_v36, %v2427_v46  ;;  %v2733_v22 = vsub.f32 1.0, %v8057_v42  ;;  %v2782_v46 = vrot.slane %v7899_v47, 7  ;;  %v2734_v36 = vsub.f32 1.0, %v8060_v9 }
 0xad8   :  { %v8154_v26 = vadd.f32 %v2491_v45, %v2468_v31  ;;  %v2827_v45 = vsel %vm957_vm9, %v9597_v55, %v2825_v28  ;;  %v2796_v23 = vmul.f32 %v2781_v44, %v8057_v42  ;;  %v2735_v1 = vsub.f32 1.0, %v8064_v20 }
 0xad9   :  { %v8159_v43 = vadd.f32 %v2490_v34, %v2467_v51  ;;  %v2797_v51 = vmul.f32 %v2782_v46, %v8060_v9  ;;  %v2784_v28 = vrot.slane %v7919_v5, 7  ;;  %v2736_v47 = vsub.f32 1.0, %v8054_v12 }
 0xada   :  { %v2453_v6 = vpop.permute.xlu1 %2452  ;;  %v2830_v37 = vrot.slane %v8154_v26, 5  ;;  %v2737_v9 = vsub.f32 1.0, %v8069_v17 }
 0xadb   :  { %v2828_v4 = vrot.slane %v8159_v43, 6  ;;  %v2469_v58 = vmul.f32 %v2453_v6, %v2429_v52  ;;  %v2783_v52 = vrot.slane %v7911_v30, 7  ;;  %v2800_v5 = vmul.f32 %v2784_v28, %v8069_v17 }
 0xadc   :  { %v2740_v28 = vsub.f32 1.0, %v8078_v60 }
 0xadd   :  { %v8170_v16 = vadd.f32 %v2492_v35, %v2469_v58  ;;  %v2829_v61 = vsel %vm960_vm10, %v2828_v4, %v2827_v45  ;;  %v2798_v58 = vmul.f32 %v2783_v52, %v8064_v20  ;;  %v2787_v52 = vrot.slane %v7940_v32, 7 }
 0xade   :  { %v2831_v24 = vsel %vm963_vm11, %v2830_v37, %v2829_v61 }
 0xadf   :  { %v2832_v41 = vrot.slane %v8170_v16, 4 }
 0xae1   :  { %v2833_v7 = vsel %vm966_vm12, %v2832_v41, %v2831_v24 }
 0xae2   :  { %2834 = vrot.lane.b32.xlu0 %v2833_v7, %s6677_s5  ;;  %v2785_v7 = vrot.slane %v7934_v56, 7 }
 0xb2c   :  { %v2756_v25 = vpop.permute.xlu0 %2755 }
 0xb2d   :  { %v2776_v61 = vmul.f32 %v2756_v25, %v2736_v47 }
 0xb30   :  { %v2750_v31 = vpop.permute.xlu0 %2749 }
 0xb31   :  { %v2773_v50 = vmul.f32 %v2750_v31, %v2733_v22  ;;  %v2752_v34 = vpop.permute.xlu1 %2751  ;;  %v9686_v22 = vrot.slane %v7908_v63, 7  ;;  %v2786_v63 = vrot.slane %v7930_v0, 7 }
 0xb32   :  { %v2774_v19 = vmul.f32 %v2752_v34, %v2734_v36  ;;  %v2738_v36 = vsub.f32 1.0, %v8074_v2 }
 0xb33   :  { %v8184_v6 = vadd.f32 %v2796_v23, %v2773_v50  ;;  %v2799_v20 = vmul.f32 %v8054_v12, %v9686_v22  ;;  %v2801_v50 = vmul.f32 %v2785_v7, %v8074_v2  ;;  %v2802_v2 = vmul.f32 %v2786_v63, %v8081_v49  ;;  %v9688_v7 = vld [vmem:[#allocation6_spill] sm:$0xff] }
 0xb34   :  { %v8189_v4 = vadd.f32 %v2797_v51, %v2774_v19  ;;  %v2754_v35 = vpop.permute.xlu0 %2753  ;;  %v2739_v19 = vsub.f32 1.0, %v8081_v49 }
 0xb35   :  { %v3131_v42 = vrot.slane %v8184_v6, 3  ;;  %v2775_v45 = vmul.f32 %v2754_v35, %v2735_v1  ;;  %v8207_v23 = vadd.f32 %v2799_v20, %v2776_v61  ;;  %v8253_v20 = vld [vmem:[%s9553_s7] ss:$0 sm:$0xff] }
 0xb36   :  { %v3132_v30 = vrot.slane %v8189_v4, 2  ;;  %v2758_v37 = vpop.permute.xlu1 %2757  ;;  %9689 = vst [vmem:[#allocation18_spill] sm:$0xff] %v8253_v20 }
 0xb37   :  { %v8195_v24 = vadd.f32 %v2798_v58, %v2775_v45  ;;  %v2777_v41 = vmul.f32 %v2758_v37, %v2737_v9  ;;  %v2803_v58 = vmul.f32 %v2787_v52, %v8078_v60  ;;  %v9687_v60 = vld [vmem:[#allocation5_spill] sm:$0xff] }
 0xb38   :  { %v3133_v44 = vsel %vm948_vm6, %v3132_v30, %v3131_v42 }
 0xb39   :  { %v3134_v46 = vrot.slane %v8195_v24, 1  ;;  %v8204_v31 = vadd.f32 %v2800_v5, %v2777_v41 }
 0xb3a   :  { %v2760_v25 = vpop.permute.xlu1 %2759 }
 0xb3b   :  { %v3135_v17 = vsel %vm951_vm7, %v3134_v46, %v3133_v44  ;;  %v2778_v56 = vmul.f32 %v2760_v25, %v2738_v36  ;;  %v9596_v34 = vrot.slane %v8204_v31, 7 }
 0xb3c   :  { %v3136_v12 = vsel %vm954_vm8, %v8207_v23, %v3135_v17 }
 0xb3d   :  { %v8215_v51 = vadd.f32 %v2801_v50, %v2778_v56  ;;  %v3138_v0 = vsel %vm957_vm9, %v9596_v34, %v3136_v12 }
 0xb3e   :  { %v2762_v1 = vpop.permute.xlu0 %2761 }
 0xb3f   :  { %v3139_v47 = vrot.slane %v8215_v51, 6  ;;  %v2779_v35 = vmul.f32 %v2762_v1, %v2739_v19  ;;  %v2764_v42 = vpop.permute.xlu1 %2763 }
 0xb40   :  { %v2780_v45 = vmul.f32 %v2764_v42, %v2740_v28 }
 0xb41   :  { %v8226_v9 = vadd.f32 %v2802_v2, %v2779_v35  ;;  %v3140_v32 = vsel %vm960_vm10, %v3139_v47, %v3138_v0 }
 0xb42   :  { %v8229_v30 = vadd.f32 %v2803_v58, %v2780_v45  ;;  %v8272_v45 = vld [vmem:[%s9557_s11] ss:$0 sm:$0xff] }
 0xb43   :  { %v3141_v37 = vrot.slane %v8226_v9, 5  ;;  %9690 = vst [vmem:[#allocation19_spill] sm:$0xff] %v8272_v45 }
 0xb44   :  { %v3143_v61 = vrot.slane %v8229_v30, 4 }
 0xb45   :  { %v3142_v49 = vsel %vm963_vm11, %v3141_v37, %v3140_v32 }
 0xb46   :  { %v3144_v5 = vsel %vm966_vm12, %v3143_v61, %v3142_v49 }
 0xb47   :  { %3145 = vrot.lane.b32.xlu1 %v3144_v5, %s6677_s5 }
 0xb54   :  { %v2835_v41 = vpop.permute.xlu0 %2834 }
 0xb55   :  { %5874 = vmatmul.mubr.msk.f32.vlgmr.msra.gmra.mrb[16].mxu0 %vm244_vm0, %v2835_v41 }
 0xb56   :  { %6063 = vmatpush3.bf16.msra.mxu0 %v9687_v60  ;;  %5895 = vmatprep.mubr.msk.f32.mxu0 %vm6673_vm2, %v9662_v38 }
 0xb57   :  { %6064 = vmatprep.subr.bf16.mxu0 %v9663_v8 }
 0xb5a   :  { %6066 = vmatpush3.bf16.msra.mxu0 %v9688_v7 }
 0xb5b   :  { %6073 = vmatprep.subr.bf16.mxu0 %v9663_v8 }
 0xbb9   :  { %v3146_v44 = vpop.permute.xlu1 %3145 }
 0xbba   :  { %5885 = vmatmul.mubr.msk.f32.vlgmr.msra.gmra.mrb[24].mxu1 %vm244_vm0, %v3146_v44 }
 0xbbb   :  { %6069 = vmatpush3.bf16.msra.mxu1 %v6884_v48  ;;  %5906 = vmatprep.mubr.msk.f32.mxu1 %vm6673_vm2, %v9662_v38 }
 0xbbc   :  { %6070 = vmatprep.subr.bf16.mxu1 %v9663_v8 }
 0xbbf   :  { %6072 = vmatpush3.bf16.msra.mxu1 %v9677_v54 }
 0xbc0   :  { %6079 = vmatprep.subr.bf16.mxu1 %v9663_v8 }
 0xc28   :  { %v2904_v22 = vpop.f32.mrb[16].mxu0 }
 0xc29   :  { %v2905_v46 = vadd.f32 %v8253_v20, %v2904_v22  ;;  %v5875_v36 = vpop.f32.mrb[17].mxu0 }
 0xc2b   :  { %2972 = vrot.lane.b32.xlu1 %v2905_v46, %s6676_s23  ;;  %v2909_v25 = vrot.slane %v2905_v46, 4  ;;  %v2910_v17 = vrot.slane %v2905_v46, 5  ;;  %v2911_v50 = vrot.slane %v2905_v46, 6  ;;  %v2912_v56 = vrot.slane %v2905_v46, 7 }
 0xc2c   :  { %v2913_v63 = vrot.slane %v2905_v46, 1  ;;  %v2915_v12 = vrot.slane %v2905_v46, 3  ;;  %v2914_v19 = vrot.slane %v2905_v46, 2  ;;  %v2928_v52 = vadd.f32 %v2905_v46, %v7097_v18 }
 0xc2d   :  { %2964 = vrot.lane.b32.xlu0 %v2909_v25, %s6676_s23  ;;  %v2924_v1 = vadd.f32 %v2909_v25, %v7085_v10  ;;  %v2925_v47 = vadd.f32 %v2910_v17, %v7087_v11  ;;  %v2927_v2 = vadd.f32 %v2912_v56, %v7093_v14  ;;  %v2926_v42 = vadd.f32 %v2911_v50, %v7091_v13 }
 0xc2e   :  { %v2936_v28 = vmul.f32 0.5, %v2928_v52  ;;  %v2929_v61 = vadd.f32 %v2913_v63, %v7100_v33  ;;  %v2930_v41 = vadd.f32 %v2914_v19, %v7106_v53  ;;  %v2931_v46 = vadd.f32 %v2915_v12, %v7102_v39 }
 0xc2f   :  { %2966 = vrot.lane.b32.xlu1 %v2910_v17, %s6676_s23  ;;  %v2932_v35 = vmul.f32 0.5, %v2924_v1  ;;  %v2933_v58 = vmul.f32 0.5, %v2925_v47  ;;  %v2935_v49 = vmul.f32 0.5, %v2927_v2  ;;  %v2934_v44 = vmul.f32 0.5, %v2926_v42 }
 0xc30   :  { %6378 = vtanh.f32 %v2936_v28  ;;  %v2937_v36 = vmul.f32 0.5, %v2929_v61 }
 0xc31   :  { %2968 = vrot.lane.b32.xlu0 %v2911_v50, %s6676_s23  ;;  %6380 = vtanh.f32 %v2932_v35  ;;  %v2938_v50 = vmul.f32 0.5, %v2930_v41 }
 0xc32   :  { %6382 = vtanh.f32 %v2933_v58 }
 0xc33   :  { %2970 = vrot.lane.b32.xlu1 %v2912_v56, %s6676_s23  ;;  %6384 = vtanh.f32 %v2935_v49 }
 0xc34   :  { %6386 = vtanh.f32 %v2934_v44 }
 0xc35   :  { %2974 = vrot.lane.b32.xlu0 %v2913_v63, %s6676_s23  ;;  %6388 = vtanh.f32 %v2937_v36  ;;  %v2939_v63 = vmul.f32 0.5, %v2931_v46 }
 0xc36   :  { %6390 = vtanh.f32 %v2938_v50 }
 0xc37   :  { %2978 = vrot.lane.b32.xlu1 %v2915_v12, %s6676_s23  ;;  %6392 = vtanh.f32 %v2939_v63 }
 0xc39   :  { %2976 = vrot.lane.b32.xlu0 %v2914_v19, %s6676_s23 }
 0xc3a   :  { %v6379_v17 = vpop.eup %6378 }
 0xc3b   :  { %v2952_v19 = vadd.f32 1.0, %v6379_v17  ;;  %v6381_v52 = vpop.eup %6380 }
 0xc3c   :  { %v6383_v1 = vpop.eup %6382  ;;  %v2948_v2 = vadd.f32 1.0, %v6381_v52 }
 0xc3d   :  { %v8302_v28 = vmul.f32 0.5, %v2952_v19  ;;  %v6385_v35 = vpop.eup %6384  ;;  %v2949_v58 = vadd.f32 1.0, %v6383_v1 }
 0xc3e   :  { %v8307_v49 = vmul.f32 0.5, %v2948_v2  ;;  %v2951_v44 = vadd.f32 1.0, %v6385_v35 }
 0xc3f   :  { %v8312_v50 = vmul.f32 0.5, %v2949_v58 }
 0xc40   :  { %v8317_v2 = vmul.f32 0.5, %v2951_v44 }
 0xc8d   :  { %v3215_v0 = vpop.f32.mrb[24].mxu1 }
 0xc8e   :  { %v8275_v32 = vadd.f32 %v8272_v45, %v3215_v0  ;;  %v5886_v37 = vpop.f32.mrb[25].mxu1 }
 0xc8f   :  { %v6387_v37 = vpop.eup %6386 }
 0xc90   :  { %3283 = vrot.lane.b32.xlu1 %v8275_v32, %s6676_s23  ;;  %v3220_v5 = vrot.slane %v8275_v32, 4  ;;  %v3221_v22 = vrot.slane %v8275_v32, 5  ;;  %v3222_v25 = vrot.slane %v8275_v32, 6  ;;  %v3223_v56 = vrot.slane %v8275_v32, 7  ;;  %v6389_v46 = vpop.eup %6388 }
 0xc91   :  { %v9598_v12 = vrot.slane %v8275_v32, 1  ;;  %v3225_v47 = vrot.slane %v8275_v32, 2  ;;  %v3226_v41 = vrot.slane %v8275_v32, 3  ;;  %v2950_v63 = vadd.f32 1.0, %v6387_v37  ;;  %v6391_v19 = vpop.eup %6390 }
 0xc92   :  { %3275 = vrot.lane.b32.xlu0 %v3220_v5, %s6676_s23  ;;  %v2954_v58 = vadd.f32 1.0, %v6391_v19 }
 0xc93   :  { %v8319_v34 = vmul.f32 0.5, %v2950_v63 }
 0xc94   :  { %3277 = vrot.lane.b32.xlu1 %v3221_v22, %s6676_s23 }
 0xc96   :  { %3279 = vrot.lane.b32.xlu0 %v3222_v25, %s6676_s23 }
 0xc98   :  { %3281 = vrot.lane.b32.xlu1 %v3223_v56, %s6676_s23 }
 0xc9a   :  { %3285 = vrot.lane.b32.xlu0 %v9598_v12, %s6676_s23 }
 0xc9d   :  { %v2973_v42 = vpop.permute.xlu1 %2972 }
 0xc9e   :  { %v2992_v0 = vmul.f32 %v2973_v42, %v8302_v28  ;;  %3287 = vrot.lane.b32.xlu0 %v3225_v47, %s6676_s23  ;;  %v2953_v42 = vadd.f32 1.0, %v6389_v46  ;;  %v8329_v46 = vmul.f32 0.5, %v2954_v58 }
 0xc9f   :  { %v2965_v61 = vpop.permute.xlu0 %2964 }
 0xca0   :  { %3012 = vrot.lane.b32.xlu1 %v2992_v0, %s6676_s23  ;;  %v2988_v17 = vmul.f32 %v2965_v61, %v8307_v49  ;;  %v6393_v0 = vpop.eup %6392  ;;  %v8324_v12 = vmul.f32 0.5, %v2953_v42  ;;  %v3236_v42 = vadd.f32 %v3221_v22, %v7127_v21 }
 0xca1   :  { %v2967_v36 = vpop.permute.xlu1 %2966 }
 0xca2   :  { %3289 = vrot.lane.b32.xlu0 %v3226_v41, %s6676_s23  ;;  %v2989_v1 = vmul.f32 %v2967_v36, %v8312_v50  ;;  %v2955_v36 = vadd.f32 1.0, %v6393_v0 }
 0xca3   :  { %v2969_v52 = vpop.permute.xlu0 %2968 }
 0xca4   :  { %3004 = vrot.lane.b32.xlu1 %v2988_v17, %s6676_s23  ;;  %v2990_v37 = vmul.f32 %v2969_v52, %v8319_v34 }
 0xca5   :  { %v2971_v35 = vpop.permute.xlu1 %2970 }
 0xca6   :  { %v2991_v61 = vmul.f32 %v2971_v35, %v8317_v2  ;;  %3006 = vrot.lane.b32.xlu0 %v2989_v1, %s6676_s23  ;;  %v8331_v35 = vmul.f32 0.5, %v2955_v36  ;;  %v3235_v1 = vadd.f32 %v3220_v5, %v7116_v40  ;;  %v3244_v36 = vmul.f32 0.5, %v3236_v42 }
 0xca7   :  { %v2975_v55 = vpop.permute.xlu0 %2974 }
 0xca8   :  { %3010 = vrot.lane.b32.xlu1 %v2991_v61, %s6676_s23  ;;  %v2993_v44 = vmul.f32 %v2975_v55, %v8324_v12  ;;  %v3239_v55 = vadd.f32 %v8275_v32, %v9668_v57  ;;  %v3237_v61 = vadd.f32 %v3222_v25, %v7111_v59  ;;  %v3243_v58 = vmul.f32 0.5, %v3235_v1  ;;  %v9694_v1 = vld [vmem:[#allocation9_spill] sm:$0xff] }
 0xca9   :  { %v2979_v17 = vpop.permute.xlu1 %2978  ;;  %v3242_v45 = vadd.f32 %v3226_v41, %v9694_v1 }
 0xcaa   :  { %3008 = vrot.lane.b32.xlu0 %v2990_v37, %s6676_s23  ;;  %v2995_v52 = vmul.f32 %v2979_v17, %v8331_v35  ;;  %v3247_v0 = vmul.f32 0.5, %v3239_v55  ;;  %v3238_v37 = vadd.f32 %v3223_v56, %v9667_v15  ;;  %v9692_v17 = vrot.slane %v8275_v32, 1 }
 0xcab   :  { %v2977_v63 = vpop.permute.xlu0 %2976  ;;  %v3250_v32 = vmul.f32 0.5, %v3242_v45 }
 0xcac   :  { %v2994_v19 = vmul.f32 %v2977_v63, %v8329_v46  ;;  %3014 = vrot.lane.b32.xlu1 %v2993_v44, %s6676_s23  ;;  %6394 = vtanh.f32 %v3247_v0  ;;  %v9691_v44 = vld [vmem:[#allocation14_spill] sm:$0xff]  ;;  %v3245_v63 = vmul.f32 0.5, %v3237_v61  ;;  %v3246_v22 = vmul.f32 0.5, %v3238_v37 }
 0xcad   :  { %v3240_v5 = vadd.f32 %v9692_v17, %v9691_v44  ;;  %6396 = vtanh.f32 %v3243_v58 }
 0xcae   :  { %3016 = vrot.lane.b32.xlu0 %v2994_v19, %s6676_s23  ;;  %6398 = vtanh.f32 %v3244_v36  ;;  %v9693_v19 = vld [vmem:[#allocation16_spill] sm:$0xff] }
 0xcaf   :  { %6400 = vtanh.f32 %v3245_v63  ;;  %v3248_v55 = vmul.f32 0.5, %v3240_v5 }
 0xcb0   :  { %3018 = vrot.lane.b32.xlu1 %v2995_v52, %s6676_s23  ;;  %v3241_v52 = vadd.f32 %v3225_v47, %v9693_v19  ;;  %6402 = vtanh.f32 %v3246_v22 }
 0xcb1   :  { %6404 = vtanh.f32 %v3248_v55 }
 0xcb2   :  { %v3249_v56 = vmul.f32 0.5, %v3241_v52 }
 0xcb4   :  { %6406 = vtanh.f32 %v3249_v56 }
 0xcb5   :  { %6408 = vtanh.f32 %v3250_v32 }
 0xcb6   :  { %v6395_v25 = vpop.eup %6394 }
 0xcb7   :  { %v6397_v0 = vpop.eup %6396  ;;  %v3263_v42 = vadd.f32 1.0, %v6395_v25 }
 0xcb8   :  { %v6399_v20 = vpop.eup %6398  ;;  %v3259_v17 = vadd.f32 1.0, %v6397_v0 }
 0xcb9   :  { %v6401_v58 = vpop.eup %6400  ;;  %v8357_v61 = vmul.f32 0.5, %v3263_v42  ;;  %v3260_v37 = vadd.f32 1.0, %v6399_v20 }
 0xcba   :  { %v6403_v36 = vpop.eup %6402  ;;  %v8360_v63 = vmul.f32 0.5, %v3259_v17  ;;  %v3261_v41 = vadd.f32 1.0, %v6401_v58 }
 0xcbb   :  { %v6405_v22 = vpop.eup %6404  ;;  %v8364_v45 = vmul.f32 0.5, %v3260_v37  ;;  %v3262_v25 = vadd.f32 1.0, %v6403_v36 }
 0xcbc   :  { %v8368_v0 = vmul.f32 0.5, %v3261_v41  ;;  %v3264_v42 = vadd.f32 1.0, %v6405_v22 }
 0xcbe   :  { %v6407_v32 = vpop.eup %6406  ;;  %v8376_v36 = vmul.f32 0.5, %v3264_v42 }
 0xd02   :  { %v3284_v47 = vpop.permute.xlu1 %3283 }
 0xd03   :  { %v3303_v5 = vmul.f32 %v3284_v47, %v8357_v61  ;;  %v8372_v47 = vmul.f32 0.5, %v3262_v25 }
 0xd04   :  { %v3276_v52 = vpop.permute.xlu0 %3275 }
 0xd05   :  { %v3299_v55 = vmul.f32 %v3276_v52, %v8360_v63  ;;  %3323 = vrot.lane.b32.xlu1 %v3303_v5, %s6676_s23  ;;  %v3265_v52 = vadd.f32 1.0, %v6407_v32 }
 0xd06   :  { %v3278_v56 = vpop.permute.xlu1 %3277 }
 0xd07   :  { %v3300_v20 = vmul.f32 %v3278_v56, %v8364_v45  ;;  %3315 = vrot.lane.b32.xlu0 %v3299_v55, %s6676_s23  ;;  %v6409_v55 = vpop.eup %6408  ;;  %v8381_v56 = vmul.f32 0.5, %v3265_v52 }
 0xd08   :  { %v3280_v17 = vpop.permute.xlu0 %3279  ;;  %v3266_v25 = vadd.f32 1.0, %v6409_v55 }
 0xd09   :  { %v3301_v58 = vmul.f32 %v3280_v17, %v8368_v0  ;;  %3317 = vrot.lane.b32.xlu1 %v3300_v20, %s6676_s23 }
 0xd0a   :  { %v3282_v5 = vpop.permute.xlu1 %3281  ;;  %v8386_v42 = vmul.f32 0.5, %v3266_v25 }
 0xd0b   :  { %v3302_v37 = vmul.f32 %v3282_v5, %v8372_v47  ;;  %3319 = vrot.lane.b32.xlu0 %v3301_v58, %s6676_s23 }
 0xd0c   :  { %v3286_v41 = vpop.permute.xlu0 %3285 }
 0xd0d   :  { %v3304_v22 = vmul.f32 %v3286_v41, %v8376_v36  ;;  %3321 = vrot.lane.b32.xlu1 %v3302_v37, %s6676_s23 }
 0xd0f   :  { %3325 = vrot.lane.b32.xlu0 %v3304_v22, %s6676_s23 }
 0xd10   :  { %v3288_v20 = vpop.permute.xlu0 %3287 }
 0xd11   :  { %v3305_v17 = vmul.f32 %v3288_v20, %v8381_v56 }
 0xd12   :  { %v3013_v5 = vpop.permute.xlu1 %3012 }
 0xd13   :  { %v3032_v58 = vadd.f32 %v3013_v5, %v7097_v18  ;;  %3327 = vrot.lane.b32.xlu0 %v3305_v17, %s6676_s23 }
 0xd14   :  { %v3290_v32 = vpop.permute.xlu0 %3289 }
 0xd15   :  { %6410 = vtanh.f32 %v3032_v58  ;;  %v3306_v41 = vmul.f32 %v3290_v32, %v8386_v42 }
 0xd16   :  { %v3005_v37 = vpop.permute.xlu1 %3004 }
 0xd17   :  { %v3028_v22 = vadd.f32 %v3005_v37, %v7085_v10  ;;  %3329 = vrot.lane.b32.xlu1 %v3306_v41, %s6676_s23 }
 0xd18   :  { %v3007_v52 = vpop.permute.xlu0 %3006 }
 0xd19   :  { %6412 = vtanh.f32 %v3028_v22  ;;  %v3029_v55 = vadd.f32 %v3007_v52, %v7087_v11 }
 0xd1a   :  { %v3011_v20 = vpop.permute.xlu1 %3010 }
 0xd1b   :  { %6414 = vtanh.f32 %v3029_v55  ;;  %v3031_v5 = vadd.f32 %v3011_v20, %v7093_v14 }
 0xd1c   :  { %v3009_v17 = vpop.permute.xlu0 %3008 }
 0xd1d   :  { %v3030_v25 = vadd.f32 %v3009_v17, %v7091_v13  ;;  %6416 = vtanh.f32 %v3031_v5 }
 0xd1e   :  { %v3015_v58 = vpop.permute.xlu1 %3014 }
 0xd1f   :  { %v6411_v18 = vpop.eup %6410  ;;  %6418 = vtanh.f32 %v3030_v25  ;;  %v3033_v32 = vadd.f32 %v3015_v58, %v7100_v33 }
 0xd20   :  { %v3017_v37 = vpop.permute.xlu0 %3016  ;;  %3068 = vrot.lane.b32.xlu1 %v6411_v18, %s6677_s5 }
 0xd21   :  { %6420 = vtanh.f32 %v3033_v32  ;;  %v3034_v52 = vadd.f32 %v3017_v37, %v7106_v53 }
 0xd22   :  { %v3019_v41 = vpop.permute.xlu1 %3018 }
 0xd23   :  { %v6413_v22 = vpop.eup %6412  ;;  %v3035_v55 = vadd.f32 %v3019_v41, %v7102_v39 }
 0xd24   :  { %3060 = vrot.lane.b32.xlu0 %v6413_v22, %s6677_s5 }
 0xd25   :  { %v6415_v20 = vpop.eup %6414  ;;  %6422 = vtanh.f32 %v3035_v55 }
 0xd26   :  { %3062 = vrot.lane.b32.xlu1 %v6415_v20, %s6677_s5  ;;  %6424 = vtanh.f32 %v3034_v52 }
 0xd27   :  { %v6417_v5 = vpop.eup %6416 }
 0xd29   :  { %v6419_v17 = vpop.eup %6418 }
 0xd2a   :  { %3064 = vrot.lane.b32.xlu0 %v6419_v17, %s6677_s5  ;;  %3066 = vrot.lane.b32.xlu1 %v6417_v5, %s6677_s5 }
 0xd2b   :  { %v6421_v18 = vpop.eup %6420 }
 0xd2e   :  { %3070 = vrot.lane.b32.xlu0 %v6421_v18, %s6677_s5 }
 0xd2f   :  { %v6423_v25 = vpop.eup %6422 }
 0xd30   :  { %3074 = vrot.lane.b32.xlu1 %v6423_v25, %s6677_s5  ;;  %v6425_v58 = vpop.eup %6424 }
 0xd32   :  { %3072 = vrot.lane.b32.xlu0 %v6425_v58, %s6677_s5 }
 0xd77   :  { %v3324_v32 = vpop.permute.xlu1 %3323 }
 0xd78   :  { %v3343_v37 = vadd.f32 %v3324_v32, %v9668_v57  ;;  %v9695_v57 = vld [vmem:[#allocation17_spill] sm:$0xff] }
 0xd79   :  { %v3316_v41 = vpop.permute.xlu0 %3315 }
 0xd7a   :  { %6426 = vtanh.f32 %v3343_v37  ;;  %v3339_v22 = vadd.f32 %v3316_v41, %v7116_v40 }
 0xd7b   :  { %v3318_v52 = vpop.permute.xlu1 %3317 }
 0xd7c   :  { %6428 = vtanh.f32 %v3339_v22  ;;  %v3340_v55 = vadd.f32 %v3318_v52, %v7127_v21 }
 0xd7d   :  { %v3320_v20 = vpop.permute.xlu0 %3319 }
 0xd7e   :  { %6430 = vtanh.f32 %v3340_v55  ;;  %v3341_v5 = vadd.f32 %v3320_v20, %v7111_v59 }
 0xd7f   :  { %v3322_v17 = vpop.permute.xlu1 %3321 }
 0xd80   :  { %6432 = vtanh.f32 %v3341_v5  ;;  %v3342_v18 = vadd.f32 %v3322_v17, %v9667_v15 }
 0xd81   :  { %v3326_v25 = vpop.permute.xlu0 %3325 }
 0xd82   :  { %6434 = vtanh.f32 %v3342_v18  ;;  %v3344_v58 = vadd.f32 %v3326_v25, %v9691_v44 }
 0xd84   :  { %v6427_v32 = vpop.eup %6426  ;;  %6436 = vtanh.f32 %v3344_v58 }
 0xd85   :  { %v3328_v37 = vpop.permute.xlu0 %3327  ;;  %3379 = vrot.lane.b32.xlu1 %v6427_v32, %s6677_s5  ;;  %v3092_v32 = vrot.slane %v8125_v62, 7  ;;  %v3095_v62 = vrot.slane %v8157_v27, 7 }
 0xd86   :  { %v6429_v41 = vpop.eup %6428  ;;  %v3345_v22 = vadd.f32 %v3328_v37, %v9693_v19  ;;  %v3044_v37 = vsub.f32 1.0, %v8307_v49  ;;  %v3094_v19 = vrot.slane %v9695_v57, 7  ;;  %v3048_v57 = vsub.f32 1.0, %v8302_v28 }
 0xd87   :  { %3371 = vrot.lane.b32.xlu0 %v6429_v41, %s6677_s5 }
 0xd88   :  { %v6431_v52 = vpop.eup %6430  ;;  %6438 = vtanh.f32 %v3345_v22 }
 0xd89   :  { %3373 = vrot.lane.b32.xlu1 %v6431_v52, %s6677_s5  ;;  %v3330_v55 = vpop.permute.xlu1 %3329  ;;  %v3093_v52 = vrot.slane %v8129_v3, 7  ;;  %v3046_v3 = vsub.f32 1.0, %v8319_v34 }
 0xd8a   :  { %v6433_v20 = vpop.eup %6432  ;;  %v3346_v5 = vadd.f32 %v3330_v55, %v9694_v1  ;;  %v3107_v55 = vmul.f32 %v3092_v32, %v8307_v49  ;;  %v3047_v49 = vsub.f32 1.0, %v8317_v2  ;;  %v3109_v32 = vmul.f32 %v3094_v19, %v8319_v34 }
 0xd8b   :  { %3375 = vrot.lane.b32.xlu0 %v6433_v20, %s6677_s5  ;;  %v3096_v34 = vrot.slane %v8159_v43, 7  ;;  %v3049_v19 = vsub.f32 1.0, %v8324_v12  ;;  %v9697_v43 = vrot.slane %v8145_v29, 7 }
 0xd8c   :  { %v6435_v17 = vpop.eup %6434  ;;  %6440 = vtanh.f32 %v3346_v5  ;;  %v3045_v5 = vsub.f32 1.0, %v8312_v50 }
 0xd8d   :  { %3377 = vrot.lane.b32.xlu1 %v6435_v17, %s6677_s5 }
 0xd8e   :  { %v6437_v18 = vpop.eup %6436 }
 0xd8f   :  { %3381 = vrot.lane.b32.xlu0 %v6437_v18, %s6677_s5 }
 0xd92   :  { %v6439_v25 = vpop.eup %6438  ;;  %v3069_v58 = vpop.permute.xlu1 %3068 }
 0xd93   :  { %3383 = vrot.lane.b32.xlu0 %v6439_v25, %s6677_s5  ;;  %v3108_v25 = vmul.f32 %v3093_v52, %v8312_v50 }
 0xd96   :  { %v6441_v41 = vpop.eup %6440  ;;  %v3061_v22 = vpop.permute.xlu0 %3060 }
 0xd97   :  { %v3084_v20 = vmul.f32 %v3061_v22, %v3044_v37  ;;  %3385 = vrot.lane.b32.xlu1 %v6441_v41, %s6677_s5  ;;  %v3110_v41 = vmul.f32 %v3095_v62, %v8317_v2 }
 0xd98   :  { %v3063_v17 = vpop.permute.xlu1 %3062 }
 0xd99   :  { %v8426_v18 = vadd.f32 %v3107_v55, %v3084_v20  ;;  %v3085_v1 = vmul.f32 %v3063_v17, %v3045_v5  ;;  %v3088_v17 = vmul.f32 %v3069_v58, %v3048_v57 }
 0xd9b   :  { %v8431_v15 = vadd.f32 %v3108_v25, %v3085_v1  ;;  %v3442_v55 = vrot.slane %v8426_v18, 4 }
 0xd9c   :  { %v3065_v37 = vpop.permute.xlu0 %3064  ;;  %v3067_v22 = vpop.permute.xlu1 %3066 }
 0xd9d   :  { %v3443_v50 = vrot.slane %v8431_v15, 3  ;;  %v3086_v52 = vmul.f32 %v3065_v37, %v3046_v3  ;;  %v3087_v27 = vmul.f32 %v3067_v22, %v3047_v49  ;;  %v3051_v3 = vsub.f32 1.0, %v8331_v35 }
 0xd9e   :  { %v3097_v49 = vrot.slane %v8154_v26, 7  ;;  %v3098_v37 = vrot.slane %v8170_v16, 7 }
 0xd9f   :  { %v3444_v1 = vsel %vm948_vm6, %v3443_v50, %v3442_v55  ;;  %v8441_v20 = vadd.f32 %v3109_v32, %v3086_v52  ;;  %v8443_v5 = vadd.f32 %v3110_v41, %v3087_v27  ;;  %v3112_v32 = vmul.f32 %v3096_v34, %v8324_v12 }
 0xda0   :  { %v3071_v2 = vpop.permute.xlu0 %3070  ;;  %v3111_v55 = vmul.f32 %v8302_v28, %v9697_v43  ;;  %v3050_v52 = vsub.f32 1.0, %v8329_v46  ;;  %v3114_v26 = vmul.f32 %v3098_v37, %v8331_v35  ;;  %v3113_v12 = vmul.f32 %v3097_v49, %v8329_v46 }
 0xda1   :  { %9696 = vst [vmem:[#allocation20_spill] sm:$0xff] %v8443_v5  ;;  %v3445_v25 = vrot.slane %v8441_v20, 2  ;;  %v3447_v62 = vrot.slane %v8443_v5, 1  ;;  %v3089_v41 = vmul.f32 %v3071_v2, %v3049_v19  ;;  %v3355_v49 = vsub.f32 1.0, %v8360_v63 }
 0xda2   :  { %v3075_v22 = vpop.permute.xlu1 %3074  ;;  %v8462_v5 = vadd.f32 %v3111_v55, %v3088_v17  ;;  %v3356_v43 = vsub.f32 1.0, %v8364_v45  ;;  %v3405_v55 = vrot.slane %v8195_v24, 7  ;;  %v3359_v24 = vsub.f32 1.0, %v8357_v61 }
 0xda3   :  { %v3446_v58 = vsel %vm951_vm7, %v3445_v25, %v3444_v1  ;;  %v3091_v50 = vmul.f32 %v3075_v22, %v3051_v3  ;;  %v8459_v57 = vadd.f32 %v3112_v32, %v3089_v41  ;;  %v3403_v3 = vrot.slane %v8184_v6, 7 }
 0xda4   :  { %v3448_v27 = vsel %vm954_vm8, %v3447_v62, %v3446_v58  ;;  %v3073_v16 = vpop.permute.xlu0 %3072  ;;  %v3404_v32 = vrot.slane %v8189_v4, 7  ;;  %v3357_v6 = vsub.f32 1.0, %v8368_v0  ;;  %v3420_v4 = vmul.f32 %v3405_v55, %v8368_v0 }
 0xda5   :  { %v3090_v34 = vmul.f32 %v3073_v16, %v3050_v52  ;;  %v9609_v29 = vrot.slane %v8459_v57, 7  ;;  %v8466_v28 = vadd.f32 %v3114_v26, %v3091_v50  ;;  %v3449_v19 = vsel %vm957_vm9, %v8462_v5, %v3448_v27 }
 0xda6   :  { %v3418_v41 = vmul.f32 %v3403_v3, %v8360_v63  ;;  %v3419_v52 = vmul.f32 %v3404_v32, %v8364_v45  ;;  %v3406_v26 = vrot.slane %v8207_v23, 7 }
 0xda7   :  { %v8468_v1 = vadd.f32 %v3113_v12, %v3090_v34  ;;  %v3454_v25 = vrot.slane %v8466_v28, 5  ;;  %v3451_v35 = vsel %vm960_vm10, %v9609_v29, %v3449_v19  ;;  %v3358_v34 = vsub.f32 1.0, %v8372_v47 }
 0xda8   :  { %v3421_v19 = vmul.f32 %v3406_v26, %v8372_v47  ;;  %v3408_v47 = vrot.slane %v8226_v9, 7 }
 0xda9   :  { %v3452_v2 = vrot.slane %v8468_v1, 6 }
 0xdab   :  { %v3453_v46 = vsel %vm963_vm11, %v3452_v2, %v3451_v35 }
 0xdac   :  { %v3455_v17 = vsel %vm966_vm12, %v3454_v25, %v3453_v46  ;;  %v3407_v46 = vrot.slane %v8215_v51, 7 }
 0xdad   :  { %3456 = vrot.lane.b32.xlu0 %v3455_v17, %s6677_s5  ;;  %v3360_v17 = vsub.f32 1.0, %v8376_v36 }
 0xdf7   :  { %v3380_v62 = vpop.permute.xlu1 %3379 }
 0xdf8   :  { %v3399_v3 = vmul.f32 %v3380_v62, %v3359_v24  ;;  %v3361_v62 = vsub.f32 1.0, %v8381_v56 }
 0xdf9   :  { %v3372_v37 = vpop.permute.xlu0 %3371 }
 0xdfa   :  { %v3395_v22 = vmul.f32 %v3372_v37, %v3355_v49 }
 0xdfb   :  { %v3374_v58 = vpop.permute.xlu1 %3373 }
 0xdfc   :  { %v8486_v50 = vadd.f32 %v3418_v41, %v3395_v22  ;;  %v3396_v27 = vmul.f32 %v3374_v58, %v3356_v43  ;;  %v3423_v41 = vmul.f32 %v3407_v46, %v8376_v36  ;;  %v9698_v43 = vrot.slane %v8204_v31, 7 }
 0xdfd   :  { %v3376_v16 = vpop.permute.xlu0 %3375  ;;  %v3424_v36 = vmul.f32 %v3408_v47, %v8381_v56 }
 0xdfe   :  { %v8491_v12 = vadd.f32 %v3419_v52, %v3396_v27  ;;  %v3397_v63 = vmul.f32 %v3376_v16, %v3357_v6  ;;  %v3753_v45 = vrot.slane %v8486_v50, 4  ;;  %v3422_v55 = vmul.f32 %v8357_v61, %v9698_v43 }
 0xdff   :  { %v3378_v2 = vpop.permute.xlu1 %3377  ;;  %v3409_v61 = vrot.slane %v8229_v30, 7 }
 0xe00   :  { %v3754_v25 = vrot.slane %v8491_v12, 3  ;;  %v8499_v35 = vadd.f32 %v3420_v4, %v3397_v63  ;;  %v3398_v23 = vmul.f32 %v3378_v2, %v3358_v34  ;;  %v8517_v6 = vadd.f32 %v3422_v55, %v3399_v3 }
 0xe01   :  { %v3382_v0 = vpop.permute.xlu0 %3381  ;;  %v3362_v4 = vsub.f32 1.0, %v8386_v42 }
 0xe02   :  { %v3755_v49 = vsel %vm948_vm6, %v3754_v25, %v3753_v45  ;;  %v3756_v37 = vrot.slane %v8499_v35, 2  ;;  %v8505_v32 = vadd.f32 %v3421_v19, %v3398_v23  ;;  %v3400_v22 = vmul.f32 %v3382_v0, %v3360_v17  ;;  %v9699_v0 = vld [vmem:[#allocation18_spill] sm:$0xff] }
 0xe03   :  { %v3425_v19 = vmul.f32 %v3409_v61, %v8386_v42 }
 0xe04   :  { %v3757_v51 = vsel %vm951_vm7, %v3756_v37, %v3755_v49  ;;  %v3758_v58 = vrot.slane %v8505_v32, 1  ;;  %v8515_v52 = vadd.f32 %v3423_v41, %v3400_v22 }
 0xe05   :  { %v3384_v27 = vpop.permute.xlu0 %3383 }
 0xe06   :  { %v3759_v9 = vsel %vm954_vm8, %v3758_v58, %v3757_v51  ;;  %v3401_v26 = vmul.f32 %v3384_v27, %v3361_v62  ;;  %v9608_v31 = vrot.slane %v8515_v52, 7 }
 0xe07   :  { %v3760_v63 = vsel %vm957_vm9, %v8517_v6, %v3759_v9 }
 0xe08   :  { %v8523_v16 = vadd.f32 %v3424_v36, %v3401_v26  ;;  %v3762_v56 = vsel %vm960_vm10, %v9608_v31, %v3760_v63 }
 0xe09   :  { %v3386_v34 = vpop.permute.xlu1 %3385 }
 0xe0a   :  { %v3763_v24 = vrot.slane %v8523_v16, 6  ;;  %v3402_v2 = vmul.f32 %v3386_v34, %v3362_v4  ;;  %v9700_v4 = vld [vmem:[#allocation10_spill] sm:$0xff]  ;;  %v9701_v34 = vld [vmem:[#allocation19_spill] sm:$0xff] }
 0xe0c   :  { %v8533_v45 = vadd.f32 %v3425_v19, %v3402_v2  ;;  %v3764_v30 = vsel %vm963_vm11, %v3763_v24, %v3762_v56 }
 0xe0e   :  { %v3765_v25 = vrot.slane %v8533_v45, 5 }
 0xe10   :  { %v3766_v23 = vsel %vm966_vm12, %v3765_v25, %v3764_v30 }
 0xe11   :  { %3767 = vrot.lane.b32.xlu1 %v3766_v23, %s6677_s5 }
 0xe1f   :  { %v3457_v46 = vpop.permute.xlu0 %3456 }
 0xe20   :  { %5896 = vmatmul.mubr.msk.f32.vlgmr.msra.gmra.mrb[18].mxu0 %vm244_vm0, %v3457_v46 }
 0xe21   :  { %6075 = vmatpush3.bf16.msra.mxu0 %v9687_v60  ;;  %5917 = vmatprep.mubr.msk.f32.mxu0 %vm6673_vm2, %v9662_v38 }
 0xe22   :  { %6076 = vmatprep.subr.bf16.mxu0 %v9663_v8 }
 0xe25   :  { %6078 = vmatpush3.bf16.msra.mxu0 %v9688_v7 }
 0xe26   :  { %6085 = vmatprep.subr.bf16.mxu0 %v9663_v8 }
 0xe83   :  { %v3768_v42 = vpop.permute.xlu1 %3767 }
 0xe84   :  { %5907 = vmatmul.mubr.msk.f32.vlgmr.msra.gmra.mrb[26].mxu1 %vm244_vm0, %v3768_v42 }
 0xe85   :  { %6081 = vmatpush3.bf16.msra.mxu1 %v6884_v48  ;;  %5928 = vmatprep.mubr.msk.f32.mxu1 %vm6673_vm2, %v9662_v38 }
 0xe86   :  { %6082 = vmatprep.subr.bf16.mxu1 %v9663_v8 }
 0xe89   :  { %6084 = vmatpush3.bf16.msra.mxu1 %v9677_v54 }
 0xe8a   :  { %6091 = vmatprep.subr.bf16.mxu1 %v9663_v8 }
 0xef3   :  { %v3526_v17 = vpop.f32.mrb[18].mxu0 }
 0xef4   :  { %v3527_v3 = vadd.f32 %v9699_v0, %v3526_v17  ;;  %v5897_v49 = vpop.f32.mrb[19].mxu0 }
 0xef6   :  { %v3531_v37 = vrot.slane %v3527_v3, 3  ;;  %v3532_v47 = vrot.slane %v3527_v3, 4  ;;  %v3533_v41 = vrot.slane %v3527_v3, 5  ;;  %v3534_v22 = vrot.slane %v3527_v3, 6 }
 0xef7   :  { %v3535_v43 = vrot.slane %v3527_v3, 7  ;;  %v3536_v55 = vrot.slane %v3527_v3, 1  ;;  %v3537_v51 = vrot.slane %v3527_v3, 2  ;;  %v3551_v42 = vadd.f32 %v3527_v3, %v7100_v33 }
 0xef8   :  { %3586 = vrot.lane.b32.xlu0 %v3531_v37, %s6676_s23  ;;  %3588 = vrot.lane.b32.xlu1 %v3532_v47, %s6676_s23  ;;  %v3546_v58 = vadd.f32 %v3531_v37, %v7085_v10  ;;  %v3547_v62 = vadd.f32 %v3532_v47, %v7087_v11  ;;  %v3548_v9 = vadd.f32 %v3533_v41, %v7091_v13 }
 0xef9   :  { %v3549_v26 = vadd.f32 %v3534_v22, %v7093_v14  ;;  %v3550_v63 = vadd.f32 %v3535_v43, %v9700_v4  ;;  %v3552_v30 = vadd.f32 %v3536_v55, %v7106_v53  ;;  %v3553_v49 = vadd.f32 %v3537_v51, %v7102_v39 }
 0xefa   :  { %v3554_v27 = vmul.f32 0.5, %v3546_v58  ;;  %v3555_v36 = vmul.f32 0.5, %v3547_v62  ;;  %v3556_v2 = vmul.f32 0.5, %v3548_v9  ;;  %v3559_v47 = vmul.f32 0.5, %v3551_v42 }
 0xefb   :  { %v3557_v25 = vmul.f32 0.5, %v3549_v26  ;;  %v3558_v46 = vmul.f32 0.5, %v3550_v63  ;;  %v3560_v0 = vmul.f32 0.5, %v3552_v30 }
 0xefc   :  { %3590 = vrot.lane.b32.xlu0 %v3533_v41, %s6676_s23  ;;  %3592 = vrot.lane.b32.xlu1 %v3534_v22, %s6676_s23  ;;  %6442 = vtanh.f32 %v3554_v27 }
 0xefd   :  { %6444 = vtanh.f32 %v3555_v36 }
 0xefe   :  { %6446 = vtanh.f32 %v3556_v2 }
 0xeff   :  { %6448 = vtanh.f32 %v3557_v25 }
 0xf00   :  { %3594 = vrot.lane.b32.xlu0 %v3535_v43, %s6676_s23  ;;  %3598 = vrot.lane.b32.xlu1 %v3536_v55, %s6676_s23  ;;  %6450 = vtanh.f32 %v3558_v46  ;;  %v3561_v55 = vmul.f32 0.5, %v3553_v49 }
 0xf01   :  { %6452 = vtanh.f32 %v3560_v0 }
 0xf02   :  { %6454 = vtanh.f32 %v3559_v47 }
 0xf03   :  { %6456 = vtanh.f32 %v3561_v55 }
 0xf04   :  { %3596 = vrot.lane.b32.xlu0 %v3527_v3, %s6676_s23  ;;  %3600 = vrot.lane.b32.xlu1 %v3537_v51, %s6676_s23 }
 0xf06   :  { %v6443_v41 = vpop.eup %6442 }
 0xf07   :  { %v6445_v3 = vpop.eup %6444  ;;  %v3570_v51 = vadd.f32 1.0, %v6443_v41 }
 0xf08   :  { %v3571_v58 = vadd.f32 1.0, %v6445_v3  ;;  %v6447_v62 = vpop.eup %6446 }
 0xf09   :  { %v6449_v9 = vpop.eup %6448  ;;  %v8603_v36 = vmul.f32 0.5, %v3570_v51 }
 0xf0a   :  { %v8605_v26 = vmul.f32 0.5, %v3571_v58  ;;  %v6451_v63 = vpop.eup %6450  ;;  %v3573_v42 = vadd.f32 1.0, %v6449_v9 }
 0xf0b   :  { %v6453_v25 = vpop.eup %6452  ;;  %v3574_v0 = vadd.f32 1.0, %v6451_v63 }
 0xf0c   :  { %v6455_v49 = vpop.eup %6454  ;;  %v8614_v55 = vmul.f32 0.5, %v3573_v42  ;;  %v3576_v58 = vadd.f32 1.0, %v6453_v25 }
 0xf0d   :  { %v8617_v51 = vmul.f32 0.5, %v3574_v0 }
 0xf0e   :  { %v8621_v63 = vmul.f32 0.5, %v3576_v58 }
 0xf57   :  { %v3837_v61 = vpop.f32.mrb[26].mxu1 }
 0xf58   :  { %v8568_v24 = vadd.f32 %v9701_v34, %v3837_v61  ;;  %v5908_v19 = vpop.f32.mrb[27].mxu1  ;;  %v3572_v61 = vadd.f32 1.0, %v6447_v62  ;;  %v3575_v62 = vadd.f32 1.0, %v6455_v49 }
 0xf5a   :  { %3907 = vrot.lane.b32.xlu1 %v8568_v24, %s6676_s23  ;;  %v3842_v56 = vrot.slane %v8568_v24, 3  ;;  %v3843_v23 = vrot.slane %v8568_v24, 4  ;;  %v3844_v17 = vrot.slane %v8568_v24, 5  ;;  %v3845_v37 = vrot.slane %v8568_v24, 6 }
 0xf5b   :  { %v3847_v22 = vrot.slane %v8568_v24, 1  ;;  %v3846_v43 = vrot.slane %v8568_v24, 7  ;;  %v3848_v27 = vrot.slane %v8568_v24, 2  ;;  %v8611_v46 = vmul.f32 0.5, %v3572_v61 }
 0xf5c   :  { %3897 = vrot.lane.b32.xlu0 %v3842_v56, %s6676_s23  ;;  %v3862_v58 = vadd.f32 %v8568_v24, %v9691_v44 }
 0xf5e   :  { %3899 = vrot.lane.b32.xlu1 %v3843_v23, %s6676_s23 }
 0xf60   :  { %3901 = vrot.lane.b32.xlu0 %v3844_v17, %s6676_s23 }
 0xf62   :  { %3903 = vrot.lane.b32.xlu1 %v3845_v37, %s6676_s23 }
 0xf64   :  { %3909 = vrot.lane.b32.xlu0 %v3847_v22, %s6676_s23 }
 0xf66   :  { %3905 = vrot.lane.b32.xlu1 %v3846_v43, %s6676_s23 }
 0xf68   :  { %3911 = vrot.lane.b32.xlu0 %v3848_v27, %s6676_s23 }
 0xf6a   :  { %v3587_v34 = vpop.permute.xlu0 %3586  ;;  %v3589_v19 = vpop.permute.xlu1 %3588 }
 0xf6b   :  { %v3610_v2 = vmul.f32 %v3587_v34, %v8603_v36  ;;  %v3611_v30 = vmul.f32 %v3589_v19, %v8605_v26  ;;  %v6457_v34 = vpop.eup %6456 }
 0xf6c   :  { %v3577_v42 = vadd.f32 1.0, %v6457_v34  ;;  %v3858_v34 = vadd.f32 %v3843_v23, %v7127_v21 }
 0xf6d   :  { %3626 = vrot.lane.b32.xlu1 %v3610_v2, %s6676_s23  ;;  %3628 = vrot.lane.b32.xlu0 %v3611_v30, %s6676_s23  ;;  %v8625_v30 = vmul.f32 0.5, %v3575_v62  ;;  %v3857_v62 = vadd.f32 %v3842_v56, %v7116_v40 }
 0xf6e   :  { %v3591_v47 = vpop.permute.xlu0 %3590  ;;  %v3593_v41 = vpop.permute.xlu1 %3592 }
 0xf6f   :  { %v3612_v3 = vmul.f32 %v3591_v47, %v8611_v46  ;;  %v3613_v61 = vmul.f32 %v3593_v41, %v8614_v55 }
 0xf71   :  { %3630 = vrot.lane.b32.xlu0 %v3612_v3, %s6676_s23  ;;  %v8629_v3 = vmul.f32 0.5, %v3577_v42 }
 0xf72   :  { %v3595_v19 = vpop.permute.xlu0 %3594  ;;  %v3599_v2 = vpop.permute.xlu1 %3598 }
 0xf73   :  { %v3614_v9 = vmul.f32 %v3595_v19, %v8617_v51  ;;  %v3616_v25 = vmul.f32 %v3599_v2, %v8621_v63  ;;  %v3870_v19 = vmul.f32 0.5, %v3862_v58  ;;  %v3859_v2 = vadd.f32 %v3844_v17, %v7111_v59  ;;  %v9705_v58 = vld [vmem:[#allocation9_spill] sm:$0xff] }
 0xf75   :  { %3634 = vrot.lane.b32.xlu1 %v3614_v9, %s6676_s23  ;;  %3632 = vrot.lane.b32.xlu0 %v3613_v61, %s6676_s23  ;;  %v3865_v61 = vmul.f32 0.5, %v3857_v62  ;;  %v9702_v9 = vld [vmem:[#allocation12_spill] sm:$0xff]  ;;  %6458 = vtanh.f32 %v3870_v19 }
 0xf76   :  { %v3597_v0 = vpop.permute.xlu0 %3596  ;;  %v3601_v47 = vpop.permute.xlu1 %3600  ;;  %v3860_v42 = vadd.f32 %v3845_v37, %v9702_v9  ;;  %v3864_v37 = vadd.f32 %v3848_v27, %v9705_v58 }
 0xf77   :  { %v3615_v49 = vmul.f32 %v3597_v0, %v8625_v30  ;;  %v3617_v41 = vmul.f32 %v3601_v47, %v8629_v3  ;;  %v3866_v0 = vmul.f32 0.5, %v3858_v34  ;;  %6460 = vtanh.f32 %v3865_v61  ;;  %v9704_v47 = vld [vmem:[#allocation15_spill] sm:$0xff] }
 0xf78   :  { %v3861_v23 = vadd.f32 %v3846_v43, %v9704_v47 }
 0xf79   :  { %3636 = vrot.lane.b32.xlu0 %v3615_v49, %s6676_s23  ;;  %3638 = vrot.lane.b32.xlu1 %v3616_v25, %s6676_s23  ;;  %v9703_v25 = vld [vmem:[#allocation16_spill] sm:$0xff]  ;;  %v3867_v49 = vmul.f32 0.5, %v3859_v2  ;;  %6462 = vtanh.f32 %v3866_v0 }
 0xf7a   :  { %v3863_v56 = vadd.f32 %v3847_v22, %v9703_v25  ;;  %v3869_v62 = vmul.f32 0.5, %v3861_v23  ;;  %v3872_v22 = vmul.f32 0.5, %v3864_v37 }
 0xf7b   :  { %6464 = vtanh.f32 %v3867_v49 }
 0xf7c   :  { %v3871_v17 = vmul.f32 0.5, %v3863_v56 }
 0xf7d   :  { %3640 = vrot.lane.b32.xlu1 %v3617_v41, %s6676_s23  ;;  %v3868_v41 = vmul.f32 0.5, %v3860_v42 }
 0xf7f   :  { %6466 = vtanh.f32 %v3868_v41  ;;  %v6459_v34 = vpop.eup %6458 }
 0xf80   :  { %6468 = vtanh.f32 %v3871_v17  ;;  %v3886_v2 = vadd.f32 1.0, %v6459_v34 }
 0xf81   :  { %6470 = vtanh.f32 %v3869_v62  ;;  %v6461_v19 = vpop.eup %6460 }
 0xf82   :  { %6472 = vtanh.f32 %v3872_v22  ;;  %v8658_v43 = vmul.f32 0.5, %v3886_v2  ;;  %v3881_v42 = vadd.f32 1.0, %v6461_v19 }
 0xf83   :  { %v6463_v61 = vpop.eup %6462 }
 0xf84   :  { %v3882_v0 = vadd.f32 1.0, %v6463_v61  ;;  %v8661_v23 = vmul.f32 0.5, %v3881_v42 }
 0xf85   :  { %v6465_v31 = vpop.eup %6464 }
 0xf86   :  { %v8664_v17 = vmul.f32 0.5, %v3882_v0  ;;  %v3883_v37 = vadd.f32 1.0, %v6465_v31 }
 0xf88   :  { %v8668_v29 = vmul.f32 0.5, %v3883_v37 }
 0xf89   :  { %v6467_v56 = vpop.eup %6466 }
 0xf8a   :  { %v6469_v41 = vpop.eup %6468  ;;  %v3884_v62 = vadd.f32 1.0, %v6467_v56 }
 0xf8b   :  { %v6471_v34 = vpop.eup %6470 }
 0xf8c   :  { %v8672_v42 = vmul.f32 0.5, %v3884_v62  ;;  %v3885_v0 = vadd.f32 1.0, %v6471_v34 }
 0xf8e   :  { %v8680_v37 = vmul.f32 0.5, %v3885_v0 }
 0xfcc   :  { %v3908_v49 = vpop.permute.xlu1 %3907 }
 0xfcd   :  { %v3926_v24 = vmul.f32 %v3908_v49, %v8658_v43  ;;  %v3887_v49 = vadd.f32 1.0, %v6469_v41 }
 0xfce   :  { %v3898_v27 = vpop.permute.xlu0 %3897 }
 0xfcf   :  { %3947 = vrot.lane.b32.xlu0 %v3926_v24, %s6676_s23  ;;  %v3921_v2 = vmul.f32 %v3898_v27, %v8661_v23  ;;  %v6473_v24 = vpop.eup %6472  ;;  %v8676_v48 = vmul.f32 0.5, %v3887_v49 }
 0xfd0   :  { %v3900_v22 = vpop.permute.xlu1 %3899 }
 0xfd1   :  { %v3922_v19 = vmul.f32 %v3900_v22, %v8664_v17  ;;  %v3888_v22 = vadd.f32 1.0, %v6473_v24 }
 0xfd2   :  { %v3902_v61 = vpop.permute.xlu0 %3901 }
 0xfd3   :  { %3937 = vrot.lane.b32.xlu0 %v3921_v2, %s6676_s23  ;;  %3939 = vrot.lane.b32.xlu1 %v3922_v19, %s6676_s23  ;;  %v3923_v56 = vmul.f32 %v3902_v61, %v8668_v29  ;;  %v8684_v19 = vmul.f32 0.5, %v3888_v22 }
 0xfd4   :  { %v3904_v31 = vpop.permute.xlu1 %3903 }
 0xfd5   :  { %v3924_v54 = vmul.f32 %v3904_v31, %v8672_v42 }
 0xfd6   :  { %v3910_v27 = vpop.permute.xlu0 %3909 }
 0xfd7   :  { %3941 = vrot.lane.b32.xlu0 %v3923_v56, %s6676_s23  ;;  %3943 = vrot.lane.b32.xlu1 %v3924_v54, %s6676_s23  ;;  %v3927_v41 = vmul.f32 %v3910_v27, %v8676_v48 }
 0xfd8   :  { %v3906_v62 = vpop.permute.xlu1 %3905 }
 0xfd9   :  { %v3925_v34 = vmul.f32 %v3906_v62, %v8680_v37 }
 0xfda   :  { %v3912_v2 = vpop.permute.xlu0 %3911 }
 0xfdb   :  { %3949 = vrot.lane.b32.xlu1 %v3927_v41, %s6676_s23  ;;  %3945 = vrot.lane.b32.xlu0 %v3925_v34, %s6676_s23  ;;  %v3928_v61 = vmul.f32 %v3912_v2, %v8684_v19 }
 0xfdf   :  { %v3629_v49 = vpop.permute.xlu0 %3628  ;;  %3951 = vrot.lane.b32.xlu1 %v3928_v61, %s6676_s23  ;;  %v3627_v54 = vpop.permute.xlu1 %3626 }
 0xfe0   :  { %v3651_v0 = vadd.f32 %v3629_v49, %v7087_v11  ;;  %v3650_v24 = vadd.f32 %v3627_v54, %v7085_v10 }
 0xfe2   :  { %6474 = vtanh.f32 %v3651_v0 }
 0xfe3   :  { %6476 = vtanh.f32 %v3650_v24  ;;  %v3631_v31 = vpop.permute.xlu0 %3630 }
 0xfe4   :  { %v3652_v56 = vadd.f32 %v3631_v31, %v7091_v13 }
 0xfe6   :  { %6478 = vtanh.f32 %v3652_v56 }
 0xfe7   :  { %v3633_v27 = vpop.permute.xlu0 %3632  ;;  %v3635_v22 = vpop.permute.xlu1 %3634 }
 0xfe8   :  { %v3653_v62 = vadd.f32 %v3633_v27, %v7093_v14  ;;  %v3654_v41 = vadd.f32 %v3635_v22, %v9700_v4 }
 0xfea   :  { %6480 = vtanh.f32 %v3653_v62 }
 0xfeb   :  { %6482 = vtanh.f32 %v3654_v41  ;;  %v3637_v34 = vpop.permute.xlu0 %3636  ;;  %v3639_v2 = vpop.permute.xlu1 %3638 }
 0xfec   :  { %v6475_v61 = vpop.eup %6474  ;;  %v3655_v49 = vadd.f32 %v3637_v34, %v7100_v33  ;;  %v3656_v54 = vadd.f32 %v3639_v2, %v7106_v53 }
 0xfed   :  { %v6477_v0 = vpop.eup %6476  ;;  %3684 = vrot.lane.b32.xlu1 %v6475_v61, %s6677_s5 }
 0xfee   :  { %6484 = vtanh.f32 %v3655_v49  ;;  %3682 = vrot.lane.b32.xlu0 %v6477_v0, %s6677_s5 }
 0xfef   :  { %6486 = vtanh.f32 %v3656_v54  ;;  %v3641_v24 = vpop.permute.xlu1 %3640 }
 0xff0   :  { %v6479_v31 = vpop.eup %6478  ;;  %v3657_v56 = vadd.f32 %v3641_v24, %v7102_v39 }
 0xff2   :  { %6488 = vtanh.f32 %v3657_v56  ;;  %3686 = vrot.lane.b32.xlu0 %v6479_v31, %s6677_s5 }
 0xff4   :  { %v6481_v27 = vpop.eup %6480 }
 0xff5   :  { %v6483_v22 = vpop.eup %6482  ;;  %3688 = vrot.lane.b32.xlu1 %v6481_v27, %s6677_s5 }
 0xff6   :  { %3690 = vrot.lane.b32.xlu0 %v6483_v22, %s6677_s5 }
 0xff8   :  { %v6485_v62 = vpop.eup %6484 }
 0xff9   :  { %v6487_v41 = vpop.eup %6486 }
 0xffa   :  { %3692 = vrot.lane.b32.xlu0 %v6485_v62, %s6677_s5  ;;  %3694 = vrot.lane.b32.xlu1 %v6487_v41, %s6677_s5 }
 0xffc   :  { %v6489_v34 = vpop.eup %6488 }
 0xffe   :  { %3696 = vrot.lane.b32.xlu1 %v6489_v34, %s6677_s5 }
0x1041   :  { %v3948_v2 = vpop.permute.xlu0 %3947 }
0x1045   :  { %v3938_v61 = vpop.permute.xlu0 %3937  ;;  %v3940_v49 = vpop.permute.xlu1 %3939 }
0x1046   :  { %v3961_v54 = vadd.f32 %v3938_v61, %v7116_v40  ;;  %v3962_v0 = vadd.f32 %v3940_v49, %v7127_v21  ;;  %v3966_v61 = vadd.f32 %v3948_v2, %v9691_v44 }
0x1048   :  { %6490 = vtanh.f32 %v3961_v54 }
0x1049   :  { %6492 = vtanh.f32 %v3962_v0  ;;  %v3942_v24 = vpop.permute.xlu0 %3941  ;;  %v3944_v31 = vpop.permute.xlu1 %3943 }
0x104a   :  { %v3963_v56 = vadd.f32 %v3942_v24, %v7111_v59  ;;  %v3964_v27 = vadd.f32 %v3944_v31, %v9702_v9 }
0x104c   :  { %6494 = vtanh.f32 %v3963_v56 }
0x104d   :  { %6496 = vtanh.f32 %v3964_v27  ;;  %v3946_v22 = vpop.permute.xlu0 %3945  ;;  %v3950_v62 = vpop.permute.xlu1 %3949 }
0x104e   :  { %v3965_v41 = vadd.f32 %v3946_v22, %v9704_v47  ;;  %v3967_v34 = vadd.f32 %v3950_v62, %v9703_v25  ;;  %v3715_v62 = vrot.slane %v8431_v15, 7  ;;  %v3716_v15 = vrot.slane %v8441_v20, 7 }
0x1050   :  { %6498 = vtanh.f32 %v3965_v41  ;;  %v3667_v41 = vsub.f32 1.0, %v8605_v26 }
0x1051   :  { %6500 = vtanh.f32 %v3967_v34  ;;  %v3952_v49 = vpop.permute.xlu1 %3951  ;;  %v3666_v34 = vsub.f32 1.0, %v8603_v36 }
0x1052   :  { %v6491_v54 = vpop.eup %6490  ;;  %v3968_v0 = vadd.f32 %v3952_v49, %v9705_v58  ;;  %6502 = vtanh.f32 %v3966_v61 }
0x1053   :  { %v6493_v21 = vpop.eup %6492  ;;  %3993 = vrot.lane.b32.xlu0 %v6491_v54, %s6677_s5  ;;  %v3730_v54 = vmul.f32 %v3715_v62, %v8605_v26  ;;  %v9706_v62 = vld [vmem:[#allocation20_spill] sm:$0xff] }
0x1054   :  { %6504 = vtanh.f32 %v3968_v0  ;;  %3995 = vrot.lane.b32.xlu1 %v6493_v21, %s6677_s5  ;;  %v3714_v21 = vrot.slane %v8426_v18, 7  ;;  %v3668_v18 = vsub.f32 1.0, %v8611_v46 }
0x1056   :  { %v6495_v24 = vpop.eup %6494 }
0x1057   :  { %v6497_v31 = vpop.eup %6496  ;;  %3997 = vrot.lane.b32.xlu0 %v6495_v24, %s6677_s5  ;;  %v3729_v24 = vmul.f32 %v3714_v21, %v8603_v36  ;;  %v3669_v36 = vsub.f32 1.0, %v8614_v55  ;;  %v3718_v21 = vrot.slane %v8462_v5, 7 }
0x1058   :  { %3999 = vrot.lane.b32.xlu1 %v6497_v31, %s6677_s5 }
0x105a   :  { %v6499_v2 = vpop.eup %6498 }
0x105b   :  { %v6501_v56 = vpop.eup %6500  ;;  %4001 = vrot.lane.b32.xlu0 %v6499_v2, %s6677_s5 }
0x105c   :  { %4005 = vrot.lane.b32.xlu1 %v6501_v56, %s6677_s5  ;;  %v6503_v27 = vpop.eup %6502 }
0x105e   :  { %v6505_v22 = vpop.eup %6504 }
0x105f   :  { %4003 = vrot.lane.b32.xlu0 %v6503_v27, %s6677_s5  ;;  %v3685_v61 = vpop.permute.xlu1 %3684 }
0x1060   :  { %v3683_v49 = vpop.permute.xlu0 %3682  ;;  %4007 = vrot.lane.b32.xlu1 %v6505_v22, %s6677_s5  ;;  %v3707_v0 = vmul.f32 %v3685_v61, %v3667_v41  ;;  %v3731_v22 = vmul.f32 %v3716_v15, %v8611_v46  ;;  %v3717_v41 = vrot.slane %v9706_v62, 7  ;;  %v3670_v61 = vsub.f32 1.0, %v8617_v51 }
0x1061   :  { %v3706_v31 = vmul.f32 %v3683_v49, %v3666_v34  ;;  %v3719_v15 = vrot.slane %v8468_v1, 7  ;;  %v9707_v1 = vrot.slane %v8459_v57, 7 }
0x1062   :  { %v8728_v2 = vadd.f32 %v3730_v54, %v3707_v0  ;;  %v3732_v0 = vmul.f32 %v3717_v41, %v8614_v55 }
0x1063   :  { %v8731_v56 = vadd.f32 %v3729_v24, %v3706_v31  ;;  %v3735_v62 = vmul.f32 %v3719_v15, %v8621_v63 }
0x1064   :  { %v4065_v27 = vrot.slane %v8728_v2, 4  ;;  %v3687_v44 = vpop.permute.xlu0 %3686 }
0x1065   :  { %v4064_v58 = vrot.slane %v8731_v56, 5  ;;  %v3708_v26 = vmul.f32 %v3687_v44, %v3668_v18  ;;  %v3733_v44 = vmul.f32 %v3718_v21, %v8617_v51 }
0x1067   :  { %v4066_v20 = vsel %vm948_vm6, %v4065_v27, %v4064_v58  ;;  %v8741_v34 = vadd.f32 %v3731_v22, %v3708_v26  ;;  %v3689_v49 = vpop.permute.xlu1 %3688  ;;  %v3671_v27 = vsub.f32 1.0, %v8625_v30  ;;  %v3672_v22 = vsub.f32 1.0, %v8621_v63 }
0x1068   :  { %v3691_v54 = vpop.permute.xlu0 %3690  ;;  %v3709_v24 = vmul.f32 %v3689_v49, %v3669_v36  ;;  %v3734_v36 = vmul.f32 %v8625_v30, %v9707_v1 }
0x1069   :  { %v4067_v46 = vrot.slane %v8741_v34, 3  ;;  %v3710_v31 = vmul.f32 %v3691_v54, %v3670_v61  ;;  %v3720_v61 = vrot.slane %v8466_v28, 7 }
0x106a   :  { %v8748_v18 = vadd.f32 %v3732_v0, %v3709_v24  ;;  %v3673_v24 = vsub.f32 1.0, %v8629_v3 }
0x106b   :  { %v4068_v5 = vsel %vm951_vm7, %v4067_v46, %v4066_v20  ;;  %v8751_v58 = vadd.f32 %v3733_v44, %v3710_v31  ;;  %v3736_v44 = vmul.f32 %v3720_v61, %v8629_v3  ;;  %v4025_v3 = vrot.slane %v8486_v50, 7 }
0x106c   :  { %v4069_v55 = vrot.slane %v8748_v18, 2  ;;  %v3693_v26 = vpop.permute.xlu0 %3692  ;;  %v3695_v41 = vpop.permute.xlu1 %3694  ;;  %v3979_v50 = vsub.f32 1.0, %v8668_v29 }
0x106d   :  { %v4071_v51 = vrot.slane %v8751_v58, 1  ;;  %v3711_v21 = vmul.f32 %v3693_v26, %v3671_v27  ;;  %v3712_v20 = vmul.f32 %v3695_v41, %v3672_v22  ;;  %v3977_v22 = vsub.f32 1.0, %v8661_v23 }
0x106e   :  { %v4070_v49 = vsel %vm954_vm8, %v4069_v55, %v4068_v5  ;;  %v4026_v55 = vrot.slane %v8491_v12, 7  ;;  %v4040_v41 = vmul.f32 %v4025_v3, %v8661_v23 }
0x106f   :  { %v8763_v54 = vadd.f32 %v3734_v36, %v3711_v21  ;;  %v8765_v0 = vadd.f32 %v3735_v62, %v3712_v20  ;;  %v4072_v63 = vsel %vm957_vm9, %v4071_v51, %v4070_v49  ;;  %v3978_v62 = vsub.f32 1.0, %v8664_v17 }
0x1070   :  { %v3697_v46 = vpop.permute.xlu1 %3696  ;;  %v4041_v36 = vmul.f32 %v4026_v55, %v8664_v17  ;;  %v4027_v20 = vrot.slane %v8499_v35, 7  ;;  %v4028_v49 = vrot.slane %v8505_v32, 7  ;;  %v3981_v32 = vsub.f32 1.0, %v8680_v37 }
0x1071   :  { %v3713_v57 = vmul.f32 %v3697_v46, %v3673_v24  ;;  %v9617_v30 = vrot.slane %v8765_v0, 7  ;;  %v4073_v28 = vsel %vm960_vm10, %v8763_v54, %v4072_v63  ;;  %v3980_v63 = vsub.f32 1.0, %v8672_v42 }
0x1072   :  { %v4042_v46 = vmul.f32 %v4027_v20, %v8668_v29  ;;  %v4043_v35 = vmul.f32 %v4028_v49, %v8672_v42  ;;  %v3983_v55 = vsub.f32 1.0, %v8676_v48  ;;  %v4031_v20 = vrot.slane %v8533_v45, 7 }
0x1073   :  { %v8771_v31 = vadd.f32 %v3736_v44, %v3713_v57  ;;  %v4075_v5 = vsel %vm963_vm11, %v9617_v30, %v4073_v28 }
0x1075   :  { %v4076_v15 = vrot.slane %v8771_v31, 6 }
0x1077   :  { %v4077_v27 = vsel %vm966_vm12, %v4076_v15, %v4075_v5  ;;  %v4029_v15 = vrot.slane %v8517_v6, 7 }
0x1078   :  { %4078 = vrot.lane.b32.xlu0 %v4077_v27, %s6677_s5  ;;  %v4030_v27 = vrot.slane %v8523_v16, 7 }
0x1079   :  { %v4044_v42 = vmul.f32 %v4029_v15, %v8680_v37 }
0x10c5   :  { %v3994_v26 = vpop.permute.xlu0 %3993 }
0x10c6   :  { %v4017_v51 = vmul.f32 %v3994_v26, %v3977_v22  ;;  %v3996_v1 = vpop.permute.xlu1 %3995 }
0x10c7   :  { %v4018_v21 = vmul.f32 %v3996_v1, %v3978_v62 }
0x10c8   :  { %v8788_v61 = vadd.f32 %v4040_v41, %v4017_v51  ;;  %v4046_v51 = vmul.f32 %v4030_v27, %v8676_v48  ;;  %v9708_v48 = vrot.slane %v8515_v52, 7 }
0x10c9   :  { %v8792_v24 = vadd.f32 %v4041_v36, %v4018_v21  ;;  %v3998_v12 = vpop.permute.xlu0 %3997  ;;  %v3982_v21 = vsub.f32 1.0, %v8658_v43 }
0x10ca   :  { %v4375_v23 = vrot.slane %v8788_v61, 5  ;;  %v4019_v44 = vmul.f32 %v3998_v12, %v3979_v50  ;;  %v4000_v17 = vpop.permute.xlu1 %3999  ;;  %v3984_v12 = vsub.f32 1.0, %v8684_v19 }
0x10cb   :  { %v4376_v57 = vrot.slane %v8792_v24, 4  ;;  %v4020_v28 = vmul.f32 %v4000_v17, %v3980_v63  ;;  %v4047_v17 = vmul.f32 %v4031_v20, %v8684_v19 }
0x10cc   :  { %v8800_v5 = vadd.f32 %v4042_v46, %v4019_v44 }
0x10cd   :  { %v4377_v3 = vsel %vm948_vm6, %v4376_v57, %v4375_v23  ;;  %v8805_v22 = vadd.f32 %v4043_v35, %v4020_v28  ;;  %v4002_v29 = vpop.permute.xlu0 %4001  ;;  %v4045_v23 = vmul.f32 %v8658_v43, %v9708_v48 }
0x10ce   :  { %v4378_v26 = vrot.slane %v8800_v5, 3  ;;  %v4021_v62 = vmul.f32 %v4002_v29, %v3981_v32  ;;  %v4006_v41 = vpop.permute.xlu1 %4005  ;;  %v9709_v29 = vld [vmem:[#allocation7_spill] sm:$0xff] }
0x10cf   :  { %v4380_v6 = vrot.slane %v8805_v22, 2  ;;  %v4023_v1 = vmul.f32 %v4006_v41, %v3983_v55  ;;  %v9710_v55 = vld [vmem:[#allocation8_spill] sm:$0xff] }
0x10d0   :  { %v4379_v16 = vsel %vm951_vm7, %v4378_v26, %v4377_v3  ;;  %v8813_v36 = vadd.f32 %v4044_v42, %v4021_v62  ;;  %v8855_v26 = vld [vmem:[%s9553_s7] ss:$0 sm:$0xff] }
0x10d1   :  { %v4381_v50 = vsel %vm954_vm8, %v4380_v6, %v4379_v16  ;;  %v8818_v49 = vadd.f32 %v4046_v51, %v4023_v1  ;;  %v4004_v37 = vpop.permute.xlu0 %4003 }
0x10d2   :  { %v4382_v63 = vrot.slane %v8813_v36, 1  ;;  %v4022_v46 = vmul.f32 %v4004_v37, %v3982_v21  ;;  %v4008_v44 = vpop.permute.xlu1 %4007 }
0x10d3   :  { %v4024_v57 = vmul.f32 %v4008_v44, %v3984_v12  ;;  %v9616_v28 = vrot.slane %v8818_v49, 7 }
0x10d4   :  { %v8826_v35 = vadd.f32 %v4045_v23, %v4022_v46  ;;  %v4383_v45 = vsel %vm957_vm9, %v4382_v63, %v4381_v50  ;;  %v8872_v63 = vld [vmem:[%s9557_s11] ss:$0 sm:$0xff] }
0x10d5   :  { %v8830_v15 = vadd.f32 %v4047_v17, %v4024_v57 }
0x10d6   :  { %v4384_v32 = vsel %vm960_vm10, %v8826_v35, %v4383_v45 }
0x10d7   :  { %v4387_v52 = vrot.slane %v8830_v15, 6  ;;  %v4386_v43 = vsel %vm963_vm11, %v9616_v28, %v4384_v32 }
0x10d9   :  { %v4388_v19 = vsel %vm966_vm12, %v4387_v52, %v4386_v43 }
0x10da   :  { %4389 = vrot.lane.b32.xlu1 %v4388_v19, %s6677_s5 }
0x10ea   :  { %v4079_v27 = vpop.permute.xlu0 %4078 }
0x10eb   :  { %5918 = vmatmul.mubr.msk.f32.vlgmr.msra.gmra.mrb[20].mxu0 %vm244_vm0, %v4079_v27 }
0x10ec   :  { %6087 = vmatpush3.bf16.msra.mxu0 %v9687_v60  ;;  %5939 = vmatprep.mubr.msk.f32.mxu0 %vm6673_vm2, %v9662_v38 }
0x10ed   :  { %6088 = vmatprep.subr.bf16.mxu0 %v9663_v8 }
0x10f0   :  { %6090 = vmatpush3.bf16.msra.mxu0 %v9688_v7 }
0x114c   :  { %v4390_v3 = vpop.permute.xlu1 %4389 }
0x114d   :  { %5929 = vmatmul.mubr.msk.f32.vlgmr.msra.gmra.mrb[28].mxu1 %vm244_vm0, %v4390_v3 }
0x114e   :  { %6093 = vmatpush3.bf16.msra.mxu1 %v9709_v29  ;;  %5950 = vmatprep.mubr.msk.f32.mxu1 %vm6673_vm2, %v9662_v38 }
0x114f   :  { %6094 = vmatprep.subr.bf16.mxu1 %v9663_v8 }
0x1152   :  { %6096 = vmatpush3.bf16.msra.mxu1 %v9710_v55 }
0x11be   :  { %v4148_v60 = vpop.f32.mrb[20].mxu0 }
0x11bf   :  { %v4149_v7 = vadd.f32 %v8855_v26, %v4148_v60  ;;  %v5919_v42 = vpop.f32.mrb[21].mxu0 }
0x11c1   :  { %v4153_v62 = vrot.slane %v4149_v7, 2  ;;  %v4154_v41 = vrot.slane %v4149_v7, 3  ;;  %v4155_v38 = vrot.slane %v4149_v7, 4  ;;  %v4156_v6 = vrot.slane %v4149_v7, 5 }
0x11c2   :  { %v4157_v8 = vrot.slane %v4149_v7, 6  ;;  %v4158_v51 = vrot.slane %v4149_v7, 7  ;;  %v4159_v1 = vrot.slane %v4149_v7, 1  ;;  %v4174_v27 = vadd.f32 %v4149_v7, %v7106_v53 }
0x11c3   :  { %4208 = vrot.lane.b32.xlu0 %v4153_v62, %s6676_s23  ;;  %4210 = vrot.lane.b32.xlu1 %v4154_v41, %s6676_s23  ;;  %v4168_v16 = vadd.f32 %v4153_v62, %v7085_v10  ;;  %v4169_v21 = vadd.f32 %v4154_v41, %v7087_v11  ;;  %v4170_v50 = vadd.f32 %v4155_v38, %v7091_v13 }
0x11c4   :  { %v4171_v46 = vadd.f32 %v4156_v6, %v7093_v14  ;;  %v4173_v44 = vadd.f32 %v4158_v51, %v7100_v33  ;;  %v4172_v52 = vadd.f32 %v4157_v8, %v9700_v4  ;;  %v4175_v60 = vadd.f32 %v4159_v1, %v7102_v39 }
0x11c5   :  { %v4176_v20 = vmul.f32 0.5, %v4168_v16  ;;  %v4177_v37 = vmul.f32 0.5, %v4169_v21  ;;  %v4178_v57 = vmul.f32 0.5, %v4170_v50  ;;  %v4182_v42 = vmul.f32 0.5, %v4174_v27 }
0x11c6   :  { %v4179_v32 = vmul.f32 0.5, %v4171_v46  ;;  %v4181_v19 = vmul.f32 0.5, %v4173_v44  ;;  %v4180_v29 = vmul.f32 0.5, %v4172_v52 }
0x11c7   :  { %4212 = vrot.lane.b32.xlu0 %v4155_v38, %s6676_s23  ;;  %4214 = vrot.lane.b32.xlu1 %v4156_v6, %s6676_s23  ;;  %6506 = vtanh.f32 %v4176_v20  ;;  %v4183_v38 = vmul.f32 0.5, %v4175_v60 }
0x11c8   :  { %6508 = vtanh.f32 %v4177_v37 }
0x11c9   :  { %6510 = vtanh.f32 %v4178_v57 }
0x11ca   :  { %6512 = vtanh.f32 %v4179_v32 }
0x11cb   :  { %4216 = vrot.lane.b32.xlu0 %v4157_v8, %s6676_s23  ;;  %4218 = vrot.lane.b32.xlu1 %v4158_v51, %s6676_s23  ;;  %6514 = vtanh.f32 %v4181_v19 }
0x11cc   :  { %6516 = vtanh.f32 %v4180_v29 }
0x11cd   :  { %6518 = vtanh.f32 %v4182_v42 }
0x11ce   :  { %6520 = vtanh.f32 %v4183_v38 }
0x11cf   :  { %4222 = vrot.lane.b32.xlu0 %v4159_v1, %s6676_s23  ;;  %4220 = vrot.lane.b32.xlu1 %v4149_v7, %s6676_s23 }
0x11d1   :  { %v6507_v62 = vpop.eup %6506 }
0x11d2   :  { %v6509_v7 = vpop.eup %6508  ;;  %v4192_v6 = vadd.f32 1.0, %v6507_v62 }
0x11d3   :  { %v4193_v8 = vadd.f32 1.0, %v6509_v7  ;;  %v6511_v51 = vpop.eup %6510 }
0x11d4   :  { %v6513_v16 = vpop.eup %6512  ;;  %v8912_v21 = vmul.f32 0.5, %v4192_v6  ;;  %v4194_v50 = vadd.f32 1.0, %v6511_v51 }
0x11d5   :  { %v8914_v20 = vmul.f32 0.5, %v4193_v8  ;;  %v6515_v37 = vpop.eup %6514  ;;  %v4195_v52 = vadd.f32 1.0, %v6513_v16 }
0x11d6   :  { %v6517_v57 = vpop.eup %6516  ;;  %v8920_v32 = vmul.f32 0.5, %v4194_v50  ;;  %v4197_v19 = vadd.f32 1.0, %v6515_v37 }
0x11d7   :  { %v6519_v27 = vpop.eup %6518  ;;  %v8923_v62 = vmul.f32 0.5, %v4195_v52  ;;  %v4196_v7 = vadd.f32 1.0, %v6517_v57 }
0x11d8   :  { %v8926_v38 = vmul.f32 0.5, %v4197_v19  ;;  %v4198_v6 = vadd.f32 1.0, %v6519_v27  ;;  %v6521_v8 = vpop.eup %6520 }
0x11d9   :  { %v8930_v37 = vmul.f32 0.5, %v4196_v7 }
0x1220   :  { %v4459_v12 = vpop.f32.mrb[28].mxu1 }
0x1221   :  { %v8875_v48 = vadd.f32 %v8872_v63, %v4459_v12  ;;  %v5930_v23 = vpop.f32.mrb[29].mxu1 }
0x1223   :  { %4531 = vrot.lane.b32.xlu1 %v8875_v48, %s6676_s23  ;;  %v4464_v17 = vrot.slane %v8875_v48, 2  ;;  %v4465_v45 = vrot.slane %v8875_v48, 3  ;;  %v4466_v43 = vrot.slane %v8875_v48, 4  ;;  %v4467_v3 = vrot.slane %v8875_v48, 5 }
0x1224   :  { %v4470_v55 = vrot.slane %v8875_v48, 1  ;;  %v4468_v41 = vrot.slane %v8875_v48, 6  ;;  %v4469_v1 = vrot.slane %v8875_v48, 7 }
0x1225   :  { %4519 = vrot.lane.b32.xlu0 %v4464_v17, %s6676_s23 }
0x1227   :  { %4521 = vrot.lane.b32.xlu1 %v4465_v45, %s6676_s23 }
0x1229   :  { %4523 = vrot.lane.b32.xlu0 %v4466_v43, %s6676_s23 }
0x122b   :  { %4525 = vrot.lane.b32.xlu1 %v4467_v3, %s6676_s23 }
0x122d   :  { %4533 = vrot.lane.b32.xlu0 %v4470_v55, %s6676_s23 }
0x122f   :  { %4527 = vrot.lane.b32.xlu1 %v4468_v41, %s6676_s23 }
0x1233   :  { %4529 = vrot.lane.b32.xlu1 %v4469_v1, %s6676_s23 }
0x1235   :  { %v4209_v12 = vpop.permute.xlu0 %4208  ;;  %v4211_v23 = vpop.permute.xlu1 %4210 }
0x1236   :  { %v4232_v46 = vmul.f32 %v4209_v12, %v8912_v21  ;;  %v4233_v44 = vmul.f32 %v4211_v23, %v8914_v20  ;;  %v4199_v23 = vadd.f32 1.0, %v6521_v8 }
0x1238   :  { %4248 = vrot.lane.b32.xlu1 %v4232_v46, %s6676_s23  ;;  %4250 = vrot.lane.b32.xlu0 %v4233_v44, %s6676_s23  ;;  %v8934_v46 = vmul.f32 0.5, %v4198_v6  ;;  %v8938_v27 = vmul.f32 0.5, %v4199_v23  ;;  %v9711_v6 = vld [vmem:[#allocation13_spill] sm:$0xff] }
0x1239   :  { %v4213_v29 = vpop.permute.xlu0 %4212  ;;  %v4215_v60 = vpop.permute.xlu1 %4214  ;;  %v4480_v8 = vadd.f32 %v4465_v45, %v9711_v6  ;;  %v9712_v45 = vld [vmem:[#allocation9_spill] sm:$0xff] }
0x123a   :  { %v4234_v42 = vmul.f32 %v4213_v29, %v8920_v32  ;;  %v4235_v50 = vmul.f32 %v4215_v60, %v8923_v62  ;;  %v4485_v60 = vadd.f32 %v8875_v48, %v9703_v25 }
0x123c   :  { %4252 = vrot.lane.b32.xlu0 %v4234_v42, %s6676_s23  ;;  %v4479_v42 = vadd.f32 %v4464_v17, %v7116_v40  ;;  %v4493_v7 = vmul.f32 0.5, %v4485_v60 }
0x123d   :  { %v4217_v51 = vpop.permute.xlu0 %4216  ;;  %v4219_v12 = vpop.permute.xlu1 %4218 }
0x123e   :  { %v4237_v16 = vmul.f32 %v4219_v12, %v8926_v38  ;;  %v4236_v57 = vmul.f32 %v4217_v51, %v8930_v37  ;;  %v4487_v51 = vmul.f32 0.5, %v4479_v42  ;;  %v4481_v12 = vadd.f32 %v4466_v43, %v7111_v59 }
0x123f   :  { %6522 = vtanh.f32 %v4493_v7 }
0x1240   :  { %4254 = vrot.lane.b32.xlu0 %v4235_v50, %s6676_s23  ;;  %4258 = vrot.lane.b32.xlu1 %v4237_v16, %s6676_s23  ;;  %v4488_v50 = vmul.f32 0.5, %v4480_v8  ;;  %v4482_v16 = vadd.f32 %v4467_v3, %v9702_v9  ;;  %6524 = vtanh.f32 %v4487_v51  ;;  %v4489_v23 = vmul.f32 0.5, %v4481_v12 }
0x1241   :  { %v4221_v44 = vpop.permute.xlu1 %4220  ;;  %v4223_v19 = vpop.permute.xlu0 %4222 }
0x1242   :  { %v4238_v52 = vmul.f32 %v4221_v44, %v8934_v46  ;;  %v4239_v29 = vmul.f32 %v4223_v19, %v8938_v27  ;;  %6526 = vtanh.f32 %v4488_v50  ;;  %v4490_v17 = vmul.f32 0.5, %v4482_v16 }
0x1243   :  { %v4483_v44 = vadd.f32 %v4468_v41, %v9704_v47  ;;  %6528 = vtanh.f32 %v4489_v23 }
0x1244   :  { %4256 = vrot.lane.b32.xlu0 %v4236_v57, %s6676_s23  ;;  %4260 = vrot.lane.b32.xlu1 %v4238_v52, %s6676_s23  ;;  %v4486_v57 = vadd.f32 %v4470_v55, %v9712_v45  ;;  %6530 = vtanh.f32 %v4490_v17  ;;  %v9713_v52 = vld [vmem:[#allocation14_spill] sm:$0xff] }
0x1245   :  { %v4491_v43 = vmul.f32 0.5, %v4483_v44  ;;  %v4484_v19 = vadd.f32 %v4469_v1, %v9713_v52 }
0x1247   :  { %6532 = vtanh.f32 %v4491_v43  ;;  %v4492_v42 = vmul.f32 0.5, %v4484_v19 }
0x1248   :  { %4262 = vrot.lane.b32.xlu0 %v4239_v29, %s6676_s23  ;;  %v4494_v29 = vmul.f32 0.5, %v4486_v57 }
0x1249   :  { %v6523_v3 = vpop.eup %6522 }
0x124a   :  { %v6525_v60 = vpop.eup %6524  ;;  %v4509_v7 = vadd.f32 1.0, %v6523_v3  ;;  %6534 = vtanh.f32 %v4494_v29 }
0x124b   :  { %v4503_v51 = vadd.f32 1.0, %v6525_v60  ;;  %6536 = vtanh.f32 %v4492_v42 }
0x124c   :  { %v6527_v8 = vpop.eup %6526  ;;  %v8967_v12 = vmul.f32 0.5, %v4509_v7 }
0x124d   :  { %v6529_v41 = vpop.eup %6528  ;;  %v4504_v55 = vadd.f32 1.0, %v6527_v8  ;;  %v8970_v48 = vmul.f32 0.5, %v4503_v51 }
0x124e   :  { %v6531_v50 = vpop.eup %6530  ;;  %v4505_v1 = vadd.f32 1.0, %v6529_v41 }
0x124f   :  { %v8974_v57 = vmul.f32 0.5, %v4504_v55  ;;  %v4506_v43 = vadd.f32 1.0, %v6531_v50 }
0x1250   :  { %v8978_v60 = vmul.f32 0.5, %v4505_v1 }
0x1251   :  { %v6533_v19 = vpop.eup %6532  ;;  %v8982_v51 = vmul.f32 0.5, %v4506_v43 }
0x1252   :  { %v4507_v41 = vadd.f32 1.0, %v6533_v19 }
0x1254   :  { %v6535_v7 = vpop.eup %6534  ;;  %v8987_v1 = vmul.f32 0.5, %v4507_v41 }
0x1255   :  { %v6537_v55 = vpop.eup %6536 }
0x1295   :  { %v4532_v16 = vpop.permute.xlu1 %4531 }
0x1296   :  { %v4549_v23 = vmul.f32 %v4532_v16, %v8967_v12 }
0x1297   :  { %v4520_v17 = vpop.permute.xlu0 %4519 }
0x1298   :  { %v4543_v44 = vmul.f32 %v4520_v17, %v8970_v48  ;;  %4571 = vrot.lane.b32.xlu1 %v4549_v23, %s6676_s23  ;;  %v4510_v23 = vadd.f32 1.0, %v6535_v7  ;;  %v4508_v17 = vadd.f32 1.0, %v6537_v55 }
0x1299   :  { %v4522_v3 = vpop.permute.xlu1 %4521 }
0x129a   :  { %v4544_v29 = vmul.f32 %v4522_v3, %v8974_v57  ;;  %4559 = vrot.lane.b32.xlu0 %v4543_v44, %s6676_s23  ;;  %v8993_v43 = vmul.f32 0.5, %v4508_v17 }
0x129b   :  { %v4524_v42 = vpop.permute.xlu0 %4523 }
0x129c   :  { %v4545_v8 = vmul.f32 %v4524_v42, %v8978_v60  ;;  %4561 = vrot.lane.b32.xlu1 %v4544_v29, %s6676_s23  ;;  %v8990_v29 = vmul.f32 0.5, %v4510_v23 }
0x129d   :  { %v4526_v16 = vpop.permute.xlu1 %4525 }
0x129e   :  { %v4546_v50 = vmul.f32 %v4526_v16, %v8982_v51  ;;  %4563 = vrot.lane.b32.xlu0 %v4545_v8, %s6676_s23 }
0x129f   :  { %v4534_v42 = vpop.permute.xlu0 %4533 }
0x12a0   :  { %4565 = vrot.lane.b32.xlu1 %v4546_v50, %s6676_s23  ;;  %v4550_v16 = vmul.f32 %v4534_v42, %v8990_v29 }
0x12a1   :  { %v4528_v44 = vpop.permute.xlu1 %4527 }
0x12a2   :  { %v4547_v3 = vmul.f32 %v4528_v44, %v8987_v1 }
0x12a4   :  { %4567 = vrot.lane.b32.xlu0 %v4547_v3, %s6676_s23 }
0x12a5   :  { %v4530_v19 = vpop.permute.xlu1 %4529 }
0x12a6   :  { %v4548_v7 = vmul.f32 %v4530_v19, %v8993_v43 }
0x12a8   :  { %4573 = vrot.lane.b32.xlu0 %v4550_v16, %s6676_s23  ;;  %4569 = vrot.lane.b32.xlu1 %v4548_v7, %s6676_s23 }
0x12aa   :  { %v4251_v8 = vpop.permute.xlu0 %4250  ;;  %v4249_v41 = vpop.permute.xlu1 %4248 }
0x12ab   :  { %v4273_v55 = vadd.f32 %v4251_v8, %v7087_v11  ;;  %v4272_v50 = vadd.f32 %v4249_v41, %v7085_v10 }
0x12ad   :  { %6538 = vtanh.f32 %v4273_v55 }
0x12ae   :  { %6540 = vtanh.f32 %v4272_v50  ;;  %v4253_v23 = vpop.permute.xlu0 %4252 }
0x12af   :  { %v4274_v17 = vadd.f32 %v4253_v23, %v7091_v13 }
0x12b1   :  { %6542 = vtanh.f32 %v4274_v17 }
0x12b2   :  { %v4255_v44 = vpop.permute.xlu0 %4254  ;;  %v4259_v3 = vpop.permute.xlu1 %4258 }
0x12b3   :  { %v4275_v42 = vadd.f32 %v4255_v44, %v7093_v14  ;;  %v4277_v19 = vadd.f32 %v4259_v3, %v7100_v33 }
0x12b5   :  { %6544 = vtanh.f32 %v4275_v42 }
0x12b6   :  { %v4257_v16 = vpop.permute.xlu0 %4256  ;;  %v4261_v7 = vpop.permute.xlu1 %4260  ;;  %6546 = vtanh.f32 %v4277_v19 }
0x12b7   :  { %v6539_v28 = vpop.eup %6538  ;;  %v4276_v8 = vadd.f32 %v4257_v16, %v9700_v4  ;;  %v4278_v41 = vadd.f32 %v4261_v7, %v7106_v53 }
0x12b8   :  { %v6541_v30 = vpop.eup %6540  ;;  %4306 = vrot.lane.b32.xlu1 %v6539_v28, %s6677_s5 }
0x12b9   :  { %6548 = vtanh.f32 %v4276_v8  ;;  %4304 = vrot.lane.b32.xlu0 %v6541_v30, %s6677_s5 }
0x12ba   :  { %v4263_v55 = vpop.permute.xlu0 %4262  ;;  %6550 = vtanh.f32 %v4278_v41 }
0x12bb   :  { %v6543_v50 = vpop.eup %6542  ;;  %v4279_v23 = vadd.f32 %v4263_v55, %v7102_v39 }
0x12bd   :  { %6552 = vtanh.f32 %v4279_v23  ;;  %4308 = vrot.lane.b32.xlu0 %v6543_v50, %s6677_s5 }
0x12bf   :  { %v6545_v17 = vpop.eup %6544 }
0x12c0   :  { %4310 = vrot.lane.b32.xlu1 %v6545_v17, %s6677_s5  ;;  %v6547_v44 = vpop.eup %6546 }
0x12c3   :  { %v6549_v3 = vpop.eup %6548 }
0x12c4   :  { %4312 = vrot.lane.b32.xlu0 %v6549_v3, %s6677_s5  ;;  %4314 = vrot.lane.b32.xlu1 %v6547_v44, %s6677_s5  ;;  %v6551_v28 = vpop.eup %6550 }
0x12c7   :  { %v6553_v42 = vpop.eup %6552 }
0x12c8   :  { %4318 = vrot.lane.b32.xlu0 %v6553_v42, %s6677_s5  ;;  %4316 = vrot.lane.b32.xlu1 %v6551_v28, %s6677_s5 }
0x130a   :  { %v4572_v30 = vpop.permute.xlu1 %4571 }
0x130c   :  { %v4560_v19 = vpop.permute.xlu0 %4559 }
0x130d   :  { %v4583_v16 = vadd.f32 %v4560_v19, %v7116_v40 }
0x130e   :  { %v4562_v7 = vpop.permute.xlu1 %4561 }
0x130f   :  { %6554 = vtanh.f32 %v4583_v16  ;;  %v4584_v8 = vadd.f32 %v4562_v7, %v9711_v6 }
0x1310   :  { %v4564_v41 = vpop.permute.xlu0 %4563 }
0x1311   :  { %6556 = vtanh.f32 %v4584_v8  ;;  %v4585_v55 = vadd.f32 %v4564_v41, %v7111_v59  ;;  %v4589_v41 = vadd.f32 %v4572_v30, %v9703_v25  ;;  %v4289_v30 = vsub.f32 1.0, %v8914_v20 }
0x1312   :  { %v4566_v50 = vpop.permute.xlu1 %4565 }
0x1313   :  { %6558 = vtanh.f32 %v4585_v55  ;;  %v4586_v23 = vadd.f32 %v4566_v50, %v9702_v9 }
0x1315   :  { %6560 = vtanh.f32 %v4586_v23 }
0x1316   :  { %v4568_v17 = vpop.permute.xlu0 %4567 }
0x1317   :  { %v4587_v44 = vadd.f32 %v4568_v17, %v9704_v47 }
0x1319   :  { %v6555_v3 = vpop.eup %6554  ;;  %6562 = vtanh.f32 %v4587_v44  ;;  %v4337_v44 = vrot.slane %v8728_v2, 7  ;;  %v4338_v2 = vrot.slane %v8741_v34, 7 }
0x131a   :  { %v4574_v28 = vpop.permute.xlu0 %4573  ;;  %4615 = vrot.lane.b32.xlu0 %v6555_v3, %s6677_s5  ;;  %v4570_v42 = vpop.permute.xlu1 %4569  ;;  %v4336_v3 = vrot.slane %v8731_v56, 7  ;;  %v4290_v56 = vsub.f32 1.0, %v8920_v32 }
0x131b   :  { %v6557_v19 = vpop.eup %6556  ;;  %v4590_v16 = vadd.f32 %v4574_v28, %v9712_v45  ;;  %v4588_v7 = vadd.f32 %v4570_v42, %v9713_v52  ;;  %v4288_v28 = vsub.f32 1.0, %v8912_v21 }
0x131c   :  { %4617 = vrot.lane.b32.xlu1 %v6557_v19, %s6677_s5 }
0x131d   :  { %v6559_v8 = vpop.eup %6558  ;;  %6564 = vtanh.f32 %v4590_v16  ;;  %v4352_v16 = vmul.f32 %v4337_v44, %v8914_v20  ;;  %v4353_v44 = vmul.f32 %v4338_v2, %v8920_v32 }
0x131e   :  { %6566 = vtanh.f32 %v4588_v7  ;;  %4619 = vrot.lane.b32.xlu0 %v6559_v8, %s6677_s5 }
0x131f   :  { %v6561_v55 = vpop.eup %6560  ;;  %6568 = vtanh.f32 %v4589_v41  ;;  %v4351_v41 = vmul.f32 %v4336_v3, %v8912_v21  ;;  %v4339_v21 = vrot.slane %v8748_v18, 7  ;;  %v4291_v3 = vsub.f32 1.0, %v8923_v62 }
0x1320   :  { %4621 = vrot.lane.b32.xlu1 %v6561_v55, %s6677_s5  ;;  %v4293_v18 = vsub.f32 1.0, %v8926_v38 }
0x1323   :  { %v6563_v50 = vpop.eup %6562 }
0x1324   :  { %4623 = vrot.lane.b32.xlu0 %v6563_v50, %s6677_s5 }
0x1327   :  { %v6565_v23 = vpop.eup %6564 }
0x1328   :  { %v6567_v17 = vpop.eup %6566  ;;  %4629 = vrot.lane.b32.xlu0 %v6565_v23, %s6677_s5 }
0x1329   :  { %4625 = vrot.lane.b32.xlu1 %v6567_v17, %s6677_s5  ;;  %v6569_v8 = vpop.eup %6568 }
0x132a   :  { %v4307_v42 = vpop.permute.xlu1 %4306 }
0x132b   :  { %v4305_v19 = vpop.permute.xlu0 %4304  ;;  %v4329_v7 = vmul.f32 %v4307_v42, %v4289_v30 }
0x132c   :  { %v4328_v55 = vmul.f32 %v4305_v19, %v4288_v28  ;;  %v4354_v19 = vmul.f32 %v4339_v21, %v8923_v62 }
0x132d   :  { %v9036_v50 = vadd.f32 %v4352_v16, %v4329_v7  ;;  %4627 = vrot.lane.b32.xlu1 %v6569_v8, %s6677_s5  ;;  %v4340_v7 = vrot.slane %v8751_v58, 7 }
0x132e   :  { %v9040_v23 = vadd.f32 %v4351_v41, %v4328_v55  ;;  %v4341_v41 = vrot.slane %v8763_v54, 7 }
0x132f   :  { %v4687_v17 = vrot.slane %v9036_v50, 5  ;;  %v4309_v40 = vpop.permute.xlu0 %4308  ;;  %v4355_v2 = vmul.f32 %v4340_v7, %v8930_v37 }
0x1330   :  { %v4686_v20 = vrot.slane %v9040_v23, 6  ;;  %v4330_v30 = vmul.f32 %v4309_v40, %v4290_v56  ;;  %v4292_v40 = vsub.f32 1.0, %v8930_v37  ;;  %v4356_v58 = vmul.f32 %v4341_v41, %v8926_v38 }
0x1331   :  { %v4294_v37 = vsub.f32 1.0, %v8934_v46  ;;  %v9714_v41 = vrot.slane %v8765_v0, 7 }
0x1332   :  { %v4688_v28 = vsel %vm948_vm6, %v4687_v17, %v4686_v20  ;;  %v9049_v42 = vadd.f32 %v4353_v44, %v4330_v30  ;;  %v4311_v34 = vpop.permute.xlu1 %4310 }
0x1333   :  { %v4331_v16 = vmul.f32 %v4311_v34, %v4291_v3  ;;  %v4342_v3 = vrot.slane %v8771_v31, 7 }
0x1334   :  { %v4689_v8 = vrot.slane %v9049_v42, 4 }
0x1335   :  { %v9055_v32 = vadd.f32 %v4354_v19, %v4331_v16  ;;  %v4358_v38 = vmul.f32 %v4342_v3, %v8938_v27  ;;  %v4600_v3 = vsub.f32 1.0, %v8974_v57 }
0x1336   :  { %v4690_v55 = vsel %vm951_vm7, %v4689_v8, %v4688_v28  ;;  %v4313_v56 = vpop.permute.xlu0 %4312  ;;  %v4315_v17 = vpop.permute.xlu1 %4314  ;;  %v4295_v28 = vsub.f32 1.0, %v8938_v27  ;;  %v4599_v27 = vsub.f32 1.0, %v8970_v48 }
0x1337   :  { %v4691_v62 = vrot.slane %v9055_v32, 3  ;;  %v4332_v20 = vmul.f32 %v4313_v56, %v4292_v40  ;;  %v4333_v44 = vmul.f32 %v4315_v17, %v4293_v18  ;;  %v4357_v40 = vmul.f32 %v8934_v46, %v9714_v41 }
0x1338   :  { %v4647_v46 = vrot.slane %v8788_v61, 7  ;;  %v4601_v61 = vsub.f32 1.0, %v8978_v60  ;;  %v4602_v41 = vsub.f32 1.0, %v8982_v51 }
0x1339   :  { %v4692_v54 = vsel %vm954_vm8, %v4691_v62, %v4690_v55  ;;  %v9064_v30 = vadd.f32 %v4355_v2, %v4332_v20  ;;  %v9066_v21 = vadd.f32 %v4356_v58, %v4333_v44  ;;  %v4648_v58 = vrot.slane %v8792_v24, 7 }
0x133a   :  { %v4319_v34 = vpop.permute.xlu0 %4318  ;;  %v4317_v19 = vpop.permute.xlu1 %4316  ;;  %v4662_v44 = vmul.f32 %v4647_v46, %v8970_v48  ;;  %v4603_v46 = vsub.f32 1.0, %v8987_v1 }
0x133b   :  { %v4693_v16 = vrot.slane %v9064_v30, 2  ;;  %v4695_v7 = vrot.slane %v9066_v21, 1  ;;  %v4335_v8 = vmul.f32 %v4319_v34, %v4295_v28  ;;  %v4334_v18 = vmul.f32 %v4317_v19, %v4294_v37 }
0x133c   :  { %v4649_v28 = vrot.slane %v8800_v5, 7  ;;  %v4663_v19 = vmul.f32 %v4648_v58, %v8974_v57 }
0x133d   :  { %v4694_v31 = vsel %vm957_vm9, %v4693_v16, %v4692_v54  ;;  %v9078_v55 = vadd.f32 %v4358_v38, %v4335_v8  ;;  %v9080_v2 = vadd.f32 %v4357_v40, %v4334_v18 }
0x133e   :  { %v4696_v56 = vsel %vm960_vm10, %v4695_v7, %v4694_v31  ;;  %v4650_v7 = vrot.slane %v8805_v22, 7  ;;  %v4664_v24 = vmul.f32 %v4649_v28, %v8978_v60  ;;  %v4651_v22 = vrot.slane %v8813_v36, 7 }
0x133f   :  { %v9621_v17 = vrot.slane %v9078_v55, 7  ;;  %v4697_v62 = vsel %vm963_vm11, %v9080_v2, %v4696_v56  ;;  %v4606_v36 = vsub.f32 1.0, %v8990_v29  ;;  %v4652_v28 = vrot.slane %v8826_v35, 7 }
0x1340   :  { %v4665_v5 = vmul.f32 %v4650_v7, %v8982_v51  ;;  %v4666_v58 = vmul.f32 %v4651_v22, %v8987_v1  ;;  %v4605_v35 = vsub.f32 1.0, %v8967_v12 }
0x1341   :  { %v4699_v0 = vsel %vm966_vm12, %v9621_v17, %v4697_v62  ;;  %v4667_v1 = vmul.f32 %v4652_v28, %v8993_v43 }
0x1342   :  { %4700 = vrot.lane.b32.xlu0 %v4699_v0, %s6677_s5 }
0x138c   :  { %v4616_v20 = vpop.permute.xlu0 %4615 }
0x138d   :  { %v4639_v54 = vmul.f32 %v4616_v20, %v4599_v27 }
0x138e   :  { %v4618_v34 = vpop.permute.xlu1 %4617 }
0x138f   :  { %v9096_v37 = vadd.f32 %v4662_v44, %v4639_v54  ;;  %v4640_v16 = vmul.f32 %v4618_v34, %v4600_v3 }
0x1390   :  { %v4620_v38 = vpop.permute.xlu0 %4619 }
0x1391   :  { %9715 = vst [vmem:[#allocation5_spill] sm:$0xff] %v9096_v37  ;;  %v9101_v8 = vadd.f32 %v4663_v19, %v4640_v16  ;;  %v4641_v48 = vmul.f32 %v4620_v38, %v4601_v61  ;;  %v4997_v18 = vrot.slane %v9096_v37, 6  ;;  %v4604_v19 = vsub.f32 1.0, %v8993_v43 }
0x1392   :  { %v4622_v40 = vpop.permute.xlu1 %4621  ;;  %v4653_v16 = vrot.slane %v8830_v15, 7 }
0x1393   :  { %v4998_v57 = vrot.slane %v9101_v8, 5  ;;  %v9108_v31 = vadd.f32 %v4664_v24, %v4641_v48  ;;  %v4642_v56 = vmul.f32 %v4622_v40, %v4602_v41 }
0x1394   :  { %v4669_v41 = vmul.f32 %v4653_v16, %v8990_v29  ;;  %v9163_v16 = vld [vmem:[%s9548_s2] sm:$0xff] }
0x1395   :  { %v4999_v62 = vsel %vm948_vm6, %v4998_v57, %v4997_v18  ;;  %v5000_v0 = vrot.slane %v9108_v31, 4  ;;  %v9113_v60 = vadd.f32 %v4665_v5, %v4642_v56  ;;  %v9719_v57 = vrot.slane %v8818_v49, 7 }
0x1396   :  { %v4624_v27 = vpop.permute.xlu0 %4623 }
0x1397   :  { %v5001_v51 = vsel %vm951_vm7, %v5000_v0, %v4999_v62  ;;  %v5002_v20 = vrot.slane %v9113_v60, 3  ;;  %v4643_v44 = vmul.f32 %v4624_v27, %v4603_v46  ;;  %v4668_v56 = vmul.f32 %v8967_v12, %v9719_v57 }
0x1398   :  { %v6678_v12 = vmov 0  }
0x1399   :  { %v5003_v54 = vsel %vm954_vm8, %v5002_v20, %v5001_v51  ;;  %v9120_v3 = vadd.f32 %v4666_v58, %v4643_v44  ;;  %6120 = vset.pattern.permute.xlu0 %v6678_v12 }
0x139a   :  { %v4630_v34 = vpop.permute.xlu0 %4629 }
0x139b   :  { %9716 = vst [vmem:[#allocation6_spill] sm:$0xff] %v9120_v3  ;;  %v5004_v61 = vrot.slane %v9120_v3, 2  ;;  %v4646_v7 = vmul.f32 %v4630_v34, %v4606_v36  ;;  %v4626_v38 = vpop.permute.xlu1 %4625 }
0x139c   :  { %v4644_v24 = vmul.f32 %v4626_v38, %v4604_v19 }
0x139d   :  { %v5005_v48 = vsel %vm957_vm9, %v5004_v61, %v5003_v54  ;;  %v9133_v40 = vadd.f32 %v4669_v41, %v4646_v7  ;;  %v6679_v61 = vmov 1  }
0x139e   :  { %v9130_v5 = vadd.f32 %v4667_v1, %v4644_v24 }
0x139f   :  { %9718 = vst [vmem:[#allocation18_spill] sm:$0xff] %v9133_v40  ;;  %v4628_v18 = vpop.permute.xlu1 %4627  ;;  %v9620_v29 = vrot.slane %v9133_v40, 7 }
0x13a0   :  { %9717 = vst [vmem:[#allocation17_spill] sm:$0xff] %v9130_v5  ;;  %v5006_v15 = vrot.slane %v9130_v5, 1  ;;  %v4645_v22 = vmul.f32 %v4628_v18, %v4605_v35 }
0x13a2   :  { %v9139_v43 = vadd.f32 %v4668_v56, %v4645_v22  ;;  %v5007_v62 = vsel %vm960_vm10, %v5006_v15, %v5005_v48 }
0x13a4   :  { %9720 = vst [vmem:[#allocation10_spill] sm:$0xff] %v9139_v43  ;;  %v5008_v0 = vsel %vm963_vm11, %v9139_v43, %v5007_v62 }
0x13a5   :  { %v5010_v46 = vsel %vm966_vm12, %v9620_v29, %v5008_v0 }
0x13a6   :  { %5011 = vrot.lane.b32.xlu1 %v5010_v46, %s6677_s5 }
0x13b4   :  { %v4701_v27 = vpop.permute.xlu0 %4700 }
0x13b5   :  { %5940 = vmatmul.mubr.msk.f32.vlgmr.msra.gmra.mrb[22].mxu0 %vm244_vm0, %v4701_v27 }
0x1418   :  { %v5012_v49 = vpop.permute.xlu1 %5011 }
0x1419   :  { %5951 = vmatmul.mubr.msk.f32.vlgmr.msra.gmra.mrb[30].mxu1 %vm244_vm0, %v5012_v49 }
0x1488   :  { %v4770_v51 = vpop.f32.mrb[22].mxu0 }
0x1489   :  { %v4771_v20 = vadd.f32 %v8855_v26, %v4770_v51  ;;  %v5941_v58 = vpop.f32.mrb[23].mxu0 }
0x148b   :  { %v4776_v44 = vrot.slane %v4771_v20, 2  ;;  %v4777_v54 = vrot.slane %v4771_v20, 3  ;;  %v4778_v36 = vrot.slane %v4771_v20, 4  ;;  %v4779_v28 = vrot.slane %v4771_v20, 5 }
0x148c   :  { %v4780_v34 = vrot.slane %v4771_v20, 6  ;;  %v4781_v19 = vrot.slane %v4771_v20, 7  ;;  %v4775_v26 = vrot.slane %v4771_v20, 1 }
0x148d   :  { %4832 = vrot.lane.b32.xlu0 %v4776_v44, %s6676_s23  ;;  %4834 = vrot.lane.b32.xlu1 %v4777_v54, %s6676_s23  ;;  %v4792_v7 = vadd.f32 %v4777_v54, %v7091_v13  ;;  %v4791_v38 = vadd.f32 %v4776_v44, %v7087_v11  ;;  %v4793_v24 = vadd.f32 %v4778_v36, %v7093_v14 }
0x148e   :  { %v4794_v57 = vadd.f32 %v4779_v28, %v9700_v4  ;;  %v4795_v0 = vadd.f32 %v4780_v34, %v7100_v33  ;;  %v4796_v27 = vadd.f32 %v4781_v19, %v7106_v53  ;;  %v4790_v51 = vadd.f32 %v4775_v26, %v7085_v10 }
0x148f   :  { %v4800_v1 = vmul.f32 0.5, %v4792_v7  ;;  %v4799_v18 = vmul.f32 0.5, %v4791_v38  ;;  %v4801_v15 = vmul.f32 0.5, %v4793_v24 }
0x1490   :  { %v4802_v62 = vmul.f32 0.5, %v4794_v57  ;;  %v4803_v12 = vmul.f32 0.5, %v4795_v0  ;;  %v4804_v44 = vmul.f32 0.5, %v4796_v27  ;;  %v4798_v54 = vmul.f32 0.5, %v4790_v51 }
0x1491   :  { %4836 = vrot.lane.b32.xlu0 %v4778_v36, %s6676_s23  ;;  %4838 = vrot.lane.b32.xlu1 %v4779_v28, %s6676_s23  ;;  %6570 = vtanh.f32 %v4800_v1 }
0x1492   :  { %6572 = vtanh.f32 %v4799_v18 }
0x1493   :  { %6574 = vtanh.f32 %v4801_v15 }
0x1494   :  { %6576 = vtanh.f32 %v4802_v62 }
0x1495   :  { %4840 = vrot.lane.b32.xlu0 %v4780_v34, %s6676_s23  ;;  %4842 = vrot.lane.b32.xlu1 %v4781_v19, %s6676_s23 }
0x1499   :  { %4844 = vrot.lane.b32.xlu0 %v4771_v20, %s6676_s23  ;;  %4830 = vrot.lane.b32.xlu1 %v4775_v26, %s6676_s23 }
0x149d   :  { %5305 = vperm.xlu0 %6120, %v9163_v16  }
0x14a1   :  { %6121 = vset.pattern.permute.xlu0 %v6679_v61 }
0x14ec   :  { %v5081_v48 = vpop.f32.mrb[30].mxu1 }
0x14ed   :  { %v9170_v41 = vadd.f32 %v8872_v63, %v5081_v48  ;;  %v5952_v35 = vpop.f32.mrb[31].mxu1  ;;  %v4797_v63 = vadd.f32 %v4771_v20, %v7102_v39  ;;  %v6571_v20 = vpop.eup %6570 }
0x14ee   :  { %v6573_v36 = vpop.eup %6572  ;;  %v4816_v28 = vadd.f32 1.0, %v6571_v20 }
0x14ef   :  { %5155 = vrot.lane.b32.xlu1 %v9170_v41, %s6676_s23  ;;  %v5089_v56 = vrot.slane %v9170_v41, 4  ;;  %v5087_v22 = vrot.slane %v9170_v41, 2  ;;  %v5088_v46 = vrot.slane %v9170_v41, 3  ;;  %v4805_v49 = vmul.f32 0.5, %v4797_v63  ;;  %v6575_v34 = vpop.eup %6574 }
0x14f0   :  { %v5090_v58 = vrot.slane %v9170_v41, 5  ;;  %v5091_v19 = vrot.slane %v9170_v41, 6  ;;  %v4815_v26 = vadd.f32 1.0, %v6573_v36  ;;  %v9199_v61 = vmul.f32 0.5, %v4816_v28  ;;  %v6577_v38 = vpop.eup %6576 }
0x14f1   :  { %5147 = vrot.lane.b32.xlu0 %v5089_v56, %s6676_s23  ;;  %6578 = vtanh.f32 %v4805_v49  ;;  %v4817_v7 = vadd.f32 1.0, %v6575_v34  ;;  %v5092_v35 = vrot.slane %v9170_v41, 7  ;;  %v4818_v63 = vadd.f32 1.0, %v6577_v38 }
0x14f2   :  { %6580 = vtanh.f32 %v4803_v12  ;;  %v9203_v15 = vmul.f32 0.5, %v4815_v26 }
0x14f3   :  { %5143 = vrot.lane.b32.xlu1 %v5087_v22, %s6676_s23  ;;  %6582 = vtanh.f32 %v4804_v44  ;;  %v9207_v57 = vmul.f32 0.5, %v4817_v7  ;;  %v9211_v20 = vmul.f32 0.5, %v4818_v63 }
0x14f4   :  { %6584 = vtanh.f32 %v4798_v54 }
0x14f7   :  { %5145 = vrot.lane.b32.xlu1 %v5088_v46, %s6676_s23 }
0x14fb   :  { %5149 = vrot.lane.b32.xlu1 %v5090_v58, %s6676_s23  ;;  %v6579_v18 = vpop.eup %6578 }
0x14fc   :  { %v6581_v62 = vpop.eup %6580  ;;  %v4821_v54 = vadd.f32 1.0, %v6579_v18 }
0x14fd   :  { %v6583_v51 = vpop.eup %6582  ;;  %v4819_v44 = vadd.f32 1.0, %v6581_v62 }
0x14fe   :  { %v6585_v36 = vpop.eup %6584  ;;  %v4820_v38 = vadd.f32 1.0, %v6583_v51  ;;  %v5086_v51 = vrot.slane %v9170_v41, 1 }
0x14ff   :  { %5151 = vrot.lane.b32.xlu1 %v5091_v19, %s6676_s23  ;;  %v4833_v1 = vpop.permute.xlu0 %4832  ;;  %v4835_v24 = vpop.permute.xlu1 %4834  ;;  %v9216_v7 = vmul.f32 0.5, %v4819_v44  ;;  %v5108_v44 = vadd.f32 %v9170_v41, %v9712_v45 }
0x1500   :  { %v4856_v48 = vmul.f32 %v4835_v24, %v9199_v61  ;;  %v4855_v49 = vmul.f32 %v4833_v1, %v9203_v15  ;;  %v9219_v1 = vmul.f32 0.5, %v4821_v54  ;;  %v4814_v24 = vadd.f32 1.0, %v6585_v36 }
0x1501   :  { %v9223_v18 = vmul.f32 0.5, %v4820_v38  ;;  %v5104_v54 = vadd.f32 %v5089_v56, %v9702_v9  ;;  %v5116_v36 = vmul.f32 0.5, %v5108_v44  ;;  %v5103_v38 = vadd.f32 %v5088_v46, %v7111_v59 }
0x1502   :  { %4874 = vrot.lane.b32.xlu0 %v4856_v48, %s6676_s23 }
0x1503   :  { %5153 = vrot.lane.b32.xlu1 %v5092_v35, %s6676_s23  ;;  %v4837_v0 = vpop.permute.xlu0 %4836  ;;  %v4839_v27 = vpop.permute.xlu1 %4838  ;;  %6586 = vtanh.f32 %v5116_v36 }
0x1504   :  { %v4857_v12 = vmul.f32 %v4837_v0, %v9207_v57  ;;  %v4858_v26 = vmul.f32 %v4839_v27, %v9211_v20 }
0x1506   :  { %4876 = vrot.lane.b32.xlu0 %v4857_v12, %s6676_s23 }
0x1507   :  { %4872 = vrot.lane.b32.xlu1 %v4855_v49, %s6676_s23  ;;  %v4841_v28 = vpop.permute.xlu0 %4840  ;;  %v4843_v34 = vpop.permute.xlu1 %4842  ;;  %v9225_v49 = vmul.f32 0.5, %v4814_v24  ;;  %v5105_v24 = vadd.f32 %v5090_v58, %v9704_v47 }
0x1508   :  { %v4859_v63 = vmul.f32 %v4841_v28, %v9216_v7  ;;  %v4860_v27 = vmul.f32 %v4843_v34, %v9223_v18  ;;  %v5102_v28 = vadd.f32 %v5087_v22, %v9711_v6  ;;  %v5112_v34 = vmul.f32 0.5, %v5104_v54 }
0x1509   :  { %v5113_v56 = vmul.f32 0.5, %v5105_v24  ;;  %v5106_v22 = vadd.f32 %v5091_v19, %v9713_v52  ;;  %v9260_v19 = vld [vmem:[%s9549_s3] ss:$0 sm:$0xff] }
0x150a   :  { %4878 = vrot.lane.b32.xlu0 %v4858_v26, %s6676_s23  ;;  %v5110_v26 = vmul.f32 0.5, %v5102_v28  ;;  %6588 = vtanh.f32 %v5112_v34 }
0x150b   :  { %v4845_v48 = vpop.permute.xlu0 %4844  ;;  %v4831_v62 = vpop.permute.xlu1 %4830 }
0x150c   :  { %v4861_v0 = vmul.f32 %v4845_v48, %v9219_v1  ;;  %v4854_v12 = vmul.f32 %v4831_v62, %v9225_v49  ;;  %6590 = vtanh.f32 %v5110_v26 }
0x150d   :  { %v6587_v48 = vpop.eup %6586 }
0x150e   :  { %4884 = vrot.lane.b32.xlu1 %v4861_v0, %s6676_s23  ;;  %4880 = vrot.lane.b32.xlu0 %v4859_v63, %s6676_s23  ;;  %v5114_v63 = vmul.f32 0.5, %v5106_v22  ;;  %v5107_v0 = vadd.f32 %v5092_v35, %v9703_v25  ;;  %v5132_v46 = vadd.f32 1.0, %v6587_v48 }
0x1510   :  { %v5115_v44 = vmul.f32 0.5, %v5107_v0  ;;  %v9254_v54 = vmul.f32 0.5, %v5132_v46  ;;  %v9273_v0 = vld [vmem:[%s9549_s3 + $0x1] ss:$0 sm:$0xff]  ;;  %s6686_s3 = smov [#allocation2]  }
0x1511   :  { %s5611_s20 = sshll.u32 %s6686_s3, 4  ;;  %s5612_s20 = int_to_ptr.vmem [resolvable:$true] %s5611_s20 }
0x1512   :  { %4882 = vrot.lane.b32.xlu0 %v4860_v27, %s6676_s23  ;;  %4870 = vrot.lane.b32.xlu1 %v4854_v12, %s6676_s23  ;;  %9721 = vst [vmem:[#allocation19_spill] sm:$0xff] %v9254_v54  ;;  %s6648_s10 = scalar_lea.vmem %s5612_s20, 256  ;;  %p6653_p1 = scmp.lt.s32.totalorder %s5612_s20, %s5612_s20 }
0x1513   :  { %p6649_p0 = scmp.ne.s32.totalorder %s5612_s20, %s6648_s10  ;;  %p6654_p2 = scmp.lt.s32.totalorder %s6648_s10, %s6648_s10 }
0x1514   :  { %v6589_v62 = vpop.eup %6588 }
0x1515   :  { %v5128_v58 = vadd.f32 1.0, %v6589_v62  ;;  %p6655_p3 = por %p6654_p2, %p6653_p1 }
0x1516   :  { %5141 = vrot.lane.b32.xlu0 %v5086_v51, %s6676_s23  ;;  %v6591_v27 = vpop.eup %6590 }
0x1517   :  { %v5126_v36 = vadd.f32 1.0, %v6591_v27  ;;  %v9262_v26 = vmul.f32 0.5, %v5128_v58  ;;  %p6656_p4 = pnand %p6655_p3, %p6649_p0 }
0x1519   :  { %9722 = vst [vmem:[#allocation12_spill] sm:$0xff] %v9262_v26 }
0x151a   :  { %5423 = vperm.xlu0 %6121, %v9163_v16   ;;  %v5111_v16 = vmul.f32 0.5, %v5103_v38  ;;  %v9265_v38 = vmul.f32 0.5, %v5126_v36 }
0x151c   :  { %6592 = vtanh.f32 %v5111_v16  ;;  %v5306_v12 = vpop.permute.xlu0 %5305 }
0x151d   :  { %6594 = vtanh.f32 %v5113_v56  ;;  %v5312_v22 = vmul.f32 %v9260_v19, %v5306_v12 }
0x151e   :  { %6596 = vtanh.f32 %v5114_v63 }
0x151f   :  { %6598 = vtanh.f32 %v5115_v44  ;;  %v9280_v12 = vadd.f32 %v9273_v0, %v5312_v22 }
0x1526   :  { %v6593_v28 = vpop.eup %6592 }
0x1527   :  { %v5127_v16 = vadd.f32 1.0, %v6593_v28  ;;  %v6595_v24 = vpop.eup %6594 }
0x1528   :  { %v5129_v46 = vadd.f32 1.0, %v6595_v24  ;;  %v6597_v27 = vpop.eup %6596 }
0x1529   :  { %v9277_v62 = vmul.f32 0.5, %v5127_v16  ;;  %v5130_v28 = vadd.f32 1.0, %v6597_v27 }
0x152a   :  { %v9284_v36 = vmul.f32 0.5, %v5129_v46 }
0x152c   :  { %9723 = vst [vmem:[#allocation16_spill] sm:$0xff] %v9284_v36 }
0x1561   :  { %v5156_v34 = vpop.permute.xlu1 %5155 }
0x1562   :  { %v5172_v41 = vmul.f32 %v5156_v34, %v9254_v54  ;;  %v6599_v34 = vpop.eup %6598 }
0x1563   :  { %v5148_v35 = vpop.permute.xlu0 %5147  ;;  %v5131_v22 = vadd.f32 1.0, %v6599_v34 }
0x1564   :  { %5195 = vrot.lane.b32.xlu0 %v5172_v41, %s6676_s23  ;;  %v5168_v48 = vmul.f32 %v5148_v35, %v9262_v26  ;;  %v5321_v35 = vand.u32 2139095040, %v9280_v12 }
0x1565   :  { %v5144_v56 = vpop.permute.xlu1 %5143  ;;  %v9294_v27 = vmul.f32 0.5, %v5131_v22 }
0x1566   :  { %v5166_v63 = vmul.f32 %v5144_v56, %v9265_v38  ;;  %v9724_v56 = vld [vmem:[#allocation11_spill] sm:$0xff] }
0x1567   :  { %v5101_v24 = vadd.f32 %v5086_v51, %v9724_v56  ;;  %9726 = vst [vmem:[#allocation20_spill] sm:$0xff] %v9294_v27 }
0x1568   :  { %5187 = vrot.lane.b32.xlu0 %v5168_v48, %s6676_s23  ;;  %5183 = vrot.lane.b32.xlu1 %v5166_v63, %s6676_s23  ;;  %v9290_v48 = vmul.f32 0.5, %v5130_v28 }
0x1569   :  { %v5146_v44 = vpop.permute.xlu1 %5145  ;;  %v5109_v46 = vmul.f32 0.5, %v5101_v24 }
0x156a   :  { %v5167_v58 = vmul.f32 %v5146_v44, %v9277_v62  ;;  %9725 = vst [vmem:[#allocation15_spill] sm:$0xff] %v9290_v48  ;;  %v5322_v44 = vshrl.u32 %v5321_v35, 23 }
0x156b   :  { %6600 = vtanh.f32 %v5109_v46 }
0x156c   :  { %5185 = vrot.lane.b32.xlu1 %v5167_v58, %s6676_s23  ;;  %v5656_v37 = vadd.s32 4294967169, %v5322_v44 }
0x156d   :  { %v5150_v41 = vpop.permute.xlu1 %5149 }
0x156e   :  { %v5169_v16 = vmul.f32 %v5150_v41, %v9284_v36  ;;  %v5328_v34 = vadd.s32 1, %v5656_v37 }
0x1570   :  { %5189 = vrot.lane.b32.xlu1 %v5169_v16, %s6676_s23  ;;  %vm5329_vm13 = vcmp.gt.s32.totalorder %v5328_v34, 0 }
0x1571   :  { %v5152_v63 = vpop.permute.xlu1 %5151 }
0x1572   :  { %v5170_v58 = vmul.f32 %v5152_v63, %v9290_v48  ;;  %v5330_v63 = vsel %vm5329_vm13, %v5328_v34, 0 }
0x1574   :  { %5191 = vrot.lane.b32.xlu0 %v5170_v58, %s6676_s23  ;;  %v4875_v29 = vpop.permute.xlu0 %4874 }
0x1575   :  { %v5154_v17 = vpop.permute.xlu1 %5153  ;;  %v6601_v22 = vpop.eup %6600  ;;  %v4896_v58 = vadd.f32 %v4875_v29, %v7091_v13 }
0x1576   :  { %v5171_v41 = vmul.f32 %v5154_v17, %v9294_v27  ;;  %v5125_v37 = vadd.f32 1.0, %v6601_v22 }
0x1578   :  { %5193 = vrot.lane.b32.xlu1 %v5171_v41, %s6676_s23  ;;  %v4877_v51 = vpop.permute.xlu0 %4876  ;;  %v5332_v41 = vand.u32 31, %v5330_v63  ;;  %v9307_v13 = vmul.f32 0.5, %v5125_v37  ;;  %v9627_v37 = vmov 683565275  }
0x1579   :  { %v4873_v28 = vpop.permute.xlu1 %4872  ;;  %v4897_v16 = vadd.f32 %v4877_v51, %v7093_v14 }
0x157a   :  { %v4895_v35 = vadd.f32 %v4873_v28, %v7087_v11  ;;  %v9304_v28 = vsub.s32 32, %v5332_v41  ;;  %9727 = vst [vmem:[#allocation7_spill] sm:$0xff] %v9307_v13 }
0x157c   :  { %6602 = vtanh.f32 %v4895_v35  ;;  %v4879_v24 = vpop.permute.xlu0 %4878 }
0x157d   :  { %6604 = vtanh.f32 %v4897_v16  ;;  %v4898_v40 = vadd.f32 %v4879_v24, %v9700_v4  ;;  %v9637_v16 = vand.u32 2147483647, %v9280_v12  ;;  %v6680_v24 = vmov 2102212464  }
0x157e   :  { %v5344_v22 = vshll.u32 %v6680_v24, %v5332_v41 }
0x1580   :  { %v4881_v44 = vpop.permute.xlu0 %4880  ;;  %v4885_v46 = vpop.permute.xlu1 %4884 }
0x1581   :  { %v4899_v17 = vadd.f32 %v4881_v44, %v7100_v33  ;;  %v4901_v11 = vadd.f32 %v4885_v46, %v7102_v39  ;;  %v9312_v39 = vshrl.u32 %v5330_v63, 5  ;;  %v9626_v44 = vmov 1326507024  }
0x1583   :  { %6606 = vtanh.f32 %v4899_v17  ;;  %v5348_v17 = vshrl.u32 %v9626_v44, %v9304_v28  ;;  %vm5353_vm14 = vcmp.lt.s32.totalorder %v9312_v39, 4  ;;  %vm5350_vm15 = vcmp.lt.s32.totalorder %v9312_v39, 1 }
0x1584   :  { %6608 = vtanh.f32 %v4896_v58  ;;  %v4883_v14 = vpop.permute.xlu0 %4882  ;;  %v4871_v34 = vpop.permute.xlu1 %4870  ;;  %vm5352_vm1 = vcmp.lt.s32.totalorder %v9312_v39, 3  ;;  %vm5351_vm2 = vcmp.lt.s32.totalorder %v9312_v39, 2 }
0x1585   :  { %6610 = vtanh.f32 %v4898_v40  ;;  %v4900_v33 = vadd.f32 %v4883_v14, %v7106_v53  ;;  %v9624_v40 = vmov 920167782   ;;  %v4894_v63 = vadd.f32 %v4871_v34, %v7085_v10 }
0x1586   :  { %v6603_v51 = vpop.eup %6602  ;;  %6612 = vtanh.f32 %v4901_v11  ;;  %v5345_v58 = vshrl.u32 %v9624_v40, %v9304_v28  ;;  %v5347_v53 = vshll.u32 %v9624_v40, %v5332_v41  ;;  %v5335_v11 = vshll.u32 %v9627_v37, %v5332_v41 }
0x1587   :  { %4928 = vrot.lane.b32.xlu0 %v6603_v51, %s6677_s5  ;;  %v6605_v35 = vpop.eup %6604  ;;  %6614 = vtanh.f32 %v4900_v33  ;;  %v9629_v14 = vmov 2475754826   ;;  %v5342_v10 = vshrl.u32 %v6680_v24, %v9304_v28  ;;  %v5325_v34 = vand.u32 8388607, %v9637_v16 }
0x1588   :  { %v5142_v29 = vpop.permute.xlu0 %5141  ;;  %v5338_v51 = vshll.u32 %v9629_v14, %v5332_v41  ;;  %v5346_v33 = vor.u32 %v5345_v58, %v5344_v22  ;;  %v5349_v37 = vor.u32 %v5348_v17, %v5347_v53  ;;  %6616 = vtanh.f32 %v4894_v63 }
0x1589   :  { %v5165_v4 = vmul.f32 %v5142_v29, %v9307_v13  ;;  %v5326_v58 = vor.u32 8388608, %v5325_v34  ;;  %v9728_v34 = vmov 683565275  }
0x158a   :  { %v5359_v22 = vsel %vm5353_vm14, %v5346_v33, 920167782  ;;  %v5363_v53 = vsel %vm5353_vm14, %v5349_v37, 1326507024 }
0x158b   :  { %4932 = vrot.lane.b32.xlu0 %v6605_v35, %s6677_s5  ;;  %5181 = vrot.lane.b32.xlu1 %v5165_v4, %s6676_s23  ;;  %v5336_v4 = vshrl.u32 %v9629_v14, %v9304_v28  ;;  %v6685_v35 = vmov 2131351028  }
0x158c   :  { %v5339_v40 = vshrl.u32 %v6685_v35, %v9304_v28  ;;  %v5341_v44 = vshll.u32 %v6685_v35, %v5332_v41 }
0x158d   :  { %v6607_v46 = vpop.eup %6606  ;;  %v5337_v54 = vor.u32 %v5336_v4, %v5335_v11 }
0x158e   :  { %v6609_v29 = vpop.eup %6608  ;;  %v5340_v27 = vor.u32 %v5339_v40, %v5338_v51  ;;  %v5343_v41 = vor.u32 %v5342_v10, %v5341_v44 }
0x158f   :  { %4936 = vrot.lane.b32.xlu0 %v6607_v46, %s6677_s5  ;;  %4930 = vrot.lane.b32.xlu1 %v6609_v29, %s6677_s5  ;;  %v6611_v14 = vpop.eup %6610  ;;  %v5366_v46 = vshll.u32 %v5326_v58, 8 }
0x1590   :  { %v6613_v13 = vpop.eup %6612  ;;  %v5358_v40 = vsel %vm5350_vm15, %v5337_v54, %v5340_v27  ;;  %v5360_v44 = vsel %vm5352_vm1, %v5343_v41, %v5359_v22  ;;  %v5362_v63 = vsel %vm5350_vm15, %v5340_v27, %v5343_v41  ;;  %v5334_v22 = vshrl.u32 %v9728_v34, %v9304_v28 }
0x1591   :  { %v6615_v17 = vpop.eup %6614  ;;  %v5361_v37 = vsel %vm5351_vm2, %v5358_v40, %v5360_v44 }
0x1592   :  { %v9361_v4 = vmul.u32.u64.low %v5366_v46, %v5361_v37  ;;  %v9362_v10 = vmul.u32.u64.high %v5366_v46, %v5361_v37, %v9361_v4  ;;  %v5354_v44 = vsel %vm5350_vm15, %v5334_v22, %v5337_v54 }
0x1593   :  { %4940 = vrot.lane.b32.xlu0 %v6613_v13, %s6677_s5  ;;  %4934 = vrot.lane.b32.xlu1 %v6611_v14, %s6677_s5  ;;  %v5364_v13 = vsel %vm5352_vm1, %v5346_v33, %v5363_v53  ;;  %v6617_v14 = vpop.eup %6616 }
0x1594   :  { %v5365_v51 = vsel %vm5351_vm2, %v5362_v63, %v5364_v13  ;;  %v5376_v37 = vadd.s32 1, %v9362_v10 }
0x1595   :  { %v9370_v58 = vmul.u32.u64.low %v5366_v46, %v5365_v51  ;;  %v9371_v53 = vmul.u32.u64.high %v5366_v46, %v5365_v51, %v9370_v58 }
0x1597   :  { %4938 = vrot.lane.b32.xlu1 %v6615_v17, %s6677_s5  ;;  %v5355_v17 = vsel %vm5353_vm14, %v5343_v41, 2102212464  ;;  %vm5375_vm4 = vc.u32 %v9371_v53, %v9361_v4 }
0x1598   :  { %v5356_v63 = vsel %vm5352_vm1, %v5340_v27, %v5355_v17  ;;  %v5377_v27 = vsel %vm5375_vm4, %v5376_v37, %v9362_v10  ;;  %v9729_v17 = vmov 2475754826  }
0x1599   :  { %v5424_v11 = vpop.permute.xlu0 %5423  ;;  %v5357_v28 = vsel %vm5351_vm2, %v5354_v44, %v5356_v63 }
0x159a   :  { %v5426_v29 = vmul.f32 %v9260_v19, %v5424_v11  ;;  %v5373_v54 = vmul.u32 %v5366_v46, %v5357_v28 }
0x159b   :  { %4926 = vrot.lane.b32.xlu1 %v6617_v14, %s6677_s5 }
0x159c   :  { %v9366_v33 = vadd.f32 %v9273_v0, %v5426_v29  ;;  %v5378_v44 = vadd.s32 %v5377_v27, %v5373_v54 }
0x159e   :  { %v5431_v19 = vand.u32 2139095040, %v9366_v33  ;;  %v9638_v0 = vand.u32 2147483647, %v9366_v33  ;;  %v5379_v36 = vadd.s32 536870912, %v5378_v44 }
0x15a0   :  { %v5432_v40 = vshrl.u32 %v5431_v19, 23  ;;  %v5435_v41 = vand.u32 8388607, %v9638_v0 }
0x15a2   :  { %v5660_v13 = vadd.s32 4294967169, %v5432_v40  ;;  %v5436_v29 = vor.u32 8388608, %v5435_v41  ;;  %v9731_v41 = vmov 1326507024  }
0x15a4   :  { %v5438_v11 = vadd.s32 1, %v5660_v13  ;;  %v9730_v13 = vmov 920167782   ;;  %v5476_v0 = vshll.u32 %v5436_v29, 8 }
0x15a6   :  { %vm5439_vm5 = vcmp.gt.s32.totalorder %v5438_v11, 0 }
0x15a7   :  { %v5440_v14 = vsel %vm5439_vm5, %v5438_v11, 0  ;;  %vm5430_vm5 = vcmp.lt.s32.totalorder %v9366_v33, 0 }
0x15a8   :  { %v5442_v51 = vand.u32 31, %v5440_v14  ;;  %v5441_v22 = vshrl.u32 %v5440_v14, 5 }
0x15aa   :  { %v5443_v58 = vsub.s32 32, %v5442_v51  ;;  %v5445_v39 = vshll.u32 %v9728_v34, %v5442_v51  ;;  %v5448_v19 = vshll.u32 %v9729_v17, %v5442_v51  ;;  %v5451_v40 = vshll.u32 %v6685_v35, %v5442_v51 }
0x15ab   :  { %v5454_v63 = vshll.u32 %v6680_v24, %v5442_v51  ;;  %v5457_v16 = vshll.u32 %v9730_v13, %v5442_v51  ;;  %vm5460_vm12 = vcmp.lt.s32.totalorder %v5441_v22, 1  ;;  %vm5463_vm13 = vcmp.lt.s32.totalorder %v5441_v22, 4 }
0x15ac   :  { %v5444_v46 = vshrl.u32 %v9728_v34, %v5443_v58  ;;  %v5446_v28 = vshrl.u32 %v9729_v17, %v5443_v58  ;;  %v5449_v10 = vshrl.u32 %v6685_v35, %v5443_v58  ;;  %v5452_v37 = vshrl.u32 %v6680_v24, %v5443_v58 }
0x15ad   :  { %v5455_v11 = vshrl.u32 %v9730_v13, %v5443_v58  ;;  %v5458_v14 = vshrl.u32 %v9731_v41, %v5443_v58  ;;  %vm5461_vm14 = vcmp.lt.s32.totalorder %v5441_v22, 2  ;;  %vm5462_vm15 = vcmp.lt.s32.totalorder %v5441_v22, 3 }
0x15ae   :  { %v5447_v43 = vor.u32 %v5446_v28, %v5445_v39  ;;  %v5450_v54 = vor.u32 %v5449_v10, %v5448_v19  ;;  %v5453_v27 = vor.u32 %v5452_v37, %v5451_v40  ;;  %v9406_v22 = vshrl.u32 %v5379_v36, 30 }
0x15af   :  { %v5456_v48 = vor.u32 %v5455_v11, %v5454_v63  ;;  %v5459_v51 = vor.u32 %v5458_v14, %v5457_v16 }
0x15b0   :  { %v5464_v34 = vsel %vm5460_vm12, %v5444_v46, %v5447_v43  ;;  %v5465_v17 = vsel %vm5463_vm13, %v5453_v27, 2102212464  ;;  %v5468_v5 = vsel %vm5460_vm12, %v5447_v43, %v5450_v54  ;;  %v5472_v35 = vsel %vm5460_vm12, %v5450_v54, %v5453_v27 }
0x15b1   :  { %v5466_v24 = vsel %vm5462_vm15, %v5450_v54, %v5465_v17  ;;  %v5469_v3 = vsel %vm5463_vm13, %v5456_v48, 920167782  ;;  %v5473_v13 = vsel %vm5463_vm13, %v5459_v51, 1326507024  ;;  %v5381_v28 = vshll.u32 %v9406_v22, 30 }
0x15b2   :  { %v5470_v26 = vsel %vm5462_vm15, %v5453_v27, %v5469_v3  ;;  %v5474_v58 = vsel %vm5462_vm15, %v5456_v48, %v5473_v13  ;;  %v5467_v41 = vsel %vm5461_vm14, %v5464_v34, %v5466_v24 }
0x15b3   :  { %v5471_v29 = vsel %vm5461_vm14, %v5468_v5, %v5470_v26  ;;  %v5475_v39 = vsel %vm5461_vm14, %v5472_v35, %v5474_v58  ;;  %v5483_v46 = vmul.u32 %v5476_v0, %v5467_v41  ;;  %v5382_v5 = vsub.s32 %v5378_v44, %v5381_v28 }
0x15b4   :  { %v9400_v19 = vmul.u32.u64.low %v5476_v0, %v5475_v39  ;;  %v9401_v40 = vmul.u32.u64.high %v5476_v0, %v5475_v39, %v9400_v19  ;;  %v9403_v63 = vmul.u32.u64.low %v5476_v0, %v5471_v29  ;;  %v9404_v16 = vmul.u32.u64.high %v5476_v0, %v5471_v29, %v9403_v63 }
0x15b5   :  { %v5384_v37 = vsub.s32 0, %v5382_v5 }
0x15b6   :  { %vm5485_vm1 = vc.u32 %v9401_v40, %v9403_v63  ;;  %v5486_v43 = vadd.s32 1, %v9404_v16  ;;  %v5484_v35 = vadd.s32 %v9403_v63, %v9401_v40  ;;  %v5374_v40 = vadd.s32 %v9361_v4, %v9371_v53 }
0x15b7   :  { %v5657_v54 = vmin.u32 %v5384_v37, %v5382_v5 }
0x15b8   :  { %v5487_v3 = vsel %vm5485_vm1, %v5486_v43, %v9404_v16  ;;  %vm5520_vm1 = vweird.f32 %v9366_v33 }
0x15b9   :  { %v5488_v48 = vadd.s32 %v5487_v3, %v5483_v46  ;;  %v5386_v51 = vclz %v5657_v54 }
0x15bb   :  { %v5489_v26 = vadd.s32 536870912, %v5488_v48  ;;  %v5658_v17 = vadd.s32 4294967294, %v5386_v51 }
0x15bd   :  { %v5490_v10 = vshrl.u32 %v5489_v26, 30  ;;  %vm5659_vm4 = vcmp.lt.s32.totalorder %v5658_v17, 0 }
0x15be   :  { %v5389_v16 = vsel %vm5659_vm4, 0, %v5658_v17  ;;  %vm5320_vm4 = vcmp.lt.s32.totalorder %v9280_v12, 0 }
0x15bf   :  { %v5491_v11 = vshll.u32 %v5490_v10, 30  ;;  %v5394_v3 = vsub.s32 4294967266, %v5389_v16  ;;  %v5514_v26 = vsub.s32 4, %v5490_v10 }
0x15c1   :  { %v5492_v14 = vsub.s32 %v5488_v48, %v5491_v11  ;;  %v5515_v17 = vsel %vm5430_vm5, %v5514_v26, %v5490_v10 }
0x15c3   :  { %v5494_v27 = vsub.s32 0, %v5492_v14 }
0x15c5   :  { %v5661_v36 = vmin.u32 %v5494_v27, %v5492_v14 }
0x15c7   :  { %v5496_v0 = vclz %v5661_v36  ;;  %v5395_v36 = vadd.s32 127, %v5394_v3 }
0x15c9   :  { %v5662_v34 = vadd.s32 4294967294, %v5496_v0  ;;  %v9732_v0 = vand.u32 2147483647, %v9366_v33 }
0x15cb   :  { %vm5663_vm2 = vcmp.lt.s32.totalorder %v5662_v34, 0  ;;  %vm9420_vm12 = vcmp.le.f32.partialorder %v9732_v0, 0.7853982  ;;  %v9735_v0 = vand.u32 2147483647, %v9280_v12 }
0x15cc   :  { %v5499_v24 = vsel %vm5663_vm2, 0, %v5662_v34  ;;  %vm5591_vm2 = vcmask 523264  }
0x15cd   :  { %v5500_v13 = vsub.s32 32, %v5499_v24  ;;  %v5501_v58 = vshll.u32 %v5492_v14, %v5499_v24  ;;  %v5504_v41 = vsub.s32 4294967266, %v5499_v24  ;;  %v5390_v14 = vsub.s32 32, %v5389_v16 }
0x15ce   :  { %v5391_v24 = vshll.u32 %v5382_v5, %v5389_v16 }
0x15cf   :  { %v5502_v44 = vshrl.u32 %v5484_v35, %v5500_v13  ;;  %v5505_v29 = vadd.s32 127, %v5504_v41  ;;  %v5392_v13 = vshrl.u32 %v5374_v40, %v5390_v14 }
0x15d1   :  { %v5503_v39 = vor.u32 %v5502_v44, %v5501_v58  ;;  %v5506_v19 = vshll.u32 %v5505_v29, 23  ;;  %v5396_v58 = vshll.u32 %v5395_v36, 23  ;;  %v5393_v29 = vor.u32 %v5392_v13, %v5391_v24 }
0x15d2   :  { %v4911_v24 = vsub.f32 1.0, %v9203_v15  ;;  %v4913_v13 = vsub.f32 1.0, %v9207_v57 }
0x15d3   :  { %v5507_v46 = vor.u32 4788187, %v5506_v19  ;;  %v5510_v43 = vcvt.s32.f32 %v5503_v39  ;;  %v5397_v39 = vor.u32 4788187, %v5396_v58 }
0x15d5   :  { %v5508_v48 = vand.u32 2147483647, %v5507_v46  ;;  %v5398_v3 = vand.u32 2147483647, %v5397_v39 }
0x15d6   :  { %v5196_v28 = vpop.permute.xlu0 %5195 }
0x15d7   :  { %v5511_v63 = vmul.f32 %v5510_v43, %v5508_v48  ;;  %v5400_v48 = vcvt.s32.f32 %v5393_v29  ;;  %v5212_v5 = vadd.f32 %v5196_v28, %v9712_v45 }
0x15d9   :  { %v5512_v51 = vxor.u32 2147483648, %v5511_v63  ;;  %v5401_v14 = vmul.f32 %v5400_v48, %v5398_v3 }
0x15da   :  { %v5188_v37 = vpop.permute.xlu0 %5187  ;;  %v5184_v11 = vpop.permute.xlu1 %5183 }
0x15db   :  { %v5208_v54 = vadd.f32 %v5188_v37, %v9702_v9  ;;  %v5206_v27 = vadd.f32 %v5184_v11, %v9711_v6  ;;  %v5513_v4 = vsel %vm5430_vm5, %v5512_v51, %v5511_v63  ;;  %v5517_v6 = vsel %vm9420_vm12, 0, %v5515_v17 }
0x15dc   :  { %v5516_v9 = vsel %vm9420_vm12, %v9366_v33, %v5513_v4  ;;  %v5521_v10 = vadd.s32 3, %v5517_v6  ;;  %vm9443_vm5 = vcmp.le.f32.partialorder %v9735_v0, 0.7853982 }
0x15dd   :  { %6618 = vtanh.f32 %v5206_v27  ;;  %v5402_v27 = vxor.u32 2147483648, %v5401_v14 }
0x15de   :  { %v5186_v53 = vpop.permute.xlu1 %5185  ;;  %6620 = vtanh.f32 %v5208_v54  ;;  %v5522_v19 = vand.u32 3, %v5521_v10 }
0x15df   :  { %v5207_v35 = vadd.f32 %v5186_v53, %v7111_v59  ;;  %6622 = vcosq.f32 %v5516_v9  ;;  %v5403_v33 = vsel %vm5320_vm4, %v5402_v27, %v5401_v14 }
0x15e0   :  { %vm5527_vm13 = vcmp.eq.s32.totalorder %v5522_v19, 2  ;;  %vm5524_vm14 = vcmp.eq.s32.totalorder %v5522_v19, 0  ;;  %vm5523_vm15 = vcmp.lt.s32.totalorder %v5522_v19, 2  ;;  %v5406_v53 = vsel %vm9443_vm5, %v9280_v12, %v5403_v33 }
0x15e1   :  { %6624 = vtanh.f32 %v5207_v35  ;;  %v5404_v35 = vsub.s32 4, %v9406_v22  ;;  %v4961_v19 = vrot.slane %v9055_v32, 7  ;;  %v4962_v32 = vrot.slane %v9064_v30, 7 }
0x15e2   :  { %v5190_v41 = vpop.permute.xlu1 %5189  ;;  %6626 = vsinq.f32 %v5516_v9  ;;  %v4916_v30 = vsub.f32 1.0, %v9223_v18 }
0x15e3   :  { %v5209_v44 = vadd.f32 %v5190_v41, %v9704_v47  ;;  %v5405_v6 = vsel %vm5320_vm4, %v5404_v35, %v9406_v22  ;;  %v4976_v48 = vmul.f32 %v4961_v19, %v9207_v57  ;;  %v4914_v57 = vsub.f32 1.0, %v9211_v20 }
0x15e4   :  { %v5407_v10 = vsel %vm9443_vm5, 0, %v5405_v6 }
0x15e5   :  { %6628 = vtanh.f32 %v5209_v44  ;;  %v4959_v44 = vrot.slane %v9036_v50, 7  ;;  %v5411_v3 = vadd.s32 3, %v5407_v10 }
0x15e6   :  { %v5192_v59 = vpop.permute.xlu0 %5191 }
0x15e7   :  { %v5210_v46 = vadd.f32 %v5192_v59, %v9713_v52  ;;  %v6619_v43 = vpop.eup %6618  ;;  %v4960_v59 = vrot.slane %v9049_v42, 7  ;;  %v4974_v22 = vmul.f32 %v4959_v44, %v9203_v15 }
0x15e8   :  { %v6621_v16 = vpop.eup %6620  ;;  %5239 = vrot.lane.b32.xlu0 %v6619_v43, %s6677_s5  ;;  %v4912_v43 = vsub.f32 1.0, %v9199_v61 }
0x15e9   :  { %6630 = vtanh.f32 %v5210_v46  ;;  %v6623_v26 = vpop.eup %6622 }
0x15ea   :  { %v5194_v40 = vpop.permute.xlu1 %5193  ;;  %v5528_v37 = vxor.u32 2147483648, %v6623_v26  ;;  %6632 = vtanh.f32 %v5212_v5  ;;  %v4915_v5 = vsub.f32 1.0, %v9216_v7 }
0x15eb   :  { %v6625_v47 = vpop.eup %6624  ;;  %v5211_v63 = vadd.f32 %v5194_v40, %v9703_v25 }
0x15ec   :  { %v6627_v11 = vpop.eup %6626  ;;  %5241 = vrot.lane.b32.xlu1 %v6625_v47, %s6677_s5  ;;  %5243 = vrot.lane.b32.xlu0 %v6621_v16, %s6677_s5  ;;  %v4963_v47 = vrot.slane %v9066_v21, 7 }
0x15ed   :  { %6634 = vtanh.f32 %v5211_v63  ;;  %v5525_v45 = vxor.u32 2147483648, %v6627_v11  ;;  %v5529_v52 = vsel %vm5527_vm13, %v5528_v37, %v6627_v11  ;;  %v4964_v11 = vrot.slane %v9080_v2, 7 }
0x15ee   :  { %6636 = vcosq.f32 %v5406_v53 }
0x15ef   :  { %v6629_v28 = vpop.eup %6628  ;;  %v5526_v54 = vsel %vm5524_vm14, %v6623_v26, %v5525_v45  ;;  %6638 = vsinq.f32 %v5406_v53  ;;  %v5412_v45 = vand.u32 3, %v5411_v3 }
0x15f0   :  { %5245 = vrot.lane.b32.xlu1 %v6629_v28, %s6677_s5  ;;  %v5530_v25 = vsel %vm5523_vm15, %v5526_v54, %v5529_v52  ;;  %v4978_v52 = vmul.f32 %v4963_v47, %v9216_v7  ;;  %v4917_v28 = vsub.f32 1.0, %v9219_v1  ;;  %v4977_v54 = vmul.f32 %v4962_v32, %v9211_v20 }
0x15f1   :  { %v5531_v36 = vsel %vm5520_vm1, nan, %v5530_v25  ;;  %vm5414_vm12 = vcmp.eq.s32.totalorder %v5412_v45, 0  ;;  %vm5417_vm13 = vcmp.eq.s32.totalorder %v5412_v45, 2  ;;  %v4958_v7 = vrot.slane %v9040_v23, 7 }
0x15f2   :  { %5604 = vst.msk [vmem:[#allocation2 + $0x8] sm:$0xff] %vm5591_vm2, %v5531_v36  ;;  %v9738_v20 = vrot.slane %v9078_v55, 7  ;;  %vm5413_vm14 = vcmp.lt.s32.totalorder %v5412_v45, 2  ;;  %vm5410_vm15 = vweird.f32 %v9280_v12  ;;  %v5223_v32 = vsub.f32 1.0, %v9277_v62 }
0x15f3   :  { %v6631_v51 = vpop.eup %6630  ;;  %v5272_v47 = vrot.slane %v9113_v60, 7 }
0x15f4   :  { %5247 = vrot.lane.b32.xlu0 %v6631_v51, %s6677_s5  ;;  %v6633_v17 = vpop.eup %6632  ;;  %v4980_v53 = vmul.f32 %v9219_v1, %v9738_v20  ;;  %v4910_v1 = vsub.f32 1.0, %v9225_v49 }
0x15f7   :  { %v6635_v4 = vpop.eup %6634 }
0x15f8   :  { %5251 = vrot.lane.b32.xlu0 %v6633_v17, %s6677_s5  ;;  %5249 = vrot.lane.b32.xlu1 %v6635_v4, %s6677_s5  ;;  %v6637_v42 = vpop.eup %6636 }
0x15f9   :  { %v4929_v9 = vpop.permute.xlu0 %4928  ;;  %v6639_v37 = vpop.eup %6638  ;;  %v5418_v51 = vxor.u32 2147483648, %v6637_v42 }
0x15fa   :  { %v4951_v29 = vmul.f32 %v4929_v9, %v4911_v24  ;;  %v5415_v33 = vxor.u32 2147483648, %v6639_v37 }
0x15fc   :  { %v4982_v26 = vadd.f32 %v4974_v22, %v4951_v29  ;;  %v5416_v44 = vsel %vm5414_vm12, %v6637_v42, %v5415_v33  ;;  %v5419_v29 = vsel %vm5417_vm13, %v5418_v51, %v6639_v37  ;;  %v9743_v33 = vld [vmem:[#allocation15_spill] sm:$0xff] }
0x15fd   :  { %v4933_v58 = vpop.permute.xlu0 %4932  ;;  %v5182_v41 = vpop.permute.xlu1 %5181  ;;  %v5420_v22 = vsel %vm5413_vm14, %v5416_v44, %v5419_v29 }
0x15fe   :  { %v5205_v39 = vadd.f32 %v5182_v41, %v9724_v56  ;;  %v4953_v46 = vmul.f32 %v4933_v58, %v4913_v13  ;;  %v4975_v56 = vmul.f32 %v4960_v59, %v9199_v61  ;;  %v5540_v21 = vrot.slane %v4982_v26, 7 }
0x15ff   :  { %v4979_v13 = vmul.f32 %v4964_v11, %v9223_v18  ;;  %v5270_v26 = vrot.slane %v9101_v8, 7 }
0x1600   :  { %6640 = vtanh.f32 %v5205_v39  ;;  %v4984_v15 = vadd.f32 %v4976_v48, %v4953_v46  ;;  %v4973_v39 = vmul.f32 %v4958_v7, %v9225_v49 }
0x1601   :  { %v4937_v16 = vpop.permute.xlu0 %4936  ;;  %v4931_v50 = vpop.permute.xlu1 %4930  ;;  %v5285_v42 = vmul.f32 %v5270_v26, %v9265_v38  ;;  %v9750_v26 = vld [vmem:[#allocation5_spill] sm:$0xff] }
0x1602   :  { %v4952_v40 = vmul.f32 %v4931_v50, %v4912_v43  ;;  %v4955_v63 = vmul.f32 %v4937_v16, %v4915_v5  ;;  %v5543_v0 = vrot.slane %v4984_v15, 5  ;;  %v5421_v16 = vsel %vm5410_vm15, nan, %v5420_v22  ;;  %v9739_v15 = vld [vmem:[#allocation12_spill] sm:$0xff] }
0x1603   :  { %v5583_v49 = vrot.slane %v5421_v16, 1  ;;  %v5222_v50 = vsub.f32 1.0, %v9265_v38  ;;  %v5287_v8 = vmul.f32 %v5272_v47, %v9739_v15 }
0x1604   :  { %v4983_v14 = vadd.f32 %v4975_v56, %v4952_v40  ;;  %v4986_v2 = vadd.f32 %v4978_v52, %v4955_v63  ;;  %v5271_v40 = vrot.slane %v9108_v31, 7  ;;  %v5224_v63 = vsub.f32 1.0, %v9739_v15 }
0x1605   :  { %v4941_v61 = vpop.permute.xlu0 %4940  ;;  %v4935_v27 = vpop.permute.xlu1 %4934 }
0x1606   :  { %v5541_v25 = vrot.slane %v4983_v14, 6  ;;  %v4954_v36 = vmul.f32 %v4935_v27, %v4914_v57  ;;  %v4957_v34 = vmul.f32 %v4941_v61, %v4917_v28  ;;  %v5547_v41 = vrot.slane %v4986_v2, 3  ;;  %v9740_v28 = vld [vmem:[#allocation6_spill] sm:$0xff] }
0x1607   :  { %v5286_v57 = vmul.f32 %v5271_v40, %v9277_v62  ;;  %v5273_v61 = vrot.slane %v9740_v28, 7 }
0x1608   :  { %v5542_v17 = vsel %vm948_vm6, %v5541_v25, %v5540_v21  ;;  %v4985_v4 = vadd.f32 %v4977_v54, %v4954_v36  ;;  %v4988_v10 = vadd.f32 %v4980_v53, %v4957_v34  ;;  %v9741_v54 = vld [vmem:[#allocation16_spill] sm:$0xff] }
0x1609   :  { %v5544_v35 = vsel %vm951_vm7, %v5543_v0, %v5542_v17  ;;  %v4939_v9 = vpop.permute.xlu1 %4938  ;;  %v5225_v38 = vsub.f32 1.0, %v9741_v54  ;;  %v5288_v25 = vmul.f32 %v5273_v61, %v9741_v54  ;;  %v9742_v0 = vld [vmem:[#allocation17_spill] sm:$0xff]  ;;  %v5226_v17 = vsub.f32 1.0, %v9743_v33 }
0x160a   :  { %v6641_v6 = vpop.eup %6640  ;;  %v5545_v24 = vrot.slane %v4985_v4, 4  ;;  %v4956_v58 = vmul.f32 %v4939_v9, %v4916_v30  ;;  %v5551_v43 = vrot.slane %v4988_v10, 1  ;;  %v5274_v2 = vrot.slane %v9742_v0, 7  ;;  %v9744_v9 = vld [vmem:[#allocation10_spill] sm:$0xff] }
0x160b   :  { %5237 = vrot.lane.b32.xlu1 %v6641_v6, %s6677_s5  ;;  %v5275_v6 = vrot.slane %v9744_v9, 7 }
0x160c   :  { %v5546_v23 = vsel %vm954_vm8, %v5545_v24, %v5544_v35  ;;  %v4987_v55 = vadd.f32 %v4979_v13, %v4956_v58  ;;  %v5289_v53 = vmul.f32 %v5274_v2, %v9743_v33  ;;  %v9745_v58 = vld [vmem:[#allocation20_spill] sm:$0xff] }
0x160d   :  { %v4927_v59 = vpop.permute.xlu1 %4926  ;;  %v5548_v19 = vsel %vm957_vm9, %v5547_v41, %v5546_v23  ;;  %v5227_v41 = vsub.f32 1.0, %v9745_v58  ;;  %v5290_v29 = vmul.f32 %v5275_v6, %v9745_v58 }
0x160e   :  { %v5549_v46 = vrot.slane %v4987_v55, 2  ;;  %v4950_v18 = vmul.f32 %v4927_v59, %v4910_v1 }
0x1610   :  { %v4981_v3 = vadd.f32 %v4973_v39, %v4950_v18  ;;  %v5550_v48 = vsel %vm960_vm10, %v5549_v46, %v5548_v19  ;;  %v9746_v46 = vld [vmem:[#allocation19_spill] sm:$0xff] }
0x1611   :  { %v5552_v5 = vsel %vm963_vm11, %v5551_v43, %v5550_v48  ;;  %v5228_v18 = vsub.f32 1.0, %v9746_v46  ;;  %v9747_v43 = vld [vmem:[#allocation18_spill] sm:$0xff] }
0x1612   :  { %5555 = vrot.lane.b32.xlu1 %v5552_v5, %s6677_s5  ;;  %5553 = vrot.lane.b32.xlu0 %v4981_v3, %s6677_s5  ;;  %v9748_v3 = vrot.slane %v9747_v43, 7 }
0x1614   :  { %v5291_v48 = vmul.f32 %v9746_v46, %v9748_v3 }
0x1616   :  { %5584 = vrot.lane.b32.xlu0 %v5583_v49, %s6676_s23  ;;  %v9749_v49 = vld [vmem:[#allocation7_spill] sm:$0xff] }
0x165a   :  { %v5240_v12 = vpop.permute.xlu0 %5239 }
0x165b   :  { %v5262_v56 = vmul.f32 %v5240_v12, %v5222_v50  ;;  %v5221_v50 = vsub.f32 1.0, %v9749_v49  ;;  %v5269_v12 = vrot.slane %v9750_v26, 7 }
0x165d   :  { %v5293_v11 = vadd.f32 %v5285_v42, %v5262_v56  ;;  %v5284_v42 = vmul.f32 %v5269_v12, %v9749_v49 }
0x165e   :  { %v5242_v37 = vpop.permute.xlu1 %5241  ;;  %v5244_v14 = vpop.permute.xlu0 %5243 }
0x165f   :  { %v5263_v45 = vmul.f32 %v5242_v37, %v5223_v32  ;;  %v5264_v52 = vmul.f32 %v5244_v14, %v5224_v63  ;;  %v5567_v21 = vrot.slane %v5293_v11, 7 }
0x1661   :  { %v5294_v31 = vadd.f32 %v5286_v57, %v5263_v45  ;;  %v5295_v27 = vadd.f32 %v5287_v8, %v5264_v52 }
0x1662   :  { %v5246_v30 = vpop.permute.xlu1 %5245 }
0x1663   :  { %v5568_v60 = vrot.slane %v5294_v31, 6  ;;  %v5265_v36 = vmul.f32 %v5246_v30, %v5225_v38  ;;  %v5570_v51 = vrot.slane %v5295_v27, 5 }
0x1665   :  { %v5569_v62 = vsel %vm948_vm6, %v5568_v60, %v5567_v21  ;;  %v5296_v34 = vadd.f32 %v5288_v25, %v5265_v36 }
0x1666   :  { %v5571_v4 = vsel %vm951_vm7, %v5570_v51, %v5569_v62  ;;  %v5248_v7 = vpop.permute.xlu0 %5247 }
0x1667   :  { %v5572_v20 = vrot.slane %v5296_v34, 4  ;;  %v5266_v35 = vmul.f32 %v5248_v7, %v5226_v17 }
0x1669   :  { %v5573_v24 = vsel %vm954_vm8, %v5572_v20, %v5571_v4  ;;  %v5297_v13 = vadd.f32 %v5289_v53, %v5266_v35 }
0x166a   :  { %v5250_v10 = vpop.permute.xlu1 %5249  ;;  %v5252_v19 = vpop.permute.xlu0 %5251 }
0x166b   :  { %v5574_v44 = vrot.slane %v5297_v13, 3  ;;  %v5267_v23 = vmul.f32 %v5250_v10, %v5227_v41  ;;  %v5268_v22 = vmul.f32 %v5252_v19, %v5228_v18 }
0x166d   :  { %v5575_v55 = vsel %vm957_vm9, %v5574_v44, %v5573_v24  ;;  %v5298_v1 = vadd.f32 %v5290_v29, %v5267_v23  ;;  %v5299_v5 = vadd.f32 %v5291_v48, %v5268_v22 }
0x166f   :  { %v5576_v39 = vrot.slane %v5298_v1, 2  ;;  %v5578_v40 = vrot.slane %v5299_v5, 1 }
0x1671   :  { %v5577_v59 = vsel %vm960_vm10, %v5576_v39, %v5575_v55 }
0x1672   :  { %v5579_v63 = vsel %vm963_vm11, %v5578_v40, %v5577_v59 }
0x167d   :  { %v5238_v16 = vpop.permute.xlu1 %5237 }
0x167e   :  { %v5261_v56 = vmul.f32 %v5238_v16, %v5221_v50 }
0x1680   :  { %v5292_v15 = vadd.f32 %v5284_v42, %v5261_v56 }
0x1684   :  { %v5554_v32 = vpop.permute.xlu0 %5553  ;;  %v5556_v47 = vpop.permute.xlu1 %5555 }
0x1685   :  { %v5589_v37 = vsel %vm244_vm0, %v5554_v32, %v5292_v15  ;;  %v5590_v11 = vsel %vm244_vm0, %v5556_v47, %v5579_v63 }
0x1688   :  { %v5585_v14 = vpop.permute.xlu0 %5584 }
0x1689   :  { %v5592_v57 = vsel %vm5591_vm2, %v5589_v37, %v5585_v14  ;;  %v5593_v45 = vsel %vm5591_vm2, %v5590_v11, %v5585_v14 }
0x168a   :  { %v5596_v8 = vrot.slane %v5592_v57, 7  ;;  %v5597_v52 = vrot.slane %v5593_v45, 7 }
0x168c   :  { %v5598_v28 = vsel %vm116_vm3, %v5596_v8, %v5597_v52 }
0x168d   :  { %5603 = vst [vmem:[#allocation2] sm:$0xff] %v5598_v28 }
0x168e   :  { %6659 = shalt.err (!%p6656_p4)
}
0x168f   :  { %s6660_s22 = scalar_lea.hbm %s9558_s12, 256 }
0x1690   :  { %p6661_p5 = scmp.ne.s32.totalorder %s9558_s12, %s6660_s22  ;;  %p6664_p6 = scmp.lt.u32.totalorder %s6660_s22, %s9558_s12 }
0x1692   :  { %p6666_p7 = pnand %p6664_p6, %p6661_p5 }
0x1694   :  { %6669 = shalt.err (!%p6666_p7)
}
0x1695   :  { %5614 = dma.vmem_to_hbm [thread:$0]  %s5612_s20, 256, %s9558_s12, [#allocation3]  }
0x1696   :  { %6670 = dma.done.wait [#allocation3], 256  }
0x1697   :  { %6671 = vsyncadd [#allocation3], 4294967040 }
0x1698   :  { %5618 = vsyncpa [#allocation3], 1 }

</bundles_post_ra>
